<compile_context>
chip_gen: v5e
topology: v5e:2x2
jax: 0.10.0
libtpu: 0.0.40
codegen_flags: <defaults>
</compile_context>

<pallas_src>
import functools

import jax
import jax.numpy as jnp
from jax import lax
from jax.experimental import pallas as pl
from jax.experimental.pallas import tpu as pltpu

_INV_SQRT2 = 0.7071067811865476


def _layernorm(x, gamma, beta, eps=1e-5):
    mean = jnp.mean(x, axis=-1, keepdims=True)
    var = jnp.mean((x - mean) ** 2, axis=-1, keepdims=True)
    return (x - mean) * lax.rsqrt(var + eps) * gamma + beta


def _gelu_exact(x):
    return 0.5 * x * (1.0 + lax.erf(x * _INV_SQRT2))


def _dot(x_f32, w):
    # Cast the activation to the (possibly bf16) weight dtype right at the MXU,
    # accumulate in f32.
    return jnp.dot(x_f32.astype(w.dtype), w, preferred_element_type=jnp.float32)


def manipulator_kernel(
    x_ref,
    g_in_ref, b_in_ref,          # input LayerNorm
    enc_w_ref, enc_b_ref,        # encoder Linear
    w_attn_ref, b_attn_ref,      # fused attention (Wv@Wo, bv@Wo+bo)   [L,D,D],[L,1,D]
    ln1_g_ref, ln1_b_ref,        # per-layer norm1                     [L,1,D]
    w1_ref, b1_ref,              # FFN linear 1                        [L,D,F],[L,1,F]
    w2_ref, b2_ref,              # FFN linear 2                        [L,F,D],[L,1,D]
    ln2_g_ref, ln2_b_ref,        # per-layer norm2                     [L,1,D]
    dec_w_ref, dec_b_ref,        # decoder Linear
    g_out_ref, b_out_ref,        # output LayerNorm
    o_ref,
    *, n_layers, unroll_layers,
):
    x = x_ref[...].astype(jnp.float32)

    # input_norm + encoder
    x = _layernorm(x, g_in_ref[...], b_in_ref[...])
    x = _dot(x, enc_w_ref[...]) + enc_b_ref[...]

    def layer_body(l, x):
        # seq_len == 1 => softmax over one key == 1, so MHA == out_proj(v_proj(x));
        # Wv@Wo was pre-fused in the wrapper (exact).
        attn = _dot(x, w_attn_ref[l]) + b_attn_ref[l]
        x = _layernorm(x + attn, ln1_g_ref[l], ln1_b_ref[l])
        h = _gelu_exact(_dot(x, w1_ref[l]) + b1_ref[l])
        ff = _dot(h, w2_ref[l]) + b2_ref[l]
        return _layernorm(x + ff, ln2_g_ref[l], ln2_b_ref[l])

    if unroll_layers:
        for l in range(n_layers):         # static unroll (short, LLO-visible)
            x = layer_body(l, x)
    else:
        x = lax.fori_loop(0, n_layers, layer_body, x)   # large L: bound live ranges

    # decoder + output_norm
    x = _dot(x, dec_w_ref[...]) + dec_b_ref[...]
    x = _layernorm(x, g_out_ref[...], b_out_ref[...])

    o_ref[...] = x.astype(o_ref.dtype)


PARAM_ORDER = (
    "g_in", "b_in",
    "enc_w", "enc_b",
    "w_attn", "b_attn",
    "ln1_g", "ln1_b",
    "w1", "b1", "w2", "b2",
    "ln2_g", "ln2_b",
    "dec_w", "dec_b",
    "g_out", "b_out",
)


def _pick_tile_b(B):
    """Largest batch tile that divides B; prefer >=128 rows with >=2 grid steps
    (so both v7x TensorCores get work via the 'parallel' axis)."""
    cands = [t for t in (512, 256, 128, 64, 32, 16, 8) if t <= B and B % t == 0]
    if not cands:
        return B
    for t in cands:
        if t >= 128 and B // t >= 2:
            return t
    return cands[0]


def prepare_params(raw, compute_dtype=jnp.bfloat16):
    """Fuse the seq_len==1 attention path (Wv@Wo) and cast matmul weights to
    the compute dtype.  Biases / LayerNorm params stay f32 (added after the
    f32-accumulated matmul)."""
    w_attn = jnp.einsum("lij,ljk->lik", raw["wv"], raw["wo"])
    b_attn = jnp.einsum("lrj,ljk->lrk", raw["bv"], raw["wo"]) + raw["bo"]
    return {
        "g_in": raw["g_in"], "b_in": raw["b_in"],
        "enc_w": raw["enc_w"].astype(compute_dtype), "enc_b": raw["enc_b"],
        "w_attn": w_attn.astype(compute_dtype), "b_attn": b_attn,
        "ln1_g": raw["ln1_g"], "ln1_b": raw["ln1_b"],
        "w1": raw["w1"].astype(compute_dtype), "b1": raw["b1"],
        "w2": raw["w2"].astype(compute_dtype), "b2": raw["b2"],
        "ln2_g": raw["ln2_g"], "ln2_b": raw["ln2_b"],
        "dec_w": raw["dec_w"].astype(compute_dtype), "dec_b": raw["dec_b"],
        "g_out": raw["g_out"], "b_out": raw["b_out"],
    }


def enhanced_latent_manipulator(x, fused_params, *, tile_b=None,
                                unroll_max_layers=4,
                                vmem_limit_bytes=48 * 1024 * 1024):
    B, D = x.shape
    L = fused_params["w1"].shape[0]

    if tile_b is None:
        tile_b = _pick_tile_b(B)
    assert B % tile_b == 0, (B, tile_b)

    param_arrays = [fused_params[k] for k in PARAM_ORDER]

    def full_spec(arr):
        nd = arr.ndim
        return pl.BlockSpec(arr.shape, lambda i, _nd=nd: (0,) * _nd)

    in_specs = [pl.BlockSpec((tile_b, D), lambda i: (i, 0))]
    in_specs += [full_spec(a) for a in param_arrays]

    kernel = functools.partial(
        manipulator_kernel,
        n_layers=L,
        unroll_layers=(L <= unroll_max_layers),
    )

    return pl.pallas_call(
        kernel,
        out_shape=jax.ShapeDtypeStruct((B, D), x.dtype),
        grid_spec=pltpu.PrefetchScalarGridSpec(
            num_scalar_prefetch=0,
            grid=(B // tile_b,),
            in_specs=in_specs,
            out_specs=pl.BlockSpec((tile_b, D), lambda i: (i, 0)),
        ),
        compiler_params=pltpu.CompilerParams(
            dimension_semantics=("parallel",),
            vmem_limit_bytes=vmem_limit_bytes,
        ),
    )(x, *param_arrays)


def init_params(key, D, F, L):
    """Deterministic synthetic parameters (shapes match the PyTorch module,
    weights already transposed to [in, out])."""
    ks = jax.random.split(key, 16)
    w = lambda k, shape: jax.random.normal(k, shape, jnp.float32) * 0.02
    return {
        "g_in": jnp.ones((1, D), jnp.float32),
        "b_in": jnp.zeros((1, D), jnp.float32),
        "enc_w": w(ks[0], (D, D)),
        "enc_b": w(ks[1], (1, D)),
        "wv": w(ks[2], (L, D, D)),
        "bv": w(ks[3], (L, 1, D)),
        "wo": w(ks[4], (L, D, D)),
        "bo": w(ks[5], (L, 1, D)),
        "ln1_g": jnp.ones((L, 1, D), jnp.float32),
        "ln1_b": jnp.zeros((L, 1, D), jnp.float32),
        "w1": w(ks[6], (L, D, F)),
        "b1": w(ks[7], (L, 1, F)),
        "w2": w(ks[8], (L, F, D)),
        "b2": w(ks[9], (L, 1, D)),
        "ln2_g": jnp.ones((L, 1, D), jnp.float32),
        "ln2_b": jnp.zeros((L, 1, D), jnp.float32),
        "dec_w": w(ks[10], (D, D)),
        "dec_b": w(ks[11], (1, D)),
        "g_out": jnp.ones((1, D), jnp.float32),
        "b_out": jnp.zeros((1, D), jnp.float32),
    }


def reference_forward_fused(x, fp):
    """Pure-JAX reference of the exact kernel math (fused attention, low-precision
    matmul operands, f32 accumulation)."""
    x = _layernorm(x.astype(jnp.float32), fp["g_in"], fp["b_in"])
    x = _dot(x, fp["enc_w"]) + fp["enc_b"]
    L = fp["w1"].shape[0]
    for l in range(L):
        attn = _dot(x, fp["w_attn"][l]) + fp["b_attn"][l]
        x = _layernorm(x + attn, fp["ln1_g"][l], fp["ln1_b"][l])
        h = _gelu_exact(_dot(x, fp["w1"][l]) + fp["b1"][l])
        ff = _dot(h, fp["w2"][l]) + fp["b2"][l]
        x = _layernorm(x + ff, fp["ln2_g"][l], fp["ln2_b"][l])
    x = _dot(x, fp["dec_w"]) + fp["dec_b"]
    return _layernorm(x, fp["g_out"], fp["b_out"])


def reference_forward_f32(x, raw):
    """Full-f32, unfused reference matching the PyTorch module (eval mode)."""
    def ln(v, g, b):
        m = jnp.mean(v, axis=-1, keepdims=True)
        var = jnp.mean((v - m) ** 2, axis=-1, keepdims=True)
        return (v - m) / jnp.sqrt(var + 1e-5) * g + b

    x = ln(x, raw["g_in"], raw["b_in"])
    x = x @ raw["enc_w"] + raw["enc_b"]
    L = raw["wv"].shape[0]
    for l in range(L):
        attn = (x @ raw["wv"][l] + raw["bv"][l]) @ raw["wo"][l] + raw["bo"][l]
        x = ln(x + attn, raw["ln1_g"][l], raw["ln1_b"][l])
        h = x @ raw["w1"][l] + raw["b1"][l]
        h = 0.5 * h * (1.0 + lax.erf(h * _INV_SQRT2))
        ff = h @ raw["w2"][l] + raw["b2"][l]
        x = ln(x + ff, raw["ln2_g"][l], raw["ln2_b"][l])
    x = x @ raw["dec_w"] + raw["dec_b"]
    return ln(x, raw["g_out"], raw["b_out"])


if __name__ == "__main__":
    # Small-but-tilable shapes: batch=256 (two 128-row tiles), embedding_dim=128,
    # ff_dim=256, 2 transformer layers.
    B, D, F, L = 256, 128, 256, 2

    key = jax.random.PRNGKey(0)
    kx, kp = jax.random.split(key)
    x = jax.random.normal(kx, (B, D), jnp.float32)
    raw = init_params(kp, D, F, L)
    fused = prepare_params(raw, compute_dtype=jnp.bfloat16)

    out = enhanced_latent_manipulator(x, fused)
    out = jax.block_until_ready(out)
    assert out.shape == (B, D)

    # Tight check against a pure-JAX implementation of the *same* math
    # (fused attention, bf16 matmul operands, f32 accumulation).
    ref = reference_forward_fused(x, fused)
    assert jnp.allclose(out, ref, atol=2e-3, rtol=2e-3), float(jnp.max(jnp.abs(out - ref)))

    # Loose sanity bound against the full-f32, unfused PyTorch-equivalent math
    # (bf16 weights introduce small, bounded differences).
    ref32 = reference_forward_f32(x, raw)
    assert jnp.allclose(out, ref32, atol=1e-1, rtol=1e-1), float(jnp.max(jnp.abs(out - ref32)))

    # TODO(synk): dropout layers are treated as identity (inference mode); training-mode
    # stochastic dropout has no deterministic equivalent here.
    print("KERNEL_OK")
</pallas_src>

<mosaic_0001>
module attributes {stable_mosaic.version = 11 : i64} {
  func.func @manipulator_kernel(%arg0: i32, %arg1: memref<128x128xf32, #tpu.memory_space<vmem>>, %arg2: memref<1x128xf32, #tpu.memory_space<vmem>>, %arg3: memref<1x128xf32, #tpu.memory_space<vmem>>, %arg4: memref<128x128xbf16, #tpu.memory_space<vmem>>, %arg5: memref<1x128xf32, #tpu.memory_space<vmem>>, %arg6: memref<2x128x128xbf16, #tpu.memory_space<vmem>>, %arg7: memref<2x1x128xf32, #tpu.memory_space<vmem>>, %arg8: memref<2x1x128xf32, #tpu.memory_space<vmem>>, %arg9: memref<2x1x128xf32, #tpu.memory_space<vmem>>, %arg10: memref<2x128x256xbf16, #tpu.memory_space<vmem>>, %arg11: memref<2x1x256xf32, #tpu.memory_space<vmem>>, %arg12: memref<2x256x128xbf16, #tpu.memory_space<vmem>>, %arg13: memref<2x1x128xf32, #tpu.memory_space<vmem>>, %arg14: memref<2x1x128xf32, #tpu.memory_space<vmem>>, %arg15: memref<2x1x128xf32, #tpu.memory_space<vmem>>, %arg16: memref<128x128xbf16, #tpu.memory_space<vmem>>, %arg17: memref<1x128xf32, #tpu.memory_space<vmem>>, %arg18: memref<1x128xf32, #tpu.memory_space<vmem>>, %arg19: memref<1x128xf32, #tpu.memory_space<vmem>>, %arg20: memref<128x128xf32, #tpu.memory_space<vmem>>) attributes {dimension_semantics = [#tpu.dimension_semantics<parallel>], iteration_bounds = array<i64: 2>, scalar_prefetch = 0 : i64, scratch_operands = 0 : i64, tpu.core_type = #tpu.core_type<tc>, window_params = [{transform_indices = @transform_0, window_bounds = array<i64: 128, 128>}, {pipeline_mode = #tpu.pipeline_mode<synchronous>, transform_indices = @transform_1, window_bounds = array<i64: 1, 128>}, {pipeline_mode = #tpu.pipeline_mode<synchronous>, transform_indices = @transform_2, window_bounds = array<i64: 1, 128>}, {pipeline_mode = #tpu.pipeline_mode<synchronous>, transform_indices = @transform_3, window_bounds = array<i64: 128, 128>}, {pipeline_mode = #tpu.pipeline_mode<synchronous>, transform_indices = @transform_4, window_bounds = array<i64: 1, 128>}, {pipeline_mode = #tpu.pipeline_mode<synchronous>, transform_indices = @transform_5, window_bounds = array<i64: 2, 128, 128>}, {pipeline_mode = #tpu.pipeline_mode<synchronous>, transform_indices = @transform_6, window_bounds = array<i64: 2, 1, 128>}, {pipeline_mode = #tpu.pipeline_mode<synchronous>, transform_indices = @transform_7, window_bounds = array<i64: 2, 1, 128>}, {pipeline_mode = #tpu.pipeline_mode<synchronous>, transform_indices = @transform_8, window_bounds = array<i64: 2, 1, 128>}, {pipeline_mode = #tpu.pipeline_mode<synchronous>, transform_indices = @transform_9, window_bounds = array<i64: 2, 128, 256>}, {pipeline_mode = #tpu.pipeline_mode<synchronous>, transform_indices = @transform_10, window_bounds = array<i64: 2, 1, 256>}, {pipeline_mode = #tpu.pipeline_mode<synchronous>, transform_indices = @transform_11, window_bounds = array<i64: 2, 256, 128>}, {pipeline_mode = #tpu.pipeline_mode<synchronous>, transform_indices = @transform_12, window_bounds = array<i64: 2, 1, 128>}, {pipeline_mode = #tpu.pipeline_mode<synchronous>, transform_indices = @transform_13, window_bounds = array<i64: 2, 1, 128>}, {pipeline_mode = #tpu.pipeline_mode<synchronous>, transform_indices = @transform_14, window_bounds = array<i64: 2, 1, 128>}, {pipeline_mode = #tpu.pipeline_mode<synchronous>, transform_indices = @transform_15, window_bounds = array<i64: 128, 128>}, {pipeline_mode = #tpu.pipeline_mode<synchronous>, transform_indices = @transform_16, window_bounds = array<i64: 1, 128>}, {pipeline_mode = #tpu.pipeline_mode<synchronous>, transform_indices = @transform_17, window_bounds = array<i64: 1, 128>}, {pipeline_mode = #tpu.pipeline_mode<synchronous>, transform_indices = @transform_18, window_bounds = array<i64: 1, 128>}, {transform_indices = @transform_19, window_bounds = array<i64: 128, 128>}]} {
    %c0 = arith.constant 0 : index
    %c0_0 = arith.constant 0 : index
    %0 = vector.load %arg1[%c0, %c0_0] : memref<128x128xf32, #tpu.memory_space<vmem>>, vector<128x128xf32>
    %c0_1 = arith.constant 0 : index
    %c0_2 = arith.constant 0 : index
    %1 = vector.load %arg2[%c0_1, %c0_2] : memref<1x128xf32, #tpu.memory_space<vmem>>, vector<1x128xf32>
    %c0_3 = arith.constant 0 : index
    %c0_4 = arith.constant 0 : index
    %2 = vector.load %arg3[%c0_3, %c0_4] : memref<1x128xf32, #tpu.memory_space<vmem>>, vector<1x128xf32>
    %cst = arith.constant dense<0.000000e+00> : vector<128xf32>
    %3 = vector.multi_reduction <add>, %0, %cst [1] : vector<128x128xf32> to vector<128xf32>
    %4 = vector.shape_cast %3 : vector<128xf32> to vector<128x1xf32>
    %cst_5 = arith.constant 1.280000e+02 : f32
    %5 = vector.broadcast %cst_5 : f32 to vector<128x1xf32>
    %6 = arith.divf %4, %5 : vector<128x1xf32>
    %7 = vector.broadcast %6 : vector<128x1xf32> to vector<128x128xf32>
    %8 = arith.subf %0, %7 : vector<128x128xf32>
    %9 = arith.mulf %8, %8 : vector<128x128xf32>
    %cst_6 = arith.constant dense<0.000000e+00> : vector<128xf32>
    %10 = vector.multi_reduction <add>, %9, %cst_6 [1] : vector<128x128xf32> to vector<128xf32>
    %11 = vector.shape_cast %10 : vector<128xf32> to vector<128x1xf32>
    %cst_7 = arith.constant 1.280000e+02 : f32
    %12 = vector.broadcast %cst_7 : f32 to vector<128x1xf32>
    %13 = arith.divf %11, %12 : vector<128x1xf32>
    %14 = vector.broadcast %6 : vector<128x1xf32> to vector<128x128xf32>
    %15 = arith.subf %0, %14 : vector<128x128xf32>
    %cst_8 = arith.constant 9.99999974E-6 : f32
    %16 = vector.broadcast %cst_8 : f32 to vector<128x1xf32>
    %17 = arith.addf %13, %16 : vector<128x1xf32>
    %18 = math.rsqrt %17 : vector<128x1xf32>
    %19 = vector.broadcast %18 : vector<128x1xf32> to vector<128x128xf32>
    %20 = arith.mulf %15, %19 : vector<128x128xf32>
    %21 = vector.broadcast %1 : vector<1x128xf32> to vector<128x128xf32>
    %22 = arith.mulf %20, %21 : vector<128x128xf32>
    %23 = vector.broadcast %2 : vector<1x128xf32> to vector<128x128xf32>
    %24 = arith.addf %22, %23 : vector<128x128xf32>
    %c0_9 = arith.constant 0 : index
    %c0_10 = arith.constant 0 : index
    %25 = vector.load %arg4[%c0_9, %c0_10] : memref<128x128xbf16, #tpu.memory_space<vmem>>, vector<128x128xbf16>
    %26 = arith.truncf %24 : vector<128x128xf32> to vector<128x128xbf16>
    %cst_11 = arith.constant dense<0.000000e+00> : vector<128x128xf32>
    %27 = tpu.matmul %26, %25, %cst_11 {dimension_numbers = #tpu.dot_dimension_numbers<[1], [0], [0], [1], [0, 0, 1, 1], [], []>} : vector<128x128xbf16>, vector<128x128xbf16>, vector<128x128xf32> -> vector<128x128xf32>
    %c0_12 = arith.constant 0 : index
    %c0_13 = arith.constant 0 : index
    %28 = vector.load %arg5[%c0_12, %c0_13] : memref<1x128xf32, #tpu.memory_space<vmem>>, vector<1x128xf32>
    %29 = vector.broadcast %28 : vector<1x128xf32> to vector<128x128xf32>
    %30 = arith.addf %27, %29 : vector<128x128xf32>
    %c0_14 = arith.constant 0 : index
    %c0_15 = arith.constant 0 : index
    %c0_16 = arith.constant 0 : index
    %31 = vector.load %arg6[%c0_14, %c0_15, %c0_16] : memref<2x128x128xbf16, #tpu.memory_space<vmem>>, vector<1x128x128xbf16>
    %32 = vector.shape_cast %31 : vector<1x128x128xbf16> to vector<128x128xbf16>
    %33 = arith.truncf %30 : vector<128x128xf32> to vector<128x128xbf16>
    %cst_17 = arith.constant dense<0.000000e+00> : vector<128x128xf32>
    %34 = tpu.matmul %33, %32, %cst_17 {dimension_numbers = #tpu.dot_dimension_numbers<[1], [0], [0], [1], [0, 0, 1, 1], [], []>} : vector<128x128xbf16>, vector<128x128xbf16>, vector<128x128xf32> -> vector<128x128xf32>
    %c0_18 = arith.constant 0 : index
    %c0_19 = arith.constant 0 : index
    %c0_20 = arith.constant 0 : index
    %35 = vector.load %arg7[%c0_18, %c0_19, %c0_20] : memref<2x1x128xf32, #tpu.memory_space<vmem>>, vector<1x1x128xf32>
    %36 = vector.shape_cast %35 : vector<1x1x128xf32> to vector<1x128xf32>
    %37 = vector.broadcast %36 : vector<1x128xf32> to vector<128x128xf32>
    %38 = arith.addf %34, %37 : vector<128x128xf32>
    %39 = arith.addf %30, %38 : vector<128x128xf32>
    %c0_21 = arith.constant 0 : index
    %c0_22 = arith.constant 0 : index
    %c0_23 = arith.constant 0 : index
    %40 = vector.load %arg8[%c0_21, %c0_22, %c0_23] : memref<2x1x128xf32, #tpu.memory_space<vmem>>, vector<1x1x128xf32>
    %41 = vector.shape_cast %40 : vector<1x1x128xf32> to vector<1x128xf32>
    %c0_24 = arith.constant 0 : index
    %c0_25 = arith.constant 0 : index
    %c0_26 = arith.constant 0 : index
    %42 = vector.load %arg9[%c0_24, %c0_25, %c0_26] : memref<2x1x128xf32, #tpu.memory_space<vmem>>, vector<1x1x128xf32>
    %43 = vector.shape_cast %42 : vector<1x1x128xf32> to vector<1x128xf32>
    %cst_27 = arith.constant dense<0.000000e+00> : vector<128xf32>
    %44 = vector.multi_reduction <add>, %39, %cst_27 [1] : vector<128x128xf32> to vector<128xf32>
    %45 = vector.shape_cast %44 : vector<128xf32> to vector<128x1xf32>
    %cst_28 = arith.constant 1.280000e+02 : f32
    %46 = vector.broadcast %cst_28 : f32 to vector<128x1xf32>
    %47 = arith.divf %45, %46 : vector<128x1xf32>
    %48 = vector.broadcast %47 : vector<128x1xf32> to vector<128x128xf32>
    %49 = arith.subf %39, %48 : vector<128x128xf32>
    %50 = arith.mulf %49, %49 : vector<128x128xf32>
    %cst_29 = arith.constant dense<0.000000e+00> : vector<128xf32>
    %51 = vector.multi_reduction <add>, %50, %cst_29 [1] : vector<128x128xf32> to vector<128xf32>
    %52 = vector.shape_cast %51 : vector<128xf32> to vector<128x1xf32>
    %cst_30 = arith.constant 1.280000e+02 : f32
    %53 = vector.broadcast %cst_30 : f32 to vector<128x1xf32>
    %54 = arith.divf %52, %53 : vector<128x1xf32>
    %55 = vector.broadcast %47 : vector<128x1xf32> to vector<128x128xf32>
    %56 = arith.subf %39, %55 : vector<128x128xf32>
    %cst_31 = arith.constant 9.99999974E-6 : f32
    %57 = vector.broadcast %cst_31 : f32 to vector<128x1xf32>
    %58 = arith.addf %54, %57 : vector<128x1xf32>
    %59 = math.rsqrt %58 : vector<128x1xf32>
    %60 = vector.broadcast %59 : vector<128x1xf32> to vector<128x128xf32>
    %61 = arith.mulf %56, %60 : vector<128x128xf32>
    %62 = vector.broadcast %41 : vector<1x128xf32> to vector<128x128xf32>
    %63 = arith.mulf %61, %62 : vector<128x128xf32>
    %64 = vector.broadcast %43 : vector<1x128xf32> to vector<128x128xf32>
    %65 = arith.addf %63, %64 : vector<128x128xf32>
    %c0_32 = arith.constant 0 : index
    %c0_33 = arith.constant 0 : index
    %c0_34 = arith.constant 0 : index
    %66 = vector.load %arg10[%c0_32, %c0_33, %c0_34] : memref<2x128x256xbf16, #tpu.memory_space<vmem>>, vector<1x128x256xbf16>
    %67 = vector.shape_cast %66 : vector<1x128x256xbf16> to vector<128x256xbf16>
    %68 = arith.truncf %65 : vector<128x128xf32> to vector<128x128xbf16>
    %cst_35 = arith.constant dense<0.000000e+00> : vector<128x256xf32>
    %69 = tpu.matmul %68, %67, %cst_35 {dimension_numbers = #tpu.dot_dimension_numbers<[1], [0], [0], [1], [0, 0, 1, 1], [], []>} : vector<128x128xbf16>, vector<128x256xbf16>, vector<128x256xf32> -> vector<128x256xf32>
    %c0_36 = arith.constant 0 : index
    %c0_37 = arith.constant 0 : index
    %c0_38 = arith.constant 0 : index
    %70 = vector.load %arg11[%c0_36, %c0_37, %c0_38] : memref<2x1x256xf32, #tpu.memory_space<vmem>>, vector<1x1x256xf32>
    %71 = vector.shape_cast %70 : vector<1x1x256xf32> to vector<1x256xf32>
    %72 = vector.broadcast %71 : vector<1x256xf32> to vector<128x256xf32>
    %73 = arith.addf %69, %72 : vector<128x256xf32>
    %cst_39 = arith.constant 5.000000e-01 : f32
    %74 = vector.broadcast %cst_39 : f32 to vector<128x256xf32>
    %75 = arith.mulf %74, %73 : vector<128x256xf32>
    %cst_40 = arith.constant 0.707106769 : f32
    %76 = vector.broadcast %cst_40 : f32 to vector<128x256xf32>
    %77 = arith.mulf %73, %76 : vector<128x256xf32>
    %78 = math.erf %77 : vector<128x256xf32>
    %cst_41 = arith.constant 1.000000e+00 : f32
    %79 = vector.broadcast %cst_41 : f32 to vector<128x256xf32>
    %80 = arith.addf %79, %78 : vector<128x256xf32>
    %81 = arith.mulf %75, %80 : vector<128x256xf32>
    %c0_42 = arith.constant 0 : index
    %c0_43 = arith.constant 0 : index
    %c0_44 = arith.constant 0 : index
    %82 = vector.load %arg12[%c0_42, %c0_43, %c0_44] : memref<2x256x128xbf16, #tpu.memory_space<vmem>>, vector<1x256x128xbf16>
    %83 = vector.shape_cast %82 : vector<1x256x128xbf16> to vector<256x128xbf16>
    %84 = arith.truncf %81 : vector<128x256xf32> to vector<128x256xbf16>
    %cst_45 = arith.constant dense<0.000000e+00> : vector<128x128xf32>
    %85 = tpu.matmul %84, %83, %cst_45 {dimension_numbers = #tpu.dot_dimension_numbers<[1], [0], [0], [1], [0, 0, 1, 1], [], []>} : vector<128x256xbf16>, vector<256x128xbf16>, vector<128x128xf32> -> vector<128x128xf32>
    %c0_46 = arith.constant 0 : index
    %c0_47 = arith.constant 0 : index
    %c0_48 = arith.constant 0 : index
    %86 = vector.load %arg13[%c0_46, %c0_47, %c0_48] : memref<2x1x128xf32, #tpu.memory_space<vmem>>, vector<1x1x128xf32>
    %87 = vector.shape_cast %86 : vector<1x1x128xf32> to vector<1x128xf32>
    %88 = vector.broadcast %87 : vector<1x128xf32> to vector<128x128xf32>
    %89 = arith.addf %85, %88 : vector<128x128xf32>
    %90 = arith.addf %65, %89 : vector<128x128xf32>
    %c0_49 = arith.constant 0 : index
    %c0_50 = arith.constant 0 : index
    %c0_51 = arith.constant 0 : index
    %91 = vector.load %arg14[%c0_49, %c0_50, %c0_51] : memref<2x1x128xf32, #tpu.memory_space<vmem>>, vector<1x1x128xf32>
    %92 = vector.shape_cast %91 : vector<1x1x128xf32> to vector<1x128xf32>
    %c0_52 = arith.constant 0 : index
    %c0_53 = arith.constant 0 : index
    %c0_54 = arith.constant 0 : index
    %93 = vector.load %arg15[%c0_52, %c0_53, %c0_54] : memref<2x1x128xf32, #tpu.memory_space<vmem>>, vector<1x1x128xf32>
    %94 = vector.shape_cast %93 : vector<1x1x128xf32> to vector<1x128xf32>
    %cst_55 = arith.constant dense<0.000000e+00> : vector<128xf32>
    %95 = vector.multi_reduction <add>, %90, %cst_55 [1] : vector<128x128xf32> to vector<128xf32>
    %96 = vector.shape_cast %95 : vector<128xf32> to vector<128x1xf32>
    %cst_56 = arith.constant 1.280000e+02 : f32
    %97 = vector.broadcast %cst_56 : f32 to vector<128x1xf32>
    %98 = arith.divf %96, %97 : vector<128x1xf32>
    %99 = vector.broadcast %98 : vector<128x1xf32> to vector<128x128xf32>
    %100 = arith.subf %90, %99 : vector<128x128xf32>
    %101 = arith.mulf %100, %100 : vector<128x128xf32>
    %cst_57 = arith.constant dense<0.000000e+00> : vector<128xf32>
    %102 = vector.multi_reduction <add>, %101, %cst_57 [1] : vector<128x128xf32> to vector<128xf32>
    %103 = vector.shape_cast %102 : vector<128xf32> to vector<128x1xf32>
    %cst_58 = arith.constant 1.280000e+02 : f32
    %104 = vector.broadcast %cst_58 : f32 to vector<128x1xf32>
    %105 = arith.divf %103, %104 : vector<128x1xf32>
    %106 = vector.broadcast %98 : vector<128x1xf32> to vector<128x128xf32>
    %107 = arith.subf %90, %106 : vector<128x128xf32>
    %cst_59 = arith.constant 9.99999974E-6 : f32
    %108 = vector.broadcast %cst_59 : f32 to vector<128x1xf32>
    %109 = arith.addf %105, %108 : vector<128x1xf32>
    %110 = math.rsqrt %109 : vector<128x1xf32>
    %111 = vector.broadcast %110 : vector<128x1xf32> to vector<128x128xf32>
    %112 = arith.mulf %107, %111 : vector<128x128xf32>
    %113 = vector.broadcast %92 : vector<1x128xf32> to vector<128x128xf32>
    %114 = arith.mulf %112, %113 : vector<128x128xf32>
    %115 = vector.broadcast %94 : vector<1x128xf32> to vector<128x128xf32>
    %116 = arith.addf %114, %115 : vector<128x128xf32>
    %c1 = arith.constant 1 : index
    %c0_60 = arith.constant 0 : index
    %c0_61 = arith.constant 0 : index
    %117 = vector.load %arg6[%c1, %c0_60, %c0_61] : memref<2x128x128xbf16, #tpu.memory_space<vmem>>, vector<1x128x128xbf16>
    %118 = vector.shape_cast %117 : vector<1x128x128xbf16> to vector<128x128xbf16>
    %119 = arith.truncf %116 : vector<128x128xf32> to vector<128x128xbf16>
    %cst_62 = arith.constant dense<0.000000e+00> : vector<128x128xf32>
    %120 = tpu.matmul %119, %118, %cst_62 {dimension_numbers = #tpu.dot_dimension_numbers<[1], [0], [0], [1], [0, 0, 1, 1], [], []>} : vector<128x128xbf16>, vector<128x128xbf16>, vector<128x128xf32> -> vector<128x128xf32>
    %c1_63 = arith.constant 1 : index
    %c0_64 = arith.constant 0 : index
    %c0_65 = arith.constant 0 : index
    %121 = vector.load %arg7[%c1_63, %c0_64, %c0_65] : memref<2x1x128xf32, #tpu.memory_space<vmem>>, vector<1x1x128xf32>
    %122 = vector.shape_cast %121 : vector<1x1x128xf32> to vector<1x128xf32>
    %123 = vector.broadcast %122 : vector<1x128xf32> to vector<128x128xf32>
    %124 = arith.addf %120, %123 : vector<128x128xf32>
    %125 = arith.addf %116, %124 : vector<128x128xf32>
    %c1_66 = arith.constant 1 : index
    %c0_67 = arith.constant 0 : index
    %c0_68 = arith.constant 0 : index
    %126 = vector.load %arg8[%c1_66, %c0_67, %c0_68] : memref<2x1x128xf32, #tpu.memory_space<vmem>>, vector<1x1x128xf32>
    %127 = vector.shape_cast %126 : vector<1x1x128xf32> to vector<1x128xf32>
    %c1_69 = arith.constant 1 : index
    %c0_70 = arith.constant 0 : index
    %c0_71 = arith.constant 0 : index
    %128 = vector.load %arg9[%c1_69, %c0_70, %c0_71] : memref<2x1x128xf32, #tpu.memory_space<vmem>>, vector<1x1x128xf32>
    %129 = vector.shape_cast %128 : vector<1x1x128xf32> to vector<1x128xf32>
    %cst_72 = arith.constant dense<0.000000e+00> : vector<128xf32>
    %130 = vector.multi_reduction <add>, %125, %cst_72 [1] : vector<128x128xf32> to vector<128xf32>
    %131 = vector.shape_cast %130 : vector<128xf32> to vector<128x1xf32>
    %cst_73 = arith.constant 1.280000e+02 : f32
    %132 = vector.broadcast %cst_73 : f32 to vector<128x1xf32>
    %133 = arith.divf %131, %132 : vector<128x1xf32>
    %134 = vector.broadcast %133 : vector<128x1xf32> to vector<128x128xf32>
    %135 = arith.subf %125, %134 : vector<128x128xf32>
    %136 = arith.mulf %135, %135 : vector<128x128xf32>
    %cst_74 = arith.constant dense<0.000000e+00> : vector<128xf32>
    %137 = vector.multi_reduction <add>, %136, %cst_74 [1] : vector<128x128xf32> to vector<128xf32>
    %138 = vector.shape_cast %137 : vector<128xf32> to vector<128x1xf32>
    %cst_75 = arith.constant 1.280000e+02 : f32
    %139 = vector.broadcast %cst_75 : f32 to vector<128x1xf32>
    %140 = arith.divf %138, %139 : vector<128x1xf32>
    %141 = vector.broadcast %133 : vector<128x1xf32> to vector<128x128xf32>
    %142 = arith.subf %125, %141 : vector<128x128xf32>
    %cst_76 = arith.constant 9.99999974E-6 : f32
    %143 = vector.broadcast %cst_76 : f32 to vector<128x1xf32>
    %144 = arith.addf %140, %143 : vector<128x1xf32>
    %145 = math.rsqrt %144 : vector<128x1xf32>
    %146 = vector.broadcast %145 : vector<128x1xf32> to vector<128x128xf32>
    %147 = arith.mulf %142, %146 : vector<128x128xf32>
    %148 = vector.broadcast %127 : vector<1x128xf32> to vector<128x128xf32>
    %149 = arith.mulf %147, %148 : vector<128x128xf32>
    %150 = vector.broadcast %129 : vector<1x128xf32> to vector<128x128xf32>
    %151 = arith.addf %149, %150 : vector<128x128xf32>
    %c1_77 = arith.constant 1 : index
    %c0_78 = arith.constant 0 : index
    %c0_79 = arith.constant 0 : index
    %152 = vector.load %arg10[%c1_77, %c0_78, %c0_79] : memref<2x128x256xbf16, #tpu.memory_space<vmem>>, vector<1x128x256xbf16>
    %153 = vector.shape_cast %152 : vector<1x128x256xbf16> to vector<128x256xbf16>
    %154 = arith.truncf %151 : vector<128x128xf32> to vector<128x128xbf16>
    %cst_80 = arith.constant dense<0.000000e+00> : vector<128x256xf32>
    %155 = tpu.matmul %154, %153, %cst_80 {dimension_numbers = #tpu.dot_dimension_numbers<[1], [0], [0], [1], [0, 0, 1, 1], [], []>} : vector<128x128xbf16>, vector<128x256xbf16>, vector<128x256xf32> -> vector<128x256xf32>
    %c1_81 = arith.constant 1 : index
    %c0_82 = arith.constant 0 : index
    %c0_83 = arith.constant 0 : index
    %156 = vector.load %arg11[%c1_81, %c0_82, %c0_83] : memref<2x1x256xf32, #tpu.memory_space<vmem>>, vector<1x1x256xf32>
    %157 = vector.shape_cast %156 : vector<1x1x256xf32> to vector<1x256xf32>
    %158 = vector.broadcast %157 : vector<1x256xf32> to vector<128x256xf32>
    %159 = arith.addf %155, %158 : vector<128x256xf32>
    %cst_84 = arith.constant 5.000000e-01 : f32
    %160 = vector.broadcast %cst_84 : f32 to vector<128x256xf32>
    %161 = arith.mulf %160, %159 : vector<128x256xf32>
    %cst_85 = arith.constant 0.707106769 : f32
    %162 = vector.broadcast %cst_85 : f32 to vector<128x256xf32>
    %163 = arith.mulf %159, %162 : vector<128x256xf32>
    %164 = math.erf %163 : vector<128x256xf32>
    %cst_86 = arith.constant 1.000000e+00 : f32
    %165 = vector.broadcast %cst_86 : f32 to vector<128x256xf32>
    %166 = arith.addf %165, %164 : vector<128x256xf32>
    %167 = arith.mulf %161, %166 : vector<128x256xf32>
    %c1_87 = arith.constant 1 : index
    %c0_88 = arith.constant 0 : index
    %c0_89 = arith.constant 0 : index
    %168 = vector.load %arg12[%c1_87, %c0_88, %c0_89] : memref<2x256x128xbf16, #tpu.memory_space<vmem>>, vector<1x256x128xbf16>
    %169 = vector.shape_cast %168 : vector<1x256x128xbf16> to vector<256x128xbf16>
    %170 = arith.truncf %167 : vector<128x256xf32> to vector<128x256xbf16>
    %cst_90 = arith.constant dense<0.000000e+00> : vector<128x128xf32>
    %171 = tpu.matmul %170, %169, %cst_90 {dimension_numbers = #tpu.dot_dimension_numbers<[1], [0], [0], [1], [0, 0, 1, 1], [], []>} : vector<128x256xbf16>, vector<256x128xbf16>, vector<128x128xf32> -> vector<128x128xf32>
    %c1_91 = arith.constant 1 : index
    %c0_92 = arith.constant 0 : index
    %c0_93 = arith.constant 0 : index
    %172 = vector.load %arg13[%c1_91, %c0_92, %c0_93] : memref<2x1x128xf32, #tpu.memory_space<vmem>>, vector<1x1x128xf32>
    %173 = vector.shape_cast %172 : vector<1x1x128xf32> to vector<1x128xf32>
    %174 = vector.broadcast %173 : vector<1x128xf32> to vector<128x128xf32>
    %175 = arith.addf %171, %174 : vector<128x128xf32>
    %176 = arith.addf %151, %175 : vector<128x128xf32>
    %c1_94 = arith.constant 1 : index
    %c0_95 = arith.constant 0 : index
    %c0_96 = arith.constant 0 : index
    %177 = vector.load %arg14[%c1_94, %c0_95, %c0_96] : memref<2x1x128xf32, #tpu.memory_space<vmem>>, vector<1x1x128xf32>
    %178 = vector.shape_cast %177 : vector<1x1x128xf32> to vector<1x128xf32>
    %c1_97 = arith.constant 1 : index
    %c0_98 = arith.constant 0 : index
    %c0_99 = arith.constant 0 : index
    %179 = vector.load %arg15[%c1_97, %c0_98, %c0_99] : memref<2x1x128xf32, #tpu.memory_space<vmem>>, vector<1x1x128xf32>
    %180 = vector.shape_cast %179 : vector<1x1x128xf32> to vector<1x128xf32>
    %cst_100 = arith.constant dense<0.000000e+00> : vector<128xf32>
    %181 = vector.multi_reduction <add>, %176, %cst_100 [1] : vector<128x128xf32> to vector<128xf32>
    %182 = vector.shape_cast %181 : vector<128xf32> to vector<128x1xf32>
    %cst_101 = arith.constant 1.280000e+02 : f32
    %183 = vector.broadcast %cst_101 : f32 to vector<128x1xf32>
    %184 = arith.divf %182, %183 : vector<128x1xf32>
    %185 = vector.broadcast %184 : vector<128x1xf32> to vector<128x128xf32>
    %186 = arith.subf %176, %185 : vector<128x128xf32>
    %187 = arith.mulf %186, %186 : vector<128x128xf32>
    %cst_102 = arith.constant dense<0.000000e+00> : vector<128xf32>
    %188 = vector.multi_reduction <add>, %187, %cst_102 [1] : vector<128x128xf32> to vector<128xf32>
    %189 = vector.shape_cast %188 : vector<128xf32> to vector<128x1xf32>
    %cst_103 = arith.constant 1.280000e+02 : f32
    %190 = vector.broadcast %cst_103 : f32 to vector<128x1xf32>
    %191 = arith.divf %189, %190 : vector<128x1xf32>
    %192 = vector.broadcast %184 : vector<128x1xf32> to vector<128x128xf32>
    %193 = arith.subf %176, %192 : vector<128x128xf32>
    %cst_104 = arith.constant 9.99999974E-6 : f32
    %194 = vector.broadcast %cst_104 : f32 to vector<128x1xf32>
    %195 = arith.addf %191, %194 : vector<128x1xf32>
    %196 = math.rsqrt %195 : vector<128x1xf32>
    %197 = vector.broadcast %196 : vector<128x1xf32> to vector<128x128xf32>
    %198 = arith.mulf %193, %197 : vector<128x128xf32>
    %199 = vector.broadcast %178 : vector<1x128xf32> to vector<128x128xf32>
    %200 = arith.mulf %198, %199 : vector<128x128xf32>
    %201 = vector.broadcast %180 : vector<1x128xf32> to vector<128x128xf32>
    %202 = arith.addf %200, %201 : vector<128x128xf32>
    %c0_105 = arith.constant 0 : index
    %c0_106 = arith.constant 0 : index
    %203 = vector.load %arg16[%c0_105, %c0_106] : memref<128x128xbf16, #tpu.memory_space<vmem>>, vector<128x128xbf16>
    %204 = arith.truncf %202 : vector<128x128xf32> to vector<128x128xbf16>
    %cst_107 = arith.constant dense<0.000000e+00> : vector<128x128xf32>
    %205 = tpu.matmul %204, %203, %cst_107 {dimension_numbers = #tpu.dot_dimension_numbers<[1], [0], [0], [1], [0, 0, 1, 1], [], []>} : vector<128x128xbf16>, vector<128x128xbf16>, vector<128x128xf32> -> vector<128x128xf32>
    %c0_108 = arith.constant 0 : index
    %c0_109 = arith.constant 0 : index
    %206 = vector.load %arg17[%c0_108, %c0_109] : memref<1x128xf32, #tpu.memory_space<vmem>>, vector<1x128xf32>
    %207 = vector.broadcast %206 : vector<1x128xf32> to vector<128x128xf32>
    %208 = arith.addf %205, %207 : vector<128x128xf32>
    %c0_110 = arith.constant 0 : index
    %c0_111 = arith.constant 0 : index
    %209 = vector.load %arg18[%c0_110, %c0_111] : memref<1x128xf32, #tpu.memory_space<vmem>>, vector<1x128xf32>
    %c0_112 = arith.constant 0 : index
    %c0_113 = arith.constant 0 : index
    %210 = vector.load %arg19[%c0_112, %c0_113] : memref<1x128xf32, #tpu.memory_space<vmem>>, vector<1x128xf32>
    %cst_114 = arith.constant dense<0.000000e+00> : vector<128xf32>
    %211 = vector.multi_reduction <add>, %208, %cst_114 [1] : vector<128x128xf32> to vector<128xf32>
    %212 = vector.shape_cast %211 : vector<128xf32> to vector<128x1xf32>
    %cst_115 = arith.constant 1.280000e+02 : f32
    %213 = vector.broadcast %cst_115 : f32 to vector<128x1xf32>
    %214 = arith.divf %212, %213 : vector<128x1xf32>
    %215 = vector.broadcast %214 : vector<128x1xf32> to vector<128x128xf32>
    %216 = arith.subf %208, %215 : vector<128x128xf32>
    %217 = arith.mulf %216, %216 : vector<128x128xf32>
    %cst_116 = arith.constant dense<0.000000e+00> : vector<128xf32>
    %218 = vector.multi_reduction <add>, %217, %cst_116 [1] : vector<128x128xf32> to vector<128xf32>
    %219 = vector.shape_cast %218 : vector<128xf32> to vector<128x1xf32>
    %cst_117 = arith.constant 1.280000e+02 : f32
    %220 = vector.broadcast %cst_117 : f32 to vector<128x1xf32>
    %221 = arith.divf %219, %220 : vector<128x1xf32>
    %222 = vector.broadcast %214 : vector<128x1xf32> to vector<128x128xf32>
    %223 = arith.subf %208, %222 : vector<128x128xf32>
    %cst_118 = arith.constant 9.99999974E-6 : f32
    %224 = vector.broadcast %cst_118 : f32 to vector<128x1xf32>
    %225 = arith.addf %221, %224 : vector<128x1xf32>
    %226 = math.rsqrt %225 : vector<128x1xf32>
    %227 = vector.broadcast %226 : vector<128x1xf32> to vector<128x128xf32>
    %228 = arith.mulf %223, %227 : vector<128x128xf32>
    %229 = vector.broadcast %209 : vector<1x128xf32> to vector<128x128xf32>
    %230 = arith.mulf %228, %229 : vector<128x128xf32>
    %231 = vector.broadcast %210 : vector<1x128xf32> to vector<128x128xf32>
    %232 = arith.addf %230, %231 : vector<128x128xf32>
    %c0_119 = arith.constant 0 : index
    %c0_120 = arith.constant 0 : index
    %233 = vector.load %arg20[%c0_119, %c0_120] : memref<128x128xf32, #tpu.memory_space<vmem>>, vector<128x128xf32>
    tpu.vector_store %arg20[%c0_119, %c0_120], %232 {strides = array<i32>} : memref<128x128xf32, #tpu.memory_space<vmem>>, vector<128x128xf32>,
    return
  }
  func.func @transform_0(%arg0: i32) -> (i32, i32) {
    %c0_i32 = arith.constant 0 : i32
    %c0_i32_0 = arith.constant 0 : i32
    return %arg0, %c0_i32 : i32, i32
  }
  func.func @transform_1(%arg0: i32) -> (i32, i32) {
    %c0_i32 = arith.constant 0 : i32
    %c0_i32_0 = arith.constant 0 : i32
    %c0_i32_1 = arith.constant 0 : i32
    return %c0_i32, %c0_i32_0 : i32, i32
  }
  func.func @transform_2(%arg0: i32) -> (i32, i32) {
    %c0_i32 = arith.constant 0 : i32
    %c0_i32_0 = arith.constant 0 : i32
    %c0_i32_1 = arith.constant 0 : i32
    return %c0_i32, %c0_i32_0 : i32, i32
  }
  func.func @transform_3(%arg0: i32) -> (i32, i32) {
    %c0_i32 = arith.constant 0 : i32
    %c0_i32_0 = arith.constant 0 : i32
    %c0_i32_1 = arith.constant 0 : i32
    return %c0_i32, %c0_i32_0 : i32, i32
  }
  func.func @transform_4(%arg0: i32) -> (i32, i32) {
    %c0_i32 = arith.constant 0 : i32
    %c0_i32_0 = arith.constant 0 : i32
    %c0_i32_1 = arith.constant 0 : i32
    return %c0_i32, %c0_i32_0 : i32, i32
  }
  func.func @transform_5(%arg0: i32) -> (i32, i32, i32) {
    %c0_i32 = arith.constant 0 : i32
    %c0_i32_0 = arith.constant 0 : i32
    %c0_i32_1 = arith.constant 0 : i32
    %c0_i32_2 = arith.constant 0 : i32
    return %c0_i32, %c0_i32_0, %c0_i32_1 : i32, i32, i32
  }
  func.func @transform_6(%arg0: i32) -> (i32, i32, i32) {
    %c0_i32 = arith.constant 0 : i32
    %c0_i32_0 = arith.constant 0 : i32
    %c0_i32_1 = arith.constant 0 : i32
    %c0_i32_2 = arith.constant 0 : i32
    return %c0_i32, %c0_i32_0, %c0_i32_1 : i32, i32, i32
  }
  func.func @transform_7(%arg0: i32) -> (i32, i32, i32) {
    %c0_i32 = arith.constant 0 : i32
    %c0_i32_0 = arith.constant 0 : i32
    %c0_i32_1 = arith.constant 0 : i32
    %c0_i32_2 = arith.constant 0 : i32
    return %c0_i32, %c0_i32_0, %c0_i32_1 : i32, i32, i32
  }
  func.func @transform_8(%arg0: i32) -> (i32, i32, i32) {
    %c0_i32 = arith.constant 0 : i32
    %c0_i32_0 = arith.constant 0 : i32
    %c0_i32_1 = arith.constant 0 : i32
    %c0_i32_2 = arith.constant 0 : i32
    return %c0_i32, %c0_i32_0, %c0_i32_1 : i32, i32, i32
  }
  func.func @transform_9(%arg0: i32) -> (i32, i32, i32) {
    %c0_i32 = arith.constant 0 : i32
    %c0_i32_0 = arith.constant 0 : i32
    %c0_i32_1 = arith.constant 0 : i32
    %c0_i32_2 = arith.constant 0 : i32
    return %c0_i32, %c0_i32_0, %c0_i32_1 : i32, i32, i32
  }
  func.func @transform_10(%arg0: i32) -> (i32, i32, i32) {
    %c0_i32 = arith.constant 0 : i32
    %c0_i32_0 = arith.constant 0 : i32
    %c0_i32_1 = arith.constant 0 : i32
    %c0_i32_2 = arith.constant 0 : i32
    return %c0_i32, %c0_i32_0, %c0_i32_1 : i32, i32, i32
  }
  func.func @transform_11(%arg0: i32) -> (i32, i32, i32) {
    %c0_i32 = arith.constant 0 : i32
    %c0_i32_0 = arith.constant 0 : i32
    %c0_i32_1 = arith.constant 0 : i32
    %c0_i32_2 = arith.constant 0 : i32
    return %c0_i32, %c0_i32_0, %c0_i32_1 : i32, i32, i32
  }
  func.func @transform_12(%arg0: i32) -> (i32, i32, i32) {
    %c0_i32 = arith.constant 0 : i32
    %c0_i32_0 = arith.constant 0 : i32
    %c0_i32_1 = arith.constant 0 : i32
    %c0_i32_2 = arith.constant 0 : i32
    return %c0_i32, %c0_i32_0, %c0_i32_1 : i32, i32, i32
  }
  func.func @transform_13(%arg0: i32) -> (i32, i32, i32) {
    %c0_i32 = arith.constant 0 : i32
    %c0_i32_0 = arith.constant 0 : i32
    %c0_i32_1 = arith.constant 0 : i32
    %c0_i32_2 = arith.constant 0 : i32
    return %c0_i32, %c0_i32_0, %c0_i32_1 : i32, i32, i32
  }
  func.func @transform_14(%arg0: i32) -> (i32, i32, i32) {
    %c0_i32 = arith.constant 0 : i32
    %c0_i32_0 = arith.constant 0 : i32
    %c0_i32_1 = arith.constant 0 : i32
    %c0_i32_2 = arith.constant 0 : i32
    return %c0_i32, %c0_i32_0, %c0_i32_1 : i32, i32, i32
  }
  func.func @transform_15(%arg0: i32) -> (i32, i32) {
    %c0_i32 = arith.constant 0 : i32
    %c0_i32_0 = arith.constant 0 : i32
    %c0_i32_1 = arith.constant 0 : i32
    return %c0_i32, %c0_i32_0 : i32, i32
  }
  func.func @transform_16(%arg0: i32) -> (i32, i32) {
    %c0_i32 = arith.constant 0 : i32
    %c0_i32_0 = arith.constant 0 : i32
    %c0_i32_1 = arith.constant 0 : i32
    return %c0_i32, %c0_i32_0 : i32, i32
  }
  func.func @transform_17(%arg0: i32) -> (i32, i32) {
    %c0_i32 = arith.constant 0 : i32
    %c0_i32_0 = arith.constant 0 : i32
    %c0_i32_1 = arith.constant 0 : i32
    return %c0_i32, %c0_i32_0 : i32, i32
  }
  func.func @transform_18(%arg0: i32) -> (i32, i32) {
    %c0_i32 = arith.constant 0 : i32
    %c0_i32_0 = arith.constant 0 : i32
    %c0_i32_1 = arith.constant 0 : i32
    return %c0_i32, %c0_i32_0 : i32, i32
  }
  func.func @transform_19(%arg0: i32) -> (i32, i32) {
    %c0_i32 = arith.constant 0 : i32
    %c0_i32_0 = arith.constant 0 : i32
    return %arg0, %c0_i32 : i32, i32
  }
}

</mosaic_0001>

<bundles_post_ra>
// kernel: tpu_custom_call.1
= control target key start
LH: loop header
LB: loop body
LE: loop exit
PB: predicated region body
PF: predicated region fallthrough
CT: control target
= control target key end

     0   :  { %s14095_s0 = inlined_call_operand.hbm [shape: f32[256,128], index: 0, kind: input, shape index: {}]   ;;  %s14096_s1 = inlined_call_operand.hbm [shape: f32[1,128], index: 1, kind: input, shape index: {}]   ;;  %s14097_s2 = inlined_call_operand.hbm [shape: f32[1,128], index: 2, kind: input, shape index: {}]   ;;  %s14098_s3 = inlined_call_operand.hbm [shape: bf16[128,128], index: 3, kind: input, shape index: {}]   ;;  %s14099_s4 = inlined_call_operand.hbm [shape: f32[1,128], index: 4, kind: input, shape index: {}]   ;;  %s14100_s5 = inlined_call_operand.hbm [shape: bf16[2,128,128], index: 5, kind: input, shape index: {}]   ;;  %s14101_s6 = inlined_call_operand.vmem [shape: f32[2,1,128], index: 6, kind: input, shape index: {}]   ;;  %s14102_s7 = inlined_call_operand.hbm [shape: f32[2,1,128], index: 7, kind: input, shape index: {}]   ;;  %s14103_s8 = inlined_call_operand.hbm [shape: f32[2,1,128], index: 8, kind: input, shape index: {}]   ;;  %s14104_s9 = inlined_call_operand.hbm [shape: bf16[2,128,256], index: 9, kind: input, shape index: {}]   ;;  %s14105_s10 = inlined_call_operand.vmem [shape: f32[2,1,256], index: 10, kind: input, shape index: {}]   ;;  %s14106_s11 = inlined_call_operand.hbm [shape: bf16[2,256,128], index: 11, kind: input, shape index: {}]   ;;  %s14107_s12 = inlined_call_operand.vmem [shape: f32[2,1,128], index: 12, kind: input, shape index: {}]   ;;  %s14108_s13 = inlined_call_operand.vmem [shape: f32[2,1,128], index: 13, kind: input, shape index: {}]   ;;  %s14109_s14 = inlined_call_operand.vmem [shape: f32[2,1,128], index: 14, kind: input, shape index: {}]   ;;  %s14110_s15 = inlined_call_operand.hbm [shape: bf16[128,128], index: 15, kind: input, shape index: {}]   ;;  %s14111_s16 = inlined_call_operand.vmem [shape: f32[1,128], index: 16, kind: input, shape index: {}]   ;;  %s14112_s17 = inlined_call_operand.vmem [shape: f32[1,128], index: 17, kind: input, shape index: {}]   ;;  %s14113_s18 = inlined_call_operand.vmem [shape: f32[1,128], index: 18, kind: input, shape index: {}]   ;;  %s14114_s19 = inlined_call_operand.hbm [shape: f32[256,128], index: 19, kind: output, shape index: {}]  }
   0x1   :  { %14151 = sst [smem:[#allocation48_spill]] %s14095_s0 }
   0x2   :  { %14152 = sst [smem:[#allocation49_spill]] %s14096_s1 }
   0x3   :  { %14153 = sst [smem:[#allocation50_spill]] %s14097_s2 }
   0x4   :  { %14154 = sst [smem:[#allocation51_spill]] %s14098_s3 }
   0x5   :  { %14155 = sst [smem:[#allocation52_spill]] %s14099_s4 }
   0x6   :  { %14156 = sst [smem:[#allocation53_spill]] %s14100_s5 }
   0x7   :  { %14157 = sst [smem:[#allocation54_spill]] %s14102_s7 }
   0x8   :  { %14158 = sst [smem:[#allocation55_spill]] %s14103_s8 }
   0x9   :  { %14159 = sst [smem:[#allocation56_spill]] %s14106_s11 }
   0xa   :  { %14160 = sst [smem:[#allocation57_spill]] %s14108_s13 }
   0xb   :  { %14161 = sst [smem:[#allocation58_spill]] %s14109_s14 }
   0xc   :  { %14162 = sst [smem:[#allocation59_spill]] %s14111_s16 }
   0xd   :  { %14163 = sst [smem:[#allocation60_spill]] %s14112_s17 }
   0xe   :  { %14164 = sst [smem:[#allocation61_spill]] %s14113_s18 }
   0xf   :  { %14165 = sst [smem:[#allocation62_spill]] %s14114_s19 }
  0x10   :  { %24 = vsyncpa [#allocation3], 0 }
  0x11   :  { %26 = vsyncpa [#allocation3 + $0x1], 0 }
  0x12   :  { %27 = vsyncpa [#allocation6], 0 }
  0x13   :  { %28 = vsyncpa [#allocation9], 0 }
  0x14   :  { %29 = vsyncpa [#allocation12], 0 }
  0x15   :  { %30 = vsyncpa [#allocation15], 0 }
  0x16   :  { %31 = vsyncpa [#allocation18], 0 }
  0x17   :  { %32 = vsyncpa [#allocation4], 0 }
  0x18   :  { %34 = vsyncpa [#allocation4 + $0x1], 0  ;;  %s9089_s0 = smov 0   ;;  %s9091_s30 = smov 0  }
  0x19   :  { %s9093_s20 = smov 0   ;;  %s9095_s21 = smov 0  }
  0x1a LB: > { %s14166_s2 = sld [smem:[#allocation49_spill]]  ;;  %s9113_s24 = sadd.s32 4294967295, %s8968_s21   ;;  %s8968_s21 = sphi %s9095_s21, %s14381_s21   ;;  %s8964_s20 = sphi %s9093_s20, %s14380_s20   ;;  %s8960_s30 = sphi %s9091_s30, %s14379_s30   ;;  %s8956_s0 = sphi %s9089_s0, %s14378_s0  }
  0x1b   : > { %p7466_p0 = scmp.ge.s32.totalorder %s8968_s21, 1  ;;  %p61_p1 = scmp.eq.s32.totalorder %s9113_s24, 0 }
  0x1c   : > { %p475_p2 = scmp.lt.s32.totalorder %s8968_s21, 3  ;;  %s8970_s3 = smov [#allocation5]  }
  0x1d   : > { %s489_s26 = sshll.u32 %s8970_s3, 4  ;;  %s14168_s29 = sld [smem:[#allocation51_spill]]  ;;  %s490_s26 = int_to_ptr.vmem [resolvable:$true] %s489_s26 }
  0x1e   : > { %p9118_p3 = pnand %p7466_p0, %p475_p2  ;;  %s14118_s3 = smov 64  }
  0x1f   : > { %s14120_s18 = smov 4   ;;  %s14170_s5 = sld [smem:[#allocation53_spill]] }
  0x20   : > { %s487_s23 = sshll.u32 %s14166_s2, 4  ;;  %p8094_p5 = pneg %p9118_p3  ;;  %s488_s23 = int_to_ptr.hbm [resolvable:$true] %s487_s23 }
  0x21   : > { %s8971_s2 = smov [#allocation8]   ;;  %s8974_s17 = smov [#allocation11]  }
  0x22   : > { %p9130_p6 = pnand %p8094_p5, %p61_p1  ;;  %s512_s19 = sshll.u32 %s8971_s2, 4  ;;  %s513_s19 = int_to_ptr.vmem [resolvable:$true] %s512_s19 }
  0x23   : > { %s510_s1 = sshll.u32 %s14168_s29, 4  ;;  %s538_s16 = sshll.u32 %s8974_s17, 4  ;;  %s511_s1 = int_to_ptr.hbm [resolvable:$true] %s510_s1  ;;  %s539_s16 = int_to_ptr.vmem [resolvable:$true] %s538_s16 }
  0x24   : > { %8097 = dma.hbm_to_vmem [thread:$0]  (!%p9130_p6), %s488_s23, 16, %s490_s26, [#allocation6]  }
  0x25   : > { %8103 = dma.hbm_to_vmem [thread:$0]  (!%p9130_p6), %s511_s1, 1024, %s513_s19, [#allocation9], %s14118_s3, %s14118_s3, %s14120_s18  }
  0x26   : > { %s536_s29 = sshll.u32 %s14170_s5, 4  ;;  %s14171_s8 = sld [smem:[#allocation55_spill]]  ;;  %s537_s29 = int_to_ptr.hbm [resolvable:$true] %s536_s29 }
  0x27   : > { %8109 = dma.hbm_to_vmem [thread:$0]  (!%p9130_p6), %s537_s29, 2048, %s539_s16, [#allocation12], %s14118_s3, %s14118_s3, %s14120_s18  }
  0x28   : > { %s8975_s19 = smov [#allocation14]   ;;  %s14172_s11 = sld [smem:[#allocation56_spill]] }
  0x29   : > { %s569_s1 = sshll.u32 %s8975_s19, 4  ;;  %s8976_s17 = smov 16   ;;  %s570_s1 = int_to_ptr.vmem [resolvable:$true] %s569_s1 }
  0x2a   : > { %s8977_s14 = smov 1   ;;  %s14173_s3 = sld [smem:[#allocation50_spill]] }
  0x2b   : > { %s8978_s26 = smov [#allocation17]   ;;  %s14174_s19 = smov 4  }
  0x2c   : > { %s567_s2 = sshll.u32 %s14171_s8, 4  ;;  %s600_s18 = sshll.u32 %s8978_s26, 4  ;;  %s568_s2 = int_to_ptr.hbm [resolvable:$true] %s567_s2  ;;  %s601_s18 = int_to_ptr.vmem [resolvable:$true] %s600_s18 }
  0x2d   : > { %8115 = dma.hbm_to_vmem [thread:$0]  (!%p9130_p6), %s568_s2, 32, %s570_s1, [#allocation15], %s8976_s17, %s8976_s17, %s8977_s14  }
  0x2e   : > { %s598_s5 = sshll.u32 %s14172_s11, 4  ;;  %s14175_s27 = smov 64   ;;  %s599_s5 = int_to_ptr.hbm [resolvable:$true] %s598_s5 }
  0x2f   : > { %8121 = dma.hbm_to_vmem [thread:$0]  (!%p9130_p6), %s599_s5, 4096, %s601_s18, [#allocation18], %s14175_s27, %s14175_s27, %s14174_s19  }
  0x30   : > { %s499_s23 = sshll.u32 %s14173_s3, 4  ;;  %s8979_s28 = smov [#allocation7]   ;;  %s500_s23 = int_to_ptr.hbm [resolvable:$true] %s499_s23 }
  0x31   : > { %s501_s8 = sshll.u32 %s8979_s28, 4  ;;  %s14176_s4 = sld [smem:[#allocation52_spill]]  ;;  %s502_s8 = int_to_ptr.vmem [resolvable:$true] %s501_s8 }
  0x32   : > { %8100 = dma.hbm_to_vmem [thread:$0]  (!%p9130_p6), %s500_s23, 16, %s502_s8, [#allocation6]  }
  0x33   : > { %s14177_s7 = sld [smem:[#allocation54_spill]]  ;;  %s8980_s29 = smov [#allocation10]  }
  0x34   : > { %s527_s26 = sshll.u32 %s8980_s29, 4  ;;  %s8981_s5 = smov [#allocation13]   ;;  %s528_s26 = int_to_ptr.vmem [resolvable:$true] %s527_s26 }
  0x35   : > { %s555_s18 = sshll.u32 %s8981_s5, 4  ;;  %s581_s28 = sshll.u32 %s14104_s9, 4  ;;  %s556_s18 = int_to_ptr.vmem [resolvable:$true] %s555_s18  ;;  %s582_s28 = int_to_ptr.hbm [resolvable:$true] %s581_s28 }
  0x36   : > { %s8982_s8 = smov [#allocation16]   ;;  %s621_s1 = sshll.u32 %s14110_s15, 4  ;;  %s622_s1 = int_to_ptr.hbm [resolvable:$true] %s621_s1 }
  0x37   : > { %s525_s2 = sshll.u32 %s14176_s4, 4  ;;  %s583_s23 = sshll.u32 %s8982_s8, 4  ;;  %s526_s2 = int_to_ptr.hbm [resolvable:$true] %s525_s2  ;;  %s584_s23 = int_to_ptr.vmem [resolvable:$true] %s583_s23 }
  0x38   : > { %8106 = dma.hbm_to_vmem [thread:$0]  (!%p9130_p6), %s526_s2, 16, %s528_s26, [#allocation9]  }
  0x39   : > { %s553_s16 = sshll.u32 %s14177_s7, 4  ;;  %s14123_s29 = smov 128   ;;  %s554_s16 = int_to_ptr.hbm [resolvable:$true] %s553_s16 }
  0x3a   : > { %8112 = dma.hbm_to_vmem [thread:$0]  (!%p9130_p6), %s554_s16, 32, %s556_s18, [#allocation12], %s8976_s17, %s8976_s17, %s8977_s14  }
  0x3b   : > { %s14124_s26 = smov 8   ;;  %s8985_s14 = smov [#allocation19]  }
  0x3c   : > { %8118 = dma.hbm_to_vmem [thread:$0]  (!%p9130_p6), %s582_s28, 4096, %s584_s23, [#allocation15], %s14123_s29, %s14123_s29, %s14124_s26  }
  0x3d   : > { %s623_s17 = sshll.u32 %s8985_s14, 4  ;;  %s7465_s16 = sadd.s32 4294967294, %s8968_s21   ;;  %s624_s17 = int_to_ptr.vmem [resolvable:$true] %s623_s17 }
  0x3e   : > { %8124 = dma.hbm_to_vmem [thread:$0]  (!%p9130_p6), %s622_s1, 1024, %s624_s17, [#allocation18], %s14175_s27, %s14175_s27, %s14174_s19  }
  0x3f   : > { %s9195_s5 = sadd.s32 1, %s8968_s21   ;;  %s47_s11 = sadd.s32 1, %s8964_s20 }
  0x40   : > { %s44_s18 = ssub.s32 %s8968_s21, %s9195_s5  ;;  %p54_p8 = scmp.ne.s32.totalorder %s8964_s20, %s8960_s30 }
  0x41   : > { %p45_p7 = scmp.eq.s32.totalorder %s44_s18, 0  ;;  %p55_p9 = scmp.eq.s32.totalorder %s8968_s21, 0 }
  0x42   : > { %p60_p10 = scmp.ne.s32.totalorder %s8960_s30, %s8956_s0  ;;  %p462_p13 = scmp.eq.s32.totalorder %s9113_s24, 1 }
  0x43   : > { %s9206_s13 = scalar_select %p45_p7, %s8964_s20, %s47_s11  }
  0x44   : > { %p9208_p11 = por %p55_p9, %p54_p8  ;;  %p9214_p12 = por %p61_p1, %p60_p10 }
  0x45   : > { %p468_p0 = scmp.eq.s32.totalorder %s7465_s16, 1  ;;  %p8143_p2 = scmp.lt.s32.totalorder %s8968_s21, 2 }
  0x46   : > { %s646_s27 = sand.u32 1, %s8964_s20   ;;  %p9221_p5 = por %p462_p13, %p54_p8 }
  0x47   : > { %p9225_p6 = por %p468_p0, %p60_p10  ;;  %s7478_s23 = sshll.u32 %s646_s27, 7 }
  0x48   : > { %s7952_s2 = sshll.u32 %s8968_s21, 7  ;;  %s14182_s14 = sld [smem:[#allocation48_spill]] }
  0x49   : > { %s650_s18 = scalar_lea.vmem [#allocation2], %s7478_s23  ;;  %p9235_p7 = pnand %p8143_p2, %p9208_p11 }
  0x4a   : > { %s658_s11 = sshll.u32 %s650_s18, 4  ;;  %s647_s26 = scalar_lea.sflag [#allocation3], %s646_s27  ;;  %s659_s11 = int_to_ptr.vmem [resolvable:$true] %s658_s11 }
  0x4b   : > { %p8856_p9 = pneg %p9235_p7 }
  0x4e   : > { %s655_s17 = scalar_lea.hbm %s14182_s14, %s7952_s2  ;;  %s8859_s3 = scalar_lea.hbm %s14182_s14, 256 }
  0x4f   : > { %s656_s29 = sshll.u32 %s655_s17, 4  ;;  %s657_s29 = int_to_ptr.hbm [resolvable:$true] %s656_s29 }
  0x50   : > { %s8852_s4 = sshra.s32 %s657_s29, 4  ;;  %s8853_s4 = int_to_ptr.hbm [resolvable:$true] %s8852_s4 }
  0x51   : > { %s8854_s7 = scalar_lea.hbm %s8853_s4, 128  ;;  %p8860_p11 = scmp.lt.s32.totalorder %s8853_s4, %s14182_s14 }
  0x52   : > { %p8855_p8 = scmp.ne.s32.totalorder %s8853_s4, %s8854_s7  ;;  %p8861_p0 = scmp.lt.s32.totalorder %s8859_s3, %s8854_s7 }
  0x54   : > { %p8857_p10 = pnand %p8856_p9, %p8855_p8  ;;  %p8862_p2 = por %p8861_p0, %p8860_p11 }
  0x56   : > { %p8858_p13 = pneg %p8857_p10 }
  0x58   : > { %p8863_p4 = pnand %p8862_p2, %p8858_p13 }
  0x5a   : > { %8866 = shalt.err (!%p8863_p4)
}
  0x5b   : > { %s14184_s27 = smov 8   ;;  %s14185_s17 = smov 128  }
  0x5c   : > { %8128 = dma.hbm_to_vmem [thread:$0]  (!%p9235_p7), %s657_s29, 2048, %s659_s11, %s647_s26, %s14185_s17, %s14185_s17, %s14184_s27  }
  0x5d   : > { %670 = sbr.rel (%p9118_p3) target bundleno = 3381 (0xd35), region = 96 }
  0x62   : > { %s9255_s18 = sand.u32 1, %s8960_s30  }
  0x63   : > { %s7482_s4 = sshll.u32 %s9255_s18, 7  ;;  %s673_s7 = scalar_lea.sflag [#allocation3], %s9255_s18 }
  0x64   : > { %s9261_s23 = scalar_lea.vmem [#allocation2], %s7482_s4 }
  0x65   : > { %8927 = dma.done.wait (%p9214_p12), %s673_s7, 2048  }
  0x66   : > { %8929 = vsyncadd (%p9214_p12), %s673_s7, 4294965248 }
  0x67   : > { %8931 = dma.done.wait (%p61_p1), [#allocation6], 32  }
  0x68   : > { %8933 = vsyncadd (%p61_p1), [#allocation6], 4294967264 }
  0x69   : > { %8935 = dma.done.wait (%p61_p1), [#allocation9], 1040  }
  0x6a   : > { %8937 = vsyncadd (%p61_p1), [#allocation9], 4294966256 }
  0x6b   : > { %8939 = dma.done.wait (%p61_p1), [#allocation12], 2080  }
  0x6c   : > { %8941 = vsyncadd (%p61_p1), [#allocation12], 4294965216 }
  0x6d   : > { %8943 = dma.done.wait (%p61_p1), [#allocation15], 4128  }
  0x6e   : > { %8945 = vsyncadd (%p61_p1), [#allocation15], 4294963168 }
  0x6f   : > { %8947 = dma.done.wait (%p61_p1), [#allocation18], 5120  }
  0x70   : > { %8949 = vsyncadd (%p61_p1), [#allocation18], 4294962176  ;;  %v786_v0 = vld [vmem:[%s9261_s23 + $0x10] sm:$0xff]  ;;  %v784_v1 = vld [vmem:[%s9261_s23] sm:$0xff]  ;;  %v8986_v7 = vmov 128.0   ;;  %s14287_s27 = sld [smem:[#allocation57_spill]] }
  0x71   : > { %806 = vadd.xlane.f32.xlu1 %v786_v0  ;;  %802 = vadd.xlane.f32.xlu0 %v784_v1  ;;  %v788_v2 = vld [vmem:[%s9261_s23 + $0x20] sm:$0xff]  ;;  %v787_v3 = vld [vmem:[%s9261_s23 + $0x18] sm:$0xff]  ;;  %v785_v4 = vld [vmem:[%s9261_s23 + $0x8] sm:$0xff]  ;;  %8224 = vrcp.f32 %v8986_v7  ;;  %s14373_s26 = sld [smem:[#allocation59_spill]]  ;;  %s13951_s22 = scalar_lea.vmem [#allocation20], %s7482_s4 }
  0x72   : > { %810 = vadd.xlane.f32.xlu2 %v788_v2  ;;  %v789_v5 = vld [vmem:[%s9261_s23 + $0x28] sm:$0xff]  ;;  %v790_v6 = vld [vmem:[%s9261_s23 + $0x30] sm:$0xff]  ;;  %v9310_v28 = vld [vmem:[%s9261_s23 + $0x38] sm:$0xff]  ;;  %s14374_s16 = sld [smem:[#allocation60_spill]]  ;;  %s8049_s4 = sshll.u32 %s9113_s24, 7 }
  0x73   : > { %v9325_v36 = vld [vmem:[%s9261_s23 + $0x40] sm:$0xff]  ;;  %v9336_v42 = vld [vmem:[%s9261_s23 + $0x58] sm:$0xff]  ;;  %v9339_v43 = vld [vmem:[%s9261_s23 + $0x48] sm:$0xff]  ;;  %s14375_s1 = sld [smem:[#allocation61_spill]]  ;;  %s7282_s19 = scalar_lea.sflag [#allocation4], %s9255_s18 }
  0x74   : > { %v9348_v46 = vld [vmem:[%s9261_s23 + $0x60] sm:$0xff]  ;;  %v9351_v47 = vld [vmem:[%s9261_s23 + $0x50] sm:$0xff]  ;;  %v9356_v48 = vld [vmem:[%s9261_s23 + $0x68] sm:$0xff]  ;;  %s14376_s25 = sld [smem:[#allocation62_spill]] }
  0x75   : > { %v9360_v49 = vld [vmem:[%s9261_s23 + $0x70] sm:$0xff]  ;;  %v7960_v50 = vld [vmem:[#allocation8 + $0x38] sm:$0xff]  ;;  %v7957_v53 = vld [vmem:[#allocation8 + $0x20] sm:$0xff] }
  0x76   : > { %1243 = vmatpush.bf16.msra.mxu0 %v7960_v50  ;;  %v7959_v51 = vld [vmem:[#allocation8 + $0x30] sm:$0xff]  ;;  %v7958_v52 = vld [vmem:[#allocation8 + $0x28] sm:$0xff]  ;;  %v7956_v54 = vld [vmem:[#allocation8 + $0x18] sm:$0xff] }
  0x77   : > { %v8225_v8 = vpop.eup %8224  ;;  %v7955_v55 = vld [vmem:[#allocation8 + $0x10] sm:$0xff]  ;;  %v7954_v57 = vld [vmem:[#allocation8 + $0x8] sm:$0xff]  ;;  %v7953_v60 = vld [vmem:[#allocation8] sm:$0xff] }
  0x78   : > { %v835_v9 = vmul.f32 128.0, %v8225_v8  ;;  %vm839_vm0 = vweird.f32 %v8225_v8 }
  0x79   : > { %808 = vadd.xlane.f32.xlu1 %v787_v3  ;;  %804 = vadd.xlane.f32.xlu0 %v785_v4 }
  0x7a   : > { %812 = vadd.xlane.f32.xlu2 %v789_v5  ;;  %v836_v10 = vsub.f32 1.0, %v835_v9  ;;  %1244 = vmatpush.bf16.msra.mxu0 %v7959_v51  ;;  %s7293_s29 = scalar_lea.hbm %s14376_s25, %s8049_s4 }
  0x7b   : > { %s7296_s24 = sshll.u32 %s7293_s29, 4  ;;  %s7297_s24 = int_to_ptr.hbm [resolvable:$true] %s7296_s24 }
  0x7c   : > { %v837_v11 = vmul.f32 %v8225_v8, %v836_v10  ;;  %s8896_s11 = sshra.s32 %s7297_s24, 4  ;;  %s8897_s11 = int_to_ptr.hbm [resolvable:$true] %s8896_s11 }
  0x7d   : > { %p8903_p12 = scmp.lt.s32.totalorder %s8897_s11, %s14376_s25 }
  0x7e   : > { %v838_v12 = vadd.f32 %v8225_v8, %v837_v11  ;;  %1245 = vmatpush.bf16.msra.mxu0 %v7958_v52 }
  0x80   : > { %v9294_v13 = vsel %vm839_vm0, %v8225_v8, %v838_v12 }
  0x81   : > { %14186 = vst [vmem:[#allocation28_spill] sm:$0xff] %v9294_v13 }
  0x82   : > { %814 = vadd.xlane.f32.xlu2 %v790_v6  ;;  %1246 = vmatpush.bf16.msra.mxu0 %v7957_v53 }
  0x86   : > { %1247 = vmatpush.bf16.msra.mxu0 %v7956_v54 }
  0x8a   : > { %1248 = vmatpush.bf16.msra.mxu0 %v7955_v55 }
  0x8e   : > { %1249 = vmatpush.bf16.msra.mxu0 %v7954_v57 }
  0x92   : > { %1250 = vmatpush.bf16.msra.mxu0 %v7953_v60  ;;  %v9414_v60 = vld [vmem:[#allocation5] ss:$0 sm:$0xff] }
  0xe4   : > { %v807_v14 = vpop.xlane.xlu1 %806  ;;  %v803_v15 = vpop.xlane.xlu0 %802 }
  0xe5   : > { %v841_v16 = vmul.f32 %v9294_v13, %v803_v15  ;;  %v811_v18 = vpop.xlane.xlu2 %810  ;;  %v843_v27 = vmul.f32 %v9294_v13, %v807_v14 }
  0xe6   : > { %v845_v26 = vmul.f32 %v9294_v13, %v811_v18 }
  0xe7   : > { %v9297_v17 = vsub.f32 %v784_v1, %v841_v16  ;;  %v9319_v33 = vsub.f32 %v786_v0, %v843_v27 }
  0xe8   : > { %v9317_v32 = vsub.f32 %v788_v2, %v845_v26 }
  0xe9   : > { %v873_v19 = vmul.f32 %v9297_v17, %v9297_v17  ;;  %v875_v37 = vmul.f32 %v9319_v33, %v9319_v33 }
  0xea   : > { %v877_v34 = vmul.f32 %v9317_v32, %v9317_v32 }
  0xeb   : > { %889 = vadd.xlane.f32.xlu0 %v873_v19 }
  0xec   : > { %v809_v20 = vpop.xlane.xlu1 %808  ;;  %v805_v21 = vpop.xlane.xlu0 %804 }
  0xed   : > { %v844_v22 = vmul.f32 %v9294_v13, %v809_v20  ;;  %v842_v23 = vmul.f32 %v9294_v13, %v805_v21  ;;  %v813_v31 = vpop.xlane.xlu2 %812 }
  0xee   : > { %v846_v35 = vmul.f32 %v9294_v13, %v813_v31 }
  0xef   : > { %v9303_v24 = vsub.f32 %v787_v3, %v844_v22  ;;  %v9305_v25 = vsub.f32 %v785_v4, %v842_v23 }
  0xf0   : > { %v9330_v38 = vsub.f32 %v789_v5, %v846_v35 }
  0xf1   : > { %v876_v29 = vmul.f32 %v9303_v24, %v9303_v24  ;;  %v874_v30 = vmul.f32 %v9305_v25, %v9305_v25 }
  0xf2   : > { %v878_v40 = vmul.f32 %v9330_v38, %v9330_v38 }
  0xf3   : > { %895 = vadd.xlane.f32.xlu2 %v876_v29  ;;  %816 = vadd.xlane.f32.xlu0 %v9310_v28 }
  0xf4   : > { %891 = vadd.xlane.f32.xlu1 %v874_v30 }
  0xf5   : > { %v815_v39 = vpop.xlane.xlu2 %814 }
  0xf6   : > { %v847_v41 = vmul.f32 %v9294_v13, %v815_v39 }
  0xf8   : > { %v9342_v44 = vsub.f32 %v790_v6, %v847_v41 }
  0xfa   : > { %v879_v45 = vmul.f32 %v9342_v44, %v9342_v44 }
  0xfb   : > { %897 = vadd.xlane.f32.xlu2 %v877_v34  ;;  %818 = vadd.xlane.f32.xlu0 %v9325_v36 }
  0xfc   : > { %893 = vadd.xlane.f32.xlu1 %v875_v37 }
 0x103   : > { %824 = vadd.xlane.f32.xlu2 %v9336_v42  ;;  %899 = vadd.xlane.f32.xlu0 %v878_v40 }
 0x104   : > { %820 = vadd.xlane.f32.xlu1 %v9339_v43 }
 0x10b   : > { %826 = vadd.xlane.f32.xlu2 %v9348_v46  ;;  %901 = vadd.xlane.f32.xlu0 %v879_v45 }
 0x10c   : > { %822 = vadd.xlane.f32.xlu1 %v9351_v47 }
 0x113   : > { %828 = vadd.xlane.f32.xlu0 %v9356_v48 }
 0x11b   : > { %830 = vadd.xlane.f32.xlu0 %v9360_v49 }
 0x15e   : > { %v890_v56 = vpop.xlane.xlu0 %889 }
 0x15f   : > { %v921_v58 = vmul.f32 %v890_v56, %v9294_v13 }
 0x161   : > { %v937_v59 = vadd.f32 1e-05, %v921_v58 }
 0x163   : > { %8226 = vrsqrt.f32 %v937_v59  ;;  %vm959_vm2 = vweird.f32 %v937_v59 }
 0x166   : > { %v896_v61 = vpop.xlane.xlu2 %895  ;;  %v817_v62 = vpop.xlane.xlu0 %816 }
 0x167   : > { %v924_v63 = vmul.f32 %v896_v61, %v9294_v13  ;;  %v892_v0 = vpop.xlane.xlu1 %891  ;;  %v848_v1 = vmul.f32 %v9294_v13, %v817_v62 }
 0x168   : > { %v922_v2 = vmul.f32 %v892_v0, %v9294_v13 }
 0x169   : > { %v8227_v3 = vpop.eup %8226  ;;  %v9367_v4 = vadd.f32 1e-05, %v924_v63  ;;  %v9370_v5 = vsub.f32 %v9310_v28, %v848_v1  ;;  %v9421_v63 = vld [vmem:[%s9261_s23 + $0x78] sm:$0xff]  ;;  %s14288_s23 = sld [smem:[#allocation58_spill]] }
 0x16a   : > { %v954_v6 = vmul.f32 %v8227_v3, %v937_v59  ;;  %v938_v7 = vadd.f32 1e-05, %v922_v2  ;;  %vm960_vm1 = vweird.f32 %v8227_v3 }
 0x16b   : > { %8228 = vrsqrt.f32 %v9367_v4  ;;  %v880_v8 = vmul.f32 %v9370_v5, %v9370_v5  ;;  %vm9392_vm3 = vmor %vm959_vm2, %vm960_vm1  ;;  %vm989_vm7 = vweird.f32 %v9367_v4 }
 0x16c   : > { %v955_v9 = vmul.f32 %v8227_v3, %v954_v6  ;;  %8230 = vrsqrt.f32 %v938_v7  ;;  %vm969_vm5 = vweird.f32 %v938_v7 }
 0x16d   : > { %903 = vadd.xlane.f32.xlu1 %v880_v8 }
 0x16e   : > { %v956_v10 = vmul.f32 0.5, %v955_v9  ;;  %v898_v11 = vpop.xlane.xlu2 %897  ;;  %v819_v12 = vpop.xlane.xlu0 %818  ;;  %v9429_v9 = vld [vmem:[#allocation7] ss:$0 sm:$0xff] }
 0x16f   : > { %v894_v14 = vpop.xlane.xlu1 %893  ;;  %v849_v15 = vmul.f32 %v9294_v13, %v819_v12  ;;  %v925_v22 = vmul.f32 %v898_v11, %v9294_v13 }
 0x170   : > { %v957_v16 = vsub.f32 1.5, %v956_v10  ;;  %v923_v18 = vmul.f32 %v894_v14, %v9294_v13 }
 0x171   : > { %v9377_v19 = vpop.eup %8228  ;;  %v9380_v20 = vsub.f32 %v9325_v36, %v849_v15  ;;  %v9390_v31 = vadd.f32 1e-05, %v925_v22 }
 0x172   : > { %v8231_v21 = vpop.eup %8230  ;;  %v9383_v23 = vadd.f32 1e-05, %v923_v18  ;;  %v958_v27 = vmul.f32 %v8227_v3, %v957_v16  ;;  %v984_v28 = vmul.f32 %v9377_v19, %v9367_v4  ;;  %vm990_vm8 = vweird.f32 %v9377_v19 }
 0x173   : > { %v964_v26 = vmul.f32 %v8231_v21, %v938_v7  ;;  %v881_v29 = vmul.f32 %v9380_v20, %v9380_v20  ;;  %vm970_vm4 = vweird.f32 %v8231_v21  ;;  %vm9448_vm11 = vmor %vm989_vm7, %vm990_vm8  ;;  %vm999_vm15 = vweird.f32 %v9390_v31 }
 0x174   : > { %8232 = vrsqrt.f32 %v9383_v23  ;;  %v985_v45 = vmul.f32 %v9377_v19, %v984_v28  ;;  %v962_v51 = vsel %vm9392_vm3, %v8227_v3, %v958_v27  ;;  %vm971_vm6 = vmor %vm969_vm5, %vm970_vm4  ;;  %vm979_vm10 = vweird.f32 %v9383_v23 }
 0x175   : > { %v965_v30 = vmul.f32 %v8231_v21, %v964_v26  ;;  %905 = vadd.xlane.f32.xlu1 %v881_v29  ;;  %8234 = vrsqrt.f32 %v9390_v31  ;;  %v1113_v59 = vmul.f32 %v962_v51, %v9297_v17 }
 0x176   : > { %v825_v34 = vpop.xlane.xlu2 %824  ;;  %v900_v35 = vpop.xlane.xlu0 %899  ;;  %v986_v61 = vmul.f32 0.5, %v985_v45 }
 0x177   : > { %v966_v37 = vmul.f32 0.5, %v965_v30  ;;  %v852_v39 = vmul.f32 %v9294_v13, %v825_v34  ;;  %v821_v40 = vpop.xlane.xlu1 %820  ;;  %v926_v41 = vmul.f32 %v900_v35, %v9294_v13  ;;  %v1132_v8 = vmul.f32 %v9414_v60, %v1113_v59 }
 0x178   : > { %v850_v50 = vmul.f32 %v9294_v13, %v821_v40  ;;  %v987_v11 = vsub.f32 1.5, %v986_v61 }
 0x179   : > { %v967_v52 = vsub.f32 1.5, %v966_v37  ;;  %v9402_v53 = vadd.f32 1e-05, %v926_v41  ;;  %v9405_v54 = vsub.f32 %v9336_v42, %v852_v39  ;;  %v1151_v26 = vadd.f32 %v9429_v9, %v1132_v8 }
 0x17a   : > { %v8233_v55 = vpop.eup %8232  ;;  %v9409_v56 = vsub.f32 %v9339_v43, %v850_v50  ;;  %v988_v4 = vmul.f32 %v9377_v19, %v987_v11 }
 0x17b   : > { %v968_v57 = vmul.f32 %v8231_v21, %v967_v52  ;;  %v974_v58 = vmul.f32 %v8233_v55, %v9383_v23  ;;  %8236 = vrsqrt.f32 %v9402_v53  ;;  %v884_v42 = vmul.f32 %v9405_v54, %v9405_v54  ;;  %v9431_v10 = vpop.eup %8234 }
 0x17c   : > { %v882_v62 = vmul.f32 %v9409_v56, %v9409_v56  ;;  %vm980_vm9 = vweird.f32 %v8233_v55  ;;  %v992_v39 = vsel %vm9448_vm11, %v9377_v19, %v988_v4  ;;  %vm1009_vm13 = vweird.f32 %v9402_v53 }
 0x17d   : > { %v975_v43 = vmul.f32 %v8233_v55, %v974_v58  ;;  %v972_v0 = vsel %vm971_vm6, %v8231_v21, %v968_v57  ;;  %911 = vadd.xlane.f32.xlu0 %v884_v42  ;;  %832 = vadd.xlane.f32.xlu1 %v9421_v63  ;;  %vm981_vm12 = vmor %vm979_vm10, %vm980_vm9  ;;  %v1116_v51 = vmul.f32 %v992_v39, %v9303_v24  ;;  %vm1000_vm0 = vweird.f32 %v9431_v10  ;;  %v7961_v39 = vld [vmem:[#allocation11] sm:$0xff] }
 0x17e   : > { %907 = vadd.xlane.f32.xlu2 %v882_v62  ;;  %v827_v1 = vpop.xlane.xlu2 %826  ;;  %v9423_v2 = vpop.xlane.xlu0 %901  ;;  %v1114_v17 = vmul.f32 %v972_v0, %v9305_v25  ;;  %vm1001_vm2 = vmor %vm999_vm15, %vm1000_vm0 }
 0x17f   : > { %v976_v3 = vmul.f32 0.5, %v975_v43  ;;  %v853_v6 = vmul.f32 %v9294_v13, %v827_v1  ;;  %v823_v7 = vpop.xlane.xlu1 %822  ;;  %v1135_v19 = vmul.f32 %v9414_v60, %v1116_v51  ;;  %v927_v11 = vmul.f32 %v9423_v2, %v9294_v13  ;;  %v7963_v2 = vld [vmem:[#allocation11 + $0x10] sm:$0xff] }
 0x180   : > { %v851_v12 = vmul.f32 %v9294_v13, %v823_v7  ;;  %v1133_v14 = vmul.f32 %v9414_v60, %v1114_v17 }
 0x181   : > { %v8237_v15 = vpop.eup %8236  ;;  %v977_v25 = vsub.f32 1.5, %v976_v3  ;;  %v9438_v16 = vsub.f32 %v9348_v46, %v853_v6  ;;  %v994_v46 = vmul.f32 %v9431_v10, %v9390_v31  ;;  %v1154_v42 = vadd.f32 %v9429_v9, %v1135_v19 }
 0x182   : > { %v1004_v18 = vmul.f32 %v8237_v15, %v9402_v53  ;;  %v9442_v21 = vsub.f32 %v9351_v47, %v851_v12  ;;  %v1152_v27 = vadd.f32 %v9429_v9, %v1133_v14  ;;  %vm1010_vm14 = vweird.f32 %v8237_v15  ;;  %v7968_v14 = vld [vmem:[#allocation11 + $0x38] sm:$0xff] }
 0x183   : > { %v978_v22 = vmul.f32 %v8233_v55, %v977_v25  ;;  %v885_v29 = vmul.f32 %v9438_v16, %v9438_v16  ;;  %v995_v37 = vmul.f32 %v9431_v10, %v994_v46  ;;  %vm1011_vm1 = vmor %vm1009_vm13, %vm1010_vm14  ;;  %v943_v12 = vadd.f32 1e-05, %v927_v11  ;;  %1368 = vmatpush.bf16.msra.mxu1 %v7968_v14  ;;  %v7965_v25 = vld [vmem:[#allocation11 + $0x20] sm:$0xff] }
 0x184   : > { %v883_v47 = vmul.f32 %v9442_v21, %v9442_v21  ;;  %v1183_v23 = vpack.c.bf16 %v1152_v27, %v1151_v26  ;;  %v1005_v30 = vmul.f32 %v8237_v15, %v1004_v18  ;;  %v7964_v27 = vld [vmem:[#allocation11 + $0x18] sm:$0xff] }
 0x185   : > { %v982_v35 = vsel %vm981_vm12, %v8233_v55, %v978_v22  ;;  %913 = vadd.xlane.f32.xlu1 %v885_v29  ;;  %v996_v52 = vmul.f32 0.5, %v995_v37  ;;  %8238 = vrsqrt.f32 %v943_v12  ;;  %vm1019_vm3 = vweird.f32 %v943_v12 }
 0x186   : > { %909 = vadd.xlane.f32.xlu2 %v883_v47  ;;  %v829_v34 = vpop.xlane.xlu0 %828  ;;  %1251 = vmatmul.bf16.vlgmr.msra.gmra.mxu0 %v1183_v23  ;;  %v1115_v41 = vmul.f32 %v982_v35, %v9319_v33  ;;  %v1006_v45 = vmul.f32 0.5, %v1005_v30  ;;  %v7962_v23 = vld [vmem:[#allocation11 + $0x8] sm:$0xff] }
 0x187   : > { %v854_v36 = vmul.f32 %v9294_v13, %v829_v34 }
 0x188   : > { %v1134_v55 = vmul.f32 %v9414_v60, %v1115_v41  ;;  %v1007_v57 = vsub.f32 1.5, %v1006_v45 }
 0x189   : > { %v9464_v40 = vsub.f32 %v9356_v48, %v854_v36  ;;  %v997_v48 = vsub.f32 1.5, %v996_v52 }
 0x18a   : > { %v1153_v33 = vadd.f32 %v9429_v9, %v1134_v55  ;;  %v1008_v24 = vmul.f32 %v8237_v15, %v1007_v57 }
 0x18b   : > { %v886_v50 = vmul.f32 %v9464_v40, %v9464_v40  ;;  %v998_v43 = vmul.f32 %v9431_v10, %v997_v48 }
 0x18c   : > { %v1184_v53 = vpack.c.bf16 %v1154_v42, %v1153_v33  ;;  %v1012_v0 = vsel %vm1011_vm1, %v8237_v15, %v1008_v24 }
 0x18d   : > { %v1118_v31 = vmul.f32 %v1012_v0, %v9330_v38  ;;  %v7967_v38 = vld [vmem:[#allocation11 + $0x30] sm:$0xff] }
 0x18e   : > { %915 = vadd.xlane.f32.xlu2 %v886_v50  ;;  %v831_v58 = vpop.xlane.xlu0 %830  ;;  %1369 = vmatpush.bf16.msra.mxu1 %v7967_v38 }
 0x18f   : > { %v855_v59 = vmul.f32 %v9294_v13, %v831_v58  ;;  %v1137_v17 = vmul.f32 %v9414_v60, %v1118_v31 }
 0x191   : > { %v9476_v61 = vsub.f32 %v9360_v49, %v855_v59  ;;  %v1002_v49 = vsel %vm1001_vm2, %v9431_v10, %v998_v43  ;;  %v1156_v6 = vadd.f32 %v9429_v9, %v1137_v17  ;;  %v7966_v10 = vld [vmem:[#allocation11 + $0x28] sm:$0xff] }
 0x192   : > { %v1117_v1 = vmul.f32 %v1002_v49, %v9317_v32  ;;  %v8239_v32 = vpop.eup %8238  ;;  %1370 = vmatpush.bf16.msra.mxu1 %v7966_v10 }
 0x193   : > { %v887_v62 = vmul.f32 %v9476_v61, %v9476_v61  ;;  %v1014_v15 = vmul.f32 %v8239_v32, %v943_v12  ;;  %vm1020_vm4 = vweird.f32 %v8239_v32 }
 0x194   : > { %v1136_v3 = vmul.f32 %v9414_v60, %v1117_v1  ;;  %vm1021_vm5 = vmor %vm1019_vm3, %vm1020_vm4 }
 0x195   : > { %917 = vadd.xlane.f32.xlu0 %v887_v62  ;;  %v1015_v18 = vmul.f32 %v8239_v32, %v1014_v15 }
 0x196   : > { %1256 = vmatmul.bf16.gmra.mxu0 %v1184_v53  ;;  %v1155_v7 = vadd.f32 %v9429_v9, %v1136_v3  ;;  %1371 = vmatpush.bf16.msra.mxu1 %v7965_v25 }
 0x197   : > { %v1016_v28 = vmul.f32 0.5, %v1015_v18 }
 0x198   : > { %v1185_v8 = vpack.c.bf16 %v1156_v6, %v1155_v7 }
 0x199   : > { %v1017_v46 = vsub.f32 1.5, %v1016_v28 }
 0x19a   : > { %1372 = vmatpush.bf16.msra.mxu1 %v7964_v27 }
 0x19b   : > { %v1018_v34 = vmul.f32 %v8239_v32, %v1017_v46 }
 0x19d   : > { %v1022_v45 = vsel %vm1021_vm5, %v8239_v32, %v1018_v34 }
 0x19e   : > { %1373 = vmatpush.bf16.msra.mxu1 %v7963_v2  ;;  %v1119_v19 = vmul.f32 %v1022_v45, %v9342_v44 }
 0x1a0   : > { %v1138_v31 = vmul.f32 %v9414_v60, %v1119_v19 }
 0x1a2   : > { %1374 = vmatpush.bf16.msra.mxu1 %v7962_v23  ;;  %v1157_v14 = vadd.f32 %v9429_v9, %v1138_v31 }
 0x1a6   : > { %1261 = vmatmul.bf16.gmra.mxu0 %v1185_v8  ;;  %1375 = vmatpush.bf16.msra.mxu1 %v7961_v39 }
 0x1e0   : > { %v904_v22 = vpop.xlane.xlu1 %903 }
 0x1e1   : > { %v928_v26 = vmul.f32 %v904_v22, %v9294_v13 }
 0x1e3   : > { %v944_v4 = vadd.f32 1e-05, %v928_v26 }
 0x1e5   : > { %8240 = vrsqrt.f32 %v944_v4  ;;  %vm1029_vm7 = vweird.f32 %v944_v4 }
 0x1e8   : > { %v906_v47 = vpop.xlane.xlu1 %905 }
 0x1e9   : > { %v929_v29 = vmul.f32 %v906_v47, %v9294_v13 }
 0x1eb   : > { %v8241_v30 = vpop.eup %8240  ;;  %v945_v36 = vadd.f32 1e-05, %v929_v29 }
 0x1ec   : > { %v1024_v35 = vmul.f32 %v8241_v30, %v944_v4  ;;  %vm1030_vm6 = vweird.f32 %v8241_v30 }
 0x1ed   : > { %8242 = vrsqrt.f32 %v945_v36  ;;  %vm1031_vm8 = vmor %vm1029_vm7, %vm1030_vm6  ;;  %vm1039_vm10 = vweird.f32 %v945_v36 }
 0x1ee   : > { %v1025_v37 = vmul.f32 %v8241_v30, %v1024_v35 }
 0x1f0   : > { %v1026_v41 = vmul.f32 0.5, %v1025_v37  ;;  %v912_v51 = vpop.xlane.xlu0 %911  ;;  %v833_v57 = vpop.xlane.xlu1 %832 }
 0x1f1   : > { %v908_v50 = vpop.xlane.xlu2 %907  ;;  %v932_v58 = vmul.f32 %v912_v51, %v9294_v13  ;;  %v856_v59 = vmul.f32 %v9294_v13, %v833_v57  ;;  %v9526_v51 = vld [vmem:[#allocation10] ss:$0 sm:$0xff] }
 0x1f2   : > { %v1027_v52 = vsub.f32 1.5, %v1026_v41  ;;  %v930_v55 = vmul.f32 %v908_v50, %v9294_v13 }
 0x1f3   : > { %v8243_v48 = vpop.eup %8242  ;;  %v9499_v42 = vadd.f32 1e-05, %v932_v58  ;;  %v9502_v43 = vsub.f32 %v9421_v63, %v856_v59 }
 0x1f4   : > { %v1028_v33 = vmul.f32 %v8241_v30, %v1027_v52  ;;  %v946_v24 = vadd.f32 1e-05, %v930_v55  ;;  %v1034_v62 = vmul.f32 %v8243_v48, %v945_v36  ;;  %vm1040_vm9 = vweird.f32 %v8243_v48 }
 0x1f5   : > { %v888_v49 = vmul.f32 %v9502_v43, %v9502_v43  ;;  %vm1041_vm11 = vmor %vm1039_vm10, %vm1040_vm9  ;;  %vm1069_vm1 = vweird.f32 %v9499_v42 }
 0x1f6   : > { %8244 = vrsqrt.f32 %v946_v24  ;;  %v1032_v53 = vsel %vm1031_vm8, %v8241_v30, %v1028_v33  ;;  %v1035_v0 = vmul.f32 %v8243_v48, %v1034_v62  ;;  %vm1049_vm13 = vweird.f32 %v946_v24 }
 0x1f7   : > { %8246 = vrsqrt.f32 %v9499_v42  ;;  %v1120_v44 = vmul.f32 %v1032_v53, %v9370_v5  ;;  %919 = vadd.xlane.f32.xlu1 %v888_v49 }
 0x1f8   : > { %v1036_v1 = vmul.f32 0.5, %v1035_v0  ;;  %v914_v6 = vpop.xlane.xlu1 %913 }
 0x1f9   : > { %v910_v17 = vpop.xlane.xlu2 %909  ;;  %v1139_v3 = vmul.f32 %v9414_v60, %v1120_v44  ;;  %v933_v10 = vmul.f32 %v914_v6, %v9294_v13 }
 0x1fa   : > { %v931_v63 = vmul.f32 %v910_v17, %v9294_v13  ;;  %v1037_v7 = vsub.f32 1.5, %v1036_v1 }
 0x1fb   : > { %v1158_v8 = vadd.f32 %v9429_v9, %v1139_v3  ;;  %v9518_v26 = vadd.f32 1e-05, %v933_v10 }
 0x1fc   : > { %v8245_v11 = vpop.eup %8244  ;;  %v947_v12 = vadd.f32 1e-05, %v931_v63  ;;  %v1038_v5 = vmul.f32 %v8243_v48, %v1037_v7 }
 0x1fd   : > { %v9513_v38 = vpop.eup %8246  ;;  %v1044_v32 = vmul.f32 %v8245_v11, %v946_v24  ;;  %v1186_v18 = vpack.c.bf16 %v1158_v8, %v1157_v14  ;;  %vm1050_vm12 = vweird.f32 %v8245_v11  ;;  %vm1079_vm7 = vweird.f32 %v9518_v26 }
 0x1fe   : > { %v1064_v15 = vmul.f32 %v9513_v38, %v9499_v42  ;;  %8248 = vrsqrt.f32 %v947_v12  ;;  %v1042_v4 = vsel %vm1041_vm11, %v8243_v48, %v1038_v5  ;;  %vm1051_vm14 = vmor %vm1049_vm13, %vm1050_vm12  ;;  %vm1059_vm15 = vweird.f32 %v947_v12 }
 0x1ff   : > { %v1045_v25 = vmul.f32 %v8245_v11, %v1044_v32  ;;  %1266 = vmatmul.bf16.gmra.mxu0 %v1186_v18  ;;  %v1121_v30 = vmul.f32 %v1042_v4, %v9380_v20  ;;  %8250 = vrsqrt.f32 %v9518_v26  ;;  %vm1070_vm2 = vweird.f32 %v9513_v38 }
 0x200   : > { %v1065_v28 = vmul.f32 %v9513_v38, %v1064_v15  ;;  %vm1071_vm4 = vmor %vm1069_vm1, %vm1070_vm2 }
 0x201   : > { %v1046_v22 = vmul.f32 0.5, %v1045_v25  ;;  %v916_v27 = vpop.xlane.xlu2 %915  ;;  %v1140_v45 = vmul.f32 %v9414_v60, %v1121_v30 }
 0x202   : > { %v934_v2 = vmul.f32 %v916_v27, %v9294_v13  ;;  %v1066_v36 = vmul.f32 0.5, %v1065_v28 }
 0x203   : > { %v1047_v46 = vsub.f32 1.5, %v1046_v22  ;;  %v1252_v23 = vpop.f32.mrf.mxu0 }
 0x204   : > { %v8249_v47 = vpop.eup %8248  ;;  %v950_v29 = vadd.f32 1e-05, %v934_v2  ;;  %v1067_v52 = vsub.f32 1.5, %v1066_v36  ;;  %v9534_v24 = vadd.f32 %v9526_v51, %v1252_v23 }
 0x205   : > { %v1048_v34 = vmul.f32 %v8245_v11, %v1047_v46  ;;  %v1054_v35 = vmul.f32 %v8249_v47, %v947_v12  ;;  %vm1060_vm0 = vweird.f32 %v8249_v47  ;;  %v8251_v55 = vpop.eup %8250 }
 0x206   : > { %8252 = vrsqrt.f32 %v950_v29  ;;  %vm1061_vm3 = vmor %vm1059_vm15, %vm1060_vm0  ;;  %v1068_v62 = vmul.f32 %v9513_v38, %v1067_v52  ;;  %v1074_v53 = vmul.f32 %v8251_v55, %v9518_v26  ;;  %vm1089_vm5 = vweird.f32 %v950_v29 }
 0x207   : > { %v1055_v37 = vmul.f32 %v8249_v47, %v1054_v35  ;;  %v1052_v39 = vsel %vm1051_vm14, %v8245_v11, %v1048_v34  ;;  %vm1080_vm8 = vweird.f32 %v8251_v55 }
 0x208   : > { %v1122_v41 = vmul.f32 %v1052_v39, %v9409_v56  ;;  %v1159_v56 = vadd.f32 %v9429_v9, %v1140_v45  ;;  %v1075_v1 = vmul.f32 %v8251_v55, %v1074_v53  ;;  %v1072_v17 = vsel %vm1071_vm4, %v9513_v38, %v1068_v62  ;;  %vm1081_vm10 = vmor %vm1079_vm7, %vm1080_vm8 }
 0x209   : > { %v1056_v50 = vmul.f32 0.5, %v1055_v37  ;;  %v1124_v7 = vmul.f32 %v1072_v17, %v9405_v54 }
 0x20a   : > { %v1141_v20 = vmul.f32 %v9414_v60, %v1122_v41  ;;  %v1076_v8 = vmul.f32 0.5, %v1075_v1 }
 0x20b   : > { %v1057_v57 = vsub.f32 1.5, %v1056_v50  ;;  %v1254_v59 = vpop.f32.mrf.mxu0  ;;  %v1143_v14 = vmul.f32 %v9414_v60, %v1124_v7 }
 0x20c   : > { %v8253_v58 = vpop.eup %8252  ;;  %v1160_v19 = vadd.f32 %v9429_v9, %v1141_v20  ;;  %v9539_v0 = vadd.f32 %v9526_v51, %v1254_v59  ;;  %v1077_v5 = vsub.f32 1.5, %v1076_v8 }
 0x20d   : > { %v1058_v48 = vmul.f32 %v8249_v47, %v1057_v57  ;;  %v1084_v33 = vmul.f32 %v8253_v58, %v950_v29  ;;  %vm1090_vm6 = vweird.f32 %v8253_v58  ;;  %v1162_v15 = vadd.f32 %v9429_v9, %v1143_v14 }
 0x20e   : > { %v1187_v42 = vpack.c.bf16 %v1160_v19, %v1159_v56  ;;  %v1308_v44 = vpack.c.bf16 %v9539_v0, %v9534_v24  ;;  %vm1091_vm9 = vmor %vm1089_vm5, %vm1090_vm6  ;;  %v1078_v25 = vmul.f32 %v8251_v55, %v1077_v5 }
 0x20f   : > { %v1085_v49 = vmul.f32 %v8253_v58, %v1084_v33  ;;  %v1062_v31 = vsel %vm1061_vm3, %v8249_v47, %v1058_v48 }
 0x210   : > { %1271 = vmatmul.bf16.gmra.mxu0 %v1187_v42  ;;  %1376 = vmatmul.bf16.vlgmr.msra.gmra.mxu1 %v1308_v44  ;;  %v1123_v3 = vmul.f32 %v1062_v31, %v9442_v21  ;;  %v1082_v26 = vsel %vm1081_vm10, %v8251_v55, %v1078_v25 }
 0x211   : > { %v1086_v63 = vmul.f32 0.5, %v1085_v49  ;;  %v1125_v2 = vmul.f32 %v1082_v26, %v9438_v16  ;;  %v918_v16 = vpop.xlane.xlu0 %917 }
 0x212   : > { %v1142_v11 = vmul.f32 %v9414_v60, %v1123_v3  ;;  %v935_v37 = vmul.f32 %v918_v16, %v9294_v13 }
 0x213   : > { %v1257_v6 = vpop.f32.mrf.mxu0  ;;  %v1087_v12 = vsub.f32 1.5, %v1086_v63  ;;  %v1144_v47 = vmul.f32 %v9414_v60, %v1125_v2 }
 0x214   : > { %v1161_v32 = vadd.f32 %v9429_v9, %v1142_v11  ;;  %v9551_v10 = vadd.f32 %v9526_v51, %v1257_v6  ;;  %v951_v39 = vadd.f32 1e-05, %v935_v37 }
 0x215   : > { %v1088_v38 = vmul.f32 %v8253_v58, %v1087_v12  ;;  %v1163_v35 = vadd.f32 %v9429_v9, %v1144_v47 }
 0x216   : > { %v1188_v18 = vpack.c.bf16 %v1162_v15, %v1161_v32  ;;  %8254 = vrsqrt.f32 %v951_v39  ;;  %vm1099_vm11 = vweird.f32 %v951_v39 }
 0x217   : > { %v1092_v27 = vsel %vm1091_vm9, %v8253_v58, %v1088_v38 }
 0x218   : > { %v1126_v4 = vmul.f32 %v1092_v27, %v9464_v40 }
 0x21a   : > { %v1145_v46 = vmul.f32 %v9414_v60, %v1126_v4 }
 0x21b   : > { %v1259_v21 = vpop.f32.mrf.mxu0 }
 0x21c   : > { %v9554_v54 = vadd.f32 %v9526_v51, %v1259_v21  ;;  %v1164_v29 = vadd.f32 %v9429_v9, %v1145_v46  ;;  %v8255_v41 = vpop.eup %8254 }
 0x21d   : > { %v1094_v45 = vmul.f32 %v8255_v41, %v951_v39  ;;  %vm1100_vm12 = vweird.f32 %v8255_v41 }
 0x21e   : > { %v1309_v22 = vpack.c.bf16 %v9554_v54, %v9551_v10  ;;  %v1189_v36 = vpack.c.bf16 %v1164_v29, %v1163_v35  ;;  %vm1101_vm13 = vmor %vm1099_vm11, %vm1100_vm12 }
 0x21f   : > { %v1095_v50 = vmul.f32 %v8255_v41, %v1094_v45 }
 0x220   : > { %1276 = vmatmul.bf16.gmra.mxu0 %v1188_v18  ;;  %1381 = vmatmul.bf16.gmra.mxu1 %v1309_v22 }
 0x221   : > { %v1096_v57 = vmul.f32 0.5, %v1095_v50 }
 0x223   : > { %v1262_v28 = vpop.f32.mrf.mxu0  ;;  %v1097_v58 = vsub.f32 1.5, %v1096_v57 }
 0x224   : > { %v9565_v30 = vadd.f32 %v9526_v51, %v1262_v28 }
 0x225   : > { %v1098_v56 = vmul.f32 %v8255_v41, %v1097_v58 }
 0x227   : > { %v1102_v62 = vsel %vm1101_vm13, %v8255_v41, %v1098_v56 }
 0x228   : > { %v1127_v49 = vmul.f32 %v1102_v62, %v9476_v61 }
 0x22a   : > { %v1146_v17 = vmul.f32 %v9414_v60, %v1127_v49 }
 0x22b   : > { %v1264_v23 = vpop.f32.mrf.mxu0 }
 0x22c   : > { %v9568_v34 = vadd.f32 %v9526_v51, %v1264_v23  ;;  %v1165_v8 = vadd.f32 %v9429_v9, %v1146_v17 }
 0x22e   : > { %v1310_v40 = vpack.c.bf16 %v9568_v34, %v9565_v30 }
 0x230   : > { %1281 = vmatmul.bf16.gmra.mxu0 %v1189_v36  ;;  %1386 = vmatmul.bf16.gmra.mxu1 %v1310_v40 }
 0x26a   : > { %v920_v52 = vpop.xlane.xlu1 %919 }
 0x26b   : > { %v936_v20 = vmul.f32 %v920_v52, %v9294_v13 }
 0x26d   : > { %v952_v55 = vadd.f32 1e-05, %v936_v20 }
 0x26f   : > { %8256 = vrsqrt.f32 %v952_v55  ;;  %vm1109_vm15 = vweird.f32 %v952_v55 }
 0x275   : > { %v8257_v59 = vpop.eup %8256 }
 0x276   : > { %v1104_v19 = vmul.f32 %v8257_v59, %v952_v55  ;;  %vm1110_vm14 = vweird.f32 %v8257_v59 }
 0x277   : > { %vm1111_vm0 = vmor %vm1109_vm15, %vm1110_vm14 }
 0x278   : > { %v1105_v48 = vmul.f32 %v8257_v59, %v1104_v19 }
 0x27a   : > { %v1106_v33 = vmul.f32 0.5, %v1105_v48 }
 0x27c   : > { %v1107_v53 = vsub.f32 1.5, %v1106_v33  ;;  %v1267_v42 = vpop.f32.mrf.mxu0 }
 0x27d   : > { %v1268_v6 = vadd.f32 %v9526_v51, %v1267_v42 }
 0x27e   : > { %v1108_v44 = vmul.f32 %v8257_v59, %v1107_v53 }
 0x280   : > { %v1112_v31 = vsel %vm1111_vm0, %v8257_v59, %v1108_v44 }
 0x281   : > { %v1128_v1 = vmul.f32 %v1112_v31, %v9502_v43  ;;  %v9589_v43 = vld [vmem:[%s14101_s6] ss:$0 sm:$0xff] }
 0x283   : > { %v1147_v3 = vmul.f32 %v9414_v60, %v1128_v1 }
 0x284   : > { %v1269_v63 = vpop.f32.mrf.mxu0 }
 0x285   : > { %v9581_v7 = vadd.f32 %v9526_v51, %v1269_v63  ;;  %v1166_v61 = vadd.f32 %v9429_v9, %v1147_v3 }
 0x287   : > { %v1190_v11 = vpack.c.bf16 %v1166_v61, %v1165_v8  ;;  %v1311_v12 = vpack.c.bf16 %v9581_v7, %v1268_v6 }
 0x289   : > { %1286 = vmatmul.bf16.gmra.mxu0 %v1190_v11  ;;  %1391 = vmatmul.bf16.gmra.mxu1 %v1311_v12 }
 0x28d   : > { %v1272_v60 = vpop.f32.mrf.mxu0  ;;  %v1377_v14 = vpop.f32.mrf.mxu1 }
 0x28e   : > { %v1378_v5 = vadd.f32 %v9589_v43, %v1377_v14  ;;  %v9594_v9 = vadd.f32 %v9526_v51, %v1272_v60 }
 0x290   : > { %v1417_v32 = vadd.f32 %v1378_v5, %v9534_v24 }
 0x292   : > { %1435 = vadd.xlane.f32.xlu2 %v1417_v32 }
 0x295   : > { %v1274_v38 = vpop.f32.mrf.mxu0  ;;  %v1379_v15 = vpop.f32.mrf.mxu1 }
 0x296   : > { %v9597_v21 = vadd.f32 %v9526_v51, %v1274_v38  ;;  %v1380_v25 = vadd.f32 %v9589_v43, %v1379_v15 }
 0x298   : > { %v1312_v18 = vpack.c.bf16 %v9597_v21, %v9594_v9  ;;  %v1418_v22 = vadd.f32 %v1380_v25, %v9539_v0 }
 0x29a   : > { %1396 = vmatmul.bf16.gmra.mxu1 %v1312_v18  ;;  %1437 = vadd.xlane.f32.xlu0 %v1418_v22 }
 0x29d   : > { %v1277_v27 = vpop.f32.mrf.mxu0  ;;  %v1382_v24 = vpop.f32.mrf.mxu1 }
 0x29e   : > { %v1383_v26 = vadd.f32 %v9589_v43, %v1382_v24  ;;  %v9606_v2 = vadd.f32 %v9526_v51, %v1277_v27 }
 0x2a0   : > { %v1419_v4 = vadd.f32 %v1383_v26, %v9551_v10 }
 0x2a2   : > { %1439 = vadd.xlane.f32.xlu1 %v1419_v4 }
 0x2a5   : > { %v1279_v28 = vpop.f32.mrf.mxu0  ;;  %v1384_v47 = vpop.f32.mrf.mxu1 }
 0x2a6   : > { %v9609_v46 = vadd.f32 %v9526_v51, %v1279_v28  ;;  %v1385_v29 = vadd.f32 %v9589_v43, %v1384_v47 }
 0x2a8   : > { %v1313_v0 = vpack.c.bf16 %v9609_v46, %v9606_v2  ;;  %v1420_v23 = vadd.f32 %v1385_v29, %v9554_v54 }
 0x2aa   : > { %1401 = vmatmul.bf16.gmra.mxu1 %v1313_v0  ;;  %1441 = vadd.xlane.f32.xlu2 %v1420_v23 }
 0x2ad   : > { %v1282_v35 = vpop.f32.mrf.mxu0  ;;  %v1387_v10 = vpop.f32.mrf.mxu1 }
 0x2ae   : > { %v1388_v36 = vadd.f32 %v9589_v43, %v1387_v10  ;;  %v9618_v37 = vadd.f32 %v9526_v51, %v1282_v35  ;;  %v7616_v35 = vld [vmem:[#allocation16 + $0x70] sm:$0xf]  ;;  %v7984_v10 = vld [vmem:[#allocation16 + $0x74] sm:$0xf0] }
 0x2b0   : > { %v1421_v40 = vadd.f32 %v1388_v36, %v9565_v30  ;;  %v7983_v36 = vld [vmem:[#allocation16 + $0x74] sm:$0xf] }
 0x2b2   : > { %1443 = vadd.xlane.f32.xlu0 %v1421_v40 }
 0x2b5   : > { %v1284_v16 = vpop.f32.mrf.mxu0  ;;  %v1389_v41 = vpop.f32.mrf.mxu1 }
 0x2b6   : > { %v9621_v39 = vadd.f32 %v9526_v51, %v1284_v16  ;;  %v1390_v45 = vadd.f32 %v9589_v43, %v1389_v41  ;;  %v7608_v41 = vld [vmem:[#allocation16 + $0x60] sm:$0xf] }
 0x2b8   : > { %v1314_v54 = vpack.c.bf16 %v9621_v39, %v9618_v37  ;;  %v1422_v50 = vadd.f32 %v1390_v45, %v9568_v34  ;;  %v7982_v45 = vld [vmem:[#allocation16 + $0x64] sm:$0xf0] }
 0x2ba   : > { %1406 = vmatmul.bf16.gmra.mxu1 %v1314_v54  ;;  %1445 = vadd.xlane.f32.xlu1 %v1422_v50  ;;  %v7981_v54 = vld [vmem:[#allocation16 + $0x64] sm:$0xf] }
 0x305   : > { %v1436_v52 = vpop.xlane.xlu2 %1435 }
 0x306   : > { %v1467_v30 = vmul.f32 %v1436_v52, %v9294_v13  ;;  %v1287_v20 = vpop.f32.mrf.mxu0  ;;  %v1392_v55 = vpop.f32.mrf.mxu1  ;;  %v7610_v52 = vld [vmem:[#allocation16 + $0x68] sm:$0xf0] }
 0x307   : > { %v1393_v57 = vadd.f32 %v9589_v43, %v1392_v55  ;;  %v9638_v62 = vadd.f32 %v9526_v51, %v1287_v20  ;;  %v7980_v20 = vld [vmem:[#allocation16 + $0x54] sm:$0xf0]  ;;  %v7979_v55 = vld [vmem:[#allocation16 + $0x54] sm:$0xf] }
 0x308   : > { %v9629_v58 = vsub.f32 %v1417_v32, %v1467_v30  ;;  %v7613_v30 = vor.u32 %v7981_v54, %v7610_v52 }
 0x309   : > { %v9631_v59 = vadd.f32 %v1393_v57, %v1268_v6 }
 0x30a   : > { %v1499_v56 = vmul.f32 %v9629_v58, %v9629_v58 }
 0x30b   : > { %1447 = vadd.xlane.f32.xlu1 %v9631_v59 }
 0x30c   : > { %1515 = vadd.xlane.f32.xlu2 %v1499_v56  ;;  %v7602_v56 = vld [vmem:[#allocation16 + $0x58] sm:$0xf0] }
 0x30d   : > { %v1438_v34 = vpop.xlane.xlu0 %1437 }
 0x30e   : > { %v1468_v19 = vmul.f32 %v1438_v34, %v9294_v13  ;;  %v1289_v48 = vpop.f32.mrf.mxu0  ;;  %v1394_v33 = vpop.f32.mrf.mxu1  ;;  %v7605_v34 = vor.u32 %v7979_v55, %v7602_v56 }
 0x30f   : > { %v9641_v53 = vadd.f32 %v9526_v51, %v1289_v48  ;;  %v1395_v42 = vadd.f32 %v9589_v43, %v1394_v33  ;;  %v7978_v48 = vld [vmem:[#allocation16 + $0x44] sm:$0xf0]  ;;  %v7977_v33 = vld [vmem:[#allocation16 + $0x44] sm:$0xf] }
 0x310   : > { %v9644_v49 = vsub.f32 %v1418_v22, %v1468_v19  ;;  %v7592_v19 = vld [vmem:[#allocation16 + $0x40] sm:$0xf] }
 0x311   : > { %v9647_v44 = vadd.f32 %v1395_v42, %v9581_v7  ;;  %v1315_v31 = vpack.c.bf16 %v9641_v53, %v9638_v62  ;;  %v7593_v42 = vor.u32 %v7978_v48, %v7592_v19 }
 0x312   : > { %v1500_v1 = vmul.f32 %v9644_v49, %v9644_v49 }
 0x313   : > { %1411 = vmatmul.bf16.gmra.mxu1 %v1315_v31  ;;  %v7594_v31 = vld [vmem:[#allocation16 + $0x48] sm:$0xf0] }
 0x314   : > { %1449 = vadd.xlane.f32.xlu2 %v9647_v44  ;;  %1517 = vadd.xlane.f32.xlu0 %v1500_v1  ;;  %v7597_v1 = vor.u32 %v7977_v33, %v7594_v31 }
 0x315   : > { %v1440_v17 = vpop.xlane.xlu1 %1439 }
 0x316   : > { %v1469_v51 = vmul.f32 %v1440_v17, %v9294_v13  ;;  %v7584_v17 = vld [vmem:[#allocation16 + $0x30] sm:$0xf] }
 0x317   : > { %v1397_v3 = vpop.f32.mrf.mxu1 }
 0x318   : > { %v1398_v63 = vadd.f32 %v9589_v43, %v1397_v3  ;;  %v9656_v6 = vsub.f32 %v1419_v4, %v1469_v51  ;;  %v7976_v51 = vld [vmem:[#allocation16 + $0x34] sm:$0xf0]  ;;  %v7975_v3 = vld [vmem:[#allocation16 + $0x34] sm:$0xf] }
 0x31a   : > { %v9659_v7 = vadd.f32 %v1398_v63, %v9594_v9  ;;  %v1501_v8 = vmul.f32 %v9656_v6, %v9656_v6  ;;  %v7585_v63 = vor.u32 %v7976_v51, %v7584_v17 }
 0x31c   : > { %1451 = vadd.xlane.f32.xlu2 %v9659_v7  ;;  %1519 = vadd.xlane.f32.xlu0 %v1501_v8  ;;  %v7586_v8 = vld [vmem:[#allocation16 + $0x38] sm:$0xf0] }
 0x31d   : > { %v1442_v61 = vpop.xlane.xlu2 %1441 }
 0x31e   : > { %v1470_v11 = vmul.f32 %v1442_v61, %v9294_v13  ;;  %v7589_v61 = vor.u32 %v7975_v3, %v7586_v8 }
 0x31f   : > { %v1399_v12 = vpop.f32.mrf.mxu1 }
 0x320   : > { %v1400_v60 = vadd.f32 %v9589_v43, %v1399_v12  ;;  %v9666_v14 = vsub.f32 %v1420_v23, %v1470_v11  ;;  %v7576_v11 = vld [vmem:[#allocation16 + $0x20] sm:$0xf]  ;;  %v7974_v12 = vld [vmem:[#allocation16 + $0x24] sm:$0xf0] }
 0x322   : > { %v9669_v5 = vadd.f32 %v1400_v60, %v9597_v21  ;;  %v1502_v32 = vmul.f32 %v9666_v14, %v9666_v14  ;;  %v7973_v60 = vld [vmem:[#allocation16 + $0x24] sm:$0xf] }
 0x324   : > { %1521 = vadd.xlane.f32.xlu1 %v1502_v32  ;;  %1453 = vadd.xlane.f32.xlu0 %v9669_v5  ;;  %v7577_v32 = vor.u32 %v7974_v12, %v7576_v11 }
 0x325   : > { %v1444_v38 = vpop.xlane.xlu0 %1443 }
 0x326   : > { %v1471_v9 = vmul.f32 %v1444_v38, %v9294_v13  ;;  %v7578_v38 = vld [vmem:[#allocation16 + $0x28] sm:$0xf0] }
 0x327   : > { %v1402_v15 = vpop.f32.mrf.mxu1 }
 0x328   : > { %v1403_v25 = vadd.f32 %v9589_v43, %v1402_v15  ;;  %v9676_v18 = vsub.f32 %v1421_v40, %v1471_v9  ;;  %v7617_v40 = vor.u32 %v7984_v10, %v7616_v35  ;;  %v7581_v9 = vor.u32 %v7973_v60, %v7578_v38  ;;  %v7568_v15 = vld [vmem:[#allocation16 + $0x10] sm:$0xf]  ;;  %v7560_v10 = vld [vmem:[#allocation16] sm:$0xf] }
 0x32a   : > { %v9679_v22 = vadd.f32 %v1403_v25, %v9606_v2  ;;  %v1503_v21 = vmul.f32 %v9676_v18, %v9676_v18  ;;  %1903 = vmatpush.bf16.msra.mxu2 %v7617_v40  ;;  %v7972_v25 = vld [vmem:[#allocation16 + $0x14] sm:$0xf0]  ;;  %v7969_v40 = vld [vmem:[#allocation16 + $0x4] sm:$0xf] }
 0x32c   : > { %1455 = vadd.xlane.f32.xlu0 %v9679_v22  ;;  %1523 = vadd.xlane.f32.xlu1 %v1503_v21  ;;  %v7971_v21 = vld [vmem:[#allocation16 + $0x14] sm:$0xf] }
 0x32d   : > { %v1446_v27 = vpop.xlane.xlu1 %1445 }
 0x32e   : > { %v1472_v24 = vmul.f32 %v1446_v27, %v9294_v13 }
 0x32f   : > { %v1404_v26 = vpop.f32.mrf.mxu1 }
 0x330   : > { %v1405_v4 = vadd.f32 %v9589_v43, %v1404_v26  ;;  %v9686_v28 = vsub.f32 %v1422_v50, %v1472_v24  ;;  %v7609_v50 = vor.u32 %v7982_v45, %v7608_v41  ;;  %v7569_v24 = vor.u32 %v7972_v25, %v7568_v15  ;;  %v7570_v26 = vld [vmem:[#allocation16 + $0x18] sm:$0xf0]  ;;  %v7562_v41 = vld [vmem:[#allocation16 + $0x8] sm:$0xf0] }
 0x331   : > { %v7565_v54 = vor.u32 %v7969_v40, %v7562_v41 }
 0x332   : > { %v9689_v47 = vadd.f32 %v1405_v4, %v9609_v46  ;;  %v1504_v2 = vmul.f32 %v9686_v28, %v9686_v28  ;;  %v7618_v46 = vld [vmem:[#allocation16 + $0x78] sm:$0xf0]  ;;  %1904 = vmatpush.bf16.msra.mxu2 %v7609_v50 }
 0x333   : > { %v7621_v16 = vor.u32 %v7983_v36, %v7618_v46  ;;  %v7970_v36 = vld [vmem:[#allocation16 + $0x4] sm:$0xf0] }
 0x334   : > { %1525 = vadd.xlane.f32.xlu2 %v1504_v2  ;;  %1457 = vadd.xlane.f32.xlu1 %v9689_v47 }
 0x335   : > { %1952 = vmatpush.bf16.msra.mxu3 %v7621_v16  ;;  %v7561_v16 = vor.u32 %v7970_v36, %v7560_v10  ;;  %v9737_v10 = vld [vmem:[#allocation13] ss:$0 sm:$0xff] }
 0x337   : > { %v1407_v29 = vpop.f32.mrf.mxu1 }
 0x338   : > { %v1408_v0 = vadd.f32 %v9589_v43, %v1407_v29  ;;  %v7573_v29 = vor.u32 %v7971_v21, %v7570_v26 }
 0x339   : > { %1953 = vmatpush.bf16.msra.mxu3 %v7613_v30 }
 0x33a   : > { %v9696_v23 = vadd.f32 %v1408_v0, %v9618_v37  ;;  %v7600_v37 = vld [vmem:[#allocation16 + $0x50] sm:$0xf] }
 0x33b   : > { %v7601_v57 = vor.u32 %v7980_v20, %v7600_v37 }
 0x33c   : > { %1459 = vadd.xlane.f32.xlu1 %v9696_v23 }
 0x33d   : > { %1905 = vmatpush.bf16.msra.mxu2 %v7601_v57  ;;  %1954 = vmatpush.bf16.msra.mxu3 %v7605_v34 }
 0x33f   : > { %v1409_v50 = vpop.f32.mrf.mxu1 }
 0x340   : > { %v1410_v52 = vadd.f32 %v9589_v43, %v1409_v50 }
 0x341   : > { %1906 = vmatpush.bf16.msra.mxu2 %v7593_v42  ;;  %1955 = vmatpush.bf16.msra.mxu3 %v7597_v1 }
 0x342   : > { %v9713_v19 = vadd.f32 %v1410_v52, %v9621_v39 }
 0x345   : > { %1907 = vmatpush.bf16.msra.mxu2 %v7585_v63  ;;  %1956 = vmatpush.bf16.msra.mxu3 %v7589_v61 }
 0x349   : > { %1908 = vmatpush.bf16.msra.mxu2 %v7577_v32  ;;  %1957 = vmatpush.bf16.msra.mxu3 %v7581_v9 }
 0x34d   : > { %1909 = vmatpush.bf16.msra.mxu2 %v7569_v24  ;;  %1958 = vmatpush.bf16.msra.mxu3 %v7573_v29 }
 0x351   : > { %1910 = vmatpush.bf16.msra.mxu2 %v7561_v16  ;;  %1959 = vmatpush.bf16.msra.mxu3 %v7565_v54 }
 0x37e   : > { %v1448_v27 = vpop.xlane.xlu1 %1447 }
 0x37f   : > { %v1473_v4 = vmul.f32 %v1448_v27, %v9294_v13  ;;  %v1516_v2 = vpop.xlane.xlu2 %1515 }
 0x380   : > { %v1547_v0 = vmul.f32 %v1516_v2, %v9294_v13 }
 0x381   : > { %v9702_v35 = vsub.f32 %v9631_v59, %v1473_v4 }
 0x382   : > { %v1563_v46 = vadd.f32 1e-05, %v1547_v0 }
 0x383   : > { %v1505_v45 = vmul.f32 %v9702_v35, %v9702_v35 }
 0x384   : > { %8258 = vrsqrt.f32 %v1563_v46  ;;  %vm1585_vm2 = vweird.f32 %v1563_v46 }
 0x385   : > { %1527 = vadd.xlane.f32.xlu2 %v1505_v45  ;;  %v9747_v45 = vld [vmem:[#allocation14] ss:$0 sm:$0xff] }
 0x387   : > { %v1450_v59 = vpop.xlane.xlu2 %1449  ;;  %v1518_v30 = vpop.xlane.xlu0 %1517 }
 0x388   : > { %v1474_v37 = vmul.f32 %v1450_v59, %v9294_v13  ;;  %v1548_v20 = vmul.f32 %v1518_v30, %v9294_v13 }
 0x38a   : > { %v8259_v55 = vpop.eup %8258  ;;  %v1564_v57 = vadd.f32 1e-05, %v1548_v20  ;;  %v9710_v56 = vsub.f32 %v9647_v44, %v1474_v37 }
 0x38b   : > { %v1580_v34 = vmul.f32 %v8259_v55, %v1563_v46  ;;  %vm1586_vm1 = vweird.f32 %v8259_v55 }
 0x38c   : > { %8260 = vrsqrt.f32 %v1564_v57  ;;  %v1506_v48 = vmul.f32 %v9710_v56, %v9710_v56  ;;  %vm1587_vm3 = vmor %vm1585_vm2, %vm1586_vm1  ;;  %vm1595_vm5 = vweird.f32 %v1564_v57 }
 0x38d   : > { %v1581_v33 = vmul.f32 %v8259_v55, %v1580_v34  ;;  %1461 = vadd.xlane.f32.xlu2 %v9713_v19 }
 0x38e   : > { %1529 = vadd.xlane.f32.xlu0 %v1506_v48 }
 0x38f   : > { %v1582_v42 = vmul.f32 0.5, %v1581_v33  ;;  %v1452_v31 = vpop.xlane.xlu2 %1451  ;;  %v1520_v1 = vpop.xlane.xlu0 %1519 }
 0x390   : > { %v1475_v17 = vmul.f32 %v1452_v31, %v9294_v13  ;;  %v1549_v44 = vmul.f32 %v1520_v1, %v9294_v13  ;;  %v1412_v51 = vpop.f32.mrf.mxu1 }
 0x391   : > { %v1583_v3 = vsub.f32 1.5, %v1582_v42  ;;  %v1413_v39 = vadd.f32 %v9589_v43, %v1412_v51 }
 0x392   : > { %v8261_v63 = vpop.eup %8260  ;;  %v1565_v8 = vadd.f32 1e-05, %v1549_v44  ;;  %v9722_v61 = vsub.f32 %v9659_v7, %v1475_v17 }
 0x393   : > { %v1584_v11 = vmul.f32 %v8259_v55, %v1583_v3  ;;  %v1590_v12 = vmul.f32 %v8261_v63, %v1564_v57  ;;  %v9725_v60 = vadd.f32 %v1413_v39, %v9638_v62  ;;  %vm1596_vm4 = vweird.f32 %v8261_v63  ;;  %v7992_v39 = vld [vmem:[#allocation17 + $0x38] sm:$0xff] }
 0x394   : > { %8262 = vrsqrt.f32 %v1565_v8  ;;  %v1507_v32 = vmul.f32 %v9722_v61, %v9722_v61  ;;  %vm1597_vm6 = vmor %vm1595_vm5, %vm1596_vm4  ;;  %vm1605_vm8 = vweird.f32 %v1565_v8  ;;  %3557 = vmatpush.bf16.msrb.mxu0 %v7992_v39 }
 0x395   : > { %v1591_v38 = vmul.f32 %v8261_v63, %v1590_v12  ;;  %1463 = vadd.xlane.f32.xlu2 %v9725_v60  ;;  %v1588_v25 = vsel %vm1587_vm3, %v8259_v55, %v1584_v11 }
 0x396   : > { %1531 = vadd.xlane.f32.xlu0 %v1507_v32  ;;  %v1739_v0 = vmul.f32 %v1588_v25, %v9629_v58  ;;  %v7991_v32 = vld [vmem:[#allocation17 + $0x30] sm:$0xff] }
 0x397   : > { %v1592_v9 = vmul.f32 0.5, %v1591_v38  ;;  %v1522_v15 = vpop.xlane.xlu1 %1521  ;;  %v1454_v7 = vpop.xlane.xlu0 %1453 }
 0x398   : > { %v1550_v21 = vmul.f32 %v1522_v15, %v9294_v13  ;;  %v1476_v27 = vmul.f32 %v1454_v7, %v9294_v13  ;;  %v1414_v62 = vpop.f32.mrf.mxu1  ;;  %3558 = vmatpush.bf16.msrb.mxu0 %v7991_v32 }
 0x399   : > { %v1593_v24 = vsub.f32 1.5, %v1592_v9  ;;  %v1415_v26 = vadd.f32 %v9589_v43, %v1414_v62 }
 0x39a   : > { %v8263_v4 = vpop.eup %8262  ;;  %v1566_v2 = vadd.f32 1e-05, %v1550_v21  ;;  %v9734_v29 = vsub.f32 %v9669_v5, %v1476_v27  ;;  %v1758_v5 = vmul.f32 %v9737_v10, %v1739_v0 }
 0x39b   : > { %v1594_v36 = vmul.f32 %v8261_v63, %v1593_v24  ;;  %v1600_v40 = vmul.f32 %v8263_v4, %v1565_v8  ;;  %v9740_v46 = vadd.f32 %v1415_v26, %v9641_v53  ;;  %vm1606_vm7 = vweird.f32 %v8263_v4 }
 0x39c   : > { %8264 = vrsqrt.f32 %v1566_v2  ;;  %v1508_v43 = vmul.f32 %v9734_v29, %v9734_v29  ;;  %vm9765_vm9 = vmor %vm1605_vm8, %vm1606_vm7  ;;  %vm1615_vm11 = vweird.f32 %v1566_v2 }
 0x39d   : > { %v1601_v16 = vmul.f32 %v8263_v4, %v1600_v40  ;;  %v1598_v41 = vsel %vm1597_vm6, %v8261_v63, %v1594_v36  ;;  %v8000_v63 = vld [vmem:[#allocation17 + $0x78] sm:$0xff] }
 0x39e   : > { %1465 = vadd.xlane.f32.xlu0 %v9740_v46  ;;  %1533 = vadd.xlane.f32.xlu1 %v1508_v43  ;;  %v1740_v58 = vmul.f32 %v1598_v41, %v9644_v49  ;;  %v9756_v49 = vadd.f32 %v9747_v45, %v1758_v5 }
 0x39f   : > { %v1602_v54 = vmul.f32 0.5, %v1601_v16  ;;  %v1524_v50 = vpop.xlane.xlu1 %1523  ;;  %v1456_v53 = vpop.xlane.xlu0 %1455  ;;  %3606 = vmatpush.bf16.msrb.mxu1 %v8000_v63 }
 0x3a0   : > { %v1551_v52 = vmul.f32 %v1524_v50, %v9294_v13  ;;  %v1477_v59 = vmul.f32 %v1456_v53, %v9294_v13  ;;  %v1759_v30 = vmul.f32 %v9737_v10, %v1740_v58 }
 0x3a1   : > { %v1603_v37 = vsub.f32 1.5, %v1602_v54 }
 0x3a2   : > { %v8265_v20 = vpop.eup %8264  ;;  %v1567_v55 = vadd.f32 1e-05, %v1551_v52  ;;  %v9753_v57 = vsub.f32 %v9679_v22, %v1477_v59  ;;  %v9759_v34 = vadd.f32 %v9747_v45, %v1759_v30 }
 0x3a3   : > { %v1604_v48 = vmul.f32 %v8263_v4, %v1603_v37  ;;  %v1610_v33 = vmul.f32 %v8265_v20, %v1566_v2  ;;  %vm1616_vm10 = vweird.f32 %v8265_v20 }
 0x3a4   : > { %14191 = vst [vmem:[#allocation29_spill] sm:$0xff] %v9759_v34  ;;  %8266 = vrsqrt.f32 %v1567_v55  ;;  %v1809_v42 = vpack.c.bf16 %v9759_v34, %v9756_v49  ;;  %v1509_v31 = vmul.f32 %v9753_v57, %v9753_v57  ;;  %vm1617_vm12 = vmor %vm1615_vm11, %vm1616_vm10  ;;  %vm1625_vm14 = vweird.f32 %v1567_v55 }
 0x3a5   : > { %v1611_v1 = vmul.f32 %v8265_v20, %v1610_v33  ;;  %v1608_v3 = vsel %vm9765_vm9, %v8263_v4, %v1604_v48 }
 0x3a6   : > { %1911 = vmatmul.bf16.vlgmr.msra.gmra.mxu2 %v1809_v42  ;;  %1960 = vmatmul.bf16.vlgmr.msra.gmra.mxu3 %v1809_v42  ;;  %v1741_v7 = vmul.f32 %v1608_v3, %v9656_v6 }
 0x3a7   : > { %v1612_v17 = vmul.f32 0.5, %v1611_v1  ;;  %1535 = vadd.xlane.f32.xlu1 %v1509_v31  ;;  %v1526_v44 = vpop.xlane.xlu2 %1525  ;;  %v1458_v51 = vpop.xlane.xlu1 %1457  ;;  %v7990_v1 = vld [vmem:[#allocation17 + $0x28] sm:$0xff] }
 0x3a8   : > { %v1552_v11 = vmul.f32 %v1526_v44, %v9294_v13  ;;  %v1478_v8 = vmul.f32 %v1458_v51, %v9294_v13  ;;  %v1760_v4 = vmul.f32 %v9737_v10, %v1741_v7  ;;  %3559 = vmatpush.bf16.msrb.mxu0 %v7990_v1  ;;  %v7998_v44 = vld [vmem:[#allocation17 + $0x68] sm:$0xff] }
 0x3a9   : > { %v1613_v12 = vsub.f32 1.5, %v1612_v17 }
 0x3aa   : > { %v8267_v38 = vpop.eup %8266  ;;  %v1568_v9 = vadd.f32 1e-05, %v1552_v11  ;;  %v9774_v15 = vsub.f32 %v9689_v47, %v1478_v8  ;;  %v9787_v16 = vadd.f32 %v9747_v45, %v1760_v4 }
 0x3ab   : > { %v1614_v25 = vmul.f32 %v8265_v20, %v1613_v12  ;;  %v1620_v21 = vmul.f32 %v8267_v38, %v1567_v55  ;;  %vm1626_vm13 = vweird.f32 %v8267_v38 }
 0x3ac   : > { %8268 = vrsqrt.f32 %v1568_v9  ;;  %v1510_v27 = vmul.f32 %v9774_v15, %v9774_v15  ;;  %14194 = vst [vmem:[#allocation30_spill] sm:$0xff] %v9787_v16  ;;  %vm1627_vm15 = vmor %vm1625_vm14, %vm1626_vm13  ;;  %vm1635_vm1 = vweird.f32 %v1568_v9 }
 0x3ad   : > { %v1621_v62 = vmul.f32 %v8267_v38, %v1620_v21  ;;  %v1618_v24 = vsel %vm1617_vm12, %v8265_v20, %v1614_v25 }
 0x3ae   : > { %1537 = vadd.xlane.f32.xlu2 %v1510_v27  ;;  %v1742_v26 = vmul.f32 %v1618_v24, %v9666_v14 }
 0x3af   : > { %v1622_v47 = vmul.f32 0.5, %v1621_v62  ;;  %v1460_v0 = vpop.xlane.xlu1 %1459 }
 0x3b0   : > { %v1479_v6 = vmul.f32 %v1460_v0, %v9294_v13  ;;  %v1761_v2 = vmul.f32 %v9737_v10, %v1742_v26 }
 0x3b1   : > { %v1623_v36 = vsub.f32 1.5, %v1622_v47 }
 0x3b2   : > { %v8269_v40 = vpop.eup %8268  ;;  %v9784_v43 = vsub.f32 %v9696_v23, %v1479_v6  ;;  %v9790_v41 = vadd.f32 %v9747_v45, %v1761_v2 }
 0x3b3   : > { %v1624_v14 = vmul.f32 %v8267_v38, %v1623_v36  ;;  %v1630_v58 = vmul.f32 %v8269_v40, %v1568_v9  ;;  %vm1636_vm0 = vweird.f32 %v8269_v40  ;;  %v7989_v9 = vld [vmem:[#allocation17 + $0x20] sm:$0xff] }
 0x3b4   : > { %14195 = vst [vmem:[#allocation31_spill] sm:$0xff] %v9790_v41  ;;  %v1511_v5 = vmul.f32 %v9784_v43, %v9784_v43  ;;  %v1810_v54 = vpack.c.bf16 %v9790_v41, %v9787_v16  ;;  %vm1637_vm2 = vmor %vm1635_vm1, %vm1636_vm0  ;;  %3560 = vmatpush.bf16.msrb.mxu0 %v7989_v9  ;;  %v7997_v36 = vld [vmem:[#allocation17 + $0x60] sm:$0xff] }
 0x3b5   : > { %v1631_v50 = vmul.f32 %v8269_v40, %v1630_v58  ;;  %v1628_v53 = vsel %vm1627_vm15, %v8267_v38, %v1624_v14 }
 0x3b6   : > { %1539 = vadd.xlane.f32.xlu0 %v1511_v5  ;;  %1916 = vmatmul.bf16.gmra.mxu2 %v1810_v54  ;;  %v1743_v59 = vmul.f32 %v1628_v53, %v9676_v18  ;;  %v7999_v18 = vld [vmem:[#allocation17 + $0x70] sm:$0xff] }
 0x3b7   : > { %v1632_v23 = vmul.f32 0.5, %v1631_v50  ;;  %1965 = vmatmul.bf16.gmra.mxu3 %v1810_v54  ;;  %3607 = vmatpush.bf16.msrb.mxu1 %v7999_v18 }
 0x3b8   : > { %v1762_v48 = vmul.f32 %v9737_v10, %v1743_v59 }
 0x3b9   : > { %v1633_v52 = vsub.f32 1.5, %v1632_v23 }
 0x3ba   : > { %v9801_v33 = vadd.f32 %v9747_v45, %v1762_v48 }
 0x3bb   : > { %v1634_v30 = vmul.f32 %v8269_v40, %v1633_v52  ;;  %3608 = vmatpush.bf16.msrb.mxu1 %v7998_v44 }
 0x3bc   : > { %14196 = vst [vmem:[#allocation32_spill] sm:$0xff] %v9801_v33 }
 0x3bd   : > { %v1638_v37 = vsel %vm1637_vm2, %v8269_v40, %v1634_v30 }
 0x3be   : > { %v1744_v20 = vmul.f32 %v1638_v37, %v9686_v28 }
 0x3bf   : > { %3609 = vmatpush.bf16.msrb.mxu1 %v7997_v36 }
 0x3c0   : > { %v1763_v55 = vmul.f32 %v9737_v10, %v1744_v20 }
 0x3c2   : > { %v9804_v42 = vadd.f32 %v9747_v45, %v1763_v55 }
 0x3c4   : > { %14197 = vst [vmem:[#allocation33_spill] sm:$0xff] %v9804_v42  ;;  %v1811_v31 = vpack.c.bf16 %v9804_v42, %v9801_v33 }
 0x3c6   : > { %1921 = vmatmul.bf16.gmra.mxu2 %v1811_v31 }
 0x3c7   : > { %1970 = vmatmul.bf16.gmra.mxu3 %v1811_v31 }
 0x3f8   : > { %v1528_v28 = vpop.xlane.xlu2 %1527 }
 0x3f9   : > { %v1553_v22 = vmul.f32 %v1528_v28, %v9294_v13 }
 0x3fb   : > { %v1569_v17 = vadd.f32 1e-05, %v1553_v22 }
 0x3fd   : > { %8270 = vrsqrt.f32 %v1569_v17  ;;  %vm1645_vm4 = vweird.f32 %v1569_v17 }
 0x400   : > { %v1462_v51 = vpop.xlane.xlu2 %1461 }
 0x401   : > { %v1480_v3 = vmul.f32 %v1462_v51, %v9294_v13  ;;  %v1530_v39 = vpop.xlane.xlu0 %1529 }
 0x402   : > { %v1554_v63 = vmul.f32 %v1530_v39, %v9294_v13 }
 0x403   : > { %v8271_v11 = vpop.eup %8270  ;;  %v9812_v8 = vsub.f32 %v9713_v19, %v1480_v3 }
 0x404   : > { %v1640_v12 = vmul.f32 %v8271_v11, %v1569_v17  ;;  %v1570_v32 = vadd.f32 1e-05, %v1554_v63  ;;  %vm1646_vm3 = vweird.f32 %v8271_v11 }
 0x405   : > { %v1512_v38 = vmul.f32 %v9812_v8, %v9812_v8  ;;  %vm1647_vm5 = vmor %vm1645_vm4, %vm1646_vm3 }
 0x406   : > { %v1641_v7 = vmul.f32 %v8271_v11, %v1640_v12  ;;  %8272 = vrsqrt.f32 %v1570_v32  ;;  %vm1655_vm7 = vweird.f32 %v1570_v32 }
 0x407   : > { %1541 = vadd.xlane.f32.xlu1 %v1512_v38 }
 0x408   : > { %v1642_v25 = vmul.f32 0.5, %v1641_v7  ;;  %v1464_v21 = vpop.xlane.xlu2 %1463 }
 0x409   : > { %v1481_v27 = vmul.f32 %v1464_v21, %v9294_v13  ;;  %v1532_v62 = vpop.xlane.xlu0 %1531 }
 0x40a   : > { %v1643_v24 = vsub.f32 1.5, %v1642_v25  ;;  %v1555_v26 = vmul.f32 %v1532_v62, %v9294_v13  ;;  %v1817_v25 = vld [vmem:[%s14105_s10] sm:$0x3] }
 0x40b   : > { %v9819_v19 = vsub.f32 %v9725_v60, %v1481_v27  ;;  %v9850_v62 = vperm.slane %v1817_v25, 0 }
 0x40c   : > { %v8273_v4 = vpop.eup %8272  ;;  %v1571_v47 = vadd.f32 1e-05, %v1555_v26  ;;  %v1644_v0 = vmul.f32 %v8271_v11, %v1643_v24  ;;  %v9852_v24 = vperm.slane %v1817_v25, 1 }
 0x40d   : > { %v1650_v6 = vmul.f32 %v8273_v4, %v1570_v32  ;;  %v1513_v2 = vmul.f32 %v9819_v19, %v9819_v19  ;;  %vm1656_vm6 = vweird.f32 %v8273_v4 }
 0x40e   : > { %8274 = vrsqrt.f32 %v1571_v47  ;;  %v1648_v60 = vsel %vm1647_vm5, %v8271_v11, %v1644_v0  ;;  %vm1657_vm8 = vmor %vm1655_vm7, %vm1656_vm6  ;;  %vm1665_vm10 = vweird.f32 %v1571_v47  ;;  %14200 = vst [vmem:[#allocation36_spill] sm:$0xff] %v9852_v24 }
 0x40f   : > { %v1651_v40 = vmul.f32 %v8273_v4, %v1650_v6  ;;  %1543 = vadd.xlane.f32.xlu2 %v1513_v2  ;;  %v1745_v30 = vmul.f32 %v1648_v60, %v9702_v35 }
 0x411   : > { %v1652_v14 = vmul.f32 0.5, %v1651_v40  ;;  %v1534_v58 = vpop.xlane.xlu1 %1533  ;;  %v1466_v5 = vpop.xlane.xlu0 %1465  ;;  %v1764_v1 = vmul.f32 %v9737_v10, %v1745_v30 }
 0x412   : > { %v1556_v54 = vmul.f32 %v1534_v58, %v9294_v13  ;;  %v1482_v50 = vmul.f32 %v1466_v5, %v9294_v13 }
 0x413   : > { %v1653_v23 = vsub.f32 1.5, %v1652_v14  ;;  %v9836_v51 = vadd.f32 %v9747_v45, %v1764_v1 }
 0x414   : > { %v8275_v53 = vpop.eup %8274  ;;  %v1572_v52 = vadd.f32 1e-05, %v1556_v54  ;;  %v9826_v59 = vsub.f32 %v9740_v46, %v1482_v50 }
 0x415   : > { %v1654_v37 = vmul.f32 %v8273_v4, %v1653_v23  ;;  %v1660_v20 = vmul.f32 %v8275_v53, %v1571_v47  ;;  %14198 = vst [vmem:[#allocation34_spill] sm:$0xff] %v9836_v51  ;;  %vm1666_vm9 = vweird.f32 %v8275_v53 }
 0x416   : > { %8276 = vrsqrt.f32 %v1572_v52  ;;  %v1514_v48 = vmul.f32 %v9826_v59, %v9826_v59  ;;  %vm1667_vm11 = vmor %vm1665_vm10, %vm1666_vm9  ;;  %vm1675_vm13 = vweird.f32 %v1572_v52 }
 0x417   : > { %v1661_v55 = vmul.f32 %v8275_v53, %v1660_v20  ;;  %v1658_v31 = vsel %vm1657_vm8, %v8273_v4, %v1654_v37 }
 0x418   : > { %1545 = vadd.xlane.f32.xlu0 %v1514_v48  ;;  %v1746_v18 = vmul.f32 %v1658_v31, %v9710_v56 }
 0x419   : > { %v1662_v28 = vmul.f32 0.5, %v1661_v55 }
 0x41a   : > { %v1536_v46 = vpop.xlane.xlu1 %1535  ;;  %v1765_v22 = vmul.f32 %v9737_v10, %v1746_v18 }
 0x41b   : > { %v1663_v35 = vsub.f32 1.5, %v1662_v28  ;;  %v1557_v17 = vmul.f32 %v1536_v46, %v9294_v13 }
 0x41c   : > { %v8277_v44 = vpop.eup %8276  ;;  %v9839_v3 = vadd.f32 %v9747_v45, %v1765_v22 }
 0x41d   : > { %v1670_v39 = vmul.f32 %v8277_v44, %v1572_v52  ;;  %v1664_v63 = vmul.f32 %v8275_v53, %v1663_v35  ;;  %v9843_v12 = vadd.f32 1e-05, %v1557_v17  ;;  %vm1676_vm12 = vweird.f32 %v8277_v44 }
 0x41e   : > { %14199 = vst [vmem:[#allocation35_spill] sm:$0xff] %v9839_v3  ;;  %v1812_v56 = vpack.c.bf16 %v9839_v3, %v9836_v51  ;;  %vm1677_vm14 = vmor %vm1675_vm13, %vm1676_vm12 }
 0x41f   : > { %v1671_v11 = vmul.f32 %v8277_v44, %v1670_v39  ;;  %8278 = vrsqrt.f32 %v9843_v12  ;;  %v1668_v21 = vsel %vm1667_vm11, %v8275_v53, %v1664_v63  ;;  %vm1685_vm0 = vweird.f32 %v9843_v12 }
 0x420   : > { %1926 = vmatmul.bf16.gmra.mxu2 %v1812_v56  ;;  %1975 = vmatmul.bf16.gmra.mxu3 %v1812_v56  ;;  %v1747_v26 = vmul.f32 %v1668_v21, %v9722_v61 }
 0x421   : > { %v1672_v32 = vmul.f32 0.5, %v1671_v11  ;;  %v1538_v38 = vpop.xlane.xlu2 %1537 }
 0x422   : > { %v1558_v7 = vmul.f32 %v1538_v38, %v9294_v13  ;;  %v1766_v58 = vmul.f32 %v9737_v10, %v1747_v26 }
 0x423   : > { %v1673_v9 = vsub.f32 1.5, %v1672_v32 }
 0x424   : > { %v9855_v4 = vadd.f32 1e-05, %v1558_v7  ;;  %v9880_v50 = vadd.f32 %v9747_v45, %v1766_v58 }
 0x425   : > { %v1674_v27 = vmul.f32 %v8277_v44, %v1673_v9  ;;  %v9858_v6 = vpop.eup %8278 }
 0x426   : > { %8280 = vrsqrt.f32 %v9855_v4  ;;  %v1680_v61 = vmul.f32 %v9858_v6, %v9843_v12  ;;  %14201 = vst [vmem:[#allocation37_spill] sm:$0xff] %v9880_v50  ;;  %vm1686_vm15 = vweird.f32 %v9858_v6  ;;  %vm1695_vm3 = vweird.f32 %v9855_v4 }
 0x427   : > { %v1678_v47 = vsel %vm1677_vm14, %v8277_v44, %v1674_v27  ;;  %vm9946_vm1 = vmor %vm1685_vm0, %vm1686_vm15 }
 0x428   : > { %v1748_v0 = vmul.f32 %v1678_v47, %v9734_v29  ;;  %v1681_v52 = vmul.f32 %v9858_v6, %v1680_v61 }
 0x429   : > { %v1912_v2 = vpop.f32.mrf.mxu2  ;;  %v1961_v36 = vpop.f32.mrf.mxu3 }
 0x42a   : > { %v9861_v40 = vadd.f32 %v1912_v2, %v9850_v62  ;;  %v9864_v14 = vadd.f32 %v1961_v36, %v9852_v24  ;;  %v1767_v5 = vmul.f32 %v9737_v10, %v1748_v0  ;;  %v1540_v35 = vpop.xlane.xlu0 %1539  ;;  %v1682_v44 = vmul.f32 0.5, %v1681_v52 }
 0x42b   : > { %v1559_v25 = vmul.f32 %v1540_v35, %v9294_v13 }
 0x42c   : > { %v9872_v29 = vmul.f32 0.70710677, %v9861_v40  ;;  %v9875_v60 = vmul.f32 0.70710677, %v9864_v14  ;;  %v9883_v23 = vadd.f32 %v9747_v45, %v1767_v5  ;;  %v9892_v20 = vpop.eup %8280  ;;  %v1683_v0 = vsub.f32 1.5, %v1682_v44 }
 0x42d   : > { %v1690_v39 = vmul.f32 %v9892_v20, %v9855_v4  ;;  %vm1696_vm2 = vweird.f32 %v9892_v20 }
 0x42e   : > { %v2065_v54 = vmul.f32 %v9872_v29, %v9872_v29  ;;  %14202 = vst [vmem:[#allocation38_spill] sm:$0xff] %v9883_v23  ;;  %v2105_v53 = vmul.f32 %v9875_v60, %v9875_v60  ;;  %v1813_v37 = vpack.c.bf16 %v9883_v23, %v9880_v50  ;;  %vm9982_vm4 = vmor %vm1695_vm3, %vm1696_vm2 }
 0x42f   : > { %v1691_v2 = vmul.f32 %v9892_v20, %v1690_v39 }
 0x430   : > { %v9888_v30 = vmin.f32 %v2065_v54, 16.0  ;;  %v9894_v48 = vmin.f32 %v2105_v53, 16.0  ;;  %1931 = vmatmul.bf16.gmra.mxu2 %v1813_v37  ;;  %1980 = vmatmul.bf16.gmra.mxu3 %v1813_v37  ;;  %v7988_v37 = vld [vmem:[#allocation17 + $0x18] sm:$0xff] }
 0x431   : > { %v1914_v55 = vpop.f32.mrf.mxu2  ;;  %v1963_v31 = vpop.f32.mrf.mxu3  ;;  %3561 = vmatpush.bf16.msrb.mxu0 %v7988_v37 }
 0x432   : > { %v2067_v18 = vmul.f32 2.1237322e-06, %v9888_v30  ;;  %v2078_v1 = vmul.f32 3.8918573e-05, %v9888_v30  ;;  %v9899_v28 = vadd.f32 %v1914_v55, %v9850_v62  ;;  %v2107_v46 = vmul.f32 2.1237322e-06, %v9894_v48 }
 0x433   : > { %v2118_v22 = vmul.f32 3.8918573e-05, %v9894_v48  ;;  %v9904_v17 = vadd.f32 %v1963_v31, %v9852_v24  ;;  %v9927_v55 = vadd.f32 1e-05, %v1559_v25  ;;  %v7996_v31 = vld [vmem:[#allocation17 + $0x58] sm:$0xff] }
 0x434   : > { %v2068_v56 = vadd.f32 0.00028619796, %v2067_v18  ;;  %v2079_v63 = vadd.f32 0.001143296, %v2078_v1  ;;  %v2108_v11 = vadd.f32 0.00028619796, %v2107_v46  ;;  %3610 = vmatpush.bf16.msrb.mxu1 %v7996_v31 }
 0x435   : > { %v2119_v32 = vadd.f32 0.001143296, %v2118_v22  ;;  %v9909_v38 = vmul.f32 0.70710677, %v9899_v28  ;;  %v9919_v47 = vmul.f32 0.70710677, %v9904_v17  ;;  %8282 = vrsqrt.f32 %v9927_v55 }
 0x436   : > { %v2069_v9 = vmul.f32 %v2068_v56, %v9888_v30  ;;  %v2080_v7 = vmul.f32 %v2079_v63, %v9888_v30  ;;  %v2109_v21 = vmul.f32 %v2108_v11, %v9894_v48  ;;  %v1684_v56 = vmul.f32 %v9858_v6, %v1683_v0 }
 0x437   : > { %v2120_v27 = vmul.f32 %v2119_v32, %v9894_v48  ;;  %v2145_v26 = vmul.f32 %v9909_v38, %v9909_v38  ;;  %v2185_v53 = vmul.f32 %v9919_v47, %v9919_v47  ;;  %v1692_v63 = vmul.f32 0.5, %v1691_v2 }
 0x438   : > { %v2070_v36 = vadd.f32 0.0036580483, %v2069_v9  ;;  %v2081_v58 = vadd.f32 0.014752088, %v2080_v7  ;;  %v2110_v5 = vadd.f32 0.0036580483, %v2109_v21 }
 0x439   : > { %v2121_v61 = vadd.f32 0.014752088, %v2120_v27  ;;  %v9922_v54 = vmin.f32 %v2145_v26, 16.0  ;;  %v9935_v39 = vmin.f32 %v2185_v53, 16.0 }
 0x43a   : > { %v2082_v52 = vmul.f32 %v2081_v58, %v9888_v30  ;;  %v2071_v18 = vmul.f32 %v2070_v36, %v9888_v30  ;;  %v2111_v44 = vmul.f32 %v2110_v5, %v9894_v48  ;;  %v1693_v5 = vsub.f32 1.5, %v1692_v63  ;;  %v1966_v4 = vpop.f32.mrf.mxu3 }
 0x43b   : > { %v2122_v1 = vmul.f32 %v2121_v61, %v9894_v48  ;;  %v2147_v46 = vmul.f32 2.1237322e-06, %v9922_v54  ;;  %v2158_v22 = vmul.f32 3.8918573e-05, %v9922_v54  ;;  %v2187_v26 = vmul.f32 2.1237322e-06, %v9935_v39 }
 0x43c   : > { %v2083_v35 = vadd.f32 0.112945676, %v2082_v52  ;;  %v2072_v25 = vadd.f32 0.05243302, %v2071_v18  ;;  %v2112_v12 = vadd.f32 0.05243302, %v2111_v44  ;;  %v1688_v52 = vsel %vm9946_vm1, %v9858_v6, %v1684_v56 }
 0x43d   : > { %v2123_v11 = vadd.f32 0.112945676, %v2122_v1  ;;  %v2148_v32 = vadd.f32 0.00028619796, %v2147_v46  ;;  %v2159_v7 = vadd.f32 0.001143296, %v2158_v22  ;;  %v1749_v6 = vmul.f32 %v1688_v52, %v9753_v57 }
 0x43e   : > { %v2084_v9 = vmul.f32 %v2083_v35, %v9888_v30  ;;  %v2198_v58 = vmul.f32 3.8918573e-05, %v9935_v39  ;;  %v2188_v18 = vadd.f32 0.00028619796, %v2187_v26  ;;  %v9959_v35 = vpop.eup %8282  ;;  %v2073_v44 = vmul.f32 %v2072_v25, %v9888_v30  ;;  %v1917_v25 = vpop.f32.mrf.mxu2 }
 0x43f   : > { %v2124_v21 = vmul.f32 %v2123_v11, %v9894_v48  ;;  %v2149_v27 = vmul.f32 %v2148_v32, %v9922_v54  ;;  %v2160_v36 = vmul.f32 %v2159_v7, %v9922_v54  ;;  %v2113_v11 = vmul.f32 %v2112_v12, %v9894_v48 }
 0x440   : > { %v2085_v2 = vadd.f32 0.4994258, %v2084_v9  ;;  %v2199_v22 = vadd.f32 0.001143296, %v2198_v58  ;;  %v1694_v56 = vmul.f32 %v9892_v20, %v1693_v5  ;;  %v2189_v7 = vmul.f32 %v2188_v18, %v9935_v39 }
 0x441   : > { %v2125_v61 = vadd.f32 0.4994258, %v2124_v21  ;;  %v2150_v53 = vadd.f32 0.0036580483, %v2149_v27  ;;  %v2161_v31 = vadd.f32 0.014752088, %v2160_v36  ;;  %v1700_v57 = vmul.f32 %v9959_v35, %v9927_v55 }
 0x442   : > { %v2086_v37 = vmul.f32 %v2085_v2, %v9888_v30  ;;  %v2200_v27 = vmul.f32 %v2199_v22, %v9935_v39  ;;  %v9975_v26 = vmul.f32 0.5, %v9861_v40  ;;  %v2074_v2 = vadd.f32 0.18741608, %v2073_v44 }
 0x443   : > { %v2126_v1 = vmul.f32 %v2125_v61, %v9894_v48  ;;  %v2151_v46 = vmul.f32 %v2150_v53, %v9922_v54  ;;  %v2162_v9 = vmul.f32 %v2161_v31, %v9922_v54  ;;  %v9987_v12 = vmul.f32 0.5, %v9864_v14 }
 0x444   : > { %v9962_v63 = vadd.f32 1.0, %v2086_v37  ;;  %v2114_v36 = vadd.f32 0.18741608, %v2113_v11  ;;  %v9990_v40 = vmul.f32 %v9737_v10, %v1749_v6  ;;  %v2190_v5 = vadd.f32 0.0036580483, %v2189_v7 }
 0x445   : > { %v9967_v32 = vadd.f32 1.0, %v2126_v1  ;;  %v2152_v21 = vadd.f32 0.05243302, %v2151_v46  ;;  %v2163_v58 = vadd.f32 0.112945676, %v2162_v9  ;;  %v9993_v61 = vadd.f32 %v1917_v25, %v9850_v62 }
 0x446   : > { %8284 = vrcp.f32 %v9962_v63  ;;  %v1698_v53 = vsel %vm9982_vm4, %v9892_v20, %v1694_v56  ;;  %v9999_v52 = vmul.f32 0.5, %v9899_v28  ;;  %v10003_v37 = vmul.f32 0.5, %v9904_v17 }
 0x447   : > { %8286 = vrcp.f32 %v9967_v32  ;;  %v2153_v14 = vmul.f32 %v2152_v21, %v9922_v54  ;;  %v2201_v31 = vadd.f32 0.014752088, %v2200_v27  ;;  %v10006_v18 = vmul.f32 %v9959_v35, %v1700_v57 }
 0x448   : > { %v2164_v1 = vmul.f32 %v2163_v58, %v9922_v54  ;;  %v2191_v46 = vmul.f32 %v2190_v5, %v9935_v39  ;;  %v10011_v22 = vadd.f32 %v1966_v4, %v9852_v24  ;;  %v2075_v28 = vmul.f32 %v2074_v2, %v9888_v30  ;;  %v7987_v5 = vld [vmem:[#allocation17 + $0x10] sm:$0xff] }
 0x449   : > { %v2115_v44 = vmul.f32 %v2114_v36, %v9894_v48  ;;  %v2202_v17 = vmul.f32 %v2201_v31, %v9935_v39  ;;  %v1750_v11 = vmul.f32 %v1698_v53, %v9774_v15  ;;  %v10024_v21 = vmul.f32 0.70710677, %v9993_v61  ;;  %v7995_v53 = vld [vmem:[#allocation17 + $0x50] sm:$0xff]  ;;  %3562 = vmatpush.bf16.msrb.mxu0 %v7987_v5 }
 0x44a   : > { %v2165_v9 = vadd.f32 0.4994258, %v2164_v1  ;;  %v2192_v7 = vadd.f32 0.05243302, %v2191_v46  ;;  %vm2093_vm5 = vweird.f32 %v9962_v63  ;;  %v2154_v48 = vadd.f32 0.18741608, %v2153_v14  ;;  %3611 = vmatpush.bf16.msrb.mxu1 %v7995_v53 }
 0x44b   : > { %v2203_v27 = vadd.f32 0.112945676, %v2202_v17  ;;  %v10032_v0 = vmul.f32 0.70710677, %v10011_v22  ;;  %v2097_v2 = vand.u32 2147483647, %v9962_v63  ;;  %v2225_v46 = vmul.f32 %v10024_v21, %v10024_v21 }
 0x44c   : > { %v10013_v20 = vpop.eup %8284  ;;  %v2166_v15 = vmul.f32 %v2165_v9, %v9922_v54  ;;  %v2193_v57 = vmul.f32 %v2192_v7, %v9935_v39  ;;  %v2099_v36 = vand.u32 2147483648, %v9962_v63  ;;  %v2139_v31 = vand.u32 2147483648, %v9967_v32  ;;  %v1919_v7 = vpop.f32.mrf.mxu2 }
 0x44d   : > { %v10019_v6 = vpop.eup %8286  ;;  %v2089_v56 = vmul.f32 %v10013_v20, %v9962_v63  ;;  %v2204_v58 = vmul.f32 %v2203_v27, %v9935_v39  ;;  %vm2094_vm6 = vweird.f32 %v10013_v20  ;;  %vm2133_vm9 = vweird.f32 %v9967_v32 }
 0x44e   : > { %v2129_v30 = vmul.f32 %v10019_v6, %v9967_v32  ;;  %v10039_v1 = vadd.f32 1.0, %v2166_v15  ;;  %v2194_v27 = vadd.f32 0.18741608, %v2193_v57  ;;  %vm2134_vm7 = vweird.f32 %v10019_v6  ;;  %vm10058_vm8 = vmor %vm2093_vm5, %vm2094_vm6 }
 0x44f   : > { %v2090_v25 = vsub.f32 1.0, %v2089_v56  ;;  %v2155_v56 = vmul.f32 %v2154_v48, %v9922_v54  ;;  %v2205_v9 = vadd.f32 0.4994258, %v2204_v58  ;;  %v1769_v54 = vmul.f32 %v9737_v10, %v1750_v11  ;;  %v1968_v11 = vpop.f32.mrf.mxu3  ;;  %vm10069_vm11 = vmor %vm2133_vm9, %vm2134_vm7 }
 0x450   : > { %v2130_v4 = vsub.f32 1.0, %v2129_v30  ;;  %8288 = vrcp.f32 %v10039_v1  ;;  %v2076_v48 = vadd.f32 1.1283791, %v2075_v28  ;;  %v2116_v57 = vadd.f32 1.1283791, %v2115_v44 }
 0x451   : > { %v2091_v14 = vmul.f32 %v10013_v20, %v2090_v25  ;;  %v2265_v25 = vmul.f32 %v10032_v0, %v10032_v0  ;;  %v10063_v5 = vmin.f32 %v2225_v46, 16.0  ;;  %vm2098_vm10 = vcmp.eq.f32.partialorder %v2097_v2, 8.507059e+37 }
 0x452   : > { %v2131_v17 = vmul.f32 %v10019_v6, %v2130_v4  ;;  %v2206_v4 = vmul.f32 %v2205_v9, %v9935_v39  ;;  %v2100_v10 = vor.u32 1.1754944e-38, %v2099_v36  ;;  %v2137_v28 = vand.u32 2147483647, %v9967_v32 }
 0x453   : > { %v2092_v30 = vadd.f32 %v10013_v20, %v2091_v14  ;;  %v2140_v14 = vor.u32 1.1754944e-38, %v2139_v31  ;;  %v2195_v44 = vmul.f32 %v2194_v27, %v9935_v39  ;;  %v10076_v46 = vmin.f32 %v2265_v25, 16.0 }
 0x454   : > { %v2132_v15 = vadd.f32 %v10019_v6, %v2131_v17  ;;  %v10074_v17 = vadd.f32 1.0, %v2206_v4  ;;  %v2156_v2 = vadd.f32 1.1283791, %v2155_v56  ;;  %v2177_v36 = vand.u32 2147483647, %v10039_v1 }
 0x455   : > { %v2096_v53 = vsel %vm10058_vm8, %v10013_v20, %v2092_v30  ;;  %v10083_v32 = vadd.f32 %v9747_v45, %v1769_v54  ;;  %v2179_v31 = vand.u32 2147483648, %v10039_v1  ;;  %v2227_v39 = vmul.f32 2.1237322e-06, %v10063_v5 }
 0x456   : > { %v2136_v20 = vsel %vm10069_vm11, %v10019_v6, %v2132_v15  ;;  %v8289_v9 = vpop.eup %8288  ;;  %v2101_v30 = vsel %vm2098_vm10, %v2100_v10, %v2096_v53  ;;  %8290 = vrcp.f32 %v10074_v17  ;;  %v2077_v27 = vmul.f32 %v2076_v48, %v9872_v29  ;;  %v1922_v48 = vpop.f32.mrf.mxu2 }
 0x457   : > { %14211 = vst [vmem:[#allocation39_spill] sm:$0xff] %v10083_v32  ;;  %vm2138_vm12 = vcmp.eq.f32.partialorder %v2137_v28, 8.507059e+37  ;;  %v2169_v25 = vmul.f32 %v8289_v9, %v10039_v1  ;;  %v10092_v6 = vadd.f32 %v9747_v45, %v9990_v40  ;;  %v2117_v56 = vmul.f32 %v2116_v57, %v9875_v60 }
 0x458   : > { %v2141_v15 = vsel %vm2138_vm12, %v2140_v14, %v2136_v20  ;;  %v2196_v4 = vadd.f32 1.1283791, %v2195_v44  ;;  %v2267_v54 = vmul.f32 2.1237322e-06, %v10076_v46  ;;  %v2102_v58 = vmul.f32 %v2101_v30, %v2077_v27  ;;  %v1971_v27 = vpop.f32.mrf.mxu3 }
 0x459   : > { %14212 = vst [vmem:[#allocation40_spill] sm:$0xff] %v10092_v6  ;;  %v2157_v53 = vmul.f32 %v2156_v2, %v9909_v38  ;;  %v2170_v10 = vsub.f32 1.0, %v2169_v25  ;;  %v1814_v29 = vpack.c.bf16 %v10083_v32, %v10092_v6  ;;  %vm10099_vm13 = vcmp.eq.f32.partialorder %v2177_v36, 8.507059e+37  ;;  %v7986_v36 = vld [vmem:[#allocation17 + $0x8] sm:$0xff]  ;;  %v7985_v32 = vld [vmem:[#allocation17] sm:$0xff] }
 0x45a   : > { %v2180_v45 = vor.u32 1.1754944e-38, %v2179_v31  ;;  %v2228_v40 = vadd.f32 0.00028619796, %v2227_v39  ;;  %v10104_v60 = vadd.f32 %v1919_v7, %v9850_v62  ;;  %v2142_v57 = vmul.f32 %v2141_v15, %v2117_v56  ;;  %v7994_v7 = vld [vmem:[#allocation17 + $0x48] sm:$0xff]  ;;  %3563 = vmatpush.bf16.msrb.mxu0 %v7986_v36  ;;  %v7993_v6 = vld [vmem:[#allocation17 + $0x40] sm:$0xff] }
 0x45b   : > { %v2171_v63 = vmul.f32 %v8289_v9, %v2170_v10  ;;  %vm2174_vm14 = vweird.f32 %v8289_v9  ;;  %1936 = vmatmul.bf16.gmra.mxu2 %v1814_v29  ;;  %1985 = vmatmul.bf16.gmra.mxu3 %v1814_v29  ;;  %v10107_v38 = vadd.f32 %v1968_v11, %v9852_v24  ;;  %vm2173_vm15 = vweird.f32 %v10039_v1 }
 0x45c   : > { %v8291_v14 = vpop.eup %8290  ;;  %v2197_v44 = vmul.f32 %v2196_v4, %v9919_v47  ;;  %v2268_v20 = vadd.f32 0.00028619796, %v2267_v54  ;;  %v10112_v2 = vmul.f32 0.70710677, %v10104_v60  ;;  %v7622_v30 = vclamps-f32 %v2102_v58, 1.0  ;;  %vm2175_vm1 = vmor %vm2173_vm15, %vm2174_vm14  ;;  %3612 = vmatpush.bf16.msrb.mxu1 %v7994_v7 }
 0x45d   : > { %v2172_v31 = vadd.f32 %v8289_v9, %v2171_v63  ;;  %v2209_v39 = vmul.f32 %v8291_v14, %v10074_v17  ;;  %vm2213_vm0 = vweird.f32 %v10074_v17  ;;  %v2217_v11 = vand.u32 2147483647, %v10074_v17 }
 0x45e   : > { %v2219_v1 = vand.u32 2147483648, %v10074_v17  ;;  %v2305_v47 = vmul.f32 %v10112_v2, %v10112_v2  ;;  %v10122_v25 = vmul.f32 0.70710677, %v10107_v38  ;;  %v7623_v56 = vclamps-f32 %v2142_v57, 1.0  ;;  %3564 = vmatpush.bf16.msrb.mxu0 %v7985_v32 }
 0x45f   : > { %v2176_v15 = vsel %vm2175_vm1, %v8289_v9, %v2172_v31  ;;  %v2210_v4 = vsub.f32 1.0, %v2209_v39  ;;  %v10125_v54 = vadd.f32 %v1922_v48, %v9850_v62  ;;  %v2229_v10 = vmul.f32 %v2228_v40, %v10063_v5  ;;  %v1924_v31 = vpop.f32.mrf.mxu2 }
 0x460   : > { %v2181_v58 = vsel %vm10099_vm13, %v2180_v45, %v2176_v15  ;;  %v2269_v29 = vmul.f32 %v2268_v20, %v10076_v46  ;;  %v10131_v63 = vmin.f32 %v2305_v47, 16.0  ;;  %vm2214_vm2 = vweird.f32 %v8291_v14  ;;  %3613 = vmatpush.bf16.msrb.mxu1 %v7993_v6 }
 0x461   : > { %v2182_v23 = vmul.f32 %v2181_v58, %v2157_v53  ;;  %v2211_v36 = vmul.f32 %v8291_v14, %v2210_v4  ;;  %v2345_v9 = vmul.f32 %v10122_v25, %v10122_v25  ;;  %v3345_v57 = vadd.f32 1.0, %v7622_v30  ;;  %vm2215_vm4 = vmor %vm2213_vm0, %vm2214_vm2 }
 0x462   : > { %vm10135_vm3 = vcmp.eq.f32.partialorder %v2217_v11, 8.507059e+37  ;;  %v2220_v28 = vor.u32 1.1754944e-38, %v2219_v1  ;;  %v2307_v45 = vmul.f32 2.1237322e-06, %v10131_v63  ;;  %v10143_v53 = vmul.f32 0.70710677, %v10125_v54 }
 0x463   : > { %v7624_v40 = vclamps-f32 %v2182_v23, 1.0  ;;  %v2212_v20 = vadd.f32 %v8291_v14, %v2211_v36  ;;  %v10140_v7 = vmin.f32 %v2345_v9, 16.0  ;;  %v2230_v30 = vadd.f32 0.0036580483, %v2229_v10 }
 0x464   : > { %v2270_v39 = vadd.f32 0.0036580483, %v2269_v29  ;;  %v2308_v11 = vadd.f32 0.00028619796, %v2307_v45  ;;  %v10148_v1 = vadd.f32 %v1971_v27, %v9852_v24  ;;  %v2385_v6 = vmul.f32 %v10143_v53, %v10143_v53 }
 0x465   : > { %v3347_v47 = vadd.f32 1.0, %v7624_v40  ;;  %v2216_v32 = vsel %vm2215_vm4, %v8291_v14, %v2212_v20  ;;  %v2347_v23 = vmul.f32 2.1237322e-06, %v10140_v7  ;;  %v3346_v15 = vadd.f32 1.0, %v7623_v56  ;;  %v1973_v14 = vpop.f32.mrf.mxu3 }
 0x466   : > { %v2221_v4 = vsel %vm10135_vm3, %v2220_v28, %v2216_v32  ;;  %v2309_v17 = vmul.f32 %v2308_v11, %v10131_v63  ;;  %v10157_v58 = vadd.f32 %v1924_v31, %v9850_v62  ;;  %v10160_v36 = vmin.f32 %v2385_v6, 16.0 }
 0x467   : > { %v3379_v10 = vmul.f32 %v3347_v47, %v9999_v52  ;;  %v2222_v27 = vmul.f32 %v2221_v4, %v2197_v44  ;;  %v2348_v29 = vadd.f32 0.00028619796, %v2347_v23  ;;  %v3377_v9 = vmul.f32 %v3345_v57, %v9975_v26 }
 0x468   : > { %v2231_v45 = vmul.f32 %v2230_v30, %v10063_v5  ;;  %v2271_v56 = vmul.f32 %v2270_v39, %v10076_v46  ;;  %v10166_v48 = vmul.f32 0.70710677, %v10148_v1  ;;  %v2310_v40 = vadd.f32 0.0036580483, %v2309_v17 }
 0x469   : > { %v7625_v28 = vclamps-f32 %v2222_v27, 1.0  ;;  %v2349_v20 = vmul.f32 %v2348_v29, %v10140_v7  ;;  %v2387_v52 = vmul.f32 2.1237322e-06, %v10160_v36  ;;  %v10173_v31 = vmul.f32 0.70710677, %v10157_v58 }
 0x46a   : > { %v2425_v44 = vmul.f32 %v10166_v48, %v10166_v48  ;;  %v10176_v26 = vadd.f32 %v1973_v14, %v9852_v24  ;;  %v2238_v57 = vmul.f32 3.8918573e-05, %v10063_v5  ;;  %v3378_v30 = vmul.f32 %v3346_v15, %v9987_v12 }
 0x46b   : > { %v3348_v39 = vadd.f32 1.0, %v7625_v28  ;;  %v2350_v11 = vadd.f32 0.0036580483, %v2349_v20  ;;  %v3441_v47 = vpack.c.bf16 %v3379_v10, %v3377_v9  ;;  %v2232_v32 = vadd.f32 0.05243302, %v2231_v45 }
 0x46c   : > { %v2272_v23 = vadd.f32 0.05243302, %v2271_v56  ;;  %v10180_v6 = vmin.f32 %v2425_v44, 16.0  ;;  %v2465_v4 = vmul.f32 %v10173_v31, %v10173_v31  ;;  %v2311_v27 = vmul.f32 %v2310_v40, %v10131_v63 }
 0x46d   : > { %v3380_v17 = vmul.f32 %v3348_v39, %v10003_v37  ;;  %v2388_v29 = vadd.f32 0.00028619796, %v2387_v52  ;;  %v10187_v14 = vmul.f32 0.70710677, %v10176_v26  ;;  %3565 = vmatmul.bf16.vlgmr.msrb.gmra.mxu0 %v3441_v47  ;;  %v2239_v10 = vadd.f32 0.001143296, %v2238_v57 }
 0x46e   : > { %v2427_v12 = vmul.f32 2.1237322e-06, %v10180_v6  ;;  %v10190_v15 = vmin.f32 %v2465_v4, 16.0  ;;  %v2351_v9 = vmul.f32 %v2350_v11, %v10140_v7  ;;  %v2233_v37 = vmul.f32 %v2232_v32, %v10063_v5 }
 0x46f   : > { %v2505_v45 = vmul.f32 %v10187_v14, %v10187_v14  ;;  %v3442_v56 = vpack.c.bf16 %v3380_v17, %v3378_v30  ;;  %v2240_v40 = vmul.f32 %v2239_v10, %v10063_v5  ;;  %v1702_v20 = vmul.f32 0.5, %v10006_v18 }
 0x470   : > { %v2428_v28 = vadd.f32 0.00028619796, %v2427_v12  ;;  %v2312_v52 = vadd.f32 0.05243302, %v2311_v27  ;;  %v2389_v44 = vmul.f32 %v2388_v29, %v10160_v36  ;;  %v2318_v39 = vmul.f32 3.8918573e-05, %v10131_v63 }
 0x471   : > { %3614 = vmatmul.bf16.vlgmr.msrb.gmra.mxu1 %v3442_v56  ;;  %v2273_v57 = vmul.f32 %v2272_v23, %v10076_v46  ;;  %v2467_v11 = vmul.f32 2.1237322e-06, %v10190_v15  ;;  %v2241_v47 = vadd.f32 0.014752088, %v2240_v40  ;;  %v2352_v4 = vadd.f32 0.05243302, %v2351_v9 }
 0x472   : > { %v10202_v30 = vmin.f32 %v2505_v45, 16.0  ;;  %v2234_v32 = vadd.f32 0.18741608, %v2233_v37  ;;  %v2429_v17 = vmul.f32 %v2428_v28, %v10180_v6  ;;  %v1703_v18 = vsub.f32 1.5, %v1702_v20 }
 0x473   : > { %v2242_v12 = vmul.f32 %v2241_v47, %v10063_v5  ;;  %v2313_v27 = vmul.f32 %v2312_v52, %v10131_v63  ;;  %v2390_v29 = vadd.f32 0.0036580483, %v2389_v44  ;;  %v2319_v10 = vadd.f32 0.001143296, %v2318_v39 }
 0x474   : > { %v2274_v56 = vadd.f32 0.18741608, %v2273_v57  ;;  %v2468_v50 = vadd.f32 0.00028619796, %v2467_v11  ;;  %v2353_v23 = vmul.f32 %v2352_v4, %v10140_v7  ;;  %v2507_v40 = vmul.f32 2.1237322e-06, %v10202_v30 }
 0x475   : > { %v2243_v3 = vadd.f32 0.112945676, %v2242_v12  ;;  %v2320_v9 = vmul.f32 %v2319_v10, %v10131_v63  ;;  %v2235_v45 = vmul.f32 %v2234_v32, %v10063_v5  ;;  %v2430_v37 = vadd.f32 0.0036580483, %v2429_v17 }
 0x476   : > { %v2278_v20 = vmul.f32 3.8918573e-05, %v10076_v46  ;;  %v10214_v52 = vmul.f32 %v9959_v35, %v1703_v18  ;;  %v2314_v44 = vadd.f32 0.18741608, %v2313_v27  ;;  %v2391_v39 = vmul.f32 %v2390_v29, %v10160_v36 }
 0x477   : > { %v2244_v28 = vmul.f32 %v2243_v3, %v10063_v5  ;;  %v2321_v57 = vadd.f32 0.014752088, %v2320_v9  ;;  %v2275_v11 = vmul.f32 %v2274_v56, %v10076_v46  ;;  %v2469_v47 = vmul.f32 %v2468_v50, %v10190_v15 }
 0x478   : > { %v2279_v12 = vadd.f32 0.001143296, %v2278_v20  ;;  %v2354_v10 = vadd.f32 0.18741608, %v2353_v23  ;;  %v2508_v32 = vadd.f32 0.00028619796, %v2507_v40  ;;  %v2431_v18 = vmul.f32 %v2430_v37, %v10180_v6 }
 0x479   : > { %v2245_v4 = vadd.f32 0.4994258, %v2244_v28  ;;  %v2322_v17 = vmul.f32 %v2321_v57, %v10131_v63  ;;  %v2358_v3 = vmul.f32 3.8918573e-05, %v10140_v7  ;;  %v2236_v51 = vadd.f32 1.1283791, %v2235_v45 }
 0x47a   : > { %v2280_v29 = vmul.f32 %v2279_v12, %v10076_v46  ;;  %v2315_v9 = vmul.f32 %v2314_v44, %v10131_v63  ;;  %v2392_v56 = vadd.f32 0.05243302, %v2391_v39  ;;  %v10226_v28 = vmul.f32 0.5, %v9993_v61 }
 0x47b   : > { %v2246_v27 = vmul.f32 %v2245_v4, %v10063_v5  ;;  %v2323_v42 = vadd.f32 0.112945676, %v2322_v17  ;;  %v2359_v50 = vadd.f32 0.001143296, %v2358_v3  ;;  %v2470_v23 = vadd.f32 0.0036580483, %v2469_v47 }
 0x47c   : > { %v2281_v20 = vadd.f32 0.014752088, %v2280_v29  ;;  %v2355_v45 = vmul.f32 %v2354_v10, %v10140_v7  ;;  %v2509_v37 = vmul.f32 %v2508_v32, %v10202_v30  ;;  %v10235_v44 = vmul.f32 0.5, %v10011_v22 }
 0x47d   : > { %v10228_v40 = vadd.f32 1.0, %v2246_v27  ;;  %v2324_v5 = vmul.f32 %v2323_v42, %v10131_v63  ;;  %v2360_v57 = vmul.f32 %v2359_v50, %v10140_v7  ;;  %v2432_v39 = vadd.f32 0.05243302, %v2431_v18 }
 0x47e   : > { %v2398_v61 = vmul.f32 3.8918573e-05, %v10160_v36  ;;  %v2276_v47 = vadd.f32 1.1283791, %v2275_v11  ;;  %v2316_v4 = vadd.f32 1.1283791, %v2315_v9  ;;  %v2393_v12 = vmul.f32 %v2392_v56, %v10160_v36 }
 0x47f   : > { %8292 = vrcp.f32 %v10228_v40  ;;  %v2282_v10 = vmul.f32 %v2281_v20, %v10076_v46  ;;  %v10242_v32 = vmul.f32 0.5, %v10104_v60  ;;  %v2471_v42 = vmul.f32 %v2470_v23, %v10190_v15 }
 0x480   : > { %v2325_v17 = vadd.f32 0.4994258, %v2324_v5  ;;  %v2361_v3 = vadd.f32 0.014752088, %v2360_v57  ;;  %v10246_v22 = vmul.f32 %v2236_v51, %v10024_v21  ;;  %v2356_v18 = vadd.f32 1.1283791, %v2355_v45 }
 0x481   : > { %v2510_v27 = vadd.f32 0.0036580483, %v2509_v37  ;;  %v2283_v29 = vadd.f32 0.112945676, %v2282_v10  ;;  %v2433_v11 = vmul.f32 %v2432_v39, %v10180_v6  ;;  %v2399_v50 = vadd.f32 0.001143296, %v2398_v61 }
 0x482   : > { %v2326_v9 = vmul.f32 %v2325_v17, %v10131_v63  ;;  %v2362_v56 = vmul.f32 %v2361_v3, %v10140_v7  ;;  %v10252_v60 = vmul.f32 %v2276_v47, %v10032_v0  ;;  %v10255_v23 = vmul.f32 %v2316_v4, %v10112_v2 }
 0x483   : > { %v2394_v20 = vadd.f32 0.18741608, %v2393_v12  ;;  %v2284_v51 = vmul.f32 %v2283_v29, %v10076_v46  ;;  %v2472_v45 = vadd.f32 0.05243302, %v2471_v42  ;;  %v2400_v57 = vmul.f32 %v2399_v50, %v10160_v36 }
 0x484   : > { %v10258_v37 = vadd.f32 1.0, %v2326_v9  ;;  %v2363_v5 = vadd.f32 0.112945676, %v2362_v56  ;;  %v10262_v63 = vmul.f32 %v2356_v18, %v10122_v25  ;;  %v2511_v39 = vmul.f32 %v2510_v27, %v10202_v30 }
 0x485   : > { %v8293_v21 = vpop.eup %8292  ;;  %v2285_v61 = vadd.f32 0.4994258, %v2284_v51  ;;  %v2434_v2 = vadd.f32 0.18741608, %v2433_v11  ;;  %v2257_v47 = vand.u32 2147483647, %v10228_v40  ;;  %v10273_v17 = vmul.f32 %v2394_v20, %v10160_v36 }
 0x486   : > { %v2249_v0 = vmul.f32 %v8293_v21, %v10228_v40  ;;  %v2259_v4 = vand.u32 2147483648, %v10228_v40  ;;  %8294 = vrcp.f32 %v10258_v37  ;;  %v2364_v42 = vmul.f32 %v2363_v5, %v10140_v7 }
 0x487   : > { %v2286_v10 = vmul.f32 %v2285_v61, %v10076_v46  ;;  %v2478_v25 = vmul.f32 3.8918573e-05, %v10190_v15  ;;  %v10276_v3 = vmul.f32 %v2472_v45, %v10190_v15  ;;  %v2401_v18 = vadd.f32 0.014752088, %v2400_v57  ;;  %v1542_v45 = vpop.xlane.xlu1 %1541 }
 0x488   : > { %v2250_v12 = vsub.f32 1.0, %v2249_v0  ;;  %v2438_v27 = vmul.f32 3.8918573e-05, %v10180_v6  ;;  %vm2254_vm5 = vweird.f32 %v8293_v21  ;;  %v2365_v9 = vadd.f32 0.4994258, %v2364_v42 }
 0x489   : > { %v10279_v11 = vadd.f32 1.0, %v2286_v10  ;;  %v10282_v46 = vmul.f32 %v2434_v2, %v10180_v6  ;;  %v10284_v56 = vadd.f32 0.05243302, %v2511_v39  ;;  %vm2253_vm6 = vweird.f32 %v10228_v40 }
 0x48a   : > { %v2251_v29 = vmul.f32 %v8293_v21, %v2250_v12  ;;  %vm10287_vm7 = vcmp.eq.f32.partialorder %v2257_v47, 8.507059e+37  ;;  %v2260_v51 = vor.u32 1.1754944e-38, %v2259_v4  ;;  %v2479_v5 = vadd.f32 0.001143296, %v2478_v25  ;;  %vm2255_vm8 = vmor %vm2253_vm6, %vm2254_vm5 }
 0x48b   : > { %8296 = vrcp.f32 %v10279_v11  ;;  %v2366_v0 = vmul.f32 %v2365_v9, %v10140_v7  ;;  %v1560_v61 = vmul.f32 %v1542_v45, %v9294_v13  ;;  %v2402_v39 = vmul.f32 %v2401_v18, %v10160_v36  ;;  %v1544_v9 = vpop.xlane.xlu2 %1543 }
 0x48c   : > { %v2252_v20 = vadd.f32 %v8293_v21, %v2251_v29  ;;  %v8295_v57 = vpop.eup %8294  ;;  %v2439_v2 = vadd.f32 0.001143296, %v2438_v27  ;;  %v2337_v12 = vand.u32 2147483647, %v10258_v37  ;;  %v2518_v4 = vmul.f32 3.8918573e-05, %v10202_v30 }
 0x48d   : > { %v2329_v47 = vmul.f32 %v8295_v57, %v10258_v37  ;;  %v2339_v42 = vand.u32 2147483648, %v10258_v37  ;;  %v10301_v25 = vadd.f32 1.0, %v2366_v0  ;;  %v10303_v7 = vadd.f32 1e-05, %v1560_v61 }
 0x48e   : > { %v2256_v40 = vsel %vm2255_vm8, %v8293_v21, %v2252_v20  ;;  %vm2333_vm9 = vweird.f32 %v10258_v37  ;;  %v2297_v21 = vand.u32 2147483647, %v10279_v11  ;;  %v2480_v18 = vmul.f32 %v2479_v5, %v10190_v15 }
 0x48f   : > { %v2261_v10 = vsel %vm10287_vm7, %v2260_v51, %v2256_v40  ;;  %v2330_v29 = vsub.f32 1.0, %v2329_v47  ;;  %v2299_v27 = vand.u32 2147483648, %v10279_v11  ;;  %8298 = vrcp.f32 %v10301_v25 }
 0x490   : > { %v2403_v50 = vadd.f32 0.112945676, %v2402_v39  ;;  %v2440_v20 = vmul.f32 %v2439_v2, %v10180_v6  ;;  %v2262_v45 = vmul.f32 %v2261_v10, %v10246_v22  ;;  %vm2334_vm10 = vweird.f32 %v8295_v57 }
 0x491   : > { %v8297_v51 = vpop.eup %8296  ;;  %v2331_v0 = vmul.f32 %v8295_v57, %v2330_v29  ;;  %8300 = vrsqrt.f32 %v10303_v7  ;;  %vm10313_vm11 = vcmp.eq.f32.partialorder %v2337_v12, 8.507059e+37  ;;  %v2340_v5 = vor.u32 1.1754944e-38, %v2339_v42  ;;  %vm2335_vm14 = vmor %vm2333_vm9, %vm2334_vm10 }
 0x492   : > { %v2289_v40 = vmul.f32 %v8297_v51, %v10279_v11  ;;  %v2519_v47 = vadd.f32 0.001143296, %v2518_v4  ;;  %vm2293_vm12 = vweird.f32 %v10279_v11  ;;  %vm10319_vm13 = vcmp.eq.f32.partialorder %v2297_v21, 8.507059e+37 }
 0x493   : > { %v2332_v33 = vadd.f32 %v8295_v57, %v2331_v0  ;;  %v1561_v22 = vmul.f32 %v1544_v9, %v9294_v13  ;;  %v2300_v12 = vor.u32 1.1754944e-38, %v2299_v27  ;;  %v2404_v10 = vmul.f32 %v2403_v50, %v10160_v36 }
 0x494   : > { %v2290_v2 = vsub.f32 1.0, %v2289_v40  ;;  %v2481_v42 = vadd.f32 0.014752088, %v2480_v18  ;;  %vm1706_vm15 = vweird.f32 %v9959_v35  ;;  %v7626_v4 = vclamps-f32 %v2262_v45, 1.0 }
 0x495   : > { %v2336_v29 = vsel %vm2335_vm14, %v8295_v57, %v2332_v33  ;;  %vm2294_vm0 = vweird.f32 %v8297_v51  ;;  %v2441_v0 = vadd.f32 0.014752088, %v2440_v20  ;;  %v8299_v21 = vpop.eup %8298  ;;  %v2405_v9 = vadd.f32 0.4994258, %v2404_v10 }
 0x496   : > { %v2341_v41 = vsel %vm10313_vm11, %v2340_v5, %v2336_v29  ;;  %v2291_v16 = vmul.f32 %v8297_v51, %v2290_v2  ;;  %v2482_v37 = vmul.f32 %v2481_v42, %v10190_v15  ;;  %vm1705_vm1 = vweird.f32 %v9927_v55  ;;  %vm2295_vm3 = vmor %vm2293_vm12, %vm2294_vm0 }
 0x497   : > { %v10331_v34 = vpop.eup %8300  ;;  %v2342_v18 = vmul.f32 %v2341_v41, %v10255_v23  ;;  %v2369_v27 = vmul.f32 %v8299_v21, %v10301_v25  ;;  %vm2373_vm2 = vweird.f32 %v10301_v25  ;;  %v10337_v33 = vadd.f32 1e-05, %v1561_v22  ;;  %vm10371_vm7 = vmor %vm1705_vm1, %vm1706_vm15 }
 0x498   : > { %v2292_v57 = vadd.f32 %v8297_v51, %v2291_v16  ;;  %v2377_v50 = vand.u32 2147483647, %v10301_v25  ;;  %v2379_v20 = vand.u32 2147483648, %v10301_v25  ;;  %v2406_v45 = vmul.f32 %v2405_v9, %v10160_v36 }
 0x499   : > { %v7628_v61 = vclamps-f32 %v2342_v18, 1.0  ;;  %v3349_v5 = vadd.f32 1.0, %v7626_v4  ;;  %v2370_v41 = vsub.f32 1.0, %v2369_v27  ;;  %v2483_v23 = vadd.f32 0.112945676, %v2482_v37 }
 0x49a   : > { %v2296_v40 = vsel %vm2295_vm3, %v8297_v51, %v2292_v57  ;;  %vm2374_vm4 = vweird.f32 %v8299_v21  ;;  %v1710_v22 = vmul.f32 %v10331_v34, %v10303_v7  ;;  %v2442_v16 = vmul.f32 %v2441_v0, %v10180_v6 }
 0x49b   : > { %v3351_v2 = vadd.f32 1.0, %v7628_v61  ;;  %v2301_v10 = vsel %vm10319_vm13, %v2300_v12, %v2296_v40  ;;  %v2371_v36 = vmul.f32 %v8299_v21, %v2370_v41  ;;  %v10350_v42 = vadd.f32 1.0, %v2406_v45  ;;  %vm2375_vm6 = vmor %vm2373_vm2, %vm2374_vm4 }
 0x49c   : > { %v2302_v4 = vmul.f32 %v2301_v10, %v10252_v60  ;;  %vm10353_vm5 = vcmp.eq.f32.partialorder %v2377_v50, 8.507059e+37  ;;  %8302 = vrsqrt.f32 %v10337_v33  ;;  %v2484_v51 = vmul.f32 %v2483_v23, %v10190_v15 }
 0x49d   : > { %v3381_v29 = vmul.f32 %v3349_v5, %v10226_v28  ;;  %v3383_v0 = vmul.f32 %v3351_v2, %v10242_v32  ;;  %v2372_v9 = vadd.f32 %v8299_v21, %v2371_v36  ;;  %8304 = vrcp.f32 %v10350_v42 }
 0x49e   : > { %v2380_v60 = vor.u32 1.1754944e-38, %v2379_v20  ;;  %v1711_v39 = vmul.f32 %v10331_v34, %v1710_v22  ;;  %v2443_v12 = vadd.f32 0.112945676, %v2442_v16  ;;  %v2520_v37 = vmul.f32 %v2519_v47, %v10202_v30 }
 0x49f   : > { %v3443_v18 = vpack.c.bf16 %v3383_v0, %v3381_v29  ;;  %v7627_v27 = vclamps-f32 %v2302_v4, 1.0  ;;  %v2376_v57 = vsel %vm2375_vm6, %v8299_v21, %v2372_v9  ;;  %v2485_v50 = vadd.f32 0.4994258, %v2484_v51 }
 0x4a0   : > { %v2008_v32 = vmul.f32 0.5, %v10107_v38  ;;  %v10377_v25 = vmul.f32 0.5, %v10125_v54  ;;  %v2474_v20 = vadd.f32 0.18741608, %v10276_v3  ;;  %v2381_v47 = vsel %vm10353_vm5, %v2380_v60, %v2376_v57 }
 0x4a1   : > { %v2513_v21 = vmul.f32 %v10284_v56, %v10202_v30  ;;  %3570 = vmatmul.bf16.gmra.mxu0 %v3443_v18  ;;  %v2382_v55 = vmul.f32 %v2381_v47, %v10262_v63  ;;  %v2486_v45 = vmul.f32 %v2485_v50, %v10190_v15  ;;  %v1708_v38 = vsel %vm10371_vm7, %v9959_v35, %v10214_v52 }
 0x4a2   : > { %v10390_v54 = vpop.eup %8302  ;;  %v2396_v3 = vadd.f32 1.1283791, %v10273_v17  ;;  %v1712_v61 = vmul.f32 0.5, %v1711_v39  ;;  %v2444_v5 = vmul.f32 %v2443_v12, %v10180_v6  ;;  %v2521_v41 = vadd.f32 0.014752088, %v2520_v37 }
 0x4a3   : > { %v8305_v23 = vpop.eup %8304  ;;  %v10395_v56 = vadd.f32 1.1283791, %v10282_v46  ;;  %v7629_v63 = vclamps-f32 %v2382_v55, 1.0  ;;  %v3350_v40 = vadd.f32 1.0, %v7627_v27  ;;  %v10397_v22 = vadd.f32 1.0, %v2486_v45 }
 0x4a4   : > { %v2475_v16 = vmul.f32 %v2474_v20, %v10190_v15  ;;  %v2409_v35 = vmul.f32 %v8305_v23, %v10350_v42  ;;  %v2445_v52 = vadd.f32 0.4994258, %v2444_v5  ;;  %v2522_v2 = vmul.f32 %v2521_v41, %v10202_v30 }
 0x4a5   : > { %v2514_v17 = vadd.f32 0.18741608, %v2513_v21  ;;  %v3352_v10 = vadd.f32 1.0, %v7629_v63  ;;  %v1720_v36 = vmul.f32 %v10390_v54, %v10337_v33  ;;  %8306 = vrcp.f32 %v10397_v22  ;;  %v1546_v21 = vpop.xlane.xlu0 %1545 }
 0x4a6   : > { %v1713_v46 = vsub.f32 1.5, %v1712_v61  ;;  %v2410_v4 = vsub.f32 1.0, %v2409_v35  ;;  %v2446_v11 = vmul.f32 %v2445_v52, %v10180_v6  ;;  %v2523_v51 = vadd.f32 0.112945676, %v2522_v2 }
 0x4a7   : > { %v3382_v29 = vmul.f32 %v3350_v40, %v10235_v44  ;;  %v3384_v15 = vmul.f32 %v3352_v10, %v2008_v32  ;;  %v2417_v0 = vand.u32 2147483647, %v10350_v42  ;;  %v2419_v9 = vand.u32 2147483648, %v10350_v42 }
 0x4a8   : > { %v2411_v60 = vmul.f32 %v8305_v23, %v2410_v4  ;;  %vm2414_vm8 = vweird.f32 %v8305_v23  ;;  %v10409_v39 = vadd.f32 1.0, %v2446_v11  ;;  %v2524_v12 = vmul.f32 %v2523_v51, %v10202_v30  ;;  %v10442_v11 = vld [vmem:[#allocation14] ss:$0 sm:$0xff] }
 0x4a9   : > { %v3444_v37 = vpack.c.bf16 %v3384_v15, %v3382_v29  ;;  %vm1716_vm9 = vweird.f32 %v10331_v34  ;;  %v1721_v18 = vmul.f32 %v10390_v54, %v1720_v36  ;;  %v1751_v6 = vmul.f32 %v1708_v38, %v9784_v43 }
 0x4aa   : > { %v1714_v44 = vmul.f32 %v10331_v34, %v1713_v46  ;;  %v2412_v27 = vadd.f32 %v8305_v23, %v2411_v60  ;;  %vm2413_vm10 = vweird.f32 %v10350_v42  ;;  %8308 = vrcp.f32 %v10409_v39 }
 0x4ab   : > { %v8307_v57 = vpop.eup %8306  ;;  %v2397_v50 = vmul.f32 %v2396_v3, %v10143_v53  ;;  %v2476_v28 = vadd.f32 1.1283791, %v2475_v16  ;;  %3619 = vmatmul.bf16.gmra.mxu1 %v3444_v37  ;;  %vm2415_vm11 = vmor %vm2413_vm10, %vm2414_vm8  ;;  %v2420_v32 = vor.u32 1.1754944e-38, %v2419_v9  ;;  %v2525_v20 = vadd.f32 0.4994258, %v2524_v12 }
 0x4ac   : > { %vm1715_vm12 = vweird.f32 %v10303_v7  ;;  %v2416_v47 = vsel %vm2415_vm11, %v8305_v23, %v2412_v27  ;;  %vm2418_vm13 = vcmp.eq.f32.partialorder %v2417_v0, 8.507059e+37  ;;  %v2489_v43 = vmul.f32 %v8307_v57, %v10397_v22  ;;  %v10428_v7 = vld [vmem:[#allocation13] ss:$0 sm:$0xff] }
 0x4ad   : > { %vm1717_vm14 = vmor %vm1715_vm12, %vm1716_vm9  ;;  %v1722_v42 = vmul.f32 0.5, %v1721_v18  ;;  %v2421_v55 = vsel %vm2418_vm13, %v2420_v32, %v2416_v47  ;;  %v2526_v53 = vmul.f32 %v2525_v20, %v10202_v30  ;;  %v1562_v45 = vmul.f32 %v1546_v21, %v9294_v13 }
 0x4ae   : > { %v2490_v38 = vsub.f32 1.0, %v2489_v43  ;;  %v2499_v3 = vand.u32 2147483648, %v10397_v22  ;;  %v1718_v61 = vsel %vm1717_vm14, %v10331_v34, %v1714_v44  ;;  %v1770_v5 = vmul.f32 %v10428_v7, %v1751_v6 }
 0x4af   : > { %v2422_v41 = vmul.f32 %v2421_v55, %v2397_v50  ;;  %v10431_v23 = vadd.f32 1.0, %v2526_v53  ;;  %v10433_v63 = vadd.f32 1e-05, %v1562_v45  ;;  %v1752_v40 = vmul.f32 %v1718_v61, %v9812_v8 }
 0x4b0   : > { %v8309_v16 = vpop.eup %8308  ;;  %v2515_v35 = vmul.f32 %v2514_v17, %v10202_v30  ;;  %v2491_v52 = vmul.f32 %v8307_v57, %v2490_v38  ;;  %vm2494_vm15 = vweird.f32 %v8307_v57  ;;  %v2497_v2 = vand.u32 2147483647, %v10397_v22 }
 0x4b1   : > { %v2477_v34 = vmul.f32 %v2476_v28, %v10173_v31  ;;  %v1723_v10 = vsub.f32 1.5, %v1722_v42  ;;  %v2449_v36 = vmul.f32 %v8309_v16, %v10409_v39  ;;  %8310 = vrcp.f32 %v10431_v23 }
 0x4b2   : > { %v2492_v46 = vadd.f32 %v8307_v57, %v2491_v52  ;;  %vm2493_vm0 = vweird.f32 %v10397_v22  ;;  %v2500_v4 = vor.u32 1.1754944e-38, %v2499_v3  ;;  %v10445_v8 = vadd.f32 %v10442_v11, %v1770_v5  ;;  %v10451_v22 = vpop.f32.mrf.mxu2 }
 0x4b3   : > { %v7630_v30 = vclamps-f32 %v2422_v41, 1.0  ;;  %vm2495_vm1 = vmor %vm2493_vm0, %vm2494_vm15  ;;  %v2450_v17 = vsub.f32 1.0, %v2449_v36  ;;  %8312 = vrsqrt.f32 %v10433_v63  ;;  %v1771_v31 = vmul.f32 %v10428_v7, %v1752_v40 }
 0x4b4   : > { %14227 = vst [vmem:[#allocation41_spill] sm:$0xff] %v10445_v8  ;;  %v2496_v51 = vsel %vm2495_vm1, %v8307_v57, %v2492_v46  ;;  %vm2498_vm2 = vcmp.eq.f32.partialorder %v2497_v2, 8.507059e+37  ;;  %v2457_v29 = vand.u32 2147483647, %v10409_v39  ;;  %v2459_v15 = vand.u32 2147483648, %v10409_v39 }
 0x4b5   : > { %v2501_v0 = vsel %vm2498_vm2, %v2500_v4, %v2496_v51  ;;  %v2451_v9 = vmul.f32 %v8309_v16, %v2450_v17  ;;  %vm2454_vm3 = vweird.f32 %v8309_v16  ;;  %v10454_v60 = vadd.f32 %v10442_v11, %v1771_v31 }
 0x4b6   : > { %v2437_v12 = vmul.f32 %v10395_v56, %v10166_v48  ;;  %v2011_v37 = vmul.f32 0.5, %v10157_v58  ;;  %v2516_v18 = vadd.f32 1.1283791, %v2515_v35  ;;  %v2502_v6 = vmul.f32 %v2501_v0, %v2477_v34 }
 0x4b7   : > { %14228 = vst [vmem:[#allocation42_spill] sm:$0xff] %v10454_v60  ;;  %v8311_v44 = vpop.eup %8310  ;;  %v3353_v27 = vadd.f32 1.0, %v7630_v30  ;;  %v2452_v57 = vadd.f32 %v8309_v16, %v2451_v9  ;;  %vm2453_vm4 = vweird.f32 %v10409_v39  ;;  %v1815_v50 = vpack.c.bf16 %v10454_v60, %v10445_v8 }
 0x4b8   : > { %vm1725_vm5 = vweird.f32 %v10337_v33  ;;  %v7632_v28 = vclamps-f32 %v2502_v6, 1.0  ;;  %vm2455_vm6 = vmor %vm2453_vm4, %vm2454_vm3  ;;  %v2460_v32 = vor.u32 1.1754944e-38, %v2459_v15  ;;  %v2529_v20 = vmul.f32 %v8311_v44, %v10431_v23 }
 0x4b9   : > { %v8313_v48 = vpop.eup %8312  ;;  %v1724_v58 = vmul.f32 %v10390_v54, %v1723_v10  ;;  %vm1726_vm7 = vweird.f32 %v10390_v54  ;;  %v2456_v56 = vsel %vm2455_vm6, %v8309_v16, %v2452_v57  ;;  %vm2458_vm8 = vcmp.eq.f32.partialorder %v2457_v29, 8.507059e+37  ;;  %1941 = vmatmul.bf16.gmra.mxu2 %v1815_v50  ;;  %1990 = vmatmul.bf16.gmra.mxu3 %v1815_v50 }
 0x4ba   : > { %v3355_v39 = vadd.f32 1.0, %v7632_v28  ;;  %v2461_v47 = vsel %vm2458_vm8, %v2460_v32, %v2456_v56  ;;  %v2530_v43 = vsub.f32 1.0, %v2529_v20  ;;  %v1730_v21 = vmul.f32 %v8313_v48, %v10433_v63  ;;  %vm10474_vm10 = vmor %vm1725_vm5, %vm1726_vm7  ;;  %v1929_v35 = vpop.f32.mrf.mxu2 }
 0x4bb   : > { %v3385_v42 = vmul.f32 %v3353_v27, %v10377_v25  ;;  %vm2534_vm9 = vweird.f32 %v8311_v44  ;;  %v2537_v55 = vand.u32 2147483647, %v10431_v23  ;;  %v2539_v53 = vand.u32 2147483648, %v10431_v23 }
 0x4bc   : > { %v3387_v45 = vmul.f32 %v3355_v39, %v2011_v37  ;;  %v2462_v38 = vmul.f32 %v2461_v47, %v2437_v12  ;;  %v2531_v3 = vmul.f32 %v8311_v44, %v2530_v43  ;;  %v1731_v61 = vmul.f32 %v8313_v48, %v1730_v21 }
 0x4bd   : > { %vm2533_vm11 = vweird.f32 %v10431_v23  ;;  %v1728_v16 = vsel %vm10474_vm10, %v10390_v54, %v1724_v58  ;;  %v2517_v52 = vmul.f32 %v2516_v18, %v10187_v14  ;;  %vm2538_vm13 = vcmp.eq.f32.partialorder %v2537_v55, 8.507059e+37  ;;  %v1976_v54 = vpop.f32.mrf.mxu3 }
 0x4be   : > { %v3445_v25 = vpack.c.bf16 %v3387_v45, %v3385_v42  ;;  %v2532_v41 = vadd.f32 %v8311_v44, %v2531_v3  ;;  %v1732_v40 = vmul.f32 0.5, %v1731_v61  ;;  %vm2535_vm12 = vmor %vm2533_vm11, %vm2534_vm9  ;;  %v2540_v33 = vor.u32 1.1754944e-38, %v2539_v53 }
 0x4bf   : > { %v7631_v2 = vclamps-f32 %v2462_v38, 1.0  ;;  %vm1736_vm14 = vweird.f32 %v8313_v48  ;;  %v1753_v36 = vmul.f32 %v1728_v16, %v9819_v19  ;;  %vm1735_vm15 = vweird.f32 %v10433_v63 }
 0x4c0   : > { %3575 = vmatmul.bf16.gmra.mxu0 %v3445_v25  ;;  %v2536_v34 = vsel %vm2535_vm12, %v8311_v44, %v2532_v41  ;;  %v1733_v10 = vsub.f32 1.5, %v1732_v40  ;;  %vm1737_vm0 = vmor %vm1735_vm15, %vm1736_vm14  ;;  %v2010_v29 = vmul.f32 0.5, %v10148_v1  ;;  %v2012_v15 = vmul.f32 0.5, %v10176_v26 }
 0x4c1   : > { %v2541_v23 = vsel %vm2538_vm13, %v2540_v33, %v2536_v34  ;;  %v3354_v14 = vadd.f32 1.0, %v7631_v2  ;;  %v1772_v51 = vmul.f32 %v10428_v7, %v1753_v36  ;;  %v10522_v58 = vadd.f32 %v10451_v22, %v9850_v62 }
 0x4c2   : > { %v2542_v46 = vmul.f32 %v2541_v23, %v2517_v52  ;;  %v1734_v4 = vmul.f32 %v8313_v48, %v1733_v10  ;;  %v1932_v37 = vpop.f32.mrf.mxu2  ;;  %v10530_v43 = vadd.f32 %v1976_v54, %v9852_v24  ;;  %v10544_v5 = vadd.f32 %v1929_v35, %v9850_v62 }
 0x4c3   : > { %v3386_v9 = vmul.f32 %v3354_v14, %v2010_v29  ;;  %v10492_v63 = vadd.f32 %v10442_v11, %v1772_v51  ;;  %v10500_v1 = vadd.f32 %v1932_v37, %v9850_v62  ;;  %v10527_v47 = vmul.f32 0.70710677, %v10522_v58 }
 0x4c4   : > { %v7633_v30 = vclamps-f32 %v2542_v46, 1.0  ;;  %v1738_v17 = vsel %vm1737_vm0, %v8313_v48, %v1734_v4  ;;  %v10535_v53 = vmul.f32 0.70710677, %v10530_v43  ;;  %v10553_v33 = vmul.f32 0.70710677, %v10544_v5 }
 0x4c5   : > { %v1754_v31 = vmul.f32 %v1738_v17, %v9826_v59  ;;  %14231 = vst [vmem:[#allocation43_spill] sm:$0xff] %v10492_v63  ;;  %v1978_v26 = vpop.f32.mrf.mxu3  ;;  %v2545_v55 = vmul.f32 %v10527_v47, %v10527_v47 }
 0x4c6   : > { %v3356_v0 = vadd.f32 1.0, %v7633_v30  ;;  %v2585_v61 = vmul.f32 %v10535_v53, %v10535_v53  ;;  %v2625_v36 = vmul.f32 %v10553_v33, %v10553_v33  ;;  %v10566_v4 = vadd.f32 %v1978_v26, %v9852_v24 }
 0x4c7   : > { %v1773_v19 = vmul.f32 %v10428_v7, %v1754_v31  ;;  %v10503_v7 = vmul.f32 0.70710677, %v10500_v1  ;;  %v10539_v38 = vmin.f32 %v2545_v55, 16.0 }
 0x4c8   : > { %v3388_v12 = vmul.f32 %v3356_v0, %v2012_v15  ;;  %v10550_v52 = vmin.f32 %v2585_v61, 16.0  ;;  %v10570_v51 = vmin.f32 %v2625_v36, 16.0  ;;  %v10575_v15 = vmul.f32 0.70710677, %v10566_v4 }
 0x4c9   : > { %v10495_v18 = vadd.f32 %v10442_v11, %v1773_v19  ;;  %v2705_v44 = vmul.f32 %v10503_v7, %v10503_v7  ;;  %v2547_v16 = vmul.f32 2.1237322e-06, %v10539_v38 }
 0x4ca   : > { %v3446_v6 = vpack.c.bf16 %v3388_v12, %v3386_v9  ;;  %v1934_v3 = vpop.f32.mrf.mxu2  ;;  %v2587_v23 = vmul.f32 2.1237322e-06, %v10550_v52  ;;  %v2665_v26 = vmul.f32 %v10575_v15, %v10575_v15 }
 0x4cb   : > { %14232 = vst [vmem:[#allocation44_spill] sm:$0xff] %v10495_v18  ;;  %v1816_v59 = vpack.c.bf16 %v10495_v18, %v10492_v63  ;;  %v10507_v27 = vmin.f32 %v2705_v44, 16.0  ;;  %v10547_v25 = vadd.f32 %v1934_v3, %v9850_v62  ;;  %v2548_v10 = vadd.f32 0.00028619796, %v2547_v16 }
 0x4cc   : > { %3624 = vmatmul.bf16.gmra.mxu1 %v3446_v6  ;;  %v2588_v31 = vadd.f32 0.00028619796, %v2587_v23  ;;  %v2627_v6 = vmul.f32 2.1237322e-06, %v10570_v51 }
 0x4cd   : > { %1946 = vmatmul.bf16.gmra.mxu2 %v1816_v59  ;;  %1995 = vmatmul.bf16.gmra.mxu3 %v1816_v59  ;;  %v1981_v11 = vpop.f32.mrf.mxu3  ;;  %v2718_v50 = vmul.f32 3.8918573e-05, %v10507_v27  ;;  %v10556_v2 = vmul.f32 0.70710677, %v10547_v25  ;;  %v2707_v54 = vmul.f32 2.1237322e-06, %v10507_v27  ;;  %v2549_v17 = vmul.f32 %v2548_v10, %v10539_v38 }
 0x4ce   : > { %v10510_v57 = vadd.f32 %v1981_v11, %v9852_v24  ;;  %v2589_v37 = vmul.f32 %v2588_v31, %v10550_v52 }
 0x4cf   : > { %v2719_v20 = vadd.f32 0.001143296, %v2718_v50  ;;  %v2785_v46 = vmul.f32 %v10556_v2, %v10556_v2  ;;  %v2708_v0 = vadd.f32 0.00028619796, %v2707_v54  ;;  %v2550_v12 = vadd.f32 0.0036580483, %v2549_v17 }
 0x4d0   : > { %v10514_v28 = vmul.f32 0.70710677, %v10510_v57 }
 0x4d1   : > { %v2720_v56 = vmul.f32 %v2719_v20, %v10507_v27  ;;  %v10572_v29 = vmin.f32 %v2785_v46, 16.0  ;;  %v2709_v44 = vmul.f32 %v2708_v0, %v10507_v27  ;;  %v2551_v20 = vmul.f32 %v2550_v12, %v10539_v38 }
 0x4d2   : > { %v2745_v32 = vmul.f32 %v10514_v28, %v10514_v28 }
 0x4d3   : > { %v2721_v21 = vadd.f32 0.014752088, %v2720_v56  ;;  %v2798_v59 = vmul.f32 3.8918573e-05, %v10572_v29  ;;  %v2590_v56 = vadd.f32 0.0036580483, %v2589_v37 }
 0x4d4   : > { %v10518_v48 = vmin.f32 %v2745_v32, 16.0  ;;  %v2710_v55 = vadd.f32 0.0036580483, %v2709_v44 }
 0x4d5   : > { %v2722_v22 = vmul.f32 %v2721_v21, %v10507_v27  ;;  %v2799_v21 = vadd.f32 0.001143296, %v2798_v59 }
 0x4d6   : > { %v2758_v39 = vmul.f32 3.8918573e-05, %v10518_v48  ;;  %v2747_v50 = vmul.f32 2.1237322e-06, %v10518_v48  ;;  %v2711_v23 = vmul.f32 %v2710_v55, %v10507_v27 }
 0x4d7   : > { %v2723_v41 = vadd.f32 0.112945676, %v2722_v22  ;;  %v1983_v22 = vpop.f32.mrf.mxu3  ;;  %v2800_v16 = vmul.f32 %v2799_v21, %v10572_v29 }
 0x4d8   : > { %v2759_v42 = vadd.f32 0.001143296, %v2758_v39  ;;  %v2628_v39 = vadd.f32 0.00028619796, %v2627_v6  ;;  %v2748_v3 = vadd.f32 0.00028619796, %v2747_v50 }
 0x4d9   : > { %v2724_v34 = vmul.f32 %v2723_v41, %v10507_v27  ;;  %v2552_v41 = vadd.f32 0.05243302, %v2551_v20  ;;  %v2801_v0 = vadd.f32 0.014752088, %v2800_v16  ;;  %v2712_v37 = vadd.f32 0.05243302, %v2711_v23 }
 0x4da   : > { %v2760_v45 = vmul.f32 %v2759_v42, %v10518_v48  ;;  %v10589_v42 = vmin.f32 %v2665_v26, 16.0  ;;  %v2749_v46 = vmul.f32 %v2748_v3, %v10518_v48  ;;  %v2787_v50 = vmul.f32 2.1237322e-06, %v10572_v29 }
 0x4db   : > { %v2725_v30 = vadd.f32 0.4994258, %v2724_v34  ;;  %v10597_v34 = vadd.f32 %v1983_v22, %v9852_v24  ;;  %v2802_v20 = vmul.f32 %v2801_v0, %v10572_v29  ;;  %v2713_v55 = vmul.f32 %v2712_v37, %v10507_v27 }
 0x4dc   : > { %v2761_v40 = vadd.f32 0.014752088, %v2760_v45  ;;  %v2558_v45 = vmul.f32 3.8918573e-05, %v10539_v38  ;;  %v2667_v10 = vmul.f32 2.1237322e-06, %v10589_v42 }
 0x4dd   : > { %v2726_v19 = vmul.f32 %v2725_v30, %v10507_v27  ;;  %v2553_v30 = vmul.f32 %v2552_v41, %v10539_v38  ;;  %v2750_v59 = vadd.f32 0.0036580483, %v2749_v46 }
 0x4de   : > { %v2762_v35 = vmul.f32 %v2761_v40, %v10518_v48  ;;  %v2591_v40 = vmul.f32 %v2590_v56, %v10550_v52  ;;  %v2559_v36 = vadd.f32 0.001143296, %v2558_v45  ;;  %v2668_v12 = vadd.f32 0.00028619796, %v2667_v10 }
 0x4df   : > { %v10585_v11 = vadd.f32 1.0, %v2726_v19  ;;  %v10609_v19 = vmul.f32 0.70710677, %v10597_v34  ;;  %v2554_v26 = vadd.f32 0.18741608, %v2553_v30  ;;  %v10624_v45 = vmul.f32 0.5, %v10522_v58 }
 0x4e0   : > { %v2763_v14 = vadd.f32 0.112945676, %v2762_v35  ;;  %v2629_v35 = vmul.f32 %v2628_v39, %v10570_v51  ;;  %v2592_v31 = vadd.f32 0.05243302, %v2591_v40  ;;  %v2560_v6 = vmul.f32 %v2559_v36, %v10539_v38 }
 0x4e1   : > { %8314 = vrcp.f32 %v10585_v11  ;;  %v2825_v56 = vmul.f32 %v10609_v19, %v10609_v19  ;;  %v2669_v21 = vmul.f32 %v2668_v12, %v10589_v42  ;;  %v2751_v3 = vmul.f32 %v2750_v59, %v10518_v48 }
 0x4e2   : > { %v2764_v9 = vmul.f32 %v2763_v14, %v10518_v48  ;;  %v1937_v14 = vpop.f32.mrf.mxu2  ;;  %v2561_v22 = vadd.f32 0.014752088, %v2560_v6  ;;  %v2555_v41 = vmul.f32 %v2554_v26, %v10539_v38  ;;  %v10632_v40 = vmul.f32 0.5, %v10530_v43 }
 0x4e3   : > { %v10637_v36 = vmul.f32 0.5, %v10544_v5  ;;  %v2803_v58 = vadd.f32 0.112945676, %v2802_v20  ;;  %v10639_v46 = vmin.f32 %v2825_v56, 16.0  ;;  %v10643_v43 = vmul.f32 0.5, %v10566_v4 }
 0x4e4   : > { %v2765_v32 = vadd.f32 0.4994258, %v2764_v9  ;;  %v2630_v9 = vadd.f32 0.0036580483, %v2629_v35  ;;  %v2788_v35 = vadd.f32 0.00028619796, %v2787_v50  ;;  %vm2733_vm2 = vweird.f32 %v10585_v11 }
 0x4e5   : > { %v10646_v12 = vmul.f32 0.5, %v10500_v1  ;;  %v2752_v37 = vadd.f32 0.05243302, %v2751_v3  ;;  %v10651_v5 = vadd.f32 1.1283791, %v2555_v41  ;;  %v2804_v4 = vmul.f32 %v2803_v58, %v10572_v29 }
 0x4e6   : > { %v2766_v61 = vmul.f32 %v2765_v32, %v10518_v48  ;;  %v2593_v32 = vmul.f32 %v2592_v31, %v10550_v52  ;;  %v2631_v39 = vmul.f32 %v2630_v9, %v10570_v51  ;;  %v2670_v31 = vadd.f32 0.0036580483, %v2669_v21 }
 0x4e7   : > { %v10606_v17 = vpop.eup %8314  ;;  %v2562_v9 = vmul.f32 %v2561_v22, %v10539_v38  ;;  %v2838_v1 = vmul.f32 3.8918573e-05, %v10639_v46  ;;  %v2739_v22 = vand.u32 2147483648, %v10585_v11  ;;  %v2753_v3 = vmul.f32 %v2752_v37, %v10518_v48 }
 0x4e8   : > { %v10603_v54 = vadd.f32 1.0, %v2766_v61  ;;  %v2729_v44 = vmul.f32 %v10606_v17, %v10585_v11  ;;  %v10628_v61 = vadd.f32 %v1937_v14, %v9850_v62  ;;  %v2594_v23 = vadd.f32 0.18741608, %v2593_v32  ;;  %v1986_v32 = vpop.f32.mrf.mxu3 }
 0x4e9   : > { %v2632_v30 = vadd.f32 0.05243302, %v2631_v39  ;;  %v2714_v14 = vadd.f32 0.18741608, %v2713_v55  ;;  %v2671_v39 = vmul.f32 %v2670_v31, %v10589_v42  ;;  %v2563_v55 = vadd.f32 0.112945676, %v2562_v9 }
 0x4ea   : > { %8316 = vrcp.f32 %v10603_v54  ;;  %14233 = vst [vmem:[#allocation45_spill] sm:$0xff] %v10628_v61  ;;  %v2730_v16 = vsub.f32 1.0, %v2729_v44  ;;  %v1939_v0 = vpop.f32.mrf.mxu2  ;;  %v10649_v6 = vmul.f32 0.70710677, %v10628_v61  ;;  %v2789_v44 = vmul.f32 %v2788_v35, %v10572_v29 }
 0x4eb   : > { %v10658_v50 = vmul.f32 %v2594_v23, %v10550_v52  ;;  %v10663_v20 = vadd.f32 %v1939_v0, %v9850_v62  ;;  %v2633_v56 = vmul.f32 %v2632_v30, %v10570_v51  ;;  %v2715_v21 = vmul.f32 %v2714_v14, %v10507_v27 }
 0x4ec   : > { %v2731_v59 = vmul.f32 %v10606_v17, %v2730_v16  ;;  %vm2734_vm1 = vweird.f32 %v10606_v17  ;;  %v2865_v41 = vmul.f32 %v10649_v6, %v10649_v6  ;;  %v2790_v23 = vadd.f32 0.0036580483, %v2789_v44 }
 0x4ed   : > { %v2827_v58 = vmul.f32 2.1237322e-06, %v10639_v46  ;;  %v2805_v30 = vadd.f32 0.4994258, %v2804_v4  ;;  %v2839_v31 = vadd.f32 0.001143296, %v2838_v1  ;;  %v10676_v27 = vadd.f32 %v1986_v32, %v9852_v24  ;;  %vm10686_vm3 = vmor %vm2733_vm2, %vm2734_vm1 }
 0x4ee   : > { %v2732_v16 = vadd.f32 %v10606_v17, %v2731_v59  ;;  %v10679_v14 = vmul.f32 0.70710677, %v10663_v20  ;;  %v2672_v0 = vadd.f32 0.05243302, %v2671_v39  ;;  %v2737_v9 = vand.u32 2147483647, %v10585_v11 }
 0x4ef   : > { %14234 = vst [vmem:[#allocation46_spill] sm:$0xff] %v10676_v27  ;;  %v2564_v37 = vmul.f32 %v2563_v55, %v10539_v38  ;;  %v2716_v59 = vadd.f32 1.1283791, %v2715_v21  ;;  %v2740_v44 = vor.u32 1.1754944e-38, %v2739_v22  ;;  %v2754_v4 = vadd.f32 0.18741608, %v2753_v3 }
 0x4f0   : > { %v10634_v10 = vpop.eup %8316  ;;  %v10690_v1 = vmin.f32 %v2865_v41, 16.0  ;;  %v2736_v32 = vsel %vm10686_vm3, %v10606_v17, %v2732_v16  ;;  %v2791_v11 = vmul.f32 %v2790_v23, %v10572_v29  ;;  %v2828_v55 = vadd.f32 0.00028619796, %v2827_v58 }
 0x4f1   : > { %v2769_v26 = vmul.f32 %v10634_v10, %v10603_v54  ;;  %v2806_v21 = vmul.f32 %v2805_v30, %v10572_v29  ;;  %v2840_v18 = vmul.f32 %v2839_v31, %v10639_v46  ;;  %v10700_v63 = vmul.f32 0.70710677, %v10676_v27  ;;  %v1988_v30 = vpop.f32.mrf.mxu3 }
 0x4f2   : > { %v2945_v22 = vmul.f32 %v10679_v14, %v10679_v14  ;;  %v2634_v3 = vadd.f32 0.18741608, %v2633_v56  ;;  %v2673_v41 = vmul.f32 %v2672_v0, %v10589_v42  ;;  %vm2738_vm4 = vcmp.eq.f32.partialorder %v2737_v9, 8.507059e+37 }
 0x4f3   : > { %v2770_v35 = vsub.f32 1.0, %v2769_v26  ;;  %v2565_v17 = vadd.f32 0.4994258, %v2564_v37  ;;  %v2717_v16 = vmul.f32 %v2716_v59, %v10503_v7  ;;  %v2755_v23 = vmul.f32 %v2754_v4, %v10518_v48 }
 0x4f4   : > { %v2878_v58 = vmul.f32 3.8918573e-05, %v10690_v1  ;;  %vm2774_vm5 = vweird.f32 %v10634_v10  ;;  %v2792_v26 = vadd.f32 0.05243302, %v2791_v11  ;;  %v2829_v60 = vmul.f32 %v2828_v55, %v10639_v46 }
 0x4f5   : > { %v2771_v39 = vmul.f32 %v10634_v10, %v2770_v35  ;;  %v2741_v35 = vsel %vm2738_vm4, %v2740_v44, %v2736_v32  ;;  %v10711_v56 = vadd.f32 1.0, %v2806_v21  ;;  %v2841_v0 = vadd.f32 0.014752088, %v2840_v18 }
 0x4f6   : > { %v2905_v9 = vmul.f32 %v10700_v63, %v10700_v63  ;;  %v10715_v7 = vmin.f32 %v2945_v22, 16.0  ;;  %vm2773_vm6 = vweird.f32 %v10603_v54  ;;  %v2779_v48 = vand.u32 2147483648, %v10603_v54 }
 0x4f7   : > { %v2772_v31 = vadd.f32 %v10634_v10, %v2771_v39  ;;  %v10720_v37 = vadd.f32 %v1988_v30, %v9852_v24  ;;  %v2566_v59 = vmul.f32 %v2565_v17, %v10539_v38  ;;  %v2674_v44 = vadd.f32 0.18741608, %v2673_v41  ;;  %vm10723_vm7 = vmor %vm2773_vm6, %vm2774_vm5 }
 0x4f8   : > { %v2742_v4 = vmul.f32 %v2741_v35, %v2717_v16  ;;  %v2777_v18 = vand.u32 2147483647, %v10603_v54  ;;  %v2879_v39 = vadd.f32 0.001143296, %v2878_v58  ;;  %v2756_v11 = vadd.f32 1.1283791, %v2755_v23 }
 0x4f9   : > { %14237 = vst [vmem:[#allocation47_spill] sm:$0xff] %v10720_v37  ;;  %v2776_v55 = vsel %vm10723_vm7, %v10634_v10, %v2772_v31  ;;  %v2793_v21 = vmul.f32 %v2792_v26, %v10572_v29  ;;  %v2830_v22 = vadd.f32 0.0036580483, %v2829_v60  ;;  %8318 = vrcp.f32 %v10711_v56 }
 0x4fa   : > { %v2842_v38 = vmul.f32 %v2841_v0, %v10639_v46  ;;  %v10734_v41 = vmin.f32 %v2905_v9, 16.0  ;;  %v2958_v17 = vmul.f32 3.8918573e-05, %v10715_v7  ;;  %v2635_v16 = vmul.f32 %v2634_v3, %v10570_v51 }
 0x4fb   : > { %v2780_v54 = vor.u32 1.1754944e-38, %v2779_v48  ;;  %v10739_v35 = vmul.f32 0.70710677, %v10720_v37  ;;  %v10741_v23 = vadd.f32 1.0, %v2566_v59  ;;  %v2675_v10 = vmul.f32 %v2674_v44, %v10589_v42 }
 0x4fc   : > { %v7638_v58 = vclamps-f32 %v2742_v4, 1.0  ;;  %vm2778_vm8 = vcmp.eq.f32.partialorder %v2777_v18, 8.507059e+37  ;;  %v2880_v60 = vmul.f32 %v2879_v39, %v10690_v1  ;;  %v2794_v31 = vadd.f32 0.18741608, %v2793_v21 }
 0x4fd   : > { %v2781_v30 = vsel %vm2778_vm8, %v2780_v54, %v2776_v55  ;;  %v2831_v26 = vmul.f32 %v2830_v22, %v10639_v46  ;;  %v2867_v0 = vmul.f32 2.1237322e-06, %v10690_v1  ;;  %v2757_v3 = vmul.f32 %v2756_v11, %v10514_v28 }
 0x4fe   : > { %v2843_v9 = vadd.f32 0.112945676, %v2842_v38  ;;  %v2918_v48 = vmul.f32 3.8918573e-05, %v10734_v41  ;;  %v2959_v32 = vadd.f32 0.001143296, %v2958_v17  ;;  %v2985_v44 = vmul.f32 %v10739_v35, %v10739_v35 }
 0x4ff   : > { %v2596_v59 = vadd.f32 1.1283791, %v10658_v50  ;;  %v2636_v8 = vadd.f32 1.1283791, %v2635_v16  ;;  %8320 = vrcp.f32 %v10741_v23  ;;  %v10753_v4 = vpop.eup %8318  ;;  %v2676_v18 = vadd.f32 1.1283791, %v2675_v10 }
 0x500   : > { %v3361_v39 = vadd.f32 1.0, %v7638_v58  ;;  %v2782_v55 = vmul.f32 %v2781_v30, %v2757_v3  ;;  %v2881_v21 = vadd.f32 0.014752088, %v2880_v60  ;;  %v10757_v28 = vmul.f32 %v10651_v5, %v10527_v47 }
 0x501   : > { %v2832_v11 = vadd.f32 0.05243302, %v2831_v26  ;;  %v2868_v22 = vadd.f32 0.00028619796, %v2867_v0  ;;  %v2907_v50 = vmul.f32 2.1237322e-06, %v10734_v41  ;;  %v2795_v38 = vmul.f32 %v2794_v31, %v10572_v29 }
 0x502   : > { %v2844_v17 = vmul.f32 %v2843_v9, %v10639_v46  ;;  %v2919_v16 = vadd.f32 0.001143296, %v2918_v48  ;;  %v2960_v54 = vmul.f32 %v2959_v32, %v10715_v7  ;;  %v10764_v10 = vmul.f32 %v2596_v59, %v10535_v53 }
 0x503   : > { %v10767_v58 = vmul.f32 %v2636_v8, %v10553_v33  ;;  %v2809_v47 = vmul.f32 %v10753_v4, %v10711_v56  ;;  %v10771_v5 = vmin.f32 %v2985_v44, 16.0  ;;  %v10774_v60 = vmul.f32 %v2676_v18, %v10575_v15 }
 0x504   : > { %v7639_v29 = vclamps-f32 %v2782_v55, 1.0  ;;  %v10777_v30 = vmul.f32 0.5, %v10547_v25  ;;  %v2882_v31 = vmul.f32 %v2881_v21, %v10690_v1  ;;  %v10783_v53 = vmul.f32 %v3361_v39, %v10646_v12 }
 0x505   : > { %v10780_v26 = vpop.eup %8320  ;;  %v2833_v8 = vmul.f32 %v2832_v11, %v10639_v46  ;;  %v2869_v33 = vmul.f32 %v2868_v22, %v10690_v1  ;;  %v2908_v0 = vadd.f32 0.00028619796, %v2907_v50  ;;  %v2796_v3 = vadd.f32 1.1283791, %v2795_v38 }
 0x506   : > { %v2845_v9 = vadd.f32 0.4994258, %v2844_v17  ;;  %v2920_v15 = vmul.f32 %v2919_v16, %v10734_v41  ;;  %v2961_v48 = vadd.f32 0.014752088, %v2960_v54  ;;  %v2810_v32 = vsub.f32 1.0, %v2809_v47 }
 0x507   : > { %v10789_v25 = vmul.f32 0.5, %v10597_v34  ;;  %v2998_v59 = vmul.f32 3.8918573e-05, %v10771_v5  ;;  %v2638_v44 = vmul.f32 3.8918573e-05, %v10570_v51  ;;  %v10793_v12 = vadd.f32 1.0, %v7639_v29 }
 0x508   : > { %v2883_v18 = vadd.f32 0.112945676, %v2882_v31  ;;  %v10797_v39 = vmul.f32 %v10780_v26, %v10741_v23  ;;  %v2834_v21 = vadd.f32 0.18741608, %v2833_v8  ;;  %v2870_v11 = vadd.f32 0.0036580483, %v2869_v33 }
 0x509   : > { %v2909_v22 = vmul.f32 %v2908_v0, %v10734_v41  ;;  %v2639_v50 = vadd.f32 0.001143296, %v2638_v44  ;;  %v10802_v34 = vmul.f32 %v2796_v3, %v10556_v2  ;;  %v2817_v38 = vand.u32 2147483647, %v10711_v56 }
 0x50a   : > { %v2921_v17 = vadd.f32 0.014752088, %v2920_v15  ;;  %v2962_v16 = vmul.f32 %v2961_v48, %v10715_v7  ;;  %v2811_v54 = vmul.f32 %v10753_v4, %v2810_v32  ;;  %v2846_v47 = vmul.f32 %v2845_v9, %v10639_v46 }
 0x50b   : > { %v2999_v29 = vadd.f32 0.001143296, %v2998_v59  ;;  %v2598_v31 = vmul.f32 3.8918573e-05, %v10550_v52  ;;  %vm2813_vm9 = vweird.f32 %v10711_v56  ;;  %v2819_v8 = vand.u32 2147483648, %v10711_v56 }
 0x50c   : > { %v2884_v33 = vmul.f32 %v2883_v18, %v10690_v1  ;;  %v2640_v2 = vmul.f32 %v2639_v50, %v10570_v51  ;;  %v2835_v0 = vmul.f32 %v2834_v21, %v10639_v46  ;;  %v2871_v3 = vmul.f32 %v2870_v11, %v10690_v1 }
 0x50d   : > { %v2910_v15 = vadd.f32 0.0036580483, %v2909_v22  ;;  %v2947_v48 = vmul.f32 2.1237322e-06, %v10715_v7  ;;  %vm2814_vm10 = vweird.f32 %v10753_v4  ;;  %vm10817_vm11 = vcmp.eq.f32.partialorder %v2817_v38, 8.507059e+37 }
 0x50e   : > { %v2922_v32 = vmul.f32 %v2921_v17, %v10734_v41  ;;  %v2963_v59 = vadd.f32 0.112945676, %v2962_v16  ;;  %v2641_v44 = vadd.f32 0.014752088, %v2640_v2  ;;  %v2812_v18 = vadd.f32 %v10753_v4, %v2811_v54  ;;  %vm10833_vm12 = vmor %vm2813_vm9, %vm2814_vm10 }
 0x50f   : > { %v10823_v50 = vadd.f32 1.0, %v2846_v47  ;;  %v3000_v46 = vmul.f32 %v2999_v29, %v10771_v5  ;;  %v2599_v21 = vadd.f32 0.001143296, %v2598_v31  ;;  %v2820_v11 = vor.u32 1.1754944e-38, %v2819_v8 }
 0x510   : > { %v2885_v22 = vadd.f32 0.4994258, %v2884_v33  ;;  %v2642_v55 = vmul.f32 %v2641_v44, %v10570_v51  ;;  %v2678_v38 = vmul.f32 3.8918573e-05, %v10589_v42  ;;  %v2836_v13 = vadd.f32 1.1283791, %v2835_v0 }
 0x511   : > { %v2872_v27 = vadd.f32 0.05243302, %v2871_v3  ;;  %v2911_v24 = vmul.f32 %v2910_v15, %v10734_v41  ;;  %v2948_v17 = vadd.f32 0.00028619796, %v2947_v48  ;;  %v2923_v54 = vadd.f32 0.112945676, %v2922_v32 }
 0x512   : > { %v2964_v47 = vmul.f32 %v2963_v59, %v10715_v7  ;;  %v2643_v29 = vadd.f32 0.112945676, %v2642_v55  ;;  %v2600_v31 = vmul.f32 %v2599_v21, %v10550_v52  ;;  %v2816_v8 = vsel %vm10833_vm12, %v10753_v4, %v2812_v18 }
 0x513   : > { %8322 = vrcp.f32 %v10823_v50  ;;  %v3001_v33 = vadd.f32 0.014752088, %v3000_v46  ;;  %v2679_v2 = vadd.f32 0.001143296, %v2678_v38  ;;  %v2886_v56 = vmul.f32 %v2885_v22, %v10690_v1 }
 0x514   : > { %v2570_v0 = vsub.f32 1.0, %v10797_v39  ;;  %v2644_v3 = vmul.f32 %v2643_v29, %v10570_v51  ;;  %v2601_v15 = vadd.f32 0.014752088, %v2600_v31  ;;  %v10847_v48 = vmul.f32 %v2836_v13, %v10609_v19 }
 0x515   : > { %v2873_v55 = vmul.f32 %v2872_v27, %v10690_v1  ;;  %v2949_v32 = vmul.f32 %v2948_v17, %v10715_v7  ;;  %v2680_v4 = vmul.f32 %v2679_v2, %v10589_v42  ;;  %v2924_v59 = vmul.f32 %v2923_v54, %v10734_v41 }
 0x516   : > { %v2965_v44 = vadd.f32 0.4994258, %v2964_v47  ;;  %vm2573_vm13 = vweird.f32 %v10741_v23  ;;  %v2645_v18 = vadd.f32 0.4994258, %v2644_v3  ;;  %v2602_v39 = vmul.f32 %v2601_v15, %v10550_v52 }
 0x517   : > { %v2821_v46 = vsel %vm10817_vm11, %v2820_v11, %v2816_v8  ;;  %v3002_v19 = vmul.f32 %v3001_v33, %v10771_v5  ;;  %v2681_v27 = vadd.f32 0.014752088, %v2680_v4  ;;  %v2859_v21 = vand.u32 2147483648, %v10823_v50 }
 0x518   : > { %v10860_v22 = vadd.f32 1.0, %v2886_v56  ;;  %v2912_v38 = vadd.f32 0.05243302, %v2911_v24  ;;  %v2571_v17 = vmul.f32 %v10780_v26, %v2570_v0  ;;  %v2950_v54 = vadd.f32 0.0036580483, %v2949_v32 }
 0x519   : > { %v10863_v16 = vpop.eup %8322  ;;  %v2646_v47 = vmul.f32 %v2645_v18, %v10570_v51  ;;  %v2603_v29 = vadd.f32 0.112945676, %v2602_v39  ;;  %v2682_v9 = vmul.f32 %v2681_v27, %v10589_v42  ;;  %v2822_v11 = vmul.f32 %v2821_v46, %v10802_v34 }
 0x51a   : > { %v2874_v31 = vadd.f32 0.18741608, %v2873_v55  ;;  %v2925_v8 = vadd.f32 0.4994258, %v2924_v59  ;;  %v2966_v33 = vmul.f32 %v2965_v44, %v10715_v7  ;;  %v3003_v2 = vadd.f32 0.112945676, %v3002_v19 }
 0x51b   : > { %v10869_v56 = vadd.f32 1.0, %v2646_v47  ;;  %v2604_v24 = vmul.f32 %v2603_v29, %v10550_v52  ;;  %v2683_v0 = vadd.f32 0.112945676, %v2682_v9  ;;  %v2849_v3 = vmul.f32 %v10863_v16, %v10823_v50 }
 0x51c   : > { %8324 = vrcp.f32 %v10860_v22  ;;  %v2572_v51 = vadd.f32 %v10780_v26, %v2571_v17  ;;  %vm2574_vm14 = vweird.f32 %v10780_v26  ;;  %v2951_v34 = vmul.f32 %v2950_v54, %v10715_v7 }
 0x51d   : > { %v2987_v15 = vmul.f32 2.1237322e-06, %v10771_v5  ;;  %v2579_v55 = vand.u32 2147483648, %v10741_v23  ;;  %8326 = vrcp.f32 %v10869_v56  ;;  %v10881_v32 = vor.u32 1.1754944e-38, %v2859_v21  ;;  %vm10891_vm15 = vmor %vm2573_vm13, %vm2574_vm14 }
 0x51e   : > { %v10883_v4 = vadd.f32 1.0, %v2966_v33  ;;  %v2605_v59 = vadd.f32 0.4994258, %v2604_v24  ;;  %v2684_v44 = vmul.f32 %v2683_v0, %v10589_v42  ;;  %v7640_v18 = vclamps-f32 %v2822_v11, 1.0 }
 0x51f   : > { %v2875_v39 = vmul.f32 %v2874_v31, %v10690_v1  ;;  %v2913_v46 = vmul.f32 %v2912_v38, %v10734_v41  ;;  %v3004_v19 = vmul.f32 %v3003_v2, %v10771_v5  ;;  %v2850_v21 = vsub.f32 1.0, %v2849_v3 }
 0x520   : > { %v2576_v17 = vsel %vm10891_vm15, %v10780_v26, %v2572_v51  ;;  %v2606_v54 = vmul.f32 %v2605_v59, %v10550_v52  ;;  %v2685_v47 = vadd.f32 0.4994258, %v2684_v44  ;;  %v2926_v1 = vmul.f32 %v2925_v8, %v10734_v41  ;;  %v10911_v52 = vld [vmem:[%s14107_s12] ss:$0 sm:$0xff]  ;;  %v3566_v26 = vpop.f32.mrf.mxu0  ;;  %v3615_v8 = vpop.f32.mrf.mxu1 }
 0x521   : > { %v2952_v29 = vadd.f32 0.05243302, %v2951_v34  ;;  %v2988_v38 = vadd.f32 0.00028619796, %v2987_v15  ;;  %v2580_v9 = vor.u32 1.1754944e-38, %v2579_v55  ;;  %8328 = vrcp.f32 %v10883_v4 }
 0x522   : > { %v10900_v11 = vpop.eup %8324  ;;  %v14246_v31 = vand.u32 2147483647, %v10741_v23  ;;  %v10905_v33 = vadd.f32 1.0, %v2606_v54  ;;  %v2686_v2 = vmul.f32 %v2685_v47, %v10589_v42  ;;  %v10913_v0 = vadd.f32 1.1283791, %v2875_v39 }
 0x523   : > { %v8327_v24 = vpop.eup %8326  ;;  %v10915_v3 = vadd.f32 0.18741608, %v2913_v46  ;;  %v3005_v51 = vadd.f32 0.4994258, %v3004_v19  ;;  %v10917_v23 = vadd.f32 1.0, %v7640_v18  ;;  %v2851_v15 = vmul.f32 %v10863_v16, %v2850_v21 }
 0x524   : > { %vm2578_vm0 = vcmp.eq.f32.partialorder %v14246_v31, 8.507059e+37  ;;  %v2649_v42 = vmul.f32 %v8327_v24, %v10869_v56  ;;  %8330 = vrcp.f32 %v10905_v33  ;;  %v10922_v55 = vadd.f32 1.0, %v2926_v1 }
 0x525   : > { %v2581_v34 = vsel %vm2578_vm0, %v2580_v9, %v2576_v17  ;;  %v2953_v59 = vmul.f32 %v2952_v29, %v10715_v7  ;;  %v2989_v44 = vmul.f32 %v2988_v38, %v10771_v5  ;;  %v10926_v39 = vadd.f32 1.0, %v2686_v2 }
 0x526   : > { %v10930_v46 = vmul.f32 %v10900_v11, %v10860_v22  ;;  %v2582_v18 = vmul.f32 %v2581_v34, %v10757_v28  ;;  %v2650_v19 = vsub.f32 1.0, %v2649_v42  ;;  %v3567_v27 = vadd.f32 %v10911_v52, %v3566_v26 }
 0x527   : > { %v3006_v17 = vmul.f32 %v3005_v51, %v10771_v5  ;;  %v2659_v54 = vand.u32 2147483648, %v10869_v56  ;;  %8332 = vrcp.f32 %v10926_v39  ;;  %v10938_v47 = vpop.eup %8328  ;;  %v10941_v1 = vadd.f32 %v10863_v16, %v2851_v15 }
 0x528   : > { %v2651_v29 = vmul.f32 %v8327_v24, %v2650_v19  ;;  %vm2654_vm1 = vweird.f32 %v8327_v24  ;;  %v2657_v28 = vand.u32 2147483647, %v10869_v56  ;;  %vm2854_vm2 = vweird.f32 %v10863_v16  ;;  %v3568_v15 = vpop.f32.mrf.mxu0  ;;  %v3617_v42 = vpop.f32.mrf.mxu1 }
 0x529   : > { %8334 = vrcp.f32 %v10922_v55  ;;  %v10946_v38 = vadd.f32 0.18741608, %v2953_v59  ;;  %v2990_v9 = vadd.f32 0.0036580483, %v2989_v44  ;;  %v3616_v31 = vadd.f32 %v3615_v8, %v3567_v27 }
 0x52a   : > { %v8331_v2 = vpop.eup %8330  ;;  %v7634_v51 = vclamps-f32 %v2582_v18, 1.0  ;;  %v2652_v34 = vadd.f32 %v8327_v24, %v2651_v29  ;;  %vm2653_vm3 = vweird.f32 %v10869_v56  ;;  %vm2853_vm4 = vweird.f32 %v10823_v50 }
 0x52b   : > { %v2969_v19 = vmul.f32 %v10938_v47, %v10883_v4  ;;  %v10953_v21 = vadd.f32 1.0, %v3006_v17  ;;  %vm2655_vm5 = vmor %vm2653_vm3, %vm2654_vm1  ;;  %v2660_v59 = vor.u32 1.1754944e-38, %v2659_v54  ;;  %v2609_v8 = vmul.f32 %v8331_v2, %v10905_v33 }
 0x52c   : > { %v2656_v44 = vsel %vm2655_vm5, %v8327_v24, %v2652_v34  ;;  %vm2658_vm6 = vcmp.eq.f32.partialorder %v2657_v28, 8.507059e+37  ;;  %v10958_v18 = vadd.f32 %v3616_v31, %v9756_v49  ;;  %v3569_v56 = vadd.f32 %v10911_v52, %v3568_v15  ;;  %vm10988_vm13 = vmor %vm2853_vm4, %vm2854_vm2 }
 0x52d   : > { %v8333_v27 = vpop.eup %8332  ;;  %v2991_v29 = vmul.f32 %v2990_v9, %v10771_v5  ;;  %v2661_v26 = vsel %vm2658_vm6, %v2660_v59, %v2656_v44  ;;  %v2610_v13 = vsub.f32 1.0, %v2609_v8  ;;  %v2619_v17 = vand.u32 2147483648, %v10905_v33 }
 0x52e   : > { %v2662_v37 = vmul.f32 %v2661_v26, %v10767_v58  ;;  %v3357_v61 = vadd.f32 1.0, %v7634_v51  ;;  %v2689_v54 = vmul.f32 %v8333_v27, %v10926_v39  ;;  %3673 = vadd.xlane.f32.xlu1 %v10958_v18  ;;  %v3618_v24 = vadd.f32 %v3617_v42, %v3569_v56 }
 0x52f   : > { %v10966_v28 = vpop.eup %8334  ;;  %8336 = vrcp.f32 %v10953_v21  ;;  %v2611_v49 = vmul.f32 %v8331_v2, %v2610_v13  ;;  %vm2614_vm7 = vweird.f32 %v8331_v2  ;;  %v2617_v9 = vand.u32 2147483647, %v10905_v33 }
 0x530   : > { %v2970_v31 = vsub.f32 1.0, %v2969_v19  ;;  %v7636_v34 = vclamps-f32 %v2662_v37, 1.0  ;;  %vm2613_vm8 = vweird.f32 %v10905_v33  ;;  %v2690_v15 = vsub.f32 1.0, %v2689_v54  ;;  %v14250_v37 = vld [vmem:[#allocation29_spill] sm:$0xff]  ;;  %v3571_v33 = vpop.f32.mrf.mxu0  ;;  %v3620_v56 = vpop.f32.mrf.mxu1 }
 0x531   : > { %v14247_v58 = vand.u32 2147483647, %v10823_v50  ;;  %v2612_v51 = vadd.f32 %v8331_v2, %v2611_v49  ;;  %v2620_v42 = vor.u32 1.1754944e-38, %v2619_v17  ;;  %v2697_v59 = vand.u32 2147483647, %v10926_v39  ;;  %vm2615_vm10 = vmor %vm2613_vm8, %vm2614_vm7 }
 0x532   : > { %v2699_v13 = vand.u32 2147483648, %v10926_v39  ;;  %v3359_v8 = vadd.f32 1.0, %v7636_v34  ;;  %v2691_v44 = vmul.f32 %v8333_v27, %v2690_v15  ;;  %vm2694_vm11 = vweird.f32 %v8333_v27 }
 0x533   : > { %vm10973_vm9 = vcmp.eq.f32.partialorder %v14247_v58, 8.507059e+37  ;;  %v10980_v19 = vadd.f32 %v3618_v24, %v14250_v37  ;;  %v3389_v54 = vmul.f32 %v3357_v61, %v10624_v45  ;;  %v2616_v58 = vsel %vm2615_vm10, %v8331_v2, %v2612_v51 }
 0x534   : > { %vm2618_vm12 = vcmp.eq.f32.partialorder %v2617_v9, 8.507059e+37  ;;  %v3572_v49 = vadd.f32 %v10911_v52, %v3571_v33  ;;  %v3391_v34 = vmul.f32 %v3359_v8, %v10637_v36  ;;  %v2692_v15 = vadd.f32 %v8333_v27, %v2691_v44 }
 0x535   : > { %v2621_v24 = vsel %vm2618_vm12, %v2620_v42, %v2616_v58  ;;  %vm2693_vm14 = vweird.f32 %v10926_v39  ;;  %3675 = vadd.xlane.f32.xlu2 %v10980_v19  ;;  %v10995_v45 = vpop.eup %8336  ;;  %v2971_v61 = vmul.f32 %v10938_v47, %v2970_v31  ;;  %v2700_v50 = vor.u32 1.1754944e-38, %v2699_v13  ;;  %v14253_v31 = vld [vmem:[#allocation30_spill] sm:$0xff] }
 0x536   : > { %v2622_v2 = vmul.f32 %v2621_v24, %v10764_v10  ;;  %vm2695_vm15 = vmor %vm2693_vm14, %vm2694_vm11  ;;  %v3621_v9 = vadd.f32 %v3620_v56, %v3572_v49  ;;  %v2856_v36 = vsel %vm10988_vm13, %v10863_v16, %v10941_v1  ;;  %vm2893_vm0 = vweird.f32 %v10860_v22 }
 0x537   : > { %v3447_v39 = vpack.c.bf16 %v3391_v34, %v3389_v54  ;;  %v2696_v51 = vsel %vm2695_vm15, %v8333_v27, %v2692_v15  ;;  %vm2698_vm1 = vcmp.eq.f32.partialorder %v2697_v59, 8.507059e+37  ;;  %v2992_v42 = vadd.f32 0.05243302, %v2991_v29 }
 0x538   : > { %v7635_v8 = vclamps-f32 %v2622_v2, 1.0  ;;  %v2701_v44 = vsel %vm2698_vm1, %v2700_v50, %v2696_v51  ;;  %v11006_v37 = vadd.f32 %v3621_v9, %v14253_v31  ;;  %v14254_v10 = vsub.f32 1.0, %v10930_v46  ;;  %v3573_v58 = vpop.f32.mrf.mxu0  ;;  %v3622_v49 = vpop.f32.mrf.mxu1 }
 0x539   : > { %v2899_v33 = vand.u32 2147483648, %v10860_v22  ;;  %v3009_v16 = vmul.f32 %v10995_v45, %v10953_v21  ;;  %3580 = vmatmul.bf16.gmra.mxu0 %v3447_v39  ;;  %v2702_v1 = vmul.f32 %v2701_v44, %v10774_v60  ;;  %v2929_v27 = vmul.f32 %v10966_v28, %v10922_v55 }
 0x53a   : > { %v2891_v13 = vmul.f32 %v10900_v11, %v14254_v10  ;;  %v2955_v29 = vmul.f32 %v10946_v38, %v10715_v7  ;;  %v2972_v59 = vadd.f32 %v10938_v47, %v2971_v61  ;;  %vm2974_vm2 = vweird.f32 %v10938_v47  ;;  %3677 = vadd.xlane.f32.xlu0 %v11006_v37 }
 0x53b   : > { %v2861_v46 = vsel %vm10973_vm9, %v10881_v32, %v2856_v36  ;;  %v2979_v56 = vand.u32 2147483648, %v10883_v4  ;;  %v7637_v54 = vclamps-f32 %v2702_v1, 1.0  ;;  %v3358_v60 = vadd.f32 1.0, %v7635_v8 }
 0x53c   : > { %vm2973_vm3 = vweird.f32 %v10883_v4  ;;  %v2977_v7 = vand.u32 2147483647, %v10883_v4  ;;  %v2993_v38 = vmul.f32 %v2992_v42, %v10771_v5  ;;  %v3574_v17 = vadd.f32 %v10911_v52, %v3573_v58 }
 0x53d   : > { %v2892_v34 = vadd.f32 %v10900_v11, %v2891_v13  ;;  %vm2894_vm4 = vweird.f32 %v10900_v11  ;;  %vm11032_vm5 = vmor %vm2973_vm3, %vm2974_vm2  ;;  %v3010_v26 = vsub.f32 1.0, %v3009_v16  ;;  %v3360_v24 = vadd.f32 1.0, %v7637_v54 }
 0x53e   : > { %v2862_v15 = vmul.f32 %v2861_v46, %v10847_v48  ;;  %v2930_v61 = vsub.f32 1.0, %v2929_v27  ;;  %v2956_v2 = vadd.f32 1.1283791, %v2955_v29  ;;  %v2976_v4 = vsel %vm11032_vm5, %v10938_v47, %v2972_v59  ;;  %vm11046_vm6 = vmor %vm2893_vm0, %vm2894_vm4  ;;  %v1942_v59 = vpop.f32.mrf.mxu2 }
 0x53f   : > { %v2980_v50 = vor.u32 1.1754944e-38, %v2979_v56  ;;  %v3390_v9 = vmul.f32 %v3358_v60, %v10632_v40  ;;  %v3392_v36 = vmul.f32 %v3360_v24, %v10643_v43  ;;  %v3623_v39 = vadd.f32 %v3622_v49, %v3574_v17  ;;  %v14263_v17 = vld [vmem:[#allocation32_spill] sm:$0xff] }
 0x540   : > { %v3395_v51 = vmul.f32 %v10917_v23, %v10777_v30  ;;  %v2915_v48 = vmul.f32 %v10915_v3, %v10734_v41  ;;  %vm2978_vm7 = vcmp.eq.f32.partialorder %v2977_v7, 8.507059e+37  ;;  %v2994_v47 = vadd.f32 0.18741608, %v2993_v38  ;;  %v3576_v16 = vpop.f32.mrf.mxu0  ;;  %v14270_v38 = vld [vmem:[#allocation46_spill] sm:$0xff] }
 0x541   : > { %v2896_v40 = vsel %vm11046_vm6, %v10900_v11, %v2892_v34  ;;  %v2981_v43 = vsel %vm2978_vm7, %v2980_v50, %v2976_v4  ;;  %v3011_v8 = vmul.f32 %v10995_v45, %v3010_v26  ;;  %v3448_v44 = vpack.c.bf16 %v3392_v36, %v3390_v9  ;;  %v14260_v11 = vld [vmem:[#allocation31_spill] sm:$0xff] }
 0x542   : > { %v7641_v30 = vclamps-f32 %v2862_v15, 1.0  ;;  %v2900_v23 = vor.u32 1.1754944e-38, %v2899_v33  ;;  %v2931_v31 = vmul.f32 %v10966_v28, %v2930_v61  ;;  %v2957_v10 = vmul.f32 %v2956_v2, %v10679_v14 }
 0x543   : > { %v2877_v13 = vmul.f32 %v10913_v0, %v10649_v6  ;;  %v14259_v41 = vand.u32 2147483647, %v10860_v22  ;;  %vm2934_vm9 = vweird.f32 %v10966_v28  ;;  %3629 = vmatmul.bf16.gmra.mxu1 %v3448_v44  ;;  %v11064_v3 = vadd.f32 %v3623_v39, %v14260_v11 }
 0x544   : > { %v2982_v33 = vmul.f32 %v2981_v43, %v2957_v10  ;;  %v2995_v29 = vmul.f32 %v2994_v47, %v10771_v5  ;;  %v3577_v14 = vadd.f32 %v10911_v52, %v3576_v16  ;;  %v3012_v6 = vadd.f32 %v10995_v45, %v3011_v8  ;;  %v14266_v10 = vld [vmem:[#allocation33_spill] sm:$0xff] }
 0x545   : > { %vm2898_vm8 = vcmp.eq.f32.partialorder %v14259_v41, 8.507059e+37  ;;  %vm3014_vm10 = vweird.f32 %v10995_v45  ;;  %v3449_v22 = vpack.c.bf16 %v3395_v51, %v10783_v53  ;;  %3679 = vadd.xlane.f32.xlu1 %v11064_v3  ;;  %v11073_v0 = vadd.f32 %v1942_v59, %v9850_v62 }
 0x546   : > { %v2901_v27 = vsel %vm2898_vm8, %v2900_v23, %v2896_v40  ;;  %v3364_v46 = vadd.f32 1.0, %v7641_v30  ;;  %v2932_v56 = vadd.f32 %v10966_v28, %v2931_v31  ;;  %v3019_v54 = vand.u32 2147483648, %v10953_v21 }
 0x547   : > { %v2902_v60 = vmul.f32 %v2901_v27, %v2877_v13  ;;  %vm3013_vm11 = vweird.f32 %v10953_v21  ;;  %v3017_v58 = vand.u32 2147483647, %v10953_v21  ;;  %v11080_v49 = vmul.f32 0.70710677, %v11073_v0 }
 0x548   : > { %vm2933_vm12 = vweird.f32 %v10922_v55  ;;  %v2937_v53 = vand.u32 2147483647, %v10922_v55  ;;  %v2939_v7 = vand.u32 2147483648, %v10922_v55  ;;  %vm11087_vm13 = vmor %vm3013_vm11, %vm3014_vm10  ;;  %v7644_v32 = vclamps-f32 %v2982_v33, 1.0  ;;  %v3578_v9 = vpop.f32.mrf.mxu0 }
 0x549   : > { %v3625_v1 = vpop.f32.mrf.mxu1  ;;  %v2996_v21 = vadd.f32 1.1283791, %v2995_v29  ;;  %v3016_v26 = vsel %vm11087_vm13, %v10995_v45, %v3012_v6  ;;  %3585 = vmatmul.bf16.gmra.mxu0 %v3449_v22  ;;  %v3025_v24 = vmul.f32 %v11080_v49, %v11080_v49  ;;  %v2018_v55 = vmul.f32 0.5, %v10510_v57  ;;  %vm11103_vm14 = vmor %vm2933_vm12, %vm2934_vm9 }
 0x54a   : > { %v3626_v5 = vadd.f32 %v3625_v1, %v3577_v14  ;;  %v3396_v15 = vmul.f32 %v3364_v46, %v10789_v25  ;;  %v2916_v61 = vadd.f32 1.1283791, %v2915_v48  ;;  %v3020_v4 = vor.u32 1.1754944e-38, %v3019_v54  ;;  %v1991_v46 = vpop.f32.mrf.mxu3  ;;  %v14268_v54 = vld [vmem:[#allocation47_spill] sm:$0xff] }
 0x54b   : > { %v7642_v50 = vclamps-f32 %v2902_v60, 1.0  ;;  %v2936_v45 = vsel %vm11103_vm14, %v10966_v28, %v2932_v56  ;;  %vm3018_vm15 = vcmp.eq.f32.partialorder %v3017_v58, 8.507059e+37  ;;  %v11111_v57 = vmin.f32 %v3025_v24, 16.0  ;;  %v14269_v58 = vld [vmem:[#allocation36_spill] sm:$0xff] }
 0x54c   : > { %v11092_v34 = vadd.f32 %v3626_v5, %v14263_v17  ;;  %v3394_v25 = vmul.f32 %v10793_v12, %v2018_v55  ;;  %v2940_v36 = vor.u32 1.1754944e-38, %v2939_v7  ;;  %v3021_v39 = vsel %vm3018_vm15, %v3020_v4, %v3016_v26 }
 0x54d   : > { %v3579_v51 = vadd.f32 %v10911_v52, %v3578_v9  ;;  %vm2938_vm0 = vcmp.eq.f32.partialorder %v2937_v53, 8.507059e+37  ;;  %v3367_v42 = vadd.f32 1.0, %v7644_v32  ;;  %v2997_v48 = vmul.f32 %v2996_v21, %v10739_v35  ;;  %v14267_v52 = vld [vmem:[#allocation45_spill] sm:$0xff] }
 0x54e   : > { %3681 = vadd.xlane.f32.xlu2 %v11092_v34  ;;  %v3038_v40 = vmul.f32 3.8918573e-05, %v11111_v57  ;;  %v2917_v43 = vmul.f32 %v2916_v61, %v10700_v63  ;;  %v2941_v28 = vsel %vm2938_vm0, %v2940_v36, %v2936_v45  ;;  %v2023_v8 = vmul.f32 0.5, %v10663_v20 }
 0x54f   : > { %v3365_v30 = vadd.f32 1.0, %v7642_v50  ;;  %v3022_v23 = vmul.f32 %v3021_v39, %v2997_v48  ;;  %v3450_v12 = vpack.c.bf16 %v3396_v15, %v3394_v25  ;;  %v2021_v41 = vmul.f32 0.5, %v14267_v52 }
 0x550   : > { %v3039_v31 = vadd.f32 0.001143296, %v3038_v40  ;;  %v2942_v11 = vmul.f32 %v2941_v28, %v2917_v43  ;;  %v3399_v35 = vmul.f32 %v3367_v42, %v2023_v8  ;;  %v3027_v63 = vmul.f32 2.1237322e-06, %v11111_v57  ;;  %v1944_v28 = vpop.f32.mrf.mxu2 }
 0x551   : > { %v3627_v47 = vpop.f32.mrf.mxu1  ;;  %v3397_v1 = vmul.f32 %v3365_v30, %v2021_v41  ;;  %v7645_v20 = vclamps-f32 %v3022_v23, 1.0  ;;  %v2024_v5 = vmul.f32 0.5, %v14268_v54  ;;  %v11130_v53 = vadd.f32 %v1991_v46, %v14269_v58 }
 0x552   : > { %v3628_v44 = vadd.f32 %v3627_v47, %v3579_v51  ;;  %v3040_v16 = vmul.f32 %v3039_v31, %v11111_v57  ;;  %v7643_v33 = vclamps-f32 %v2942_v11, 1.0  ;;  %v3028_v59 = vadd.f32 0.00028619796, %v3027_v63  ;;  %v1993_v8 = vpop.f32.mrf.mxu3 }
 0x553   : > { %3634 = vmatmul.bf16.gmra.mxu1 %v3450_v12  ;;  %v3451_v29 = vpack.c.bf16 %v3399_v35, %v3397_v1  ;;  %v3368_v6 = vadd.f32 1.0, %v7645_v20  ;;  %v2022_v17 = vmul.f32 0.5, %v14270_v38  ;;  %v11135_v26 = vmul.f32 0.70710677, %v11130_v53 }
 0x554   : > { %v11120_v13 = vadd.f32 %v3628_v44, %v14266_v10  ;;  %v3041_v27 = vadd.f32 0.014752088, %v3040_v16  ;;  %v3366_v56 = vadd.f32 1.0, %v7643_v33  ;;  %v3029_v7 = vmul.f32 %v3028_v59, %v11111_v57 }
 0x555   : > { %v3400_v32 = vmul.f32 %v3368_v6, %v2024_v5  ;;  %v3065_v61 = vmul.f32 %v11135_v26, %v11135_v26  ;;  %v11155_v23 = vadd.f32 %v1944_v28, %v9850_v62  ;;  %v11158_v12 = vadd.f32 %v1993_v8, %v14269_v58 }
 0x556   : > { %3683 = vadd.xlane.f32.xlu0 %v11120_v13  ;;  %v3042_v14 = vmul.f32 %v3041_v27, %v11111_v57  ;;  %v3398_v24 = vmul.f32 %v3366_v56, %v2022_v17  ;;  %v3030_v55 = vadd.f32 0.0036580483, %v3029_v7 }
 0x557   : > { %v11140_v4 = vmin.f32 %v3065_v61, 16.0  ;;  %v11164_v11 = vmul.f32 0.70710677, %v11155_v23  ;;  %v11167_v35 = vmul.f32 0.70710677, %v11158_v12 }
 0x558   : > { %v3043_v22 = vadd.f32 0.112945676, %v3042_v14  ;;  %v3452_v2 = vpack.c.bf16 %v3400_v32, %v3398_v24  ;;  %v3031_v50 = vmul.f32 %v3030_v55, %v11111_v57  ;;  %v1947_v6 = vpop.f32.mrf.mxu2 }
 0x559   : > { %3590 = vmatmul.bf16.gmra.mxu0 %v3451_v29  ;;  %v3078_v9 = vmul.f32 3.8918573e-05, %v11140_v4  ;;  %v3067_v25 = vmul.f32 2.1237322e-06, %v11140_v4  ;;  %v3105_v63 = vmul.f32 %v11164_v11, %v11164_v11  ;;  %v3145_v1 = vmul.f32 %v11167_v35, %v11167_v35 }
 0x55a   : > { %v3044_v60 = vmul.f32 %v3043_v22, %v11111_v57  ;;  %v3032_v39 = vadd.f32 0.05243302, %v3031_v50  ;;  %v1996_v5 = vpop.f32.mrf.mxu3 }
 0x55b   : > { %v3079_v36 = vadd.f32 0.001143296, %v3078_v9  ;;  %v3068_v42 = vadd.f32 0.00028619796, %v3067_v25  ;;  %v11176_v14 = vmin.f32 %v3105_v63, 16.0  ;;  %v11178_v59 = vmin.f32 %v3145_v1, 16.0 }
 0x55c   : > { %v3045_v21 = vadd.f32 0.4994258, %v3044_v60  ;;  %v3033_v47 = vmul.f32 %v3032_v39, %v11111_v57 }
 0x55d   : > { %v3080_v51 = vmul.f32 %v3079_v36, %v11140_v4  ;;  %v3069_v43 = vmul.f32 %v3068_v42, %v11140_v4  ;;  %v3107_v46 = vmul.f32 2.1237322e-06, %v11176_v14  ;;  %v3118_v56 = vmul.f32 3.8918573e-05, %v11176_v14 }
 0x55e   : > { %v3046_v15 = vmul.f32 %v3045_v21, %v11111_v57  ;;  %v3034_v31 = vadd.f32 0.18741608, %v3033_v47  ;;  %v3147_v54 = vmul.f32 2.1237322e-06, %v11178_v59  ;;  %v3158_v24 = vmul.f32 3.8918573e-05, %v11178_v59 }
 0x55f   : > { %v3081_v48 = vadd.f32 0.014752088, %v3080_v51  ;;  %v3070_v41 = vadd.f32 0.0036580483, %v3069_v43  ;;  %v3108_v17 = vadd.f32 0.00028619796, %v3107_v46 }
 0x560   : > { %v11143_v45 = vadd.f32 1.0, %v3046_v15  ;;  %v3035_v20 = vmul.f32 %v3034_v31, %v11111_v57  ;;  %v11186_v57 = vadd.f32 %v1947_v6, %v9850_v62  ;;  %v3119_v32 = vadd.f32 0.001143296, %v3118_v56 }
 0x561   : > { %v3082_v40 = vmul.f32 %v3081_v48, %v11140_v4  ;;  %v3071_v29 = vmul.f32 %v3070_v41, %v11140_v4  ;;  %v3148_v21 = vadd.f32 0.00028619796, %v3147_v54  ;;  %v3109_v15 = vmul.f32 %v3108_v17, %v11176_v14  ;;  %v1949_v41 = vpop.f32.mrf.mxu2 }
 0x562   : > { %8338 = vrcp.f32 %v11143_v45  ;;  %v3036_v60 = vadd.f32 1.1283791, %v3035_v20  ;;  %vm3053_vm1 = vweird.f32 %v11143_v45  ;;  %v3057_v55 = vand.u32 2147483647, %v11143_v45 }
 0x563   : > { %3639 = vmatmul.bf16.gmra.mxu1 %v3452_v2  ;;  %v3083_v30 = vadd.f32 0.112945676, %v3082_v40  ;;  %v3072_v38 = vadd.f32 0.05243302, %v3071_v29  ;;  %v11195_v61 = vmul.f32 0.70710677, %v11186_v57  ;;  %v11198_v2 = vadd.f32 %v1996_v5, %v14269_v58 }
 0x564   : > { %v3059_v50 = vand.u32 2147483648, %v11143_v45  ;;  %v3120_v9 = vmul.f32 %v3119_v32, %v11176_v14  ;;  %v3149_v25 = vmul.f32 %v3148_v21, %v11178_v59  ;;  %v3159_v36 = vadd.f32 0.001143296, %v3158_v24 }
 0x565   : > { %v3084_v10 = vmul.f32 %v3083_v30, %v11140_v4  ;;  %v3110_v51 = vadd.f32 0.0036580483, %v3109_v15  ;;  %v3185_v42 = vmul.f32 %v11195_v61, %v11195_v61  ;;  %v3073_v47 = vmul.f32 %v3072_v38, %v11140_v4 }
 0x566   : > { %v3121_v40 = vadd.f32 0.014752088, %v3120_v9  ;;  %v3150_v43 = vadd.f32 0.0036580483, %v3149_v25  ;;  %v3160_v28 = vmul.f32 %v3159_v36, %v11178_v59  ;;  %vm11225_vm4 = vcmp.eq.f32.partialorder %v3057_v55, 8.507059e+37 }
 0x567   : > { %v3085_v16 = vadd.f32 0.4994258, %v3084_v10  ;;  %v3111_v30 = vmul.f32 %v3110_v51, %v11176_v14  ;;  %v11214_v31 = vmin.f32 %v3185_v42, 16.0  ;;  %v11217_v10 = vmul.f32 0.70710677, %v11198_v2 }
 0x568   : > { %v11152_v44 = vpop.eup %8338  ;;  %v3151_v63 = vmul.f32 %v3150_v43, %v11178_v59  ;;  %v3161_v1 = vadd.f32 0.014752088, %v3160_v28  ;;  %v3074_v54 = vadd.f32 0.18741608, %v3073_v47  ;;  %v3037_v24 = vmul.f32 %v3036_v60, %v11080_v49 }
 0x569   : > { %v3049_v52 = vmul.f32 %v11152_v44, %v11143_v45  ;;  %v3086_v27 = vmul.f32 %v3085_v16, %v11140_v4  ;;  %vm3054_vm2 = vweird.f32 %v11152_v44  ;;  %v3122_v16 = vmul.f32 %v3121_v40, %v11176_v14 }
 0x56a   : > { %vm11221_vm3 = vmor %vm3053_vm1, %vm3054_vm2  ;;  %v3112_v45 = vadd.f32 0.05243302, %v3111_v30  ;;  %v3162_v6 = vmul.f32 %v3161_v1, %v11178_v59  ;;  %v3187_v46 = vmul.f32 2.1237322e-06, %v11214_v31  ;;  %v3198_v56 = vmul.f32 3.8918573e-05, %v11214_v31 }
 0x56b   : > { %v3050_v33 = vsub.f32 1.0, %v3049_v52  ;;  %v11180_v22 = vadd.f32 1.0, %v3086_v27  ;;  %v3060_v27 = vor.u32 1.1754944e-38, %v3059_v50  ;;  %v3123_v29 = vadd.f32 0.112945676, %v3122_v16 }
 0x56c   : > { %v3225_v38 = vmul.f32 %v11217_v10, %v11217_v10  ;;  %v3113_v17 = vmul.f32 %v3112_v45, %v11176_v14  ;;  %v3163_v32 = vadd.f32 0.112945676, %v3162_v6  ;;  %v3199_v21 = vadd.f32 0.001143296, %v3198_v56 }
 0x56d   : > { %8340 = vrcp.f32 %v11180_v22  ;;  %v3051_v7 = vmul.f32 %v11152_v44, %v3050_v33  ;;  %v3188_v9 = vadd.f32 0.00028619796, %v3187_v46  ;;  %v3075_v36 = vmul.f32 %v3074_v54, %v11140_v4 }
 0x56e   : > { %v3164_v50 = vmul.f32 %v3163_v32, %v11178_v59  ;;  %v3200_v25 = vmul.f32 %v3199_v21, %v11214_v31  ;;  %v11250_v51 = vmin.f32 %v3225_v38, 16.0  ;;  %v3114_v49 = vadd.f32 0.18741608, %v3113_v17 }
 0x56f   : > { %v3052_v39 = vadd.f32 %v11152_v44, %v3051_v7  ;;  %v3152_v7 = vadd.f32 0.05243302, %v3151_v63  ;;  %vm3093_vm6 = vweird.f32 %v11180_v22  ;;  %v3099_v43 = vand.u32 2147483648, %v11180_v22 }
 0x570   : > { %v3165_v47 = vadd.f32 0.4994258, %v3164_v50  ;;  %v3201_v28 = vadd.f32 0.014752088, %v3200_v25  ;;  %v3097_v4 = vand.u32 2147483647, %v11180_v22  ;;  %v3189_v52 = vmul.f32 %v3188_v9, %v11214_v31 }
 0x571   : > { %v3056_v20 = vsel %vm11221_vm3, %v11152_v44, %v3052_v39  ;;  %v3124_v44 = vmul.f32 %v3123_v29, %v11176_v14  ;;  %v3153_v39 = vmul.f32 %v3152_v7, %v11178_v59  ;;  %v3076_v16 = vadd.f32 1.1283791, %v3075_v36 }
 0x572   : > { %v3061_v55 = vsel %vm11225_vm4, %v3060_v27, %v3056_v20  ;;  %v3166_v30 = vmul.f32 %v3165_v47, %v11178_v59  ;;  %v3202_v1 = vmul.f32 %v3201_v28, %v11214_v31  ;;  %v3115_v27 = vmul.f32 %v3114_v49, %v11176_v14 }
 0x573   : > { %v11207_v48 = vpop.eup %8340  ;;  %v3125_v15 = vadd.f32 0.4994258, %v3124_v44  ;;  %v3062_v40 = vmul.f32 %v3061_v55, %v3037_v24  ;;  %v3154_v63 = vadd.f32 0.18741608, %v3153_v39  ;;  %v11271_v29 = vadd.f32 %v1949_v41, %v9850_v62 }
 0x574   : > { %v3089_v8 = vmul.f32 %v11207_v48, %v11180_v22  ;;  %vm3094_vm5 = vweird.f32 %v11207_v48  ;;  %v3227_v22 = vmul.f32 2.1237322e-06, %v11250_v51  ;;  %v11268_v45 = vadd.f32 1.0, %v3166_v30 }
 0x575   : > { %v3126_v60 = vmul.f32 %v3125_v15, %v11176_v14  ;;  %vm3095_vm7 = vmor %vm3093_vm6, %vm3094_vm5  ;;  %v7646_v6 = vclamps-f32 %v3062_v40, 1.0  ;;  %vm3098_vm8 = vcmp.eq.f32.partialorder %v3097_v4, 8.507059e+37  ;;  %v3190_v46 = vadd.f32 0.0036580483, %v3189_v52  ;;  %v1998_v15 = vpop.f32.mrf.mxu3 }
 0x576   : > { %v3090_v33 = vsub.f32 1.0, %v3089_v8  ;;  %v3203_v56 = vadd.f32 0.112945676, %v3202_v1  ;;  %v3077_v14 = vmul.f32 %v3076_v16, %v11135_v26  ;;  %v3228_v38 = vadd.f32 0.00028619796, %v3227_v22 }
 0x577   : > { %v11257_v8 = vadd.f32 1.0, %v3126_v60  ;;  %v2025_v17 = vmul.f32 0.5, %v11073_v0  ;;  %v11279_v62 = vmul.f32 0.5, %v11155_v23  ;;  %v3238_v44 = vmul.f32 3.8918573e-05, %v11250_v51 }
 0x578   : > { %v3091_v5 = vmul.f32 %v11207_v48, %v3090_v33  ;;  %v3100_v33 = vor.u32 1.1754944e-38, %v3099_v43  ;;  %v3204_v7 = vmul.f32 %v3203_v56, %v11214_v31  ;;  %v11283_v32 = vmul.f32 0.70710677, %v11271_v29 }
 0x579   : > { %8342 = vrcp.f32 %v11257_v8  ;;  %v11288_v26 = vmul.f32 %v3190_v46, %v11214_v31  ;;  %v3239_v9 = vadd.f32 0.001143296, %v3238_v44  ;;  %v3139_v36 = vand.u32 2147483648, %v11257_v8 }
 0x57a   : > { %v3092_v42 = vadd.f32 %v11207_v48, %v3091_v5  ;;  %v3155_v5 = vmul.f32 %v3154_v63, %v11178_v59  ;;  %8344 = vrcp.f32 %v11268_v45  ;;  %v3369_v59 = vadd.f32 1.0, %v7646_v6 }
 0x57b   : > { %v3205_v55 = vadd.f32 0.4994258, %v3204_v7  ;;  %v3265_v23 = vmul.f32 %v11283_v32, %v11283_v32  ;;  %v3240_v47 = vmul.f32 %v3239_v9, %v11250_v51  ;;  %v11301_v43 = vadd.f32 %v1998_v15, %v14269_v58 }
 0x57c   : > { %v3096_v20 = vsel %vm3095_vm7, %v11207_v48, %v3092_v42  ;;  %v3116_v48 = vadd.f32 1.1283791, %v3115_v27  ;;  %v3156_v0 = vadd.f32 1.1283791, %v3155_v5  ;;  %v3229_v42 = vmul.f32 %v3228_v38, %v11250_v51 }
 0x57d   : > { %v3101_v54 = vsel %vm3098_vm8, %v3100_v33, %v3096_v20  ;;  %v3206_v39 = vmul.f32 %v3205_v55, %v11214_v31  ;;  %v11298_v40 = vmin.f32 %v3265_v23, 16.0  ;;  %vm3133_vm9 = vweird.f32 %v11257_v8 }
 0x57e   : > { %v11285_v24 = vmul.f32 %v3101_v54, %v3077_v14  ;;  %v3117_v25 = vmul.f32 %v3116_v48, %v11164_v11  ;;  %v3137_v28 = vand.u32 2147483647, %v11257_v8  ;;  %v3241_v52 = vadd.f32 0.014752088, %v3240_v47 }
 0x57f   : > { %v8343_v21 = vpop.eup %8342  ;;  %v11306_v4 = vadd.f32 1.0, %v3206_v39  ;;  %v3267_v41 = vmul.f32 2.1237322e-06, %v11298_v40  ;;  %v3140_v16 = vor.u32 1.1754944e-38, %v3139_v36  ;;  %v3177_v1 = vand.u32 2147483647, %v11268_v45 }
 0x580   : > { %v3129_v50 = vmul.f32 %v8343_v21, %v11257_v8  ;;  %v8345_v49 = vpop.eup %8344  ;;  %vm3134_vm10 = vweird.f32 %v8343_v21  ;;  %v3179_v58 = vand.u32 2147483648, %v11268_v45  ;;  %v3242_v27 = vmul.f32 %v3241_v52, %v11250_v51 }
 0x581   : > { %v3169_v11 = vmul.f32 %v8345_v49, %v11268_v45  ;;  %vm3174_vm11 = vweird.f32 %v8345_v49  ;;  %v11313_v22 = vmul.f32 0.70710677, %v11301_v43  ;;  %vm3135_vm12 = vmor %vm3133_vm9, %vm3134_vm10  ;;  %8346 = vrcp.f32 %v11306_v4 }
 0x582   : > { %v3130_v60 = vsub.f32 1.0, %v3129_v50  ;;  %v3268_v6 = vadd.f32 0.00028619796, %v3267_v41  ;;  %v3278_v46 = vmul.f32 3.8918573e-05, %v11298_v40  ;;  %vm3138_vm13 = vcmp.eq.f32.partialorder %v3137_v28, 8.507059e+37 }
 0x583   : > { %v3170_v63 = vsub.f32 1.0, %v3169_v11  ;;  %vm3173_vm14 = vweird.f32 %v11268_v45  ;;  %v3243_v54 = vadd.f32 0.112945676, %v3242_v27  ;;  %v3180_v48 = vor.u32 1.1754944e-38, %v3179_v58 }
 0x584   : > { %v3131_v30 = vmul.f32 %v8343_v21, %v3130_v60  ;;  %v3279_v7 = vadd.f32 0.001143296, %v3278_v46  ;;  %vm3175_vm15 = vmor %vm3173_vm14, %vm3174_vm11  ;;  %v3269_v44 = vmul.f32 %v3268_v6, %v11298_v40  ;;  %v3305_v55 = vmul.f32 %v11313_v22, %v11313_v22 }
 0x585   : > { %v3171_v33 = vmul.f32 %v8345_v49, %v3170_v63  ;;  %v3244_v8 = vmul.f32 %v3243_v54, %v11250_v51  ;;  %vm3178_vm0 = vcmp.eq.f32.partialorder %v3177_v1, 8.507059e+37  ;;  %v3401_v50 = vmul.f32 %v3369_v59, %v2025_v17 }
 0x586   : > { %v3132_v20 = vadd.f32 %v8343_v21, %v3131_v30  ;;  %v3280_v45 = vmul.f32 %v3279_v7, %v11298_v40  ;;  %v2028_v23 = vmul.f32 0.5, %v11158_v12  ;;  %v7647_v39 = vclamps-f32 %v11285_v24, 1.0 }
 0x587   : > { %v3172_v14 = vadd.f32 %v8345_v49, %v3171_v33  ;;  %v11328_v36 = vpop.eup %8346  ;;  %v3245_v47 = vadd.f32 0.4994258, %v3244_v8  ;;  %v3192_v30 = vadd.f32 0.05243302, %v11288_v26  ;;  %v3230_v52 = vadd.f32 0.0036580483, %v3229_v42 }
 0x588   : > { %v3136_v56 = vsel %vm3135_vm12, %v8343_v21, %v3132_v20  ;;  %v3157_v21 = vmul.f32 %v3156_v0, %v11167_v35  ;;  %v3281_v28 = vadd.f32 0.014752088, %v3280_v45  ;;  %v3270_v35 = vadd.f32 0.0036580483, %v3269_v44 }
 0x589   : > { %v3141_v5 = vsel %vm3138_vm13, %v3140_v16, %v3136_v56  ;;  %v3176_v15 = vsel %vm3175_vm15, %v8345_v49, %v3172_v14  ;;  %v11332_v0 = vmin.f32 %v3305_v55, 16.0  ;;  %v3246_v17 = vmul.f32 %v3245_v47, %v11250_v51 }
 0x58a   : > { %v3142_v38 = vmul.f32 %v3141_v5, %v3117_v25  ;;  %v3181_v25 = vsel %vm3178_vm0, %v3180_v48, %v3176_v15  ;;  %v3282_v12 = vmul.f32 %v3281_v28, %v11298_v40  ;;  %v3209_v24 = vmul.f32 %v11328_v36, %v11306_v4 }
 0x58b   : > { %v3182_v60 = vmul.f32 %v3181_v25, %v3157_v21  ;;  %v3307_v41 = vmul.f32 2.1237322e-06, %v11332_v0  ;;  %v3318_v16 = vmul.f32 3.8918573e-05, %v11332_v0  ;;  %v3370_v63 = vadd.f32 1.0, %v7647_v39  ;;  %v14275_v21 = vld [vmem:[#allocation28_spill] sm:$0xff] }
 0x58c   : > { %v7648_v9 = vclamps-f32 %v3142_v38, 1.0  ;;  %v11341_v1 = vadd.f32 1.0, %v3246_v17  ;;  %v3283_v58 = vadd.f32 0.112945676, %v3282_v12  ;;  %v3271_v42 = vmul.f32 %v3270_v35, %v11298_v40 }
 0x58d   : > { %v7649_v49 = vclamps-f32 %v3182_v60, 1.0  ;;  %v3308_v20 = vadd.f32 0.00028619796, %v3307_v41  ;;  %v3319_v27 = vadd.f32 0.001143296, %v3318_v16  ;;  %v2026_v6 = vmul.f32 0.5, %v11130_v53 }
 0x58e   : > { %v3371_v11 = vadd.f32 1.0, %v7648_v9  ;;  %8348 = vrcp.f32 %v11341_v1  ;;  %v3193_v46 = vmul.f32 %v3192_v30, %v11214_v31  ;;  %v3210_v56 = vsub.f32 1.0, %v3209_v24 }
 0x58f   : > { %v3372_v26 = vadd.f32 1.0, %v7649_v49  ;;  %v3231_v54 = vmul.f32 %v3230_v52, %v11250_v51  ;;  %v3284_v5 = vmul.f32 %v3283_v58, %v11298_v40  ;;  %v3402_v14 = vmul.f32 %v3370_v63, %v2026_v6 }
 0x590   : > { %v3403_v59 = vmul.f32 %v3371_v11, %v11279_v62  ;;  %v3309_v48 = vmul.f32 %v3308_v20, %v11332_v0  ;;  %v3320_v7 = vmul.f32 %v3319_v27, %v11332_v0  ;;  %v3272_v8 = vadd.f32 0.05243302, %v3271_v42 }
 0x591   : > { %v3404_v62 = vmul.f32 %v3372_v26, %v2028_v23  ;;  %v3285_v44 = vadd.f32 0.4994258, %v3284_v5  ;;  %v3194_v45 = vadd.f32 0.18741608, %v3193_v46  ;;  %v3232_v9 = vadd.f32 0.05243302, %v3231_v54 }
 0x592   : > { %v3453_v33 = vpack.c.bf16 %v3403_v59, %v3401_v50  ;;  %v3321_v53 = vadd.f32 0.014752088, %v3320_v7  ;;  %v3211_v50 = vmul.f32 %v11328_v36, %v3210_v56  ;;  %v3310_v39 = vadd.f32 0.0036580483, %v3309_v48 }
 0x593   : > { %v3454_v55 = vpack.c.bf16 %v3404_v62, %v3402_v14  ;;  %v3286_v23 = vmul.f32 %v3285_v44, %v11298_v40  ;;  %v3273_v28 = vmul.f32 %v3272_v8, %v11298_v40  ;;  %v3195_v52 = vmul.f32 %v3194_v45, %v11214_v31 }
 0x594   : > { %3595 = vmatmul.bf16.gmra.mxu0 %v3453_v33  ;;  %v11354_v25 = vpop.eup %8348  ;;  %v3322_v60 = vmul.f32 %v3321_v53, %v11332_v0  ;;  %v3212_v17 = vadd.f32 %v11328_v36, %v3211_v50  ;;  %vm3214_vm1 = vweird.f32 %v11328_v36  ;;  %vm3213_vm2 = vweird.f32 %v11306_v4 }
 0x595   : > { %3644 = vmatmul.bf16.gmra.mxu1 %v3454_v55  ;;  %v3249_v11 = vmul.f32 %v11354_v25, %v11341_v1  ;;  %v11363_v30 = vadd.f32 1.0, %v3286_v23  ;;  %v3219_v12 = vand.u32 2147483648, %v11306_v4  ;;  %v3311_v59 = vmul.f32 %v3310_v39, %v11332_v0  ;;  %vm11378_vm3 = vmor %vm3213_vm2, %vm3214_vm1 }
 0x596   : > { %v3323_v35 = vadd.f32 0.112945676, %v3322_v60  ;;  %v3217_v41 = vand.u32 2147483647, %v11306_v4  ;;  %v3274_v16 = vadd.f32 0.18741608, %v3273_v28  ;;  %v3216_v20 = vsel %vm11378_vm3, %v11328_v36, %v3212_v17 }
 0x597   : > { %8350 = vrcp.f32 %v11363_v30  ;;  %v3250_v58 = vsub.f32 1.0, %v3249_v11  ;;  %v3196_v42 = vadd.f32 1.1283791, %v3195_v52  ;;  %v3220_v4 = vor.u32 1.1754944e-38, %v3219_v12 }
 0x598   : > { %v3324_v31 = vmul.f32 %v3323_v35, %v11332_v0  ;;  %v3312_v62 = vadd.f32 0.05243302, %v3311_v59  ;;  %vm3218_vm4 = vcmp.eq.f32.partialorder %v3217_v41, 8.507059e+37  ;;  %v3275_v46 = vmul.f32 %v3274_v16, %v11298_v40 }
 0x599   : > { %v3221_v48 = vsel %vm3218_vm4, %v3220_v4, %v3216_v20  ;;  %v3251_v36 = vmul.f32 %v11354_v25, %v3250_v58  ;;  %v3259_v45 = vand.u32 2147483648, %v11341_v1  ;;  %vm3254_vm5 = vweird.f32 %v11354_v25 }
 0x59a   : > { %v3325_v27 = vadd.f32 0.4994258, %v3324_v31  ;;  %v3313_v40 = vmul.f32 %v3312_v62, %v11332_v0  ;;  %v3276_v50 = vadd.f32 1.1283791, %v3275_v46  ;;  %v3299_v23 = vand.u32 2147483648, %v11363_v30 }
 0x59b   : > { %v3297_v39 = vand.u32 2147483647, %v11363_v30  ;;  %vm3253_vm7 = vweird.f32 %v11341_v1  ;;  %v3257_v60 = vand.u32 2147483647, %v11341_v1  ;;  %vm3293_vm9 = vweird.f32 %v11363_v30 }
 0x59c   : > { %v3326_v56 = vmul.f32 %v3325_v27, %v11332_v0  ;;  %v3314_v28 = vadd.f32 0.18741608, %v3313_v40  ;;  %vm11413_vm8 = vmor %vm3253_vm7, %vm3254_vm5  ;;  %v3300_v12 = vor.u32 1.1754944e-38, %v3299_v23  ;;  %v3277_v59 = vmul.f32 %v3276_v50, %v11283_v32 }
 0x59d   : > { %v8351_v14 = vpop.eup %8350  ;;  %vm3298_vm11 = vcmp.eq.f32.partialorder %v3297_v39, 8.507059e+37  ;;  %vm3258_vm12 = vcmp.eq.f32.partialorder %v3257_v60, 8.507059e+37  ;;  %v2031_v4 = vmul.f32 0.5, %v11271_v29 }
 0x59e   : > { %v11398_v44 = vadd.f32 1.0, %v3326_v56  ;;  %vm3294_vm6 = vweird.f32 %v8351_v14 }
 0x59f   : > { %vm3295_vm10 = vmor %vm3293_vm9, %vm3294_vm6 }
 0x5a0   : > { %8352 = vrcp.f32 %v11398_v44  ;;  %vm3333_vm14 = vweird.f32 %v11398_v44 }
 0x5a1   : > { %v3674_v38 = vpop.xlane.xlu1 %3673 }
 0x5a2   : > { %v3705_v15 = vmul.f32 %v3674_v38, %v14275_v21  ;;  %v3289_v38 = vmul.f32 %v8351_v14, %v11363_v30 }
 0x5a4   : > { %v11358_v47 = vsub.f32 %v10958_v18, %v3705_v15  ;;  %v3233_v18 = vmul.f32 %v3232_v9, %v11250_v51  ;;  %v3290_v9 = vsub.f32 1.0, %v3289_v38 }
 0x5a6   : > { %v3737_v49 = vmul.f32 %v11358_v47, %v11358_v47  ;;  %v3234_v6 = vadd.f32 0.18741608, %v3233_v18  ;;  %v3260_v18 = vor.u32 1.1754944e-38, %v3259_v45  ;;  %v8353_v30 = vpop.eup %8352 }
 0x5a7   : > { %v3329_v32 = vmul.f32 %v8353_v30, %v11398_v44  ;;  %vm3334_vm13 = vweird.f32 %v8353_v30 }
 0x5a8   : > { %3753 = vadd.xlane.f32.xlu1 %v3737_v49  ;;  %v3676_v24 = vpop.xlane.xlu2 %3675  ;;  %v3235_v8 = vmul.f32 %v3234_v6, %v11250_v51  ;;  %v3291_v51 = vmul.f32 %v8351_v14, %v3290_v9  ;;  %vm3335_vm15 = vmor %vm3333_vm14, %vm3334_vm13 }
 0x5a9   : > { %v3706_v63 = vmul.f32 %v3676_v24, %v14275_v21  ;;  %v11425_v24 = vld [vmem:[%s14107_s12] ss:$0 sm:$0xff]  ;;  %v3330_v46 = vsub.f32 1.0, %v3329_v32  ;;  %v14282_v32 = vld [vmem:[#allocation37_spill] sm:$0xff] }
 0x5aa   : > { %v3236_v11 = vadd.f32 1.1283791, %v3235_v8  ;;  %v3292_v49 = vadd.f32 %v8351_v14, %v3291_v51 }
 0x5ab   : > { %v11386_v33 = vsub.f32 %v10980_v19, %v3706_v63  ;;  %v3197_v19 = vmul.f32 %v3196_v42, %v11195_v61  ;;  %v3252_v61 = vadd.f32 %v11354_v25, %v3251_v36  ;;  %v2029_v42 = vmul.f32 0.5, %v11186_v57 }
 0x5ac   : > { %v3296_v1 = vsel %vm3295_vm10, %v8351_v14, %v3292_v49  ;;  %v3237_v27 = vmul.f32 %v3236_v11, %v11217_v10  ;;  %v3339_v36 = vand.u32 2147483648, %v11398_v44  ;;  %v3331_v57 = vmul.f32 %v8353_v30, %v3330_v46  ;;  %v14281_v49 = vld [vmem:[#allocation35_spill] sm:$0xff] }
 0x5ad   : > { %v3738_v54 = vmul.f32 %v11386_v33, %v11386_v33  ;;  %v3678_v5 = vpop.xlane.xlu0 %3677  ;;  %v3222_v15 = vmul.f32 %v3221_v48, %v3197_v19  ;;  %v3256_v17 = vsel %vm11413_vm8, %v11354_v25, %v3252_v61  ;;  %v3301_v16 = vsel %vm3298_vm11, %v3300_v12, %v3296_v1  ;;  %v14280_v19 = vld [vmem:[#allocation34_spill] sm:$0xff] }
 0x5ae   : > { %v3707_v7 = vmul.f32 %v3678_v5, %v14275_v21  ;;  %v3315_v25 = vmul.f32 %v3314_v28, %v11332_v0  ;;  %v3261_v26 = vsel %vm3258_vm12, %v3260_v18, %v3256_v17  ;;  %v3302_v58 = vmul.f32 %v3301_v16, %v3277_v59  ;;  %v8008_v0 = vld [vmem:[#allocation11 + $0x78] sm:$0xff]  ;;  %v8007_v1 = vld [vmem:[#allocation11 + $0x70] sm:$0xff] }
 0x5af   : > { %3755 = vadd.xlane.f32.xlu2 %v3738_v54  ;;  %v7650_v52 = vclamps-f32 %v3222_v15, 1.0  ;;  %v3262_v5 = vmul.f32 %v3261_v26, %v3237_v27  ;;  %v3337_v48 = vand.u32 2147483647, %v11398_v44  ;;  %4109 = vmatpush.bf16.msrb.mxu2 %v8008_v0  ;;  %v3332_v8 = vadd.f32 %v8353_v30, %v3331_v57 }
 0x5b0   : > { %v11401_v55 = vsub.f32 %v11006_v37, %v3707_v7  ;;  %v7652_v62 = vclamps-f32 %v3302_v58, 1.0  ;;  %v3316_v14 = vadd.f32 1.1283791, %v3315_v25  ;;  %v3340_v45 = vor.u32 1.1754944e-38, %v3339_v36 }
 0x5b1   : > { %v3373_v20 = vadd.f32 1.0, %v7650_v52  ;;  %v7651_v15 = vclamps-f32 %v3262_v5, 1.0  ;;  %v3336_v23 = vsel %vm3335_vm15, %v8353_v30, %v3332_v8  ;;  %vm3338_vm0 = vcmp.eq.f32.partialorder %v3337_v48, 8.507059e+37  ;;  %v8003_v5 = vld [vmem:[#allocation11 + $0x50] sm:$0xff]  ;;  %v14285_v8 = vld [vmem:[#allocation39_spill] sm:$0xff] }
 0x5b2   : > { %v3739_v37 = vmul.f32 %v11401_v55, %v11401_v55  ;;  %v3375_v7 = vadd.f32 1.0, %v7652_v62  ;;  %v3317_v61 = vmul.f32 %v3316_v14, %v11313_v22  ;;  %v3341_v44 = vsel %vm3338_vm0, %v3340_v45, %v3336_v23 }
 0x5b3   : > { %v3405_v29 = vmul.f32 %v3373_v20, %v2029_v42  ;;  %v3374_v11 = vadd.f32 1.0, %v7651_v15  ;;  %v2030_v22 = vmul.f32 0.5, %v11198_v2  ;;  %v2032_v17 = vmul.f32 0.5, %v11301_v43  ;;  %4110 = vmatpush.bf16.msrb.mxu2 %v8007_v1  ;;  %v8002_v15 = vld [vmem:[#allocation11 + $0x48] sm:$0xff] }
 0x5b4   : > { %v3407_v38 = vmul.f32 %v3375_v7, %v2031_v4  ;;  %v8004_v4 = vld [vmem:[#allocation11 + $0x58] sm:$0xff]  ;;  %v14284_v7 = vld [vmem:[#allocation40_spill] sm:$0xff] }
 0x5b5   : > { %v3406_v16 = vmul.f32 %v3374_v11, %v2030_v22 }
 0x5b6   : > { %v3581_v53 = vpop.f32.mrf.mxu0  ;;  %v3455_v51 = vpack.c.bf16 %v3407_v38, %v3405_v29 }
 0x5b7   : > { %v3582_v41 = vadd.f32 %v11425_v24, %v3581_v53  ;;  %3757 = vadd.xlane.f32.xlu2 %v3739_v37  ;;  %v3342_v37 = vmul.f32 %v3341_v44, %v3317_v61 }
 0x5b8   : > { %v3680_v63 = vpop.xlane.xlu1 %3679  ;;  %3600 = vmatmul.bf16.gmra.mxu0 %v3455_v51 }
 0x5b9   : > { %v3708_v54 = vmul.f32 %v3680_v63, %v14275_v21  ;;  %v7653_v35 = vclamps-f32 %v3342_v37, 1.0 }
 0x5bb   : > { %v11443_v53 = vsub.f32 %v11064_v3, %v3708_v54  ;;  %v3376_v18 = vadd.f32 1.0, %v7653_v35  ;;  %v14283_v54 = vld [vmem:[#allocation38_spill] sm:$0xff] }
 0x5bd   : > { %v3740_v28 = vmul.f32 %v11443_v53, %v11443_v53  ;;  %v3408_v25 = vmul.f32 %v3376_v18, %v2032_v17 }
 0x5be   : > { %v3583_v31 = vpop.f32.mrf.mxu0 }
 0x5bf   : > { %v3584_v40 = vadd.f32 %v11425_v24, %v3583_v31  ;;  %v8006_v31 = vld [vmem:[#allocation11 + $0x68] sm:$0xff]  ;;  %v3456_v2 = vpack.c.bf16 %v3408_v25, %v3406_v16 }
 0x5c0   : > { %v3630_v6 = vpop.f32.mrf.mxu1  ;;  %4111 = vmatpush.bf16.msrb.mxu2 %v8006_v31 }
 0x5c1   : > { %v3631_v56 = vadd.f32 %v3630_v6, %v3582_v41  ;;  %v3682_v9 = vpop.xlane.xlu2 %3681  ;;  %3649 = vmatmul.bf16.gmra.mxu1 %v3456_v2 }
 0x5c2   : > { %v3709_v3 = vmul.f32 %v3682_v9, %v14275_v21 }
 0x5c3   : > { %v11437_v10 = vadd.f32 %v3631_v56, %v14280_v19 }
 0x5c4   : > { %v11457_v59 = vsub.f32 %v11092_v34, %v3709_v3  ;;  %v8005_v34 = vld [vmem:[#allocation11 + $0x60] sm:$0xff] }
 0x5c5   : > { %3685 = vadd.xlane.f32.xlu0 %v11437_v10  ;;  %4112 = vmatpush.bf16.msrb.mxu2 %v8005_v34 }
 0x5c6   : > { %v3586_v50 = vpop.f32.mrf.mxu0  ;;  %v3741_v43 = vmul.f32 %v11457_v59, %v11457_v59 }
 0x5c7   : > { %v3587_v12 = vadd.f32 %v11425_v24, %v3586_v50 }
 0x5c8   : > { %v3632_v39 = vpop.f32.mrf.mxu1 }
 0x5c9   : > { %v3633_v60 = vadd.f32 %v3632_v39, %v3584_v40  ;;  %v3684_v30 = vpop.xlane.xlu0 %3683  ;;  %4113 = vmatpush.bf16.msrb.mxu2 %v8004_v4 }
 0x5ca   : > { %v3710_v58 = vmul.f32 %v3684_v30, %v14275_v21 }
 0x5cb   : > { %v11450_v52 = vadd.f32 %v3633_v60, %v14281_v49  ;;  %v14286_v60 = vld [vmem:[#allocation41_spill] sm:$0xff] }
 0x5cc   : > { %v11468_v27 = vsub.f32 %v11120_v13, %v3710_v58 }
 0x5cd   : > { %3687 = vadd.xlane.f32.xlu1 %v11450_v52  ;;  %3759 = vadd.xlane.f32.xlu0 %v3740_v28 }
 0x5ce   : > { %v3588_v41 = vpop.f32.mrf.mxu0  ;;  %v3742_v56 = vmul.f32 %v11468_v27, %v11468_v27  ;;  %4114 = vmatpush.bf16.msrb.mxu2 %v8003_v5 }
 0x5cf   : > { %v3589_v20 = vadd.f32 %v11425_v24, %v3588_v41 }
 0x5d0   : > { %v3635_v63 = vpop.f32.mrf.mxu1 }
 0x5d1   : > { %v3636_v26 = vadd.f32 %v3635_v63, %v3587_v12  ;;  %v8001_v12 = vld [vmem:[#allocation11 + $0x40] sm:$0xff] }
 0x5d2   : > { %4115 = vmatpush.bf16.msrb.mxu2 %v8002_v15  ;;  %v14289_v15 = vld [vmem:[#allocation42_spill] sm:$0xff] }
 0x5d3   : > { %v11463_v42 = vadd.f32 %v3636_v26, %v14282_v32 }
 0x5d5   : > { %3689 = vadd.xlane.f32.xlu1 %v11463_v42  ;;  %3761 = vadd.xlane.f32.xlu0 %v3741_v43 }
 0x5d6   : > { %v3591_v62 = vpop.f32.mrf.mxu0  ;;  %4116 = vmatpush.bf16.msrb.mxu2 %v8001_v12 }
 0x5d7   : > { %v3592_v14 = vadd.f32 %v11425_v24, %v3591_v62  ;;  %v11508_v62 = vld [vmem:[%s14287_s27] ss:$0 sm:$0xff] }
 0x5d8   : > { %v3637_v6 = vpop.f32.mrf.mxu1 }
 0x5d9   : > { %v3638_v46 = vadd.f32 %v3637_v6, %v3589_v20 }
 0x5db   : > { %v11473_v0 = vadd.f32 %v3638_v46, %v14283_v54 }
 0x5dd   : > { %3691 = vadd.xlane.f32.xlu2 %v11473_v0  ;;  %3763 = vadd.xlane.f32.xlu1 %v3742_v56 }
 0x5de   : > { %v3593_v36 = vpop.f32.mrf.mxu0 }
 0x5df   : > { %v3594_v19 = vadd.f32 %v11425_v24, %v3593_v36 }
 0x5e0   : > { %v3640_v13 = vpop.f32.mrf.mxu1 }
 0x5e1   : > { %v3641_v48 = vadd.f32 %v3640_v13, %v3592_v14 }
 0x5e3   : > { %v11478_v57 = vadd.f32 %v3641_v48, %v14284_v7  ;;  %v11519_v48 = vld [vmem:[%s14288_s23] ss:$0 sm:$0xff] }
 0x5e5   : > { %3693 = vadd.xlane.f32.xlu2 %v11478_v57 }
 0x5e8   : > { %v3642_v29 = vpop.f32.mrf.mxu1 }
 0x5e9   : > { %v3643_v38 = vadd.f32 %v3642_v29, %v3594_v19 }
 0x5eb   : > { %v11483_v40 = vadd.f32 %v3643_v38, %v14285_v8 }
 0x5ed   : > { %3695 = vadd.xlane.f32.xlu0 %v11483_v40 }
 0x611   : > { %v3596_v9 = vpop.f32.mrf.mxu0 }
 0x612   : > { %v3597_v23 = vadd.f32 %v11425_v24, %v3596_v9  ;;  %v3645_v51 = vpop.f32.mrf.mxu1 }
 0x614   : > { %v3646_v44 = vadd.f32 %v3645_v51, %v3597_v23 }
 0x616   : > { %v11490_v28 = vadd.f32 %v3646_v44, %v14286_v60 }
 0x618   : > { %3697 = vadd.xlane.f32.xlu0 %v11490_v28 }
 0x619   : > { %v3598_v63 = vpop.f32.mrf.mxu0 }
 0x61a   : > { %v3599_v34 = vadd.f32 %v11425_v24, %v3598_v63  ;;  %v3647_v5 = vpop.f32.mrf.mxu1 }
 0x61b   : > { %v3754_v45 = vpop.xlane.xlu1 %3753 }
 0x61c   : > { %v3785_v50 = vmul.f32 %v3754_v45, %v14275_v21 }
 0x61e   : > { %v3801_v61 = vadd.f32 1e-05, %v3785_v50 }
 0x620   : > { %8354 = vrsqrt.f32 %v3801_v61  ;;  %vm3823_vm2 = vweird.f32 %v3801_v61 }
 0x622   : > { %v3756_v39 = vpop.xlane.xlu2 %3755 }
 0x623   : > { %v3786_v37 = vmul.f32 %v3756_v39, %v14275_v21 }
 0x625   : > { %v3802_v3 = vadd.f32 1e-05, %v3786_v37 }
 0x626   : > { %v8355_v11 = vpop.eup %8354 }
 0x627   : > { %v3818_v35 = vmul.f32 %v8355_v11, %v3801_v61  ;;  %8356 = vrsqrt.f32 %v3802_v3  ;;  %vm3824_vm1 = vweird.f32 %v8355_v11  ;;  %vm3833_vm5 = vweird.f32 %v3802_v3 }
 0x628   : > { %vm3825_vm3 = vmor %vm3823_vm2, %vm3824_vm1 }
 0x629   : > { %v3819_v49 = vmul.f32 %v8355_v11, %v3818_v35 }
 0x62a   : > { %v3758_v22 = vpop.xlane.xlu2 %3757 }
 0x62b   : > { %v3820_v17 = vmul.f32 0.5, %v3819_v49  ;;  %v3787_v18 = vmul.f32 %v3758_v22, %v14275_v21 }
 0x62d   : > { %v8357_v1 = vpop.eup %8356  ;;  %v3821_v41 = vsub.f32 1.5, %v3820_v17  ;;  %v11494_v30 = vadd.f32 1e-05, %v3787_v18 }
 0x62e   : > { %v3828_v16 = vmul.f32 %v8357_v1, %v3802_v3  ;;  %vm3834_vm4 = vweird.f32 %v8357_v1 }
 0x62f   : > { %v3822_v25 = vmul.f32 %v8355_v11, %v3821_v41  ;;  %8358 = vrsqrt.f32 %v11494_v30  ;;  %vm3835_vm6 = vmor %vm3833_vm5, %vm3834_vm4  ;;  %vm3843_vm8 = vweird.f32 %v11494_v30 }
 0x630   : > { %v3829_v31 = vmul.f32 %v8357_v1, %v3828_v16 }
 0x631   : > { %v3826_v2 = vsel %vm3825_vm3, %v8355_v11, %v3822_v25 }
 0x632   : > { %v3830_v43 = vmul.f32 0.5, %v3829_v31  ;;  %v3977_v4 = vmul.f32 %v3826_v2, %v11358_v47  ;;  %v3648_v47 = vadd.f32 %v3647_v5, %v3599_v34 }
 0x634   : > { %v3831_v32 = vsub.f32 1.5, %v3830_v43  ;;  %v3996_v13 = vmul.f32 %v11508_v62, %v3977_v4  ;;  %v11526_v45 = vadd.f32 %v3648_v47, %v14289_v15  ;;  %v14292_v4 = vld [vmem:[#allocation43_spill] sm:$0xff] }
 0x635   : > { %v11499_v20 = vpop.eup %8358 }
 0x636   : > { %v3832_v46 = vmul.f32 %v8357_v1, %v3831_v32  ;;  %v3838_v56 = vmul.f32 %v11499_v20, %v11494_v30  ;;  %v11532_v9 = vadd.f32 %v11519_v48, %v3996_v13  ;;  %vm3844_vm7 = vweird.f32 %v11499_v20 }
 0x637   : > { %vm11553_vm9 = vmor %vm3843_vm8, %vm3844_vm7 }
 0x638   : > { %v3686_v26 = vpop.xlane.xlu0 %3685  ;;  %v3836_v14 = vsel %vm3835_vm6, %v8357_v1, %v3832_v46  ;;  %v3839_v7 = vmul.f32 %v11499_v20, %v3838_v56 }
 0x639   : > { %v3711_v58 = vmul.f32 %v3686_v26, %v14275_v21 }
 0x63a   : > { %v3840_v23 = vmul.f32 0.5, %v3839_v7 }
 0x63b   : > { %v11503_v6 = vsub.f32 %v11437_v10, %v3711_v58  ;;  %v3978_v10 = vmul.f32 %v3836_v14, %v11386_v33 }
 0x63c   : > { %v3841_v37 = vsub.f32 1.5, %v3840_v23 }
 0x63d   : > { %v3743_v54 = vmul.f32 %v11503_v6, %v11503_v6  ;;  %v3997_v8 = vmul.f32 %v11508_v62, %v3978_v10 }
 0x63e   : > { %v3842_v17 = vmul.f32 %v11499_v20, %v3841_v37 }
 0x63f   : > { %3765 = vadd.xlane.f32.xlu1 %v3743_v54  ;;  %v11535_v61 = vadd.f32 %v11519_v48, %v3997_v8 }
 0x640   : > { %v3688_v36 = vpop.xlane.xlu1 %3687  ;;  %v3760_v19 = vpop.xlane.xlu0 %3759  ;;  %v3846_v63 = vsel %vm11553_vm9, %v11499_v20, %v3842_v17 }
 0x641   : > { %v3712_v29 = vmul.f32 %v3688_v36, %v14275_v21  ;;  %v3788_v38 = vmul.f32 %v3760_v19, %v14275_v21  ;;  %v4048_v44 = vpack.c.bf16 %v11535_v61, %v11532_v9  ;;  %v3979_v54 = vmul.f32 %v3846_v63, %v11401_v55 }
 0x643   : > { %v11529_v33 = vsub.f32 %v11450_v52, %v3712_v29  ;;  %v3804_v50 = vadd.f32 1e-05, %v3788_v38  ;;  %v3601_v52 = vpop.f32.mrf.mxu0  ;;  %4117 = vmatmul.bf16.vlgmr.msrb.gmra.mxu2 %v4048_v44  ;;  %v3998_v55 = vmul.f32 %v11508_v62, %v3979_v54 }
 0x644   : > { %v3602_v12 = vadd.f32 %v11425_v24, %v3601_v52 }
 0x645   : > { %v3744_v51 = vmul.f32 %v11529_v33, %v11529_v33  ;;  %8360 = vrsqrt.f32 %v3804_v50  ;;  %vm3853_vm11 = vweird.f32 %v3804_v50  ;;  %v11584_v44 = vadd.f32 %v11519_v48, %v3998_v55 }
 0x647   : > { %3767 = vadd.xlane.f32.xlu2 %v3744_v51  ;;  %3699 = vadd.xlane.f32.xlu1 %v11526_v45 }
 0x648   : > { %v3690_v39 = vpop.xlane.xlu1 %3689  ;;  %v3762_v60 = vpop.xlane.xlu0 %3761 }
 0x649   : > { %v3713_v3 = vmul.f32 %v3690_v39, %v14275_v21  ;;  %v3789_v11 = vmul.f32 %v3762_v60, %v14275_v21 }
 0x64b   : > { %v8361_v35 = vpop.eup %8360  ;;  %v11545_v49 = vsub.f32 %v11463_v42, %v3713_v3  ;;  %v3805_v22 = vadd.f32 1e-05, %v3789_v11  ;;  %v3650_v42 = vpop.f32.mrf.mxu1 }
 0x64c   : > { %v3848_v18 = vmul.f32 %v8361_v35, %v3804_v50  ;;  %v3651_v2 = vadd.f32 %v3650_v42, %v3602_v12  ;;  %v3603_v58 = vpop.f32.mrf.mxu0  ;;  %vm3854_vm10 = vweird.f32 %v8361_v35  ;;  %v14293_v50 = vld [vmem:[#allocation44_spill] sm:$0xff] }
 0x64d   : > { %v3745_v1 = vmul.f32 %v11545_v49, %v11545_v49  ;;  %8362 = vrsqrt.f32 %v3805_v22  ;;  %v3604_v47 = vadd.f32 %v11425_v24, %v3603_v58  ;;  %vm3855_vm12 = vmor %vm3853_vm11, %vm3854_vm10  ;;  %vm3863_vm14 = vweird.f32 %v3805_v22 }
 0x64e   : > { %v3849_v41 = vmul.f32 %v8361_v35, %v3848_v18  ;;  %v11563_v46 = vadd.f32 %v3651_v2, %v14292_v4 }
 0x64f   : > { %3769 = vadd.xlane.f32.xlu2 %v3745_v1 }
 0x650   : > { %v3692_v25 = vpop.xlane.xlu2 %3691  ;;  %v3850_v31 = vmul.f32 0.5, %v3849_v41  ;;  %v3764_v43 = vpop.xlane.xlu1 %3763  ;;  %3701 = vadd.xlane.f32.xlu1 %v11563_v46 }
 0x651   : > { %v3714_v26 = vmul.f32 %v3692_v25, %v14275_v21  ;;  %v3790_v30 = vmul.f32 %v3764_v43, %v14275_v21 }
 0x652   : > { %v3851_v32 = vsub.f32 1.5, %v3850_v31 }
 0x653   : > { %v8363_v34 = vpop.eup %8362  ;;  %v11566_v56 = vsub.f32 %v11473_v0, %v3714_v26  ;;  %v3806_v14 = vadd.f32 1e-05, %v3790_v30  ;;  %v3652_v7 = vpop.f32.mrf.mxu1 }
 0x654   : > { %v3852_v5 = vmul.f32 %v8361_v35, %v3851_v32  ;;  %v3858_v20 = vmul.f32 %v8363_v34, %v3805_v22  ;;  %v3653_v38 = vadd.f32 %v3652_v7, %v3604_v47  ;;  %vm3864_vm13 = vweird.f32 %v8363_v34 }
 0x655   : > { %v3746_v10 = vmul.f32 %v11566_v56, %v11566_v56  ;;  %8364 = vrsqrt.f32 %v3806_v14  ;;  %vm3865_vm15 = vmor %vm3863_vm14, %vm3864_vm13  ;;  %vm3873_vm1 = vweird.f32 %v3806_v14 }
 0x656   : > { %v3859_v13 = vmul.f32 %v8363_v34, %v3858_v20  ;;  %v3856_v36 = vsel %vm3855_vm12, %v8361_v35, %v3852_v5  ;;  %v11578_v23 = vadd.f32 %v3653_v38, %v14293_v50 }
 0x657   : > { %3771 = vadd.xlane.f32.xlu0 %v3746_v10  ;;  %v3980_v0 = vmul.f32 %v3856_v36, %v11443_v53 }
 0x658   : > { %v3694_v19 = vpop.xlane.xlu2 %3693  ;;  %v3860_v29 = vmul.f32 0.5, %v3859_v13  ;;  %3703 = vadd.xlane.f32.xlu2 %v11578_v23 }
 0x659   : > { %v3715_v8 = vmul.f32 %v3694_v19, %v14275_v21  ;;  %v3999_v24 = vmul.f32 %v11508_v62, %v3980_v0 }
 0x65a   : > { %v3861_v15 = vsub.f32 1.5, %v3860_v29 }
 0x65b   : > { %v11581_v51 = vsub.f32 %v11478_v57, %v3715_v8  ;;  %v11587_v53 = vadd.f32 %v11519_v48, %v3999_v24  ;;  %v8365_v52 = vpop.eup %8364 }
 0x65c   : > { %v3862_v39 = vmul.f32 %v8363_v34, %v3861_v15  ;;  %v3868_v60 = vmul.f32 %v8365_v52, %v3806_v14  ;;  %vm3874_vm0 = vweird.f32 %v8365_v52 }
 0x65d   : > { %v3747_v37 = vmul.f32 %v11581_v51, %v11581_v51  ;;  %v4049_v3 = vpack.c.bf16 %v11587_v53, %v11584_v44  ;;  %vm3875_vm2 = vmor %vm3873_vm1, %vm3874_vm0 }
 0x65e   : > { %v3869_v57 = vmul.f32 %v8365_v52, %v3868_v60  ;;  %v3866_v18 = vsel %vm3865_vm15, %v8363_v34, %v3862_v39 }
 0x65f   : > { %3773 = vadd.xlane.f32.xlu0 %v3747_v37  ;;  %4122 = vmatmul.bf16.gmra.mxu2 %v4049_v3  ;;  %v3981_v41 = vmul.f32 %v3866_v18, %v11457_v59 }
 0x660   : > { %v3696_v11 = vpop.xlane.xlu0 %3695  ;;  %v3870_v35 = vmul.f32 0.5, %v3869_v57 }
 0x661   : > { %v3716_v17 = vmul.f32 %v3696_v11, %v14275_v21  ;;  %v4000_v31 = vmul.f32 %v11508_v62, %v3981_v41 }
 0x662   : > { %v3871_v12 = vsub.f32 1.5, %v3870_v35 }
 0x663   : > { %v11596_v1 = vsub.f32 %v11483_v40, %v3716_v17  ;;  %v11605_v2 = vadd.f32 %v11519_v48, %v4000_v31 }
 0x664   : > { %v3872_v16 = vmul.f32 %v8365_v52, %v3871_v12 }
 0x665   : > { %v3748_v22 = vmul.f32 %v11596_v1, %v11596_v1 }
 0x666   : > { %v3876_v42 = vsel %vm3875_vm2, %v8365_v52, %v3872_v16  ;;  %v11631_v52 = vld [vmem:[%s14101_s6 + $0x1] ss:$0 sm:$0xff] }
 0x667   : > { %3775 = vadd.xlane.f32.xlu1 %v3748_v22  ;;  %v3982_v25 = vmul.f32 %v3876_v42, %v11468_v27 }
 0x669   : > { %v4001_v63 = vmul.f32 %v11508_v62, %v3982_v25 }
 0x66b   : > { %v11608_v40 = vadd.f32 %v11519_v48, %v4001_v63 }
 0x66d   : > { %v4050_v59 = vpack.c.bf16 %v11608_v40, %v11605_v2 }
 0x66f   : > { %4127 = vmatmul.bf16.gmra.mxu2 %v4050_v59 }
 0x68b   : > { %v3698_v26 = vpop.xlane.xlu0 %3697 }
 0x68c   : > { %v3717_v43 = vmul.f32 %v3698_v26, %v14275_v21 }
 0x68e   : > { %v11614_v58 = vsub.f32 %v11490_v28, %v3717_v43 }
 0x690   : > { %v3749_v27 = vmul.f32 %v11614_v58, %v11614_v58 }
 0x692   : > { %3777 = vadd.xlane.f32.xlu2 %v3749_v27 }
 0x6b2   : > { %v3766_v32 = vpop.xlane.xlu1 %3765 }
 0x6b3   : > { %v3791_v30 = vmul.f32 %v3766_v32, %v14275_v21 }
 0x6b5   : > { %v3807_v34 = vadd.f32 1e-05, %v3791_v30 }
 0x6b7   : > { %8366 = vrsqrt.f32 %v3807_v34  ;;  %vm3883_vm4 = vweird.f32 %v3807_v34 }
 0x6ba   : > { %v3768_v4 = vpop.xlane.xlu2 %3767  ;;  %v3700_v54 = vpop.xlane.xlu1 %3699 }
 0x6bb   : > { %v3792_v5 = vmul.f32 %v3768_v4, %v14275_v21  ;;  %v3718_v20 = vmul.f32 %v3700_v54, %v14275_v21 }
 0x6bd   : > { %v8367_v14 = vpop.eup %8366  ;;  %v3808_v47 = vadd.f32 1e-05, %v3792_v5  ;;  %v11622_v28 = vsub.f32 %v11526_v45, %v3718_v20 }
 0x6be   : > { %v3878_v10 = vmul.f32 %v8367_v14, %v3807_v34  ;;  %vm3884_vm3 = vweird.f32 %v8367_v14 }
 0x6bf   : > { %8368 = vrsqrt.f32 %v3808_v47  ;;  %v3750_v13 = vmul.f32 %v11622_v28, %v11622_v28  ;;  %vm3885_vm5 = vmor %vm3883_vm4, %vm3884_vm3  ;;  %vm3893_vm7 = vweird.f32 %v3808_v47 }
 0x6c0   : > { %v3879_v36 = vmul.f32 %v8367_v14, %v3878_v10 }
 0x6c1   : > { %3779 = vadd.xlane.f32.xlu0 %v3750_v13 }
 0x6c2   : > { %v3880_v0 = vmul.f32 0.5, %v3879_v36  ;;  %v3770_v55 = vpop.xlane.xlu2 %3769 }
 0x6c3   : > { %v3793_v7 = vmul.f32 %v3770_v55, %v14275_v21  ;;  %v3702_v15 = vpop.xlane.xlu1 %3701 }
 0x6c4   : > { %v3881_v19 = vsub.f32 1.5, %v3880_v0  ;;  %v3719_v50 = vmul.f32 %v3702_v15, %v14275_v21 }
 0x6c5   : > { %v8369_v29 = vpop.eup %8368  ;;  %v3809_v38 = vadd.f32 1e-05, %v3793_v7 }
 0x6c6   : > { %v3882_v8 = vmul.f32 %v8367_v14, %v3881_v19  ;;  %v3888_v24 = vmul.f32 %v8369_v29, %v3808_v47  ;;  %v11634_v3 = vsub.f32 %v11563_v46, %v3719_v50  ;;  %v4118_v11 = vpop.f32.mrf.mxu2  ;;  %vm3894_vm6 = vweird.f32 %v8369_v29 }
 0x6c7   : > { %8370 = vrsqrt.f32 %v3809_v38  ;;  %v4119_v17 = vadd.f32 %v11631_v52, %v4118_v11  ;;  %vm3895_vm8 = vmor %vm3893_vm7, %vm3894_vm6  ;;  %vm3903_vm10 = vweird.f32 %v3809_v38 }
 0x6c8   : > { %v3889_v45 = vmul.f32 %v8369_v29, %v3888_v24  ;;  %v3886_v60 = vsel %vm3885_vm5, %v8367_v14, %v3882_v8  ;;  %v3751_v12 = vmul.f32 %v11634_v3, %v11634_v3 }
 0x6c9   : > { %v3983_v16 = vmul.f32 %v3886_v60, %v11503_v6  ;;  %v11642_v46 = vadd.f32 %v4119_v17, %v11532_v9 }
 0x6ca   : > { %v3890_v39 = vmul.f32 0.5, %v3889_v45  ;;  %v3772_v37 = vpop.xlane.xlu0 %3771  ;;  %3781 = vadd.xlane.f32.xlu1 %v3751_v12 }
 0x6cb   : > { %v3794_v57 = vmul.f32 %v3772_v37, %v14275_v21  ;;  %v3704_v31 = vpop.xlane.xlu2 %3703  ;;  %4178 = vadd.xlane.f32.xlu0 %v11642_v46  ;;  %v4002_v6 = vmul.f32 %v11508_v62, %v3983_v16 }
 0x6cc   : > { %v3891_v35 = vsub.f32 1.5, %v3890_v39  ;;  %v3720_v59 = vmul.f32 %v3704_v31, %v14275_v21 }
 0x6cd   : > { %v8371_v18 = vpop.eup %8370  ;;  %v3810_v41 = vadd.f32 1e-05, %v3794_v57  ;;  %v11657_v14 = vadd.f32 %v11519_v48, %v4002_v6 }
 0x6ce   : > { %v3892_v22 = vmul.f32 %v8369_v29, %v3891_v35  ;;  %v3898_v42 = vmul.f32 %v8371_v18, %v3809_v38  ;;  %v11649_v32 = vsub.f32 %v11578_v23, %v3720_v59  ;;  %v4120_v34 = vpop.f32.mrf.mxu2  ;;  %vm3904_vm9 = vweird.f32 %v8371_v18 }
 0x6cf   : > { %8372 = vrsqrt.f32 %v3810_v41  ;;  %v4121_v54 = vadd.f32 %v11631_v52, %v4120_v34  ;;  %vm3905_vm11 = vmor %vm3903_vm10, %vm3904_vm9  ;;  %vm3913_vm13 = vweird.f32 %v3810_v41 }
 0x6d0   : > { %v3899_v25 = vmul.f32 %v8371_v18, %v3898_v42  ;;  %v3896_v63 = vsel %vm3895_vm8, %v8369_v29, %v3892_v22  ;;  %v3752_v20 = vmul.f32 %v11649_v32, %v11649_v32 }
 0x6d1   : > { %v3984_v26 = vmul.f32 %v3896_v63, %v11529_v33  ;;  %v11663_v13 = vadd.f32 %v4121_v54, %v11535_v61 }
 0x6d2   : > { %v3900_v43 = vmul.f32 0.5, %v3899_v25  ;;  %v3774_v27 = vpop.xlane.xlu0 %3773  ;;  %3783 = vadd.xlane.f32.xlu2 %v3752_v20 }
 0x6d3   : > { %v3795_v9 = vmul.f32 %v3774_v27, %v14275_v21  ;;  %v4003_v30 = vmul.f32 %v11508_v62, %v3984_v26  ;;  %4180 = vadd.xlane.f32.xlu1 %v11663_v13 }
 0x6d4   : > { %v3901_v4 = vsub.f32 1.5, %v3900_v43 }
 0x6d5   : > { %v8373_v5 = vpop.eup %8372  ;;  %v3811_v33 = vadd.f32 1e-05, %v3795_v9  ;;  %v11660_v47 = vadd.f32 %v11519_v48, %v4003_v30 }
 0x6d6   : > { %v3902_v23 = vmul.f32 %v8371_v18, %v3901_v4  ;;  %v3908_v10 = vmul.f32 %v8373_v5, %v3810_v41  ;;  %vm3914_vm12 = vweird.f32 %v8373_v5 }
 0x6d7   : > { %8374 = vrsqrt.f32 %v3811_v33  ;;  %v4051_v36 = vpack.c.bf16 %v11660_v47, %v11657_v14  ;;  %vm3915_vm14 = vmor %vm3913_vm13, %vm3914_vm12  ;;  %vm3923_vm0 = vweird.f32 %v3811_v33 }
 0x6d8   : > { %v3909_v0 = vmul.f32 %v8373_v5, %v3908_v10  ;;  %v3906_v55 = vsel %vm3905_vm11, %v8371_v18, %v3902_v23 }
 0x6d9   : > { %4132 = vmatmul.bf16.gmra.mxu2 %v4051_v36  ;;  %v3985_v24 = vmul.f32 %v3906_v55, %v11545_v49 }
 0x6da   : > { %v3910_v7 = vmul.f32 0.5, %v3909_v0  ;;  %v3776_v19 = vpop.xlane.xlu1 %3775 }
 0x6db   : > { %v3796_v29 = vmul.f32 %v3776_v19, %v14275_v21  ;;  %v4004_v60 = vmul.f32 %v11508_v62, %v3985_v24 }
 0x6dc   : > { %v3911_v8 = vsub.f32 1.5, %v3910_v7 }
 0x6dd   : > { %v8375_v61 = vpop.eup %8374  ;;  %v3812_v45 = vadd.f32 1e-05, %v3796_v29  ;;  %v11675_v12 = vadd.f32 %v11519_v48, %v4004_v60 }
 0x6de   : > { %v3912_v15 = vmul.f32 %v8373_v5, %v3911_v8  ;;  %v3918_v50 = vmul.f32 %v8375_v61, %v3811_v33  ;;  %vm3924_vm15 = vweird.f32 %v8375_v61 }
 0x6df   : > { %8376 = vrsqrt.f32 %v3812_v45  ;;  %vm3925_vm1 = vmor %vm3923_vm0, %vm3924_vm15  ;;  %vm3933_vm3 = vweird.f32 %v3812_v45 }
 0x6e0   : > { %v3916_v38 = vsel %vm3915_vm14, %v8373_v5, %v3912_v15  ;;  %v3919_v39 = vmul.f32 %v8375_v61, %v3918_v50 }
 0x6e1   : > { %v3986_v37 = vmul.f32 %v3916_v38, %v11566_v56 }
 0x6e2   : > { %v3920_v57 = vmul.f32 0.5, %v3919_v39  ;;  %v4123_v11 = vpop.f32.mrf.mxu2 }
 0x6e3   : > { %v4005_v35 = vmul.f32 %v11508_v62, %v3986_v37  ;;  %v4124_v17 = vadd.f32 %v11631_v52, %v4123_v11 }
 0x6e4   : > { %v3921_v18 = vsub.f32 1.5, %v3920_v57 }
 0x6e5   : > { %v8377_v49 = vpop.eup %8376  ;;  %v11678_v41 = vadd.f32 %v11519_v48, %v4005_v35  ;;  %v11681_v16 = vadd.f32 %v4124_v17, %v11584_v44 }
 0x6e6   : > { %v3922_v56 = vmul.f32 %v8375_v61, %v3921_v18  ;;  %v3928_v22 = vmul.f32 %v8377_v49, %v3812_v45  ;;  %vm3934_vm2 = vweird.f32 %v8377_v49 }
 0x6e7   : > { %v4052_v42 = vpack.c.bf16 %v11678_v41, %v11675_v12  ;;  %4182 = vadd.xlane.f32.xlu2 %v11681_v16  ;;  %vm3935_vm4 = vmor %vm3933_vm3, %vm3934_vm2 }
 0x6e8   : > { %v3929_v25 = vmul.f32 %v8377_v49, %v3928_v22  ;;  %v3926_v31 = vsel %vm3925_vm1, %v8375_v61, %v3922_v56 }
 0x6e9   : > { %4137 = vmatmul.bf16.gmra.mxu2 %v4052_v42  ;;  %v3987_v44 = vmul.f32 %v3926_v31, %v11581_v51 }
 0x6ea   : > { %v3930_v63 = vmul.f32 0.5, %v3929_v25  ;;  %v4125_v59 = vpop.f32.mrf.mxu2 }
 0x6eb   : > { %v4126_v26 = vadd.f32 %v11631_v52, %v4125_v59  ;;  %v4006_v34 = vmul.f32 %v11508_v62, %v3987_v44 }
 0x6ec   : > { %v3931_v6 = vsub.f32 1.5, %v3930_v63 }
 0x6ed   : > { %v11689_v43 = vadd.f32 %v4126_v26, %v11587_v53  ;;  %v11697_v51 = vadd.f32 %v11519_v48, %v4006_v34 }
 0x6ee   : > { %v3932_v27 = vmul.f32 %v8377_v49, %v3931_v6 }
 0x6ef   : > { %4184 = vadd.xlane.f32.xlu0 %v11689_v43 }
 0x6f0   : > { %v3936_v9 = vsel %vm3935_vm4, %v8377_v49, %v3932_v27 }
 0x6f1   : > { %v3988_v30 = vmul.f32 %v3936_v9, %v11596_v1 }
 0x6f2   : > { %v4128_v54 = vpop.f32.mrf.mxu2 }
 0x6f3   : > { %v4007_v4 = vmul.f32 %v11508_v62, %v3988_v30  ;;  %v4129_v5 = vadd.f32 %v11631_v52, %v4128_v54 }
 0x6f5   : > { %v11700_v53 = vadd.f32 %v11519_v48, %v4007_v4  ;;  %v11703_v20 = vadd.f32 %v4129_v5, %v11605_v2 }
 0x6f7   : > { %v4053_v33 = vpack.c.bf16 %v11700_v53, %v11697_v51  ;;  %4186 = vadd.xlane.f32.xlu1 %v11703_v20 }
 0x6f9   : > { %4142 = vmatmul.bf16.gmra.mxu2 %v4053_v33 }
 0x6fa   : > { %v4130_v1 = vpop.f32.mrf.mxu2 }
 0x6fb   : > { %v4131_v23 = vadd.f32 %v11631_v52, %v4130_v1 }
 0x6fd   : > { %v11710_v10 = vadd.f32 %v4131_v23, %v11608_v40 }
 0x6ff   : > { %4188 = vadd.xlane.f32.xlu2 %v11710_v10 }
 0x705   : > { %v3778_v36 = vpop.xlane.xlu2 %3777 }
 0x706   : > { %v3797_v0 = vmul.f32 %v3778_v36, %v14275_v21 }
 0x708   : > { %v3813_v55 = vadd.f32 1e-05, %v3797_v0 }
 0x70a   : > { %8378 = vrsqrt.f32 %v3813_v55  ;;  %vm3943_vm6 = vweird.f32 %v3813_v55 }
 0x710   : > { %v8379_v2 = vpop.eup %8378 }
 0x711   : > { %v3938_v7 = vmul.f32 %v8379_v2, %v3813_v55  ;;  %vm3944_vm5 = vweird.f32 %v8379_v2  ;;  %v7810_v55 = vld [vmem:[#allocation16 + $0xf0] sm:$0xf] }
 0x712   : > { %vm3945_vm7 = vmor %vm3943_vm6, %vm3944_vm5 }
 0x713   : > { %v3939_v19 = vmul.f32 %v8379_v2, %v3938_v7 }
 0x715   : > { %v3940_v24 = vmul.f32 0.5, %v3939_v19 }
 0x717   : > { %v3941_v45 = vsub.f32 1.5, %v3940_v24 }
 0x719   : > { %v3942_v40 = vmul.f32 %v8379_v2, %v3941_v45 }
 0x71b   : > { %v3946_v57 = vsel %vm3945_vm7, %v8379_v2, %v3942_v40  ;;  %v8024_v2 = vld [vmem:[#allocation16 + $0xf4] sm:$0xf0] }
 0x71c   : > { %v3989_v56 = vmul.f32 %v3946_v57, %v11614_v58 }
 0x71e   : > { %v4008_v26 = vmul.f32 %v11508_v62, %v3989_v56 }
 0x720   : > { %v11732_v34 = vadd.f32 %v11519_v48, %v4008_v26  ;;  %v8021_v26 = vld [vmem:[#allocation16 + $0xe4] sm:$0xf] }
 0x734   : > { %v3780_v29 = vpop.xlane.xlu0 %3779 }
 0x735   : > { %v3798_v8 = vmul.f32 %v3780_v29, %v14275_v21 }
 0x737   : > { %v3814_v61 = vadd.f32 1e-05, %v3798_v8  ;;  %v7811_v8 = vor.u32 %v8024_v2, %v7810_v55  ;;  %v7788_v55 = vld [vmem:[#allocation16 + $0xc8] sm:$0xf0] }
 0x739   : > { %8380 = vrsqrt.f32 %v3814_v61  ;;  %vm3953_vm9 = vweird.f32 %v3814_v61  ;;  %4648 = vmatpush.bf16.msrb.mxu3 %v7811_v8  ;;  %v7778_v8 = vld [vmem:[#allocation16 + $0xb0] sm:$0xf] }
 0x73d   : > { %v3782_v39 = vpop.xlane.xlu1 %3781 }
 0x73e   : > { %v3799_v37 = vmul.f32 %v3782_v39, %v14275_v21  ;;  %v4179_v60 = vpop.xlane.xlu0 %4178  ;;  %v7812_v39 = vld [vmem:[#allocation16 + $0xf8] sm:$0xf0] }
 0x73f   : > { %v8381_v15 = vpop.eup %8380  ;;  %v4210_v35 = vmul.f32 %v4179_v60, %v14275_v21 }
 0x740   : > { %v3948_v50 = vmul.f32 %v8381_v15, %v3814_v61  ;;  %v3815_v17 = vadd.f32 1e-05, %v3799_v37  ;;  %vm3954_vm8 = vweird.f32 %v8381_v15 }
 0x741   : > { %v11718_v49 = vsub.f32 %v11642_v46, %v4210_v35  ;;  %vm3955_vm10 = vmor %vm3953_vm9, %vm3954_vm8 }
 0x742   : > { %v3949_v38 = vmul.f32 %v8381_v15, %v3948_v50  ;;  %8382 = vrsqrt.f32 %v3815_v17  ;;  %vm3963_vm12 = vweird.f32 %v3815_v17 }
 0x743   : > { %v4242_v42 = vmul.f32 %v11718_v49, %v11718_v49 }
 0x744   : > { %v3950_v11 = vmul.f32 0.5, %v3949_v38  ;;  %v8023_v38 = vld [vmem:[#allocation16 + $0xf4] sm:$0xf] }
 0x745   : > { %v3784_v31 = vpop.xlane.xlu2 %3783  ;;  %4258 = vadd.xlane.f32.xlu0 %v4242_v42  ;;  %v7815_v60 = vor.u32 %v8023_v38, %v7812_v39 }
 0x746   : > { %v3951_v18 = vsub.f32 1.5, %v3950_v11  ;;  %v3800_v59 = vmul.f32 %v3784_v31, %v14275_v21  ;;  %v4181_v46 = vpop.xlane.xlu1 %4180 }
 0x747   : > { %v4211_v6 = vmul.f32 %v4181_v46, %v14275_v21  ;;  %4697 = vmatpush.bf16.msra.mxu0 %v7815_v60  ;;  %v8014_v60 = vld [vmem:[#allocation16 + $0xa4] sm:$0xf0] }
 0x748   : > { %v3952_v22 = vmul.f32 %v8381_v15, %v3951_v18  ;;  %v8383_v58 = vpop.eup %8382  ;;  %v3816_v44 = vadd.f32 1e-05, %v3800_v59  ;;  %v7802_v59 = vld [vmem:[#allocation16 + $0xe0] sm:$0xf] }
 0x749   : > { %v3958_v9 = vmul.f32 %v8383_v58, %v3815_v17  ;;  %v11729_v30 = vsub.f32 %v11663_v13, %v4211_v6  ;;  %vm3964_vm11 = vweird.f32 %v8383_v58  ;;  %v7804_v6 = vld [vmem:[#allocation16 + $0xe8] sm:$0xf0] }
 0x74a   : > { %v3956_v25 = vsel %vm3955_vm10, %v8381_v15, %v3952_v22  ;;  %8384 = vrsqrt.f32 %v3816_v44  ;;  %vm3965_vm13 = vmor %vm3963_vm12, %vm3964_vm11  ;;  %vm3973_vm15 = vweird.f32 %v3816_v44 }
 0x74b   : > { %v3990_v63 = vmul.f32 %v3956_v25, %v11622_v28  ;;  %v3959_v4 = vmul.f32 %v8383_v58, %v3958_v9  ;;  %v4243_v54 = vmul.f32 %v11729_v30, %v11729_v30  ;;  %v8019_v9 = vld [vmem:[#allocation16 + $0xd4] sm:$0xf] }
 0x74d   : > { %v4009_v27 = vmul.f32 %v11508_v62, %v3990_v63  ;;  %v3960_v33 = vmul.f32 0.5, %v3959_v4  ;;  %4260 = vadd.xlane.f32.xlu1 %v4243_v54  ;;  %v7796_v4 = vld [vmem:[#allocation16 + $0xd8] sm:$0xf0] }
 0x74f   : > { %v11735_v28 = vadd.f32 %v11519_v48, %v4009_v27  ;;  %v3961_v1 = vsub.f32 1.5, %v3960_v33  ;;  %v7807_v27 = vor.u32 %v8021_v26, %v7804_v6 }
 0x750   : > { %v8385_v13 = vpop.eup %8384 }
 0x751   : > { %v4054_v5 = vpack.c.bf16 %v11735_v28, %v11732_v34  ;;  %v3962_v23 = vmul.f32 %v8383_v58, %v3961_v1  ;;  %v3968_v36 = vmul.f32 %v8385_v13, %v3816_v44  ;;  %vm3974_vm14 = vweird.f32 %v8385_v13  ;;  %4698 = vmatpush.bf16.msra.mxu0 %v7807_v27 }
 0x752   : > { %vm3975_vm0 = vmor %vm3973_vm15, %vm3974_vm14  ;;  %v7799_v1 = vor.u32 %v8019_v9, %v7796_v4 }
 0x753   : > { %4147 = vmatmul.bf16.gmra.mxu2 %v4054_v5  ;;  %v3969_v0 = vmul.f32 %v8385_v13, %v3968_v36  ;;  %v3966_v7 = vsel %vm3965_vm13, %v8383_v58, %v3962_v23  ;;  %v8020_v58 = vld [vmem:[#allocation16 + $0xd4] sm:$0xf0]  ;;  %v8018_v23 = vld [vmem:[#allocation16 + $0xc4] sm:$0xf0] }
 0x754   : > { %v3991_v15 = vmul.f32 %v3966_v7, %v11634_v3 }
 0x755   : > { %v3970_v19 = vmul.f32 0.5, %v3969_v0  ;;  %v8017_v0 = vld [vmem:[#allocation16 + $0xc4] sm:$0xf]  ;;  %4699 = vmatpush.bf16.msra.mxu0 %v7799_v1  ;;  %v8010_v1 = vld [vmem:[#allocation16 + $0x84] sm:$0xf0] }
 0x757   : > { %v3971_v24 = vsub.f32 1.5, %v3970_v19 }
 0x759   : > { %v3972_v37 = vmul.f32 %v8385_v13, %v3971_v24  ;;  %v8015_v24 = vld [vmem:[#allocation16 + $0xb4] sm:$0xf] }
 0x75a   : > { %v4183_v29 = vpop.xlane.xlu2 %4182 }
 0x75b   : > { %v4212_v61 = vmul.f32 %v4183_v29, %v14275_v21  ;;  %v3976_v35 = vsel %vm3975_vm0, %v8385_v13, %v3972_v37  ;;  %v7786_v13 = vld [vmem:[#allocation16 + $0xc0] sm:$0xf]  ;;  %v7791_v29 = vor.u32 %v8017_v0, %v7788_v55 }
 0x75c   : > { %v4133_v45 = vpop.f32.mrf.mxu2  ;;  %v3992_v3 = vmul.f32 %v3976_v35, %v11649_v32  ;;  %v7787_v19 = vor.u32 %v8018_v23, %v7786_v13  ;;  %v7770_v37 = vld [vmem:[#allocation16 + $0xa0] sm:$0xf]  ;;  %v8013_v35 = vld [vmem:[#allocation16 + $0xa4] sm:$0xf] }
 0x75d   : > { %v4134_v40 = vadd.f32 %v11631_v52, %v4133_v45  ;;  %v11745_v50 = vsub.f32 %v11681_v16, %v4212_v61  ;;  %v4010_v16 = vmul.f32 %v11508_v62, %v3991_v15  ;;  %v8016_v61 = vld [vmem:[#allocation16 + $0xb4] sm:$0xf0]  ;;  %4700 = vmatpush.bf16.msra.mxu0 %v7791_v29  ;;  %v7756_v29 = vld [vmem:[#allocation16 + $0x88] sm:$0xf0] }
 0x75e   : > { %v4011_v18 = vmul.f32 %v11508_v62, %v3992_v3  ;;  %v7772_v3 = vld [vmem:[#allocation16 + $0xa8] sm:$0xf0] }
 0x75f   : > { %v11748_v57 = vadd.f32 %v4134_v40, %v11657_v14  ;;  %v4244_v11 = vmul.f32 %v11745_v50, %v11745_v50  ;;  %v11758_v14 = vadd.f32 %v11519_v48, %v4010_v16 }
 0x760   : > { %v11761_v42 = vadd.f32 %v11519_v48, %v4011_v18  ;;  %v8022_v48 = vld [vmem:[#allocation16 + $0xe4] sm:$0xf0]  ;;  %v7771_v18 = vor.u32 %v8014_v60, %v7770_v37 }
 0x761   : > { %4190 = vadd.xlane.f32.xlu2 %v11748_v57  ;;  %4262 = vadd.xlane.f32.xlu1 %v4244_v11  ;;  %v7803_v46 = vor.u32 %v8022_v48, %v7802_v59  ;;  %v7762_v59 = vld [vmem:[#allocation16 + $0x90] sm:$0xf]  ;;  %v8012_v48 = vld [vmem:[#allocation16 + $0x94] sm:$0xf0] }
 0x762   : > { %v4185_v17 = vpop.xlane.xlu0 %4184  ;;  %v4055_v31 = vpack.c.bf16 %v11761_v42, %v11758_v14  ;;  %v7763_v26 = vor.u32 %v8012_v48, %v7762_v59 }
 0x763   : > { %v4213_v56 = vmul.f32 %v4185_v17, %v14275_v21  ;;  %4649 = vmatpush.bf16.msrb.mxu3 %v7803_v46 }
 0x764   : > { %v4135_v22 = vpop.f32.mrf.mxu2  ;;  %4152 = vmatmul.bf16.gmra.mxu2 %v4055_v31 }
 0x765   : > { %v4136_v25 = vadd.f32 %v11631_v52, %v4135_v22  ;;  %v11765_v32 = vsub.f32 %v11689_v43, %v4213_v56  ;;  %v7794_v43 = vld [vmem:[#allocation16 + $0xd0] sm:$0xf]  ;;  %v7775_v56 = vor.u32 %v8013_v35, %v7772_v3 }
 0x766   : > { %v7795_v5 = vor.u32 %v8020_v58, %v7794_v43  ;;  %v8011_v43 = vld [vmem:[#allocation16 + $0x94] sm:$0xf] }
 0x767   : > { %v11770_v63 = vadd.f32 %v4136_v25, %v11660_v47  ;;  %v4245_v62 = vmul.f32 %v11765_v32, %v11765_v32 }
 0x768   : > { %4650 = vmatpush.bf16.msrb.mxu3 %v7795_v5 }
 0x769   : > { %4192 = vadd.xlane.f32.xlu0 %v11770_v63  ;;  %4264 = vadd.xlane.f32.xlu2 %v4245_v62 }
 0x76a   : > { %v4187_v44 = vpop.xlane.xlu1 %4186 }
 0x76b   : > { %v4214_v54 = vmul.f32 %v4187_v44, %v14275_v21 }
 0x76c   : > { %v4138_v47 = vpop.f32.mrf.mxu2  ;;  %4651 = vmatpush.bf16.msrb.mxu3 %v7787_v19  ;;  %v8009_v19 = vld [vmem:[#allocation16 + $0x84] sm:$0xf] }
 0x76d   : > { %v4139_v33 = vadd.f32 %v11631_v52, %v4138_v47  ;;  %v11778_v36 = vsub.f32 %v11703_v20, %v4214_v54  ;;  %v7780_v20 = vld [vmem:[#allocation16 + $0xb8] sm:$0xf0] }
 0x76e   : > { %v7783_v39 = vor.u32 %v8015_v24, %v7780_v20 }
 0x76f   : > { %v11781_v2 = vadd.f32 %v4139_v33, %v11675_v12  ;;  %v4246_v7 = vmul.f32 %v11778_v36, %v11778_v36  ;;  %v7779_v12 = vor.u32 %v8016_v61, %v7778_v8  ;;  %v7754_v33 = vld [vmem:[#allocation16 + $0x80] sm:$0xf]  ;;  %v7759_v8 = vor.u32 %v8009_v19, %v7756_v29 }
 0x770   : > { %4701 = vmatpush.bf16.msra.mxu0 %v7783_v39  ;;  %v7755_v13 = vor.u32 %v8010_v1, %v7754_v33 }
 0x771   : > { %4194 = vadd.xlane.f32.xlu0 %v11781_v2  ;;  %4266 = vadd.xlane.f32.xlu2 %v4246_v7 }
 0x772   : > { %v4189_v45 = vpop.xlane.xlu2 %4188  ;;  %4652 = vmatpush.bf16.msrb.mxu3 %v7779_v12 }
 0x773   : > { %v4215_v40 = vmul.f32 %v4189_v45, %v14275_v21 }
 0x774   : > { %v4140_v15 = vpop.f32.mrf.mxu2  ;;  %4702 = vmatpush.bf16.msra.mxu0 %v7775_v56 }
 0x775   : > { %v4141_v38 = vadd.f32 %v11631_v52, %v4140_v15  ;;  %v11789_v11 = vsub.f32 %v11710_v10, %v4215_v40 }
 0x776   : > { %4653 = vmatpush.bf16.msrb.mxu3 %v7771_v18 }
 0x777   : > { %v11792_v16 = vadd.f32 %v4141_v38, %v11678_v41  ;;  %v4247_v17 = vmul.f32 %v11789_v11, %v11789_v11 }
 0x779   : > { %4196 = vadd.xlane.f32.xlu1 %v11792_v16  ;;  %4268 = vadd.xlane.f32.xlu0 %v4247_v17  ;;  %v11816_v17 = vld [vmem:[#allocation13 + $0x1] ss:$0 sm:$0xff] }
 0x77a   : > { %4654 = vmatpush.bf16.msrb.mxu3 %v7763_v26 }
 0x77c   : > { %v4143_v22 = vpop.f32.mrf.mxu2 }
 0x77d   : > { %v4144_v10 = vadd.f32 %v11631_v52, %v4143_v22 }
 0x77e   : > { %4655 = vmatpush.bf16.msrb.mxu3 %v7755_v13 }
 0x77f   : > { %v11799_v25 = vadd.f32 %v4144_v10, %v11697_v51  ;;  %v7764_v51 = vld [vmem:[#allocation16 + $0x98] sm:$0xf0] }
 0x780   : > { %v7767_v44 = vor.u32 %v8011_v43, %v7764_v51 }
 0x781   : > { %4198 = vadd.xlane.f32.xlu1 %v11799_v25 }
 0x782   : > { %4703 = vmatpush.bf16.msra.mxu0 %v7767_v44 }
 0x784   : > { %v4145_v41 = vpop.f32.mrf.mxu2 }
 0x785   : > { %v4146_v31 = vadd.f32 %v11631_v52, %v4145_v41 }
 0x786   : > { %4704 = vmatpush.bf16.msra.mxu0 %v7759_v8 }
 0x787   : > { %v11804_v62 = vadd.f32 %v4146_v31, %v11700_v53  ;;  %v11826_v31 = vld [vmem:[#allocation14 + $0x1] ss:$0 sm:$0xff] }
 0x789   : > { %4200 = vadd.xlane.f32.xlu2 %v11804_v62 }
 0x7b8   : > { %v4259_v46 = vpop.xlane.xlu0 %4258 }
 0x7b9   : > { %v4290_v6 = vmul.f32 %v4259_v46, %v14275_v21 }
 0x7bb   : > { %v4306_v58 = vadd.f32 1e-05, %v4290_v6 }
 0x7bd   : > { %8386 = vrsqrt.f32 %v4306_v58  ;;  %vm4328_vm2 = vweird.f32 %v4306_v58 }
 0x7c0   : > { %v4261_v27 = vpop.xlane.xlu1 %4260 }
 0x7c1   : > { %v4291_v9 = vmul.f32 %v4261_v27, %v14275_v21 }
 0x7c3   : > { %v8387_v53 = vpop.eup %8386  ;;  %v4307_v4 = vadd.f32 1e-05, %v4291_v9 }
 0x7c4   : > { %v4323_v47 = vmul.f32 %v8387_v53, %v4306_v58  ;;  %vm4329_vm1 = vweird.f32 %v8387_v53 }
 0x7c5   : > { %8388 = vrsqrt.f32 %v4307_v4  ;;  %vm4330_vm3 = vmor %vm4328_vm2, %vm4329_vm1  ;;  %vm4338_vm5 = vweird.f32 %v4307_v4 }
 0x7c6   : > { %v4324_v54 = vmul.f32 %v8387_v53, %v4323_v47 }
 0x7c8   : > { %v4325_v5 = vmul.f32 0.5, %v4324_v54 }
 0x7ca   : > { %v4326_v23 = vsub.f32 1.5, %v4325_v5 }
 0x7cb   : > { %v8389_v0 = vpop.eup %8388 }
 0x7cc   : > { %v4327_v55 = vmul.f32 %v8387_v53, %v4326_v23  ;;  %v4333_v7 = vmul.f32 %v8389_v0, %v4307_v4  ;;  %vm4339_vm4 = vweird.f32 %v8389_v0 }
 0x7cd   : > { %vm4340_vm6 = vmor %vm4338_vm5, %vm4339_vm4 }
 0x7ce   : > { %v4334_v61 = vmul.f32 %v8389_v0, %v4333_v7  ;;  %v4331_v15 = vsel %vm4330_vm3, %v8387_v53, %v4327_v55 }
 0x7cf   : > { %v4482_v3 = vmul.f32 %v4331_v15, %v11718_v49 }
 0x7d0   : > { %v4335_v40 = vmul.f32 0.5, %v4334_v61 }
 0x7d1   : > { %v4501_v49 = vmul.f32 %v11816_v17, %v4482_v3 }
 0x7d2   : > { %v4336_v60 = vsub.f32 1.5, %v4335_v40 }
 0x7d3   : > { %v11836_v44 = vadd.f32 %v11826_v31, %v4501_v49 }
 0x7d4   : > { %v4191_v24 = vpop.xlane.xlu2 %4190  ;;  %v4263_v20 = vpop.xlane.xlu1 %4262  ;;  %v4337_v22 = vmul.f32 %v8389_v0, %v4336_v60  ;;  %v8039_v60 = vld [vmem:[#allocation17 + $0xf0] sm:$0xff] }
 0x7d5   : > { %v4216_v45 = vmul.f32 %v4191_v24, %v14275_v21  ;;  %v4292_v12 = vmul.f32 %v4263_v20, %v14275_v21  ;;  %v8040_v24 = vld [vmem:[#allocation17 + $0xf8] sm:$0xff] }
 0x7d6   : > { %v4148_v38 = vpop.f32.mrf.mxu2  ;;  %v8032_v20 = vld [vmem:[#allocation17 + $0xb8] sm:$0xff]  ;;  %6353 = vmatpush.bf16.msra.mxu2 %v8040_v24 }
 0x7d7   : > { %v11812_v39 = vsub.f32 %v11748_v57, %v4216_v45  ;;  %v4149_v37 = vadd.f32 %v11631_v52, %v4148_v38  ;;  %v4308_v35 = vadd.f32 1e-05, %v4292_v12  ;;  %v4341_v57 = vsel %vm4340_vm6, %v8389_v0, %v4337_v22  ;;  %6304 = vmatpush.bf16.msra.mxu1 %v8032_v20 }
 0x7d8   : > { %v4483_v10 = vmul.f32 %v4341_v57, %v11729_v30 }
 0x7d9   : > { %v4248_v18 = vmul.f32 %v11812_v39, %v11812_v39  ;;  %v11821_v56 = vadd.f32 %v4149_v37, %v11732_v34  ;;  %8390 = vrsqrt.f32 %v4308_v35  ;;  %vm4348_vm8 = vweird.f32 %v4308_v35 }
 0x7da   : > { %v4502_v46 = vmul.f32 %v11816_v17, %v4483_v10  ;;  %6354 = vmatpush.bf16.msra.mxu2 %v8039_v60 }
 0x7db   : > { %4270 = vadd.xlane.f32.xlu0 %v4248_v18  ;;  %4202 = vadd.xlane.f32.xlu2 %v11821_v56 }
 0x7dc   : > { %v4193_v41 = vpop.xlane.xlu0 %4192  ;;  %v4265_v48 = vpop.xlane.xlu2 %4264  ;;  %v11839_v27 = vadd.f32 %v11826_v31, %v4502_v46 }
 0x7dd   : > { %v4217_v59 = vmul.f32 %v4193_v41, %v14275_v21  ;;  %v4293_v34 = vmul.f32 %v4265_v48, %v14275_v21 }
 0x7de   : > { %v4150_v26 = vpop.f32.mrf.mxu2 }
 0x7df   : > { %v8391_v6 = vpop.eup %8390  ;;  %v11832_v43 = vsub.f32 %v11770_v63, %v4217_v59  ;;  %v4151_v51 = vadd.f32 %v11631_v52, %v4150_v26  ;;  %v4309_v58 = vadd.f32 1e-05, %v4293_v34  ;;  %v4553_v63 = vpack.c.bf16 %v11839_v27, %v11836_v44 }
 0x7e0   : > { %v4343_v30 = vmul.f32 %v8391_v6, %v4308_v35  ;;  %vm4349_vm7 = vweird.f32 %v8391_v6  ;;  %v8031_v35 = vld [vmem:[#allocation17 + $0xb0] sm:$0xff] }
 0x7e1   : > { %v11842_v9 = vadd.f32 %v4151_v51, %v11735_v28  ;;  %v4249_v53 = vmul.f32 %v11832_v43, %v11832_v43  ;;  %8392 = vrsqrt.f32 %v4309_v58  ;;  %4656 = vmatmul.bf16.vlgmr.msrb.gmra.mxu3 %v4553_v63  ;;  %4705 = vmatmul.bf16.vlgmr.msra.gmra.mxu0 %v4553_v63  ;;  %vm11859_vm9 = vmor %vm4348_vm8, %vm4349_vm7  ;;  %vm4358_vm11 = vweird.f32 %v4309_v58 }
 0x7e2   : > { %v4344_v4 = vmul.f32 %v8391_v6, %v4343_v30  ;;  %6305 = vmatpush.bf16.msra.mxu1 %v8031_v35 }
 0x7e3   : > { %4204 = vadd.xlane.f32.xlu0 %v11842_v9  ;;  %4272 = vadd.xlane.f32.xlu1 %v4249_v53 }
 0x7e4   : > { %v4345_v47 = vmul.f32 0.5, %v4344_v4  ;;  %v4195_v54 = vpop.xlane.xlu0 %4194  ;;  %v4267_v33 = vpop.xlane.xlu2 %4266 }
 0x7e5   : > { %v4218_v5 = vmul.f32 %v4195_v54, %v14275_v21  ;;  %v4294_v1 = vmul.f32 %v4267_v33, %v14275_v21 }
 0x7e6   : > { %v4346_v28 = vsub.f32 1.5, %v4345_v47 }
 0x7e7   : > { %v11852_v13 = vsub.f32 %v11781_v2, %v4218_v5  ;;  %v8393_v23 = vpop.eup %8392  ;;  %v11854_v0 = vadd.f32 1e-05, %v4294_v1  ;;  %v4153_v2 = vpop.f32.mrf.mxu2 }
 0x7e8   : > { %v4347_v55 = vmul.f32 %v8391_v6, %v4346_v28  ;;  %v4353_v19 = vmul.f32 %v8393_v23, %v4309_v58  ;;  %v4154_v45 = vadd.f32 %v11631_v52, %v4153_v2  ;;  %vm4359_vm10 = vweird.f32 %v8393_v23 }
 0x7e9   : > { %v4250_v7 = vmul.f32 %v11852_v13, %v11852_v13  ;;  %8394 = vrsqrt.f32 %v11854_v0  ;;  %vm4360_vm12 = vmor %vm4358_vm11, %vm4359_vm10  ;;  %vm4368_vm14 = vweird.f32 %v11854_v0 }
 0x7ea   : > { %v4354_v29 = vmul.f32 %v8393_v23, %v4353_v19  ;;  %v4351_v38 = vsel %vm11859_vm9, %v8391_v6, %v4347_v55  ;;  %v11869_v3 = vadd.f32 %v4154_v45, %v11758_v14 }
 0x7eb   : > { %4274 = vadd.xlane.f32.xlu1 %v4250_v7  ;;  %v4484_v41 = vmul.f32 %v4351_v38, %v11745_v50 }
 0x7ec   : > { %v4197_v61 = vpop.xlane.xlu1 %4196  ;;  %v4355_v40 = vmul.f32 0.5, %v4354_v29  ;;  %v4269_v12 = vpop.xlane.xlu0 %4268  ;;  %4206 = vadd.xlane.f32.xlu0 %v11869_v3 }
 0x7ed   : > { %v4219_v15 = vmul.f32 %v4197_v61, %v14275_v21  ;;  %v4295_v37 = vmul.f32 %v4269_v12, %v14275_v21  ;;  %v4503_v46 = vmul.f32 %v11816_v17, %v4484_v41 }
 0x7ee   : > { %v4356_v22 = vsub.f32 1.5, %v4355_v40  ;;  %v8030_v40 = vld [vmem:[#allocation17 + $0xa8] sm:$0xff] }
 0x7ef   : > { %v11872_v18 = vsub.f32 %v11792_v16, %v4219_v15  ;;  %v8395_v57 = vpop.eup %8394  ;;  %v4311_v10 = vadd.f32 1e-05, %v4295_v37  ;;  %v4155_v26 = vpop.f32.mrf.mxu2  ;;  %v11891_v54 = vadd.f32 %v11826_v31, %v4503_v46  ;;  %v8038_v15 = vld [vmem:[#allocation17 + $0xe8] sm:$0xff]  ;;  %6306 = vmatpush.bf16.msra.mxu1 %v8030_v40 }
 0x7f0   : > { %v4357_v49 = vmul.f32 %v8393_v23, %v4356_v22  ;;  %v4363_v48 = vmul.f32 %v8395_v57, %v11854_v0  ;;  %v4156_v6 = vadd.f32 %v11631_v52, %v4155_v26  ;;  %vm4369_vm13 = vweird.f32 %v8395_v57  ;;  %6355 = vmatpush.bf16.msra.mxu2 %v8038_v15 }
 0x7f1   : > { %v4251_v59 = vmul.f32 %v11872_v18, %v11872_v18  ;;  %8396 = vrsqrt.f32 %v4311_v10  ;;  %vm4370_vm15 = vmor %vm4368_vm14, %vm4369_vm13  ;;  %vm4378_vm1 = vweird.f32 %v4311_v10 }
 0x7f2   : > { %v4364_v14 = vmul.f32 %v8395_v57, %v4363_v48  ;;  %v4361_v16 = vsel %vm4360_vm12, %v8393_v23, %v4357_v49  ;;  %v11885_v53 = vadd.f32 %v4156_v6, %v11761_v42 }
 0x7f3   : > { %4276 = vadd.xlane.f32.xlu2 %v4251_v59  ;;  %v4485_v50 = vmul.f32 %v4361_v16, %v11765_v32 }
 0x7f4   : > { %v4199_v34 = vpop.xlane.xlu1 %4198  ;;  %v4365_v30 = vmul.f32 0.5, %v4364_v14  ;;  %4208 = vadd.xlane.f32.xlu1 %v11885_v53 }
 0x7f5   : > { %v4220_v51 = vmul.f32 %v4199_v34, %v14275_v21  ;;  %v4504_v58 = vmul.f32 %v11816_v17, %v4485_v50  ;;  %v8037_v34 = vld [vmem:[#allocation17 + $0xe0] sm:$0xff] }
 0x7f6   : > { %v4366_v63 = vsub.f32 1.5, %v4365_v30  ;;  %v8029_v50 = vld [vmem:[#allocation17 + $0xa0] sm:$0xff]  ;;  %6356 = vmatpush.bf16.msra.mxu2 %v8037_v34 }
 0x7f7   : > { %v11888_v4 = vsub.f32 %v11799_v25, %v4220_v51  ;;  %v8397_v47 = vpop.eup %8396  ;;  %v11894_v32 = vadd.f32 %v11826_v31, %v4504_v58  ;;  %v7751_v51 = vld [vmem:[%s14105_s10 + $0x2] sm:$0x3]  ;;  %6307 = vmatpush.bf16.msra.mxu1 %v8029_v50 }
 0x7f8   : > { %v4367_v52 = vmul.f32 %v8395_v57, %v4366_v63  ;;  %v4373_v42 = vmul.f32 %v8397_v47, %v4311_v10  ;;  %vm4379_vm0 = vweird.f32 %v8397_v47 }
 0x7f9   : > { %v4252_v5 = vmul.f32 %v11888_v4, %v11888_v4  ;;  %v4554_v25 = vpack.c.bf16 %v11894_v32, %v11891_v54  ;;  %vm4380_vm2 = vmor %vm4378_vm1, %vm4379_vm0 }
 0x7fa   : > { %v4374_v33 = vmul.f32 %v8397_v47, %v4373_v42  ;;  %v4371_v55 = vsel %vm4370_vm15, %v8395_v57, %v4367_v52 }
 0x7fb   : > { %4278 = vadd.xlane.f32.xlu2 %v4252_v5  ;;  %4661 = vmatmul.bf16.gmra.mxu3 %v4554_v25  ;;  %v4486_v29 = vmul.f32 %v4371_v55, %v11778_v36 }
 0x7fc   : > { %v4201_v28 = vpop.xlane.xlu2 %4200  ;;  %4710 = vmatmul.bf16.gmra.mxu0 %v4554_v25  ;;  %v4375_v23 = vmul.f32 0.5, %v4374_v33 }
 0x7fd   : > { %v4221_v1 = vmul.f32 %v4201_v28, %v14275_v21  ;;  %v4505_v24 = vmul.f32 %v11816_v17, %v4486_v29 }
 0x7fe   : > { %v4376_v19 = vsub.f32 1.5, %v4375_v23 }
 0x7ff   : > { %v11904_v7 = vsub.f32 %v11804_v62, %v4221_v1  ;;  %v11913_v62 = vadd.f32 %v11826_v31, %v4505_v24 }
 0x800   : > { %v4377_v8 = vmul.f32 %v8397_v47, %v4376_v19  ;;  %v11950_v19 = vperm.slane %v7751_v51, 0 }
 0x801   : > { %v4253_v0 = vmul.f32 %v11904_v7, %v11904_v7 }
 0x802   : > { %v4381_v2 = vsel %vm4380_vm2, %v8397_v47, %v4377_v8 }
 0x803   : > { %4280 = vadd.xlane.f32.xlu0 %v4253_v0  ;;  %v4487_v61 = vmul.f32 %v4381_v2, %v11789_v11 }
 0x805   : > { %v4506_v20 = vmul.f32 %v11816_v17, %v4487_v61 }
 0x807   : > { %v11916_v45 = vadd.f32 %v11826_v31, %v4506_v20 }
 0x809   : > { %v4555_v36 = vpack.c.bf16 %v11916_v45, %v11913_v62 }
 0x80b   : > { %4666 = vmatmul.bf16.gmra.mxu3 %v4555_v36 }
 0x80c   : > { %4715 = vmatmul.bf16.gmra.mxu0 %v4555_v36 }
 0x84e   : > { %v4203_v11 = vpop.xlane.xlu2 %4202  ;;  %v4271_v12 = vpop.xlane.xlu0 %4270 }
 0x84f   : > { %v4222_v38 = vmul.f32 %v4203_v11, %v14275_v21  ;;  %v4296_v37 = vmul.f32 %v4271_v12, %v14275_v21 }
 0x851   : > { %v11923_v60 = vsub.f32 %v11821_v56, %v4222_v38  ;;  %v4312_v35 = vadd.f32 1e-05, %v4296_v37 }
 0x853   : > { %8398 = vrsqrt.f32 %v4312_v35  ;;  %v4254_v22 = vmul.f32 %v11923_v60, %v11923_v60  ;;  %vm4388_vm4 = vweird.f32 %v4312_v35 }
 0x855   : > { %4282 = vadd.xlane.f32.xlu1 %v4254_v22 }
 0x856   : > { %v4273_v57 = vpop.xlane.xlu1 %4272  ;;  %v4205_v10 = vpop.xlane.xlu0 %4204 }
 0x857   : > { %v4297_v41 = vmul.f32 %v4273_v57, %v14275_v21  ;;  %v4223_v49 = vmul.f32 %v4205_v10, %v14275_v21 }
 0x859   : > { %v8399_v59 = vpop.eup %8398  ;;  %v4313_v48 = vadd.f32 1e-05, %v4297_v41  ;;  %v11930_v14 = vsub.f32 %v11842_v9, %v4223_v49  ;;  %v11938_v9 = vperm.slane %v7751_v51, 1 }
 0x85a   : > { %v4383_v16 = vmul.f32 %v8399_v59, %v4312_v35  ;;  %vm4389_vm3 = vweird.f32 %v8399_v59 }
 0x85b   : > { %8400 = vrsqrt.f32 %v4313_v48  ;;  %v4255_v56 = vmul.f32 %v11930_v14, %v11930_v14  ;;  %vm4390_vm5 = vmor %vm4388_vm4, %vm4389_vm3  ;;  %vm4398_vm7 = vweird.f32 %v4313_v48 }
 0x85c   : > { %v4384_v26 = vmul.f32 %v8399_v59, %v4383_v16 }
 0x85d   : > { %4284 = vadd.xlane.f32.xlu2 %v4255_v56 }
 0x85e   : > { %v4385_v46 = vmul.f32 0.5, %v4384_v26  ;;  %v4275_v6 = vpop.xlane.xlu1 %4274  ;;  %v4706_v52 = vpop.f32.mrf.mxu0 }
 0x85f   : > { %v4298_v30 = vmul.f32 %v4275_v6, %v14275_v21  ;;  %v11943_v25 = vadd.f32 %v4706_v52, %v11938_v9  ;;  %v4207_v28 = vpop.xlane.xlu0 %4206 }
 0x860   : > { %v4386_v58 = vsub.f32 1.5, %v4385_v46  ;;  %v4224_v55 = vmul.f32 %v4207_v28, %v14275_v21 }
 0x861   : > { %v8401_v63 = vpop.eup %8400  ;;  %v11940_v47 = vadd.f32 1e-05, %v4298_v30  ;;  %v11947_v23 = vmul.f32 0.70710677, %v11943_v25 }
 0x862   : > { %v4387_v5 = vmul.f32 %v8399_v59, %v4386_v58  ;;  %v4393_v42 = vmul.f32 %v8401_v63, %v4313_v48  ;;  %v11956_v61 = vsub.f32 %v11869_v3, %v4224_v55  ;;  %vm4399_vm6 = vweird.f32 %v8401_v63 }
 0x863   : > { %8402 = vrsqrt.f32 %v11940_v47  ;;  %v4850_v2 = vmul.f32 %v11947_v23, %v11947_v23  ;;  %vm4400_vm8 = vmor %vm4398_vm7, %vm4399_vm6  ;;  %vm4408_vm10 = vweird.f32 %v11940_v47 }
 0x864   : > { %v4394_v33 = vmul.f32 %v8401_v63, %v4393_v42  ;;  %v4391_v1 = vsel %vm4390_vm5, %v8399_v59, %v4387_v5  ;;  %v4657_v20 = vpop.f32.mrf.mxu3 }
 0x865   : > { %v4488_v0 = vmul.f32 %v4391_v1, %v11812_v39  ;;  %v11959_v15 = vmin.f32 %v4850_v2, 16.0  ;;  %v11962_v40 = vadd.f32 %v4657_v20, %v11950_v19  ;;  %v4256_v39 = vmul.f32 %v11956_v61, %v11956_v61 }
 0x866   : > { %v4395_v29 = vmul.f32 0.5, %v4394_v33  ;;  %v4277_v8 = vpop.xlane.xlu2 %4276  ;;  %v4708_v26 = vpop.f32.mrf.mxu0 }
 0x867   : > { %v4299_v24 = vmul.f32 %v4277_v8, %v14275_v21  ;;  %v4507_v37 = vmul.f32 %v11816_v17, %v4488_v0  ;;  %v4852_v35 = vmul.f32 2.1237322e-06, %v11959_v15  ;;  %4286 = vadd.xlane.f32.xlu0 %v4256_v39  ;;  %v4863_v22 = vmul.f32 3.8918573e-05, %v11959_v15  ;;  %v4209_v10 = vpop.xlane.xlu1 %4208 }
 0x868   : > { %v4396_v36 = vsub.f32 1.5, %v4395_v29  ;;  %v11978_v59 = vmul.f32 0.70710677, %v11962_v40  ;;  %v4225_v48 = vmul.f32 %v4209_v10, %v14275_v21  ;;  %v11997_v33 = vadd.f32 %v4708_v26, %v11938_v9 }
 0x869   : > { %v11964_v11 = vpop.eup %8402  ;;  %v11968_v12 = vadd.f32 1e-05, %v4299_v24  ;;  %v4853_v49 = vadd.f32 0.00028619796, %v4852_v35  ;;  %v4864_v56 = vadd.f32 0.001143296, %v4863_v22  ;;  %v11983_v46 = vadd.f32 %v11826_v31, %v4507_v37 }
 0x86a   : > { %v4397_v3 = vmul.f32 %v8401_v63, %v4396_v36  ;;  %v4403_v38 = vmul.f32 %v11964_v11, %v11940_v47  ;;  %v4810_v51 = vmul.f32 %v11978_v59, %v11978_v59  ;;  %v11989_v30 = vsub.f32 %v11885_v53, %v4225_v48 }
 0x86b   : > { %8404 = vrsqrt.f32 %v11968_v12  ;;  %v4854_v6 = vmul.f32 %v4853_v49, %v11959_v15  ;;  %vm4409_vm9 = vweird.f32 %v11964_v11  ;;  %v12017_v37 = vmul.f32 0.70710677, %v11997_v33 }
 0x86c   : > { %v4404_v57 = vmul.f32 %v11964_v11, %v4403_v38  ;;  %v4401_v41 = vsel %vm4400_vm8, %v8401_v63, %v4397_v3  ;;  %v11994_v42 = vmin.f32 %v4810_v51, 16.0  ;;  %v4257_v1 = vmul.f32 %v11989_v30, %v11989_v30  ;;  %vm12022_vm12 = vmor %vm4408_vm10, %vm4409_vm9 }
 0x86d   : > { %v4489_v16 = vmul.f32 %v4401_v41, %v11832_v43  ;;  %v4865_v43 = vmul.f32 %v4864_v56, %v11959_v15  ;;  %v4855_v5 = vadd.f32 0.0036580483, %v4854_v6  ;;  %v4930_v56 = vmul.f32 %v12017_v37, %v12017_v37  ;;  %v8028_v41 = vld [vmem:[#allocation17 + $0x98] sm:$0xff] }
 0x86e   : > { %v4405_v34 = vmul.f32 0.5, %v4404_v57  ;;  %v4279_v50 = vpop.xlane.xlu2 %4278  ;;  %4288 = vadd.xlane.f32.xlu1 %v4257_v1  ;;  %v4812_v39 = vmul.f32 2.1237322e-06, %v11994_v42  ;;  %v4823_v38 = vmul.f32 3.8918573e-05, %v11994_v42  ;;  %v8036_v57 = vld [vmem:[#allocation17 + $0xd8] sm:$0xff]  ;;  %vm4418_vm13 = vweird.f32 %v11968_v12  ;;  %6308 = vmatpush.bf16.msra.mxu1 %v8028_v41 }
 0x86f   : > { %v4300_v58 = vmul.f32 %v4279_v50, %v14275_v21  ;;  %v4508_v63 = vmul.f32 %v11816_v17, %v4489_v16  ;;  %v4866_v29 = vadd.f32 0.014752088, %v4865_v43  ;;  %v4856_v36 = vmul.f32 %v4855_v5, %v11959_v15  ;;  %6357 = vmatpush.bf16.msra.mxu2 %v8036_v57 }
 0x870   : > { %v4406_v52 = vsub.f32 1.5, %v4405_v34  ;;  %v4813_v10 = vadd.f32 0.00028619796, %v4812_v39  ;;  %v4824_v16 = vadd.f32 0.001143296, %v4823_v38  ;;  %v12039_v43 = vmin.f32 %v4930_v56, 16.0  ;;  %v4659_v56 = vpop.f32.mrf.mxu3 }
 0x871   : > { %v8405_v28 = vpop.eup %8404  ;;  %v12001_v55 = vadd.f32 1e-05, %v4300_v58  ;;  %v12004_v53 = vadd.f32 %v11826_v31, %v4508_v63  ;;  %v4867_v2 = vmul.f32 %v4866_v29, %v11959_v15  ;;  %v4857_v34 = vadd.f32 0.05243302, %v4856_v36 }
 0x872   : > { %v4413_v8 = vmul.f32 %v8405_v28, %v11968_v12  ;;  %v4407_v24 = vmul.f32 %v11964_v11, %v4406_v52  ;;  %vm4419_vm11 = vweird.f32 %v8405_v28  ;;  %v4814_v50 = vmul.f32 %v4813_v10, %v11994_v42 }
 0x873   : > { %8406 = vrsqrt.f32 %v12001_v55  ;;  %v4556_v0 = vpack.c.bf16 %v12004_v53, %v11983_v46  ;;  %v4868_v3 = vadd.f32 0.112945676, %v4867_v2  ;;  %v4825_v63 = vmul.f32 %v4824_v16, %v11994_v42  ;;  %vm4420_vm14 = vmor %vm4418_vm13, %vm4419_vm11 }
 0x874   : > { %v4414_v20 = vmul.f32 %v8405_v28, %v4413_v8  ;;  %v4411_v47 = vsel %vm12022_vm12, %v11964_v11, %v4407_v24  ;;  %v4815_v1 = vadd.f32 0.0036580483, %v4814_v50  ;;  %vm4428_vm0 = vweird.f32 %v12001_v55 }
 0x875   : > { %4671 = vmatmul.bf16.gmra.mxu3 %v4556_v0  ;;  %4720 = vmatmul.bf16.gmra.mxu0 %v4556_v0  ;;  %v4869_v48 = vmul.f32 %v4868_v3, %v11959_v15  ;;  %v4490_v5 = vmul.f32 %v4411_v47, %v11852_v13  ;;  %v4858_v0 = vmul.f32 %v4857_v34, %v11959_v15  ;;  %v4826_v2 = vadd.f32 0.014752088, %v4825_v63 }
 0x876   : > { %v4415_v35 = vmul.f32 0.5, %v4414_v20  ;;  %v4281_v22 = vpop.xlane.xlu0 %4280  ;;  %v4932_v13 = vmul.f32 2.1237322e-06, %v12039_v43  ;;  %v4816_v12 = vmul.f32 %v4815_v1, %v11994_v42 }
 0x877   : > { %v4301_v49 = vmul.f32 %v4281_v22, %v14275_v21  ;;  %v4870_v58 = vadd.f32 0.4994258, %v4869_v48  ;;  %v4827_v36 = vmul.f32 %v4826_v2, %v11994_v42  ;;  %v4859_v3 = vadd.f32 0.18741608, %v4858_v0 }
 0x878   : > { %v4416_v26 = vsub.f32 1.5, %v4415_v35  ;;  %v4933_v35 = vadd.f32 0.00028619796, %v4932_v13  ;;  %v4509_v57 = vmul.f32 %v11816_v17, %v4490_v5  ;;  %v4817_v10 = vadd.f32 0.05243302, %v4816_v12 }
 0x879   : > { %v12034_v6 = vpop.eup %8406  ;;  %v12036_v51 = vadd.f32 1e-05, %v4301_v49  ;;  %v4871_v11 = vmul.f32 %v4870_v58, %v11959_v15  ;;  %v4828_v38 = vadd.f32 0.112945676, %v4827_v36  ;;  %v4711_v12 = vpop.f32.mrf.mxu0  ;;  %v12087_v36 = vmul.f32 0.5, %v11943_v25 }
 0x87a   : > { %v4417_v52 = vmul.f32 %v8405_v28, %v4416_v26  ;;  %v4423_v8 = vmul.f32 %v12034_v6, %v12001_v55  ;;  %v4860_v26 = vmul.f32 %v4859_v3, %v11959_v15  ;;  %v4934_v63 = vmul.f32 %v4933_v35, %v12039_v43 }
 0x87b   : > { %8408 = vrsqrt.f32 %v12036_v51  ;;  %v12050_v20 = vadd.f32 1.0, %v4871_v11  ;;  %v4829_v48 = vmul.f32 %v4828_v38, %v11994_v42  ;;  %v12072_v5 = vadd.f32 %v11826_v31, %v4509_v57 }
 0x87c   : > { %v4421_v29 = vsel %vm4420_vm14, %v8405_v28, %v4417_v52  ;;  %v4943_v28 = vmul.f32 3.8918573e-05, %v12039_v43  ;;  %v4424_v39 = vmul.f32 %v12034_v6, %v4423_v8  ;;  %v4818_v15 = vmul.f32 %v4817_v10, %v11994_v42 }
 0x87d   : > { %v4491_v24 = vmul.f32 %v4421_v29, %v11872_v18  ;;  %8410 = vrcp.f32 %v12050_v20  ;;  %v4830_v58 = vadd.f32 0.4994258, %v4829_v48  ;;  %14299 = vst [vmem:[#allocation30_spill] sm:$0xff] %v12072_v5  ;;  %v12080_v29 = vadd.f32 %v4659_v56, %v11950_v19 }
 0x87e   : > { %v4944_v22 = vadd.f32 0.001143296, %v4943_v28  ;;  %v4425_v47 = vmul.f32 0.5, %v4424_v39  ;;  %v4861_v13 = vadd.f32 1.1283791, %v4860_v26  ;;  %v12096_v57 = vmul.f32 0.5, %v11962_v40 }
 0x87f   : > { %v4510_v18 = vmul.f32 %v11816_v17, %v4491_v24  ;;  %v4831_v8 = vmul.f32 %v4830_v58, %v11994_v42  ;;  %v4935_v39 = vadd.f32 0.0036580483, %v4934_v63  ;;  %v4819_v35 = vadd.f32 0.18741608, %v4818_v15 }
 0x880   : > { %v4945_v16 = vmul.f32 %v4944_v22, %v12039_v43  ;;  %v4426_v24 = vsub.f32 1.5, %v4425_v47  ;;  %v12093_v22 = vmul.f32 0.70710677, %v12080_v29  ;;  %v12100_v25 = vmul.f32 0.5, %v11997_v33  ;;  %v4662_v47 = vpop.f32.mrf.mxu3 }
 0x881   : > { %v12060_v49 = vpop.eup %8408  ;;  %v12066_v34 = vadd.f32 %v11826_v31, %v4510_v18  ;;  %v12089_v28 = vadd.f32 1.0, %v4831_v8  ;;  %v12103_v10 = vadd.f32 %v4711_v12, %v11938_v9  ;;  %vm4429_vm15 = vweird.f32 %v12034_v6 }
 0x882   : > { %v4946_v52 = vadd.f32 0.014752088, %v4945_v16  ;;  %v4433_v11 = vmul.f32 %v12060_v49, %v12036_v51  ;;  %v4427_v41 = vmul.f32 %v12034_v6, %v4426_v24  ;;  %v4882_v48 = vand.u32 2147483647, %v12050_v20  ;;  %vm12118_vm1 = vmor %vm4428_vm0, %vm4429_vm15 }
 0x883   : > { %14298 = vst [vmem:[#allocation29_spill] sm:$0xff] %v12066_v34  ;;  %v12068_v50 = vpop.eup %8410  ;;  %v4557_v2 = vpack.c.bf16 %v12066_v34, %v12072_v5  ;;  %8412 = vrcp.f32 %v12089_v28  ;;  %v12111_v40 = vmul.f32 %v4861_v13, %v11947_v23  ;;  %v4936_v56 = vmul.f32 %v4935_v39, %v12039_v43 }
 0x884   : > { %v4874_v1 = vmul.f32 %v12068_v50, %v12050_v20  ;;  %v4947_v0 = vmul.f32 %v4946_v52, %v12039_v43  ;;  %v4434_v38 = vmul.f32 %v12060_v49, %v4433_v11  ;;  %v4890_v33 = vmul.f32 %v12093_v22, %v12093_v22  ;;  %v4713_v11 = vpop.f32.mrf.mxu0 }
 0x885   : > { %4676 = vmatmul.bf16.gmra.mxu3 %v4557_v2  ;;  %4725 = vmatmul.bf16.gmra.mxu0 %v4557_v2  ;;  %v4820_v63 = vmul.f32 %v4819_v35, %v11994_v42  ;;  %vm4878_vm2 = vweird.f32 %v12050_v20  ;;  %v4884_v23 = vand.u32 2147483648, %v12050_v20  ;;  %v4431_v15 = vsel %vm12118_vm1, %v12034_v6, %v4427_v41 }
 0x886   : > { %v4948_v3 = vadd.f32 0.112945676, %v4947_v0  ;;  %v4875_v18 = vsub.f32 1.0, %v4874_v1  ;;  %v4435_v26 = vmul.f32 0.5, %v4434_v38  ;;  %v12124_v55 = vmin.f32 %v4890_v33, 16.0 }
 0x887   : > { %v12127_v1 = vmul.f32 0.70710677, %v12103_v10  ;;  %vm12132_vm3 = vcmp.eq.f32.partialorder %v4882_v48, 8.507059e+37  ;;  %v12138_v0 = vadd.f32 %v4662_v47, %v11950_v19  ;;  %vm4438_vm4 = vweird.f32 %v12036_v51 }
 0x888   : > { %v4949_v16 = vmul.f32 %v4948_v3, %v12039_v43  ;;  %v4876_v58 = vmul.f32 %v12068_v50, %v4875_v18  ;;  %v4937_v24 = vadd.f32 0.05243302, %v4936_v56  ;;  %v4892_v13 = vmul.f32 2.1237322e-06, %v12124_v55 }
 0x889   : > { %v12140_v2 = vpop.eup %8412  ;;  %v4903_v12 = vmul.f32 3.8918573e-05, %v12124_v55  ;;  %v5010_v6 = vmul.f32 %v12127_v1, %v12127_v1  ;;  %v4436_v39 = vsub.f32 1.5, %v4435_v26  ;;  %vm4879_vm5 = vweird.f32 %v12068_v50 }
 0x88a   : > { %v4950_v52 = vadd.f32 0.4994258, %v4949_v16  ;;  %v4877_v3 = vadd.f32 %v12068_v50, %v4876_v58  ;;  %v4821_v38 = vadd.f32 1.1283791, %v4820_v63  ;;  %v4893_v35 = vadd.f32 0.00028619796, %v4892_v13  ;;  %vm12164_vm7 = vmor %vm4878_vm2, %vm4879_vm5 }
 0x88b   : > { %v4904_v41 = vadd.f32 0.001143296, %v4903_v12  ;;  %v12151_v48 = vmin.f32 %v5010_v6, 16.0  ;;  %vm4439_vm6 = vweird.f32 %v12060_v49  ;;  %v4885_v16 = vor.u32 1.1754944e-38, %v4884_v23 }
 0x88c   : > { %v4951_v8 = vmul.f32 %v4950_v52, %v12039_v43  ;;  %v4834_v56 = vmul.f32 %v12140_v2, %v12089_v28  ;;  %v12157_v33 = vmul.f32 0.70710677, %v12138_v0  ;;  %v12160_v47 = vmul.f32 %v4431_v15, %v11888_v4  ;;  %v8035_v52 = vld [vmem:[#allocation17 + $0xd0] sm:$0xff]  ;;  %vm12198_vm8 = vmor %vm4438_vm4, %vm4439_vm6 }
 0x88d   : > { %v4938_v58 = vmul.f32 %v4937_v24, %v12039_v43  ;;  %v12171_v63 = vmul.f32 0.5, %v12080_v29  ;;  %v12174_v23 = vmul.f32 %v12060_v49, %v4436_v39  ;;  %v4881_v4 = vsel %vm12164_vm7, %v12068_v50, %v4877_v3  ;;  %6358 = vmatpush.bf16.msra.mxu2 %v8035_v52 }
 0x88e   : > { %v12149_v18 = vadd.f32 1.0, %v4951_v8  ;;  %v4894_v20 = vmul.f32 %v4893_v35, %v12124_v55  ;;  %v4905_v15 = vmul.f32 %v4904_v41, %v12124_v55  ;;  %v12182_v8 = vmul.f32 %v4821_v38, %v11978_v59 }
 0x88f   : > { %v4844_v24 = vand.u32 2147483648, %v12089_v28  ;;  %v5012_v29 = vmul.f32 2.1237322e-06, %v12151_v48  ;;  %v5023_v13 = vmul.f32 3.8918573e-05, %v12151_v48  ;;  %v4835_v12 = vsub.f32 1.0, %v4834_v56 }
 0x890   : > { %8414 = vrcp.f32 %v12149_v18  ;;  %v4906_v6 = vadd.f32 0.014752088, %v4905_v15  ;;  %v4970_v39 = vmul.f32 %v12157_v33, %v12157_v33  ;;  %v12190_v50 = vadd.f32 %v4713_v11, %v11938_v9 }
 0x891   : > { %v4886_v3 = vsel %vm12132_vm3, %v4885_v16, %v4881_v4  ;;  %v4939_v59 = vadd.f32 0.18741608, %v4938_v58  ;;  %v5013_v38 = vadd.f32 0.00028619796, %v5012_v29  ;;  %v5024_v35 = vadd.f32 0.001143296, %v5023_v13 }
 0x892   : > { %vm4838_vm9 = vweird.f32 %v12089_v28  ;;  %v4842_v56 = vand.u32 2147483647, %v12089_v28  ;;  %v4895_v26 = vadd.f32 0.0036580483, %v4894_v20  ;;  %v4907_v52 = vmul.f32 %v4906_v6, %v12124_v55 }
 0x893   : > { %v12205_v42 = vmin.f32 %v4970_v39, 16.0  ;;  %v4441_v58 = vsel %vm12198_vm8, %v12060_v49, %v12174_v23  ;;  %v4845_v51 = vor.u32 1.1754944e-38, %v4844_v24  ;;  %v5014_v11 = vmul.f32 %v5013_v38, %v12151_v48  ;;  %v8027_v38 = vld [vmem:[#allocation17 + $0x90] sm:$0xff] }
 0x894   : > { %v5025_v4 = vmul.f32 %v5024_v35, %v12151_v48  ;;  %v4887_v15 = vmul.f32 %v4886_v3, %v12111_v40  ;;  %v4836_v29 = vmul.f32 %v12140_v2, %v4835_v12  ;;  %v12217_v13 = vmul.f32 0.70710677, %v12190_v50  ;;  %6309 = vmatpush.bf16.msra.mxu1 %v8027_v38 }
 0x895   : > { %v4940_v6 = vmul.f32 %v4939_v59, %v12039_v43  ;;  %v4908_v39 = vadd.f32 0.112945676, %v4907_v52  ;;  %v5015_v34 = vadd.f32 0.0036580483, %v5014_v11  ;;  %vm4839_vm10 = vweird.f32 %v12140_v2 }
 0x896   : > { %v8415_v16 = vpop.eup %8414  ;;  %v5026_v41 = vadd.f32 0.014752088, %v5025_v4  ;;  %v4896_v23 = vmul.f32 %v4895_v26, %v12124_v55  ;;  %v4972_v24 = vmul.f32 2.1237322e-06, %v12205_v42  ;;  %vm4958_vm11 = vweird.f32 %v12149_v18  ;;  %vm12237_vm13 = vmor %vm4838_vm9, %vm4839_vm10 }
 0x897   : > { %v4954_v20 = vmul.f32 %v8415_v16, %v12149_v18  ;;  %v4909_v40 = vmul.f32 %v4908_v39, %v12124_v55  ;;  %v4983_v3 = vmul.f32 3.8918573e-05, %v12205_v42  ;;  %v4837_v43 = vadd.f32 %v12140_v2, %v4836_v29 }
 0x898   : > { %v5027_v12 = vmul.f32 %v5026_v41, %v12151_v48  ;;  %v5016_v35 = vmul.f32 %v5015_v34, %v12151_v48  ;;  %v4973_v52 = vadd.f32 0.00028619796, %v4972_v24  ;;  %vm4959_vm12 = vweird.f32 %v8415_v16 }
 0x899   : > { %v4955_v49 = vsub.f32 1.0, %v4954_v20  ;;  %v4910_v11 = vadd.f32 0.4994258, %v4909_v40  ;;  %v5090_v4 = vmul.f32 %v12217_v13, %v12217_v13  ;;  %v4962_v39 = vand.u32 2147483647, %v12149_v18  ;;  %vm12250_vm14 = vmor %vm4958_vm11, %vm4959_vm12 }
 0x89a   : > { %v5028_v26 = vadd.f32 0.112945676, %v5027_v12  ;;  %v4964_v41 = vand.u32 2147483648, %v12149_v18  ;;  %v4897_v5 = vadd.f32 0.05243302, %v4896_v23  ;;  %v4974_v24 = vmul.f32 %v4973_v52, %v12205_v42 }
 0x89b   : > { %v4956_v59 = vmul.f32 %v8415_v16, %v4955_v49  ;;  %v4911_v29 = vmul.f32 %v4910_v11, %v12124_v55  ;;  %v4984_v40 = vadd.f32 0.001143296, %v4983_v3  ;;  %v7817_v12 = vclamps-f32 %v4887_v15, 1.0 }
 0x89c   : > { %v5029_v49 = vmul.f32 %v5028_v26, %v12151_v48  ;;  %v4841_v23 = vsel %vm12237_vm13, %v12140_v2, %v4837_v43  ;;  %v4941_v38 = vadd.f32 1.1283791, %v4940_v6  ;;  %v12258_v15 = vmin.f32 %v5090_v4, 16.0 }
 0x89d   : > { %v4957_v20 = vadd.f32 %v8415_v16, %v4956_v59  ;;  %v5017_v59 = vadd.f32 0.05243302, %v5016_v35  ;;  %v12256_v26 = vadd.f32 1.0, %v4911_v29  ;;  %vm4843_vm15 = vcmp.eq.f32.partialorder %v4842_v56, 8.507059e+37 }
 0x89e   : > { %v5030_v3 = vadd.f32 0.4994258, %v5029_v49  ;;  %v4965_v52 = vor.u32 1.1754944e-38, %v4964_v41  ;;  %v4898_v2 = vmul.f32 %v4897_v5, %v12124_v55  ;;  %v4985_v6 = vmul.f32 %v4984_v40, %v12205_v42 }
 0x89f   : > { %v4961_v11 = vsel %vm12250_vm14, %v8415_v16, %v4957_v20  ;;  %v4846_v18 = vsel %vm4843_vm15, %v4845_v51, %v4841_v23  ;;  %vm4963_vm0 = vcmp.eq.f32.partialorder %v4962_v39, 8.507059e+37  ;;  %8416 = vrcp.f32 %v12256_v26 }
 0x8a0   : > { %v4975_v43 = vadd.f32 0.0036580483, %v4974_v24  ;;  %v4493_v35 = vmul.f32 %v4441_v58, %v11904_v7  ;;  %v6091_v34 = vadd.f32 1.0, %v7817_v12  ;;  %v4966_v16 = vsel %vm4963_vm0, %v4965_v52, %v4961_v11 }
 0x8a1   : > { %v5031_v20 = vmul.f32 %v5030_v3, %v12151_v48  ;;  %v4942_v4 = vmul.f32 %v4941_v38, %v12017_v37  ;;  %v5018_v56 = vmul.f32 %v5017_v59, %v12151_v48  ;;  %v4986_v41 = vadd.f32 0.014752088, %v4985_v6 }
 0x8a2   : > { %v5092_v5 = vmul.f32 2.1237322e-06, %v12258_v15  ;;  %v4847_v29 = vmul.f32 %v4846_v18, %v12182_v8  ;;  %v4899_v51 = vadd.f32 0.18741608, %v4898_v2  ;;  %v4511_v49 = vmul.f32 %v11816_v17, %v12160_v47  ;;  %v4664_v2 = vpop.f32.mrf.mxu3 }
 0x8a3   : > { %v12269_v39 = vadd.f32 1.0, %v5031_v20  ;;  %v4967_v7 = vmul.f32 %v4966_v16, %v4942_v4  ;;  %v4976_v58 = vmul.f32 %v4975_v43, %v12205_v42  ;;  %v4987_v24 = vmul.f32 %v4986_v41, %v12205_v42 }
 0x8a4   : > { %v5093_v40 = vadd.f32 0.00028619796, %v5092_v5  ;;  %v12276_v37 = vmul.f32 0.5, %v12103_v10  ;;  %v5103_v12 = vmul.f32 3.8918573e-05, %v12258_v15  ;;  %v4512_v8 = vmul.f32 %v11816_v17, %v4493_v35  ;;  %v4716_v17 = vpop.f32.mrf.mxu0 }
 0x8a5   : > { %8418 = vrcp.f32 %v12269_v39  ;;  %v12281_v23 = vpop.eup %8416  ;;  %v12284_v38 = vmul.f32 %v6091_v34, %v12087_v36  ;;  %v5019_v47 = vadd.f32 0.18741608, %v5018_v56  ;;  %v12287_v28 = vmul.f32 0.5, %v12138_v0 }
 0x8a6   : > { %v5094_v59 = vmul.f32 %v5093_v40, %v12258_v15  ;;  %v7816_v11 = vclamps-f32 %v4847_v29, 1.0  ;;  %v4900_v10 = vmul.f32 %v4899_v51, %v12124_v55  ;;  %v4914_v3 = vmul.f32 %v12281_v23, %v12256_v26 }
 0x8a7   : > { %v4988_v52 = vadd.f32 0.112945676, %v4987_v24  ;;  %v7819_v6 = vclamps-f32 %v4967_v7, 1.0  ;;  %v4977_v18 = vadd.f32 0.05243302, %v4976_v58  ;;  %v12294_v36 = vadd.f32 %v11826_v31, %v4511_v49  ;;  %v8034_v24 = vld [vmem:[#allocation17 + $0xc8] sm:$0xff] }
 0x8a8   : > { %v5095_v43 = vadd.f32 0.0036580483, %v5094_v59  ;;  %v4915_v35 = vsub.f32 1.0, %v4914_v3  ;;  %v5104_v34 = vadd.f32 0.001143296, %v5103_v12  ;;  %v12298_v16 = vadd.f32 %v11826_v31, %v4512_v8  ;;  %6359 = vmatpush.bf16.msra.mxu2 %v8034_v24 }
 0x8a9   : > { %v4989_v0 = vmul.f32 %v4988_v52, %v12205_v42  ;;  %v5020_v55 = vmul.f32 %v5019_v47, %v12151_v48  ;;  %v12303_v4 = vadd.f32 %v4664_v2, %v11950_v19  ;;  %v12306_v56 = vadd.f32 %v4716_v17, %v11938_v9 }
 0x8aa   : > { %v5096_v20 = vmul.f32 %v5095_v43, %v12258_v15  ;;  %v4916_v5 = vmul.f32 %v12281_v23, %v4915_v35  ;;  %v5105_v51 = vmul.f32 %v5104_v34, %v12258_v15  ;;  %v4558_v31 = vpack.c.bf16 %v12298_v16, %v12294_v36 }
 0x8ab   : > { %v12308_v41 = vpop.eup %8418  ;;  %v4990_v29 = vadd.f32 0.4994258, %v4989_v0  ;;  %v4901_v49 = vadd.f32 1.1283791, %v4900_v10  ;;  %v4922_v48 = vand.u32 2147483647, %v12256_v26  ;;  %v4978_v12 = vmul.f32 %v4977_v18, %v12205_v42 }
 0x8ac   : > { %v4924_v7 = vand.u32 2147483648, %v12256_v26  ;;  %v5034_v58 = vmul.f32 %v12308_v41, %v12269_v39  ;;  %v6093_v40 = vadd.f32 1.0, %v7819_v6  ;;  %v5106_v47 = vadd.f32 0.014752088, %v5105_v51  ;;  %4681 = vmatmul.bf16.gmra.mxu3 %v4558_v31  ;;  %4730 = vmatmul.bf16.gmra.mxu0 %v4558_v31 }
 0x8ad   : > { %v4991_v8 = vmul.f32 %v4990_v29, %v12205_v42  ;;  %v4917_v59 = vadd.f32 %v12281_v23, %v4916_v5  ;;  %vm4919_vm1 = vweird.f32 %v12281_v23  ;;  %v5021_v10 = vadd.f32 1.1283791, %v5020_v55 }
 0x8ae   : > { %v12323_v3 = vmul.f32 0.70710677, %v12303_v4  ;;  %v5097_v2 = vadd.f32 0.05243302, %v5096_v20  ;;  %v5107_v17 = vmul.f32 %v5106_v47, %v12258_v15  ;;  %v12329_v6 = vmul.f32 0.70710677, %v12306_v56 }
 0x8af   : > { %v12325_v52 = vadd.f32 1.0, %v4991_v8  ;;  %v12331_v18 = vadd.f32 1.0, %v7816_v11  ;;  %vm4918_vm2 = vweird.f32 %v12256_v26  ;;  %v5035_v43 = vsub.f32 1.0, %v5034_v58 }
 0x8b0   : > { %v5050_v35 = vmul.f32 %v12323_v3, %v12323_v3  ;;  %v4902_v0 = vmul.f32 %v4901_v49, %v12093_v22  ;;  %vm12337_vm3 = vmor %vm4918_vm2, %vm4919_vm1  ;;  %vm4923_vm4 = vcmp.eq.f32.partialorder %v4922_v48, 8.507059e+37  ;;  %v4979_v55 = vadd.f32 0.18741608, %v4978_v12 }
 0x8b1   : > { %8420 = vrcp.f32 %v12325_v52  ;;  %v12343_v20 = vmul.f32 %v6093_v40, %v12100_v25  ;;  %v4921_v26 = vsel %vm12337_vm3, %v12281_v23, %v4917_v59  ;;  %v4925_v11 = vor.u32 1.1754944e-38, %v4924_v7 }
 0x8b2   : > { %v5108_v5 = vadd.f32 0.112945676, %v5107_v17  ;;  %v12349_v29 = vmul.f32 %v5021_v10, %v12127_v1  ;;  %v5098_v22 = vmul.f32 %v5097_v2, %v12258_v15  ;;  %v12352_v51 = vmin.f32 %v5050_v35, 16.0 }
 0x8b3   : > { %v5170_v31 = vmul.f32 %v12329_v6, %v12329_v6  ;;  %v5036_v49 = vmul.f32 %v12308_v41, %v5035_v43  ;;  %vm5038_vm5 = vweird.f32 %v12269_v39  ;;  %v5042_v25 = vand.u32 2147483647, %v12269_v39 }
 0x8b4   : > { %v5109_v23 = vmul.f32 %v5108_v5, %v12258_v15  ;;  %v4926_v48 = vsel %vm4923_vm4, %v4925_v11, %v4921_v26  ;;  %v4980_v7 = vmul.f32 %v4979_v55, %v12205_v42  ;;  %v5052_v1 = vmul.f32 2.1237322e-06, %v12352_v51  ;;  %v4667_v5 = vpop.f32.mrf.mxu3 }
 0x8b5   : > { %v5063_v58 = vmul.f32 3.8918573e-05, %v12352_v51  ;;  %v5044_v40 = vand.u32 2147483648, %v12269_v39  ;;  %v12366_v8 = vmin.f32 %v5170_v31, 16.0  ;;  %vm5039_vm6 = vweird.f32 %v12308_v41  ;;  %v8026_v31 = vld [vmem:[#allocation17 + $0x88] sm:$0xff] }
 0x8b6   : > { %v5110_v12 = vadd.f32 0.4994258, %v5109_v23  ;;  %v5099_v59 = vadd.f32 0.18741608, %v5098_v22  ;;  %v5053_v10 = vadd.f32 0.00028619796, %v5052_v1  ;;  %v4927_v42 = vmul.f32 %v4926_v48, %v4902_v0  ;;  %vm12386_vm7 = vmor %vm5038_vm5, %vm5039_vm6  ;;  %6310 = vmatpush.bf16.msra.mxu1 %v8026_v31 }
 0x8b7   : > { %v12368_v47 = vpop.eup %8420  ;;  %v5064_v2 = vadd.f32 0.001143296, %v5063_v58  ;;  %v5037_v17 = vadd.f32 %v12308_v41, %v5036_v49  ;;  %v4981_v34 = vadd.f32 1.1283791, %v4980_v7  ;;  %v5002_v55 = vand.u32 2147483647, %v12325_v52 }
 0x8b8   : > { %v4994_v43 = vmul.f32 %v12368_v47, %v12325_v52  ;;  %v5111_v35 = vmul.f32 %v5110_v12, %v12258_v15  ;;  %v5054_v26 = vmul.f32 %v5053_v10, %v12352_v51  ;;  %v5172_v0 = vmul.f32 2.1237322e-06, %v12366_v8 }
 0x8b9   : > { %v5065_v11 = vmul.f32 %v5064_v2, %v12352_v51  ;;  %v5183_v49 = vmul.f32 3.8918573e-05, %v12366_v8  ;;  %v5004_v7 = vand.u32 2147483648, %v12325_v52  ;;  %v5100_v1 = vmul.f32 %v5099_v59, %v12258_v15 }
 0x8ba   : > { %v4995_v22 = vsub.f32 1.0, %v4994_v43  ;;  %v12378_v23 = vadd.f32 1.0, %v5111_v35  ;;  %v5055_v58 = vadd.f32 0.0036580483, %v5054_v26  ;;  %v7818_v10 = vclamps-f32 %v4927_v42, 1.0 }
 0x8bb   : > { %v5066_v12 = vadd.f32 0.014752088, %v5065_v11  ;;  %v5041_v2 = vsel %vm12386_vm7, %v12308_v41, %v5037_v17  ;;  %v12397_v39 = vadd.f32 %v4667_v5, %v11950_v19  ;;  %v5045_v43 = vor.u32 1.1754944e-38, %v5044_v40 }
 0x8bc   : > { %8422 = vrcp.f32 %v12378_v23  ;;  %v4996_v35 = vmul.f32 %v12368_v47, %v4995_v22  ;;  %v5056_v24 = vmul.f32 %v5055_v58, %v12352_v51  ;;  %vm5043_vm8 = vcmp.eq.f32.partialorder %v5042_v25, 8.507059e+37 }
 0x8bd   : > { %v5067_v15 = vmul.f32 %v5066_v12, %v12352_v51  ;;  %v12403_v59 = vmul.f32 %v4981_v34, %v12157_v33  ;;  %v5173_v42 = vadd.f32 0.00028619796, %v5172_v0  ;;  %v5184_v26 = vadd.f32 0.001143296, %v5183_v49  ;;  %v4718_v33 = vpop.f32.mrf.mxu0 }
 0x8be   : > { %v5046_v11 = vsel %vm5043_vm8, %v5045_v43, %v5041_v2  ;;  %vm4998_vm9 = vweird.f32 %v12325_v52  ;;  %v5101_v41 = vadd.f32 1.1283791, %v5100_v1  ;;  %v6092_v5 = vadd.f32 1.0, %v7818_v10 }
 0x8bf   : > { %v5068_v17 = vadd.f32 0.112945676, %v5067_v15  ;;  %vm12406_vm10 = vcmp.eq.f32.partialorder %v5002_v55, 8.507059e+37  ;;  %v5005_v31 = vor.u32 1.1754944e-38, %v5004_v7  ;;  %v5185_v22 = vmul.f32 %v5184_v26, %v12366_v8 }
 0x8c0   : > { %v12412_v25 = vmul.f32 0.70710677, %v12397_v39  ;;  %v4997_v34 = vadd.f32 %v12368_v47, %v4996_v35  ;;  %vm4999_vm11 = vweird.f32 %v12368_v47  ;;  %v5057_v0 = vadd.f32 0.05243302, %v5056_v24 }
 0x8c1   : > { %v5069_v49 = vmul.f32 %v5068_v17, %v12352_v51  ;;  %v5047_v55 = vmul.f32 %v5046_v11, %v12349_v29  ;;  %v5174_v1 = vmul.f32 %v5173_v42, %v12366_v8  ;;  %v5186_v58 = vadd.f32 0.014752088, %v5185_v22  ;;  %vm12428_vm12 = vmor %vm4998_vm9, %vm4999_vm11 }
 0x8c2   : > { %v8423_v48 = vpop.eup %8422  ;;  %v5130_v7 = vmul.f32 %v12412_v25, %v12412_v25  ;;  %v5102_v12 = vmul.f32 %v5101_v41, %v12217_v13  ;;  %v12424_v43 = vadd.f32 %v4718_v33, %v11938_v9  ;;  %v5122_v29 = vand.u32 2147483647, %v12378_v23 }
 0x8c3   : > { %v5114_v10 = vmul.f32 %v8423_v48, %v12378_v23  ;;  %v5070_v2 = vadd.f32 0.4994258, %v5069_v49  ;;  %v5124_v35 = vand.u32 2147483648, %v12378_v23  ;;  %v5187_v15 = vmul.f32 %v5186_v58, %v12366_v8 }
 0x8c4   : > { %v12435_v42 = vmin.f32 %v5130_v7, 16.0  ;;  %v5001_v13 = vsel %vm12428_vm12, %v12368_v47, %v4997_v34  ;;  %v5058_v11 = vmul.f32 %v5057_v0, %v12352_v51  ;;  %vm5119_vm13 = vweird.f32 %v8423_v48 }
 0x8c5   : > { %v5115_v26 = vsub.f32 1.0, %v5114_v10  ;;  %v5071_v52 = vmul.f32 %v5070_v2, %v12352_v51  ;;  %v5175_v41 = vadd.f32 0.0036580483, %v5174_v1  ;;  %v5188_v17 = vadd.f32 0.112945676, %v5187_v15  ;;  %v8033_v10 = vld [vmem:[#allocation17 + $0xc0] sm:$0xff] }
 0x8c6   : > { %v5132_v22 = vmul.f32 2.1237322e-06, %v12435_v42  ;;  %v5143_v58 = vmul.f32 3.8918573e-05, %v12435_v42  ;;  %v12447_v7 = vmul.f32 0.70710677, %v12424_v43  ;;  %v6124_v47 = vmul.f32 %v6092_v5, %v12171_v63  ;;  %6360 = vmatpush.bf16.msra.mxu2 %v8033_v10 }
 0x8c7   : > { %v5116_v33 = vmul.f32 %v8423_v48, %v5115_v26  ;;  %v12443_v49 = vadd.f32 1.0, %v5071_v52  ;;  %v7821_v34 = vclamps-f32 %v5047_v55, 1.0  ;;  %vm5118_vm14 = vweird.f32 %v12378_v23 }
 0x8c8   : > { %v5189_v0 = vmul.f32 %v5188_v17, %v12366_v8  ;;  %v5006_v1 = vsel %vm12406_vm10, %v5005_v31, %v5001_v13  ;;  %v5059_v24 = vadd.f32 0.18741608, %v5058_v11  ;;  %vm5120_vm15 = vmor %vm5118_vm14, %vm5119_vm13  ;;  %vm5123_vm0 = vcmp.eq.f32.partialorder %v5122_v29, 8.507059e+37 }
 0x8c9   : > { %v5117_v2 = vadd.f32 %v8423_v48, %v5116_v33  ;;  %8424 = vrcp.f32 %v12443_v49  ;;  %v5125_v15 = vor.u32 1.1754944e-38, %v5124_v35  ;;  %v5133_v52 = vadd.f32 0.00028619796, %v5132_v22 }
 0x8ca   : > { %v5190_v26 = vadd.f32 0.4994258, %v5189_v0  ;;  %v5176_v23 = vmul.f32 %v5175_v41, %v12366_v8  ;;  %v5144_v5 = vadd.f32 0.001143296, %v5143_v58  ;;  %v5250_v55 = vmul.f32 %v12447_v7, %v12447_v7  ;;  %v8025_v58 = vld [vmem:[#allocation17 + $0x80] sm:$0xff] }
 0x8cb   : > { %v5121_v63 = vsel %vm5120_vm15, %v8423_v48, %v5117_v2  ;;  %v6122_v40 = vmul.f32 %v12331_v18, %v12096_v57  ;;  %v6095_v31 = vadd.f32 1.0, %v7821_v34  ;;  %v12462_v13 = vmul.f32 %v5006_v1, %v12403_v59  ;;  %v4669_v59 = vpop.f32.mrf.mxu3  ;;  %6311 = vmatpush.bf16.msra.mxu1 %v8025_v58 }
 0x8cc   : > { %v5126_v11 = vsel %vm5123_vm0, %v5125_v15, %v5121_v63  ;;  %v5060_v35 = vmul.f32 %v5059_v24, %v12352_v51  ;;  %v5191_v17 = vmul.f32 %v5190_v26, %v12366_v8  ;;  %v5145_v48 = vmul.f32 %v5144_v5, %v12435_v42 }
 0x8cd   : > { %v5127_v29 = vmul.f32 %v5126_v11, %v5102_v12  ;;  %v14320_v41 = vpack.c.bf16 %v12343_v20, %v12284_v38  ;;  %v6187_v22 = vpack.c.bf16 %v6124_v47, %v6122_v40  ;;  %v4753_v33 = vmul.f32 0.5, %v12190_v50 }
 0x8ce   : > { %v5134_v57 = vmul.f32 %v5133_v52, %v12435_v42  ;;  %v12472_v18 = vmin.f32 %v5250_v55, 16.0  ;;  %v5177_v51 = vadd.f32 0.05243302, %v5176_v23  ;;  %v12474_v0 = vadd.f32 1.0, %v5191_v17 }
 0x8cf   : > { %6361 = vmatmul.bf16.vlgmr.msra.gmra.mxu2 %v14320_v41  ;;  %v8425_v12 = vpop.eup %8424  ;;  %v7823_v34 = vclamps-f32 %v5127_v29, 1.0  ;;  %v5146_v10 = vadd.f32 0.014752088, %v5145_v48  ;;  %v6127_v1 = vmul.f32 %v6095_v31, %v12276_v37  ;;  %v7820_v47 = vclamps-f32 %v12462_v13, 1.0  ;;  %6312 = vmatmul.bf16.vlgmr.msra.gmra.mxu1 %v6187_v22 }
 0x8d0   : > { %v5074_v38 = vmul.f32 %v8425_v12, %v12443_v49  ;;  %v5252_v20 = vmul.f32 2.1237322e-06, %v12472_v18  ;;  %v5263_v50 = vmul.f32 3.8918573e-05, %v12472_v18  ;;  %v5061_v2 = vadd.f32 1.1283791, %v5060_v35 }
 0x8d1   : > { %8426 = vrcp.f32 %v12474_v0  ;;  %v12483_v24 = vadd.f32 %v4669_v59, %v11950_v19  ;;  %v5084_v26 = vand.u32 2147483648, %v12443_v49  ;;  %v5135_v52 = vadd.f32 0.0036580483, %v5134_v57 }
 0x8d2   : > { %v5075_v15 = vsub.f32 1.0, %v5074_v38  ;;  %v5147_v37 = vmul.f32 %v5146_v10, %v12435_v42  ;;  %v6097_v63 = vadd.f32 1.0, %v7823_v34  ;;  %v5178_v23 = vmul.f32 %v5177_v51, %v12366_v8 }
 0x8d3   : > { %v5253_v5 = vadd.f32 0.00028619796, %v5252_v20  ;;  %v5264_v55 = vadd.f32 0.001143296, %v5263_v50  ;;  %vm5079_vm1 = vweird.f32 %v8425_v12  ;;  %v5082_v31 = vand.u32 2147483647, %v12443_v49 }
 0x8d4   : > { %v5076_v40 = vmul.f32 %v8425_v12, %v5075_v15  ;;  %v5148_v13 = vadd.f32 0.112945676, %v5147_v37  ;;  %vm5078_vm2 = vweird.f32 %v12443_v49  ;;  %v12493_v35 = vmul.f32 0.70710677, %v12483_v24 }
 0x8d5   : > { %v5254_v11 = vmul.f32 %v5253_v5, %v12472_v18  ;;  %v5265_v29 = vmul.f32 %v5264_v55, %v12472_v18  ;;  %v5085_v48 = vor.u32 1.1754944e-38, %v5084_v26  ;;  %v5136_v41 = vmul.f32 %v5135_v52, %v12435_v42  ;;  %vm5080_vm3 = vmor %vm5078_vm2, %vm5079_vm1 }
 0x8d6   : > { %v5077_v17 = vadd.f32 %v8425_v12, %v5076_v40  ;;  %v5149_v22 = vmul.f32 %v5148_v13, %v12435_v42  ;;  %v6129_v59 = vmul.f32 %v6097_v63, %v4753_v33  ;;  %v5210_v49 = vmul.f32 %v12493_v35, %v12493_v35 }
 0x8d7   : > { %v12497_v57 = vpop.eup %8426  ;;  %v5255_v58 = vadd.f32 0.0036580483, %v5254_v11  ;;  %v5266_v34 = vadd.f32 0.014752088, %v5265_v29  ;;  %v5062_v51 = vmul.f32 %v5061_v2, %v12323_v3  ;;  %vm5083_vm4 = vcmp.eq.f32.partialorder %v5082_v31, 8.507059e+37 }
 0x8d8   : > { %v5081_v10 = vsel %vm5080_vm3, %v8425_v12, %v5077_v17  ;;  %v5194_v38 = vmul.f32 %v12497_v57, %v12474_v0  ;;  %v5150_v50 = vadd.f32 0.4994258, %v5149_v22  ;;  %v5179_v52 = vadd.f32 0.18741608, %v5178_v23 }
 0x8d9   : > { %v5086_v20 = vsel %vm5083_vm4, %v5085_v48, %v5081_v10  ;;  %v5256_v15 = vmul.f32 %v5255_v58, %v12472_v18  ;;  %v5267_v26 = vmul.f32 %v5266_v34, %v12472_v18  ;;  %v12506_v63 = vmin.f32 %v5210_v49, 16.0  ;;  %v4283_v48 = vpop.xlane.xlu1 %4282 }
 0x8da   : > { %v5087_v33 = vmul.f32 %v5086_v20, %v5062_v51  ;;  %v5195_v37 = vsub.f32 1.0, %v5194_v38  ;;  %v5137_v5 = vadd.f32 0.05243302, %v5136_v41  ;;  %v5151_v55 = vmul.f32 %v5150_v50, %v12435_v42 }
 0x8db   : > { %v5268_v3 = vadd.f32 0.112945676, %v5267_v26  ;;  %v6190_v12 = vpack.c.bf16 %v6129_v59, %v6127_v1  ;;  %v5257_v31 = vadd.f32 0.05243302, %v5256_v15  ;;  %v5212_v13 = vmul.f32 2.1237322e-06, %v12506_v63 }
 0x8dc   : > { %v7822_v2 = vclamps-f32 %v5087_v33, 1.0  ;;  %v5196_v40 = vmul.f32 %v12497_v57, %v5195_v37  ;;  %v6094_v11 = vadd.f32 1.0, %v7820_v47  ;;  %v4752_v29 = vmul.f32 0.5, %v12303_v4 }
 0x8dd   : > { %v12512_v17 = vadd.f32 1.0, %v5151_v55  ;;  %v5269_v23 = vmul.f32 %v5268_v3, %v12472_v18  ;;  %v5180_v22 = vmul.f32 %v5179_v52, %v12366_v8  ;;  %v5213_v58 = vadd.f32 0.00028619796, %v5212_v13  ;;  %v4285_v13 = vpop.xlane.xlu2 %4284 }
 0x8de   : > { %v6096_v41 = vadd.f32 1.0, %v7822_v2  ;;  %v5223_v1 = vmul.f32 3.8918573e-05, %v12506_v63  ;;  %vm5199_vm5 = vweird.f32 %v12497_v57  ;;  %v5138_v59 = vmul.f32 %v5137_v5, %v12435_v42 }
 0x8df   : > { %6366 = vmatmul.bf16.gmra.mxu2 %v6190_v12  ;;  %8428 = vrcp.f32 %v12512_v17  ;;  %v4302_v4 = vmul.f32 %v4283_v48, %v14275_v21  ;;  %v5197_v34 = vadd.f32 %v12497_v57, %v5196_v40  ;;  %v5258_v49 = vmul.f32 %v5257_v31, %v12472_v18 }
 0x8e0   : > { %v6128_v47 = vmul.f32 %v6096_v41, %v4752_v29  ;;  %v5270_v51 = vadd.f32 0.4994258, %v5269_v23  ;;  %v6126_v10 = vmul.f32 %v6094_v11, %v12287_v28  ;;  %v5204_v8 = vand.u32 2147483648, %v12474_v0 }
 0x8e1   : > { %v5214_v38 = vmul.f32 %v5213_v58, %v12506_v63  ;;  %vm5198_vm6 = vweird.f32 %v12474_v0  ;;  %v5202_v20 = vand.u32 2147483647, %v12474_v0  ;;  %v5224_v15 = vadd.f32 0.001143296, %v5223_v1 }
 0x8e2   : > { %v5271_v50 = vmul.f32 %v5270_v51, %v12472_v18  ;;  %v5181_v26 = vadd.f32 1.1283791, %v5180_v22  ;;  %vm12531_vm7 = vmor %vm5198_vm6, %vm5199_vm5  ;;  %v5139_v52 = vadd.f32 0.18741608, %v5138_v59  ;;  %v12535_v28 = vadd.f32 1e-05, %v4302_v4 }
 0x8e3   : > { %v6189_v37 = vpack.c.bf16 %v6128_v47, %v6126_v10  ;;  %v5201_v5 = vsel %vm12531_vm7, %v12497_v57, %v5197_v34  ;;  %v5259_v55 = vadd.f32 0.18741608, %v5258_v49  ;;  %v5225_v3 = vmul.f32 %v5224_v15, %v12506_v63 }
 0x8e4   : > { %v12540_v0 = vadd.f32 1.0, %v5271_v50  ;;  %v5205_v2 = vor.u32 1.1754944e-38, %v5204_v8  ;;  %v5215_v40 = vadd.f32 0.0036580483, %v5214_v38  ;;  %8430 = vrsqrt.f32 %v12535_v28  ;;  %v4287_v50 = vpop.xlane.xlu0 %4286 }
 0x8e5   : > { %v12543_v12 = vpop.eup %8428  ;;  %6317 = vmatmul.bf16.gmra.mxu1 %v6189_v37  ;;  %vm5203_vm8 = vcmp.eq.f32.partialorder %v5202_v20, 8.507059e+37  ;;  %v5182_v11 = vmul.f32 %v5181_v26, %v12329_v6  ;;  %v5140_v29 = vmul.f32 %v5139_v52, %v12435_v42  ;;  %v5260_v48 = vmul.f32 %v5259_v55, %v12472_v18 }
 0x8e6   : > { %v5154_v31 = vmul.f32 %v12543_v12, %v12512_v17  ;;  %v5206_v57 = vsel %vm5203_vm8, %v5205_v2, %v5201_v5  ;;  %8432 = vrcp.f32 %v12540_v0  ;;  %v5226_v41 = vadd.f32 0.014752088, %v5225_v3 }
 0x8e7   : > { %v5162_v22 = vand.u32 2147483647, %v12512_v17  ;;  %v5216_v58 = vmul.f32 %v5215_v40, %v12506_v63  ;;  %v4303_v1 = vmul.f32 %v4285_v13, %v14275_v21  ;;  %v12555_v59 = vmul.f32 %v5206_v57, %v5182_v11 }
 0x8e8   : > { %v5155_v23 = vsub.f32 1.0, %v5154_v31  ;;  %v5164_v4 = vand.u32 2147483648, %v12512_v17  ;;  %v5227_v6 = vmul.f32 %v5226_v41, %v12506_v63  ;;  %v5141_v18 = vadd.f32 1.1283791, %v5140_v29 }
 0x8e9   : > { %v12562_v34 = vadd.f32 1e-05, %v4303_v1  ;;  %v5261_v49 = vadd.f32 1.1283791, %v5260_v48  ;;  %vm5158_vm9 = vweird.f32 %v12512_v17  ;;  %vm12567_vm10 = vcmp.eq.f32.partialorder %v5162_v22, 8.507059e+37  ;;  %v4289_v48 = vpop.xlane.xlu1 %4288 }
 0x8ea   : > { %v12559_v47 = vpop.eup %8430  ;;  %v5156_v42 = vmul.f32 %v12543_v12, %v5155_v23  ;;  %v5228_v51 = vadd.f32 0.112945676, %v5227_v6  ;;  %v5217_v20 = vadd.f32 0.05243302, %v5216_v58  ;;  %v7825_v15 = vclamps-f32 %v12555_v59, 1.0 }
 0x8eb   : > { %v4443_v10 = vmul.f32 %v12559_v47, %v12535_v28  ;;  %8434 = vrsqrt.f32 %v12562_v34  ;;  %vm5159_vm11 = vweird.f32 %v12543_v12  ;;  %v5165_v26 = vor.u32 1.1754944e-38, %v5164_v4 }
 0x8ec   : > { %v8433_v8 = vpop.eup %8432  ;;  %v5157_v52 = vadd.f32 %v12543_v12, %v5156_v42  ;;  %v5229_v37 = vmul.f32 %v5228_v51, %v12506_v63  ;;  %v4304_v55 = vmul.f32 %v4287_v50, %v14275_v21  ;;  %v5262_v3 = vmul.f32 %v5261_v49, %v12447_v7  ;;  %vm12589_vm13 = vmor %vm5158_vm9, %vm5159_vm11 }
 0x8ed   : > { %v5274_v33 = vmul.f32 %v8433_v8, %v12540_v0  ;;  %v4444_v5 = vmul.f32 %v12559_v47, %v4443_v10  ;;  %v5284_v40 = vand.u32 2147483648, %v12540_v0  ;;  %vm4448_vm12 = vweird.f32 %v12535_v28 }
 0x8ee   : > { %v5218_v31 = vmul.f32 %v5217_v20, %v12506_v63  ;;  %v5230_v13 = vadd.f32 0.4994258, %v5229_v37  ;;  %v12583_v57 = vadd.f32 1e-05, %v4304_v55  ;;  %vm5278_vm14 = vweird.f32 %v12540_v0 }
 0x8ef   : > { %v5275_v2 = vsub.f32 1.0, %v5274_v33  ;;  %v4445_v11 = vmul.f32 0.5, %v4444_v5  ;;  %vm5279_vm15 = vweird.f32 %v8433_v8  ;;  %v5282_v23 = vand.u32 2147483647, %v12540_v0 }
 0x8f0   : > { %v5161_v22 = vsel %vm12589_vm13, %v12543_v12, %v5157_v52  ;;  %v5231_v58 = vmul.f32 %v5230_v13, %v12506_v63  ;;  %8436 = vrsqrt.f32 %v12583_v57  ;;  %v5285_v59 = vor.u32 1.1754944e-38, %v5284_v40  ;;  %vm5280_vm1 = vmor %vm5278_vm14, %vm5279_vm15 }
 0x8f1   : > { %v5276_v7 = vmul.f32 %v8433_v8, %v5275_v2  ;;  %v8435_v41 = vpop.eup %8434  ;;  %v4446_v1 = vsub.f32 1.5, %v4445_v11  ;;  %vm4449_vm0 = vweird.f32 %v12559_v47  ;;  %v5219_v6 = vadd.f32 0.18741608, %v5218_v31 }
 0x8f2   : > { %v4453_v4 = vmul.f32 %v8435_v41, %v12562_v34  ;;  %v12602_v0 = vadd.f32 1.0, %v5231_v58  ;;  %v4305_v49 = vmul.f32 %v4289_v48, %v14275_v21  ;;  %v4721_v12 = vpop.f32.mrf.mxu0  ;;  %v5166_v51 = vsel %vm12567_vm10, %v5165_v26, %v5161_v22  ;;  %vm4450_vm3 = vmor %vm4448_vm12, %vm4449_vm0  ;;  %v12639_v58 = vld [vmem:[#allocation13 + $0x1] ss:$0 sm:$0xff] }
 0x8f3   : > { %v5277_v17 = vadd.f32 %v8433_v8, %v5276_v7  ;;  %v4447_v42 = vmul.f32 %v12559_v47, %v4446_v1  ;;  %vm5283_vm2 = vcmp.eq.f32.partialorder %v5282_v23, 8.507059e+37  ;;  %v4755_v50 = vmul.f32 0.5, %v12306_v56 }
 0x8f4   : > { %v4454_v20 = vmul.f32 %v8435_v41, %v4453_v4  ;;  %v5142_v33 = vmul.f32 %v5141_v18, %v12412_v25  ;;  %8438 = vrcp.f32 %v12602_v0  ;;  %v6099_v56 = vadd.f32 1.0, %v7825_v15 }
 0x8f5   : > { %v5281_v10 = vsel %vm5280_vm1, %v8433_v8, %v5277_v17  ;;  %v4451_v5 = vsel %vm4450_vm3, %v12559_v47, %v4447_v42  ;;  %v12617_v8 = vadd.f32 %v4721_v12, %v11938_v9  ;;  %v5220_v25 = vmul.f32 %v5219_v6, %v12506_v63 }
 0x8f6   : > { %v5286_v52 = vsel %vm5283_vm2, %v5285_v59, %v5281_v10  ;;  %v4455_v38 = vmul.f32 0.5, %v4454_v20  ;;  %v12619_v26 = vpop.eup %8436  ;;  %v12621_v55 = vmul.f32 %v5166_v51, %v5142_v33  ;;  %v12624_v18 = vadd.f32 1e-05, %v4305_v49 }
 0x8f7   : > { %v5287_v37 = vmul.f32 %v5286_v52, %v5262_v3  ;;  %vm4459_vm4 = vweird.f32 %v8435_v41  ;;  %v4463_v28 = vmul.f32 %v12619_v26, %v12583_v57  ;;  %v4757_v47 = vmul.f32 0.5, %v12424_v43 }
 0x8f8   : > { %v4456_v40 = vsub.f32 1.5, %v4455_v38  ;;  %v4494_v3 = vmul.f32 %v4451_v5, %v11923_v60  ;;  %vm4458_vm5 = vweird.f32 %v12562_v34  ;;  %8440 = vrsqrt.f32 %v12624_v18 }
 0x8f9   : > { %v7827_v2 = vclamps-f32 %v5287_v37, 1.0  ;;  %v4464_v63 = vmul.f32 %v12619_v26, %v4463_v28  ;;  %v12634_v13 = vmul.f32 0.70710677, %v12617_v8  ;;  %v6131_v29 = vmul.f32 %v6099_v56, %v4755_v50  ;;  %vm4460_vm6 = vmor %vm4458_vm5, %vm4459_vm4  ;;  %v8550_v50 = vld [vmem:[#allocation14 + $0x1] ss:$0 sm:$0xff] }
 0x8fa   : > { %v4457_v31 = vmul.f32 %v8435_v41, %v4456_v40  ;;  %v8439_v11 = vpop.eup %8438  ;;  %v5221_v7 = vadd.f32 1.1283791, %v5220_v25  ;;  %v7824_v23 = vclamps-f32 %v12621_v55, 1.0  ;;  %v4513_v1 = vmul.f32 %v12639_v58, %v4494_v3 }
 0x8fb   : > { %v6101_v15 = vadd.f32 1.0, %v7827_v2  ;;  %v5234_v60 = vmul.f32 %v8439_v11, %v12602_v0  ;;  %v4465_v22 = vmul.f32 0.5, %v4464_v63  ;;  %v5330_v17 = vmul.f32 %v12634_v13, %v12634_v13 }
 0x8fc   : > { %v4461_v48 = vsel %vm4460_vm6, %v8435_v41, %v4457_v31  ;;  %v5244_v4 = vand.u32 2147483648, %v12602_v0  ;;  %vm4468_vm7 = vweird.f32 %v12583_v57  ;;  %vm4469_vm8 = vweird.f32 %v12619_v26 }
 0x8fd   : > { %v6133_v43 = vmul.f32 %v6101_v15, %v4757_v47  ;;  %v4495_v34 = vmul.f32 %v4461_v48, %v11930_v14  ;;  %v5235_v59 = vsub.f32 1.0, %v5234_v60  ;;  %v4466_v49 = vsub.f32 1.5, %v4465_v22  ;;  %vm12664_vm11 = vmor %vm4468_vm7, %vm4469_vm8 }
 0x8fe   : > { %v8441_v42 = vpop.eup %8440  ;;  %v12648_v41 = vmin.f32 %v5330_v17, 16.0  ;;  %vm5239_vm9 = vweird.f32 %v8439_v11  ;;  %v5242_v51 = vand.u32 2147483647, %v12602_v0  ;;  %v12653_v33 = vadd.f32 %v8550_v50, %v4513_v1 }
 0x8ff   : > { %v6192_v6 = vpack.c.bf16 %v6133_v43, %v6131_v29  ;;  %v4514_v14 = vmul.f32 %v12639_v58, %v4495_v34  ;;  %v5236_v12 = vmul.f32 %v8439_v11, %v5235_v59  ;;  %v4473_v10 = vmul.f32 %v8441_v42, %v12624_v18 }
 0x900   : > { %v4467_v20 = vmul.f32 %v12619_v26, %v4466_v49  ;;  %v5343_v37 = vmul.f32 3.8918573e-05, %v12648_v41  ;;  %v5222_v5 = vmul.f32 %v5221_v7, %v12493_v35  ;;  %vm5238_vm10 = vweird.f32 %v12602_v0 }
 0x901   : > { %6371 = vmatmul.bf16.gmra.mxu2 %v6192_v6  ;;  %v12655_v52 = vadd.f32 %v8550_v50, %v4514_v14  ;;  %v5237_v38 = vadd.f32 %v8439_v11, %v5236_v12  ;;  %v4474_v55 = vmul.f32 %v8441_v42, %v4473_v10  ;;  %vm5240_vm12 = vmor %vm5238_vm10, %vm5239_vm9  ;;  %v5245_v25 = vor.u32 1.1754944e-38, %v5244_v4  ;;  %v4672_v4 = vpop.f32.mrf.mxu3 }
 0x902   : > { %v5332_v40 = vmul.f32 2.1237322e-06, %v12648_v41  ;;  %v5344_v35 = vadd.f32 0.001143296, %v5343_v37  ;;  %vm5243_vm13 = vcmp.eq.f32.partialorder %v5242_v51, 8.507059e+37  ;;  %v4471_v0 = vsel %vm12664_vm11, %v12619_v26, %v4467_v20 }
 0x903   : > { %v4559_v2 = vpack.c.bf16 %v12655_v52, %v12653_v33  ;;  %v5241_v28 = vsel %vm5240_vm12, %v8439_v11, %v5237_v38  ;;  %v4475_v57 = vmul.f32 0.5, %v4474_v55  ;;  %vm4479_vm14 = vweird.f32 %v8441_v42 }
 0x904   : > { %v5246_v47 = vsel %vm5243_vm13, %v5245_v25, %v5241_v28  ;;  %v5345_v3 = vmul.f32 %v5344_v35, %v12648_v41  ;;  %v4496_v63 = vmul.f32 %v4471_v0, %v11956_v61  ;;  %v5333_v29 = vadd.f32 0.00028619796, %v5332_v40 }
 0x905   : > { %4686 = vmatmul.bf16.gmra.mxu3 %v4559_v2  ;;  %4735 = vmatmul.bf16.gmra.mxu0 %v4559_v2  ;;  %v5247_v15 = vmul.f32 %v5246_v47, %v5222_v5  ;;  %v4476_v31 = vsub.f32 1.5, %v4475_v57  ;;  %v6098_v43 = vadd.f32 1.0, %v7824_v23  ;;  %vm4478_vm15 = vweird.f32 %v12624_v18 }
 0x906   : > { %v5346_v7 = vadd.f32 0.014752088, %v5345_v3  ;;  %vm4480_vm0 = vmor %vm4478_vm15, %vm4479_vm14  ;;  %v4754_v48 = vmul.f32 0.5, %v12397_v39  ;;  %v4756_v34 = vmul.f32 0.5, %v12483_v24  ;;  %v5334_v61 = vmul.f32 %v5333_v29, %v12648_v41  ;;  %v4723_v39 = vpop.f32.mrf.mxu0 }
 0x907   : > { %v7826_v11 = vclamps-f32 %v5247_v15, 1.0  ;;  %v4477_v60 = vmul.f32 %v8441_v42, %v4476_v31  ;;  %v4515_v23 = vmul.f32 %v12639_v58, %v4496_v63  ;;  %v12684_v18 = vadd.f32 %v4672_v4, %v11950_v19 }
 0x908   : > { %v5347_v26 = vmul.f32 %v5346_v7, %v12648_v41  ;;  %v6130_v6 = vmul.f32 %v6098_v43, %v4754_v48  ;;  %v5335_v51 = vadd.f32 0.0036580483, %v5334_v61 }
 0x909   : > { %v6100_v22 = vadd.f32 1.0, %v7826_v11  ;;  %v4481_v1 = vsel %vm4480_vm0, %v8441_v42, %v4477_v60  ;;  %v12689_v42 = vmul.f32 0.70710677, %v12684_v18  ;;  %v12694_v20 = vadd.f32 %v8550_v50, %v4515_v23  ;;  %v4674_v40 = vpop.f32.mrf.mxu3 }
 0x90a   : > { %v4497_v17 = vmul.f32 %v4481_v1, %v11989_v30  ;;  %v5348_v59 = vadd.f32 0.112945676, %v5347_v26  ;;  %v12692_v30 = vadd.f32 %v4723_v39, %v11938_v9  ;;  %v12718_v57 = vadd.f32 %v4674_v40, %v11950_v19 }
 0x90b   : > { %v6132_v49 = vmul.f32 %v6100_v22, %v4756_v34  ;;  %14329 = vst [vmem:[#allocation31_spill] sm:$0xff] %v12694_v20  ;;  %v5290_v5 = vmul.f32 %v12689_v42, %v12689_v42 }
 0x90c   : > { %v5349_v14 = vmul.f32 %v5348_v59, %v12648_v41  ;;  %v4516_v24 = vmul.f32 %v12639_v58, %v4497_v17  ;;  %v12701_v38 = vmul.f32 0.70710677, %v12692_v30  ;;  %v12728_v11 = vmul.f32 0.70710677, %v12718_v57 }
 0x90d   : > { %v6191_v12 = vpack.c.bf16 %v6132_v49, %v6130_v6  ;;  %v12706_v55 = vmin.f32 %v5290_v5, 16.0 }
 0x90e   : > { %v5350_v10 = vadd.f32 0.4994258, %v5349_v14  ;;  %v12696_v37 = vadd.f32 %v8550_v50, %v4516_v24  ;;  %v5410_v25 = vmul.f32 %v12701_v38, %v12701_v38  ;;  %v5336_v50 = vmul.f32 %v5335_v51, %v12648_v41  ;;  %v4726_v47 = vpop.f32.mrf.mxu0 }
 0x90f   : > { %6322 = vmatmul.bf16.gmra.mxu1 %v6191_v12  ;;  %v5292_v35 = vmul.f32 2.1237322e-06, %v12706_v55  ;;  %v5303_v28 = vmul.f32 3.8918573e-05, %v12706_v55  ;;  %v12724_v7 = vadd.f32 %v4726_v47, %v11938_v9  ;;  %v5370_v22 = vmul.f32 %v12728_v11, %v12728_v11 }
 0x910   : > { %14330 = vst [vmem:[#allocation32_spill] sm:$0xff] %v12696_v37  ;;  %v5351_v58 = vmul.f32 %v5350_v10, %v12648_v41  ;;  %v4560_v56 = vpack.c.bf16 %v12696_v37, %v12694_v20  ;;  %v12715_v0 = vmin.f32 %v5410_v25, 16.0  ;;  %v5337_v31 = vadd.f32 0.05243302, %v5336_v50 }
 0x911   : > { %v5293_v3 = vadd.f32 0.00028619796, %v5292_v35  ;;  %v5304_v15 = vadd.f32 0.001143296, %v5303_v28  ;;  %v12734_v1 = vmul.f32 0.70710677, %v12724_v7 }
 0x912   : > { %v12711_v2 = vadd.f32 1.0, %v5351_v58  ;;  %v5412_v63 = vmul.f32 2.1237322e-06, %v12715_v0  ;;  %v5423_v29 = vmul.f32 3.8918573e-05, %v12715_v0  ;;  %v5338_v61 = vmul.f32 %v5337_v31, %v12648_v41 }
 0x913   : > { %v5305_v43 = vmul.f32 %v5304_v15, %v12706_v55  ;;  %v5294_v60 = vmul.f32 %v5293_v3, %v12706_v55  ;;  %v12741_v39 = vmin.f32 %v5370_v22, 16.0  ;;  %v5490_v24 = vmul.f32 %v12734_v1, %v12734_v1 }
 0x914   : > { %8442 = vrcp.f32 %v12711_v2  ;;  %v5413_v26 = vadd.f32 0.00028619796, %v5412_v63  ;;  %v5424_v48 = vadd.f32 0.001143296, %v5423_v29  ;;  %v5339_v5 = vadd.f32 0.18741608, %v5338_v61 }
 0x915   : > { %4691 = vmatmul.bf16.gmra.mxu3 %v4560_v56  ;;  %4740 = vmatmul.bf16.gmra.mxu0 %v4560_v56  ;;  %v5306_v34 = vadd.f32 0.014752088, %v5305_v43  ;;  %v5295_v49 = vadd.f32 0.0036580483, %v5294_v60  ;;  %v5372_v56 = vmul.f32 2.1237322e-06, %v12741_v39  ;;  %vm5358_vm2 = vweird.f32 %v12711_v2 }
 0x916   : > { %v5414_v59 = vmul.f32 %v5413_v26, %v12715_v0  ;;  %v5425_v4 = vmul.f32 %v5424_v48, %v12715_v0  ;;  %v5383_v25 = vmul.f32 3.8918573e-05, %v12741_v39  ;;  %v12749_v40 = vmin.f32 %v5490_v24, 16.0  ;;  %v4677_v24 = vpop.f32.mrf.mxu3 }
 0x917   : > { %v5307_v6 = vmul.f32 %v5306_v34, %v12706_v55  ;;  %v5296_v28 = vmul.f32 %v5295_v49, %v12706_v55  ;;  %v5373_v3 = vadd.f32 0.00028619796, %v5372_v56  ;;  %v5340_v29 = vmul.f32 %v5339_v5, %v12648_v41 }
 0x918   : > { %v5426_v14 = vadd.f32 0.014752088, %v5425_v4  ;;  %v5415_v10 = vadd.f32 0.0036580483, %v5414_v59  ;;  %v5384_v63 = vadd.f32 0.001143296, %v5383_v25 }
 0x919   : > { %v5308_v51 = vadd.f32 0.112945676, %v5307_v6  ;;  %v5374_v26 = vmul.f32 %v5373_v3, %v12741_v39  ;;  %v5492_v34 = vmul.f32 2.1237322e-06, %v12749_v40  ;;  %v5297_v61 = vadd.f32 0.05243302, %v5296_v28  ;;  %v4728_v3 = vpop.f32.mrf.mxu0 }
 0x91a   : > { %v8443_v17 = vpop.eup %8442  ;;  %v5427_v58 = vmul.f32 %v5426_v14, %v12715_v0  ;;  %v5416_v31 = vmul.f32 %v5415_v10, %v12715_v0  ;;  %v5385_v48 = vmul.f32 %v5384_v63, %v12741_v39  ;;  %v5364_v4 = vand.u32 2147483648, %v12711_v2 }
 0x91b   : > { %v5354_v23 = vmul.f32 %v8443_v17, %v12711_v2  ;;  %v5309_v50 = vmul.f32 %v5308_v51, %v12706_v55  ;;  %vm5359_vm1 = vweird.f32 %v8443_v17  ;;  %v5362_v49 = vand.u32 2147483647, %v12711_v2 }
 0x91c   : > { %v5428_v47 = vadd.f32 0.112945676, %v5427_v58  ;;  %v5417_v6 = vadd.f32 0.05243302, %v5416_v31  ;;  %v5386_v41 = vadd.f32 0.014752088, %v5385_v48  ;;  %vm5360_vm3 = vmor %vm5358_vm2, %vm5359_vm1  ;;  %v5298_v58 = vmul.f32 %v5297_v61, %v12706_v55 }
 0x91d   : > { %v5355_v12 = vsub.f32 1.0, %v5354_v23  ;;  %v5310_v15 = vadd.f32 0.4994258, %v5309_v50  ;;  %v5493_v51 = vadd.f32 0.00028619796, %v5492_v34  ;;  %v5365_v25 = vor.u32 1.1754944e-38, %v5364_v4 }
 0x91e   : > { %v5429_v43 = vmul.f32 %v5428_v47, %v12715_v0  ;;  %v5341_v10 = vadd.f32 1.1283791, %v5340_v29  ;;  %v5418_v50 = vmul.f32 %v5417_v6, %v12715_v0  ;;  %v12772_v2 = vadd.f32 %v4677_v24, %v11950_v19 }
 0x91f   : > { %v5356_v35 = vmul.f32 %v8443_v17, %v5355_v12  ;;  %v5311_v60 = vmul.f32 %v5310_v15, %v12706_v55  ;;  %v5375_v12 = vadd.f32 0.0036580483, %v5374_v26  ;;  %vm5363_vm4 = vcmp.eq.f32.partialorder %v5362_v49, 8.507059e+37 }
 0x920   : > { %v5430_v59 = vadd.f32 0.4994258, %v5429_v43  ;;  %v5342_v15 = vmul.f32 %v5341_v10, %v12634_v13  ;;  %v5299_v31 = vadd.f32 0.18741608, %v5298_v58  ;;  %v5503_v29 = vmul.f32 3.8918573e-05, %v12749_v40 }
 0x921   : > { %v5357_v22 = vadd.f32 %v8443_v17, %v5356_v35  ;;  %v12760_v23 = vadd.f32 1.0, %v5311_v60  ;;  %v5387_v35 = vmul.f32 %v5386_v41, %v12741_v39  ;;  %v5376_v47 = vmul.f32 %v5375_v12, %v12741_v39 }
 0x922   : > { %v5431_v14 = vmul.f32 %v5430_v59, %v12715_v0  ;;  %v4759_v60 = vmul.f32 0.5, %v12617_v8  ;;  %v12783_v26 = vmul.f32 0.5, %v12684_v18  ;;  %v5419_v48 = vadd.f32 0.18741608, %v5418_v50 }
 0x923   : > { %8444 = vrcp.f32 %v12760_v23  ;;  %v5361_v5 = vsel %vm5360_vm3, %v8443_v17, %v5357_v22  ;;  %v5494_v17 = vmul.f32 %v5493_v51, %v12749_v40  ;;  %v5388_v63 = vadd.f32 0.112945676, %v5387_v35 }
 0x924   : > { %v12767_v56 = vadd.f32 1.0, %v5431_v14  ;;  %v5366_v28 = vsel %vm5363_vm4, %v5365_v25, %v5361_v5  ;;  %v12786_v34 = vmul.f32 0.70710677, %v12772_v2  ;;  %v12792_v59 = vadd.f32 %v4728_v3, %v11938_v9 }
 0x925   : > { %v5367_v22 = vmul.f32 %v5366_v28, %v5342_v15  ;;  %v5389_v13 = vmul.f32 %v5388_v63, %v12741_v39  ;;  %v5377_v4 = vadd.f32 0.05243302, %v5376_v47  ;;  %v5495_v6 = vadd.f32 0.0036580483, %v5494_v17 }
 0x926   : > { %8446 = vrcp.f32 %v12767_v56  ;;  %v5504_v41 = vadd.f32 0.001143296, %v5503_v29  ;;  %v5450_v8 = vmul.f32 %v12786_v34, %v12786_v34  ;;  %v5300_v49 = vmul.f32 %v5299_v31, %v12706_v55 }
 0x927   : > { %v12800_v24 = vmul.f32 0.5, %v12692_v30  ;;  %v5390_v12 = vadd.f32 0.4994258, %v5389_v13  ;;  %v5420_v51 = vmul.f32 %v5419_v48, %v12715_v0  ;;  %v12806_v5 = vmul.f32 0.5, %v12718_v57 }
 0x928   : > { %v5505_v58 = vmul.f32 %v5504_v41, %v12749_v40  ;;  %v7829_v25 = vclamps-f32 %v5367_v22, 1.0  ;;  %v12811_v35 = vmin.f32 %v5450_v8, 16.0  ;;  %v5378_v30 = vmul.f32 %v5377_v4, %v12741_v39 }
 0x929   : > { %v12779_v43 = vpop.eup %8444  ;;  %v5391_v55 = vmul.f32 %v5390_v12, %v12741_v39  ;;  %v5496_v28 = vmul.f32 %v5495_v6, %v12749_v40  ;;  %v12816_v47 = vmul.f32 0.70710677, %v12792_v59  ;;  %v5301_v17 = vadd.f32 1.1283791, %v5300_v49 }
 0x92a   : > { %v5314_v61 = vmul.f32 %v12779_v43, %v12760_v23  ;;  %v5506_v0 = vadd.f32 0.014752088, %v5505_v58  ;;  %v5322_v57 = vand.u32 2147483647, %v12760_v23  ;;  %v5324_v3 = vand.u32 2147483648, %v12760_v23 }
 0x92b   : > { %v12820_v15 = vadd.f32 1.0, %v5391_v55  ;;  %v5421_v31 = vadd.f32 1.1283791, %v5420_v51  ;;  %v5463_v48 = vmul.f32 3.8918573e-05, %v12811_v35  ;;  %v6103_v22 = vadd.f32 1.0, %v7829_v25 }
 0x92c   : > { %v12796_v18 = vpop.eup %8446  ;;  %v5315_v14 = vsub.f32 1.0, %v5314_v61  ;;  %v5507_v29 = vmul.f32 %v5506_v0, %v12749_v40  ;;  %vm5319_vm5 = vweird.f32 %v12779_v43  ;;  %v5379_v13 = vadd.f32 0.18741608, %v5378_v30 }
 0x92d   : > { %v5434_v10 = vmul.f32 %v12796_v18, %v12767_v56  ;;  %8448 = vrcp.f32 %v12820_v15  ;;  %v12828_v4 = vmul.f32 0.5, %v12724_v7  ;;  %v5497_v6 = vadd.f32 0.05243302, %v5496_v28 }
 0x92e   : > { %v5316_v50 = vmul.f32 %v12779_v43, %v5315_v14  ;;  %v5570_v41 = vmul.f32 %v12816_v47, %v12816_v47  ;;  %v5302_v8 = vmul.f32 %v5301_v17, %v12689_v42  ;;  %vm5318_vm6 = vweird.f32 %v12760_v23 }
 0x92f   : > { %v5435_v63 = vsub.f32 1.0, %v5434_v10  ;;  %v5508_v49 = vadd.f32 0.112945676, %v5507_v29  ;;  %v5452_v14 = vmul.f32 2.1237322e-06, %v12811_v35  ;;  %vm12835_vm7 = vmor %vm5318_vm6, %vm5319_vm5  ;;  %vm12839_vm8 = vcmp.eq.f32.partialorder %v5322_v57, 8.507059e+37 }
 0x930   : > { %v5317_v61 = vadd.f32 %v12779_v43, %v5316_v50  ;;  %v5325_v7 = vor.u32 1.1754944e-38, %v5324_v3  ;;  %v5464_v58 = vadd.f32 0.001143296, %v5463_v48  ;;  %v12844_v25 = vmul.f32 %v6103_v22, %v4759_v60 }
 0x931   : > { %v5436_v10 = vmul.f32 %v12796_v18, %v5435_v63  ;;  %v5422_v23 = vmul.f32 %v5421_v31, %v12701_v38  ;;  %v5509_v50 = vmul.f32 %v5508_v49, %v12749_v40  ;;  %v5380_v55 = vmul.f32 %v5379_v13, %v12741_v39  ;;  %v4679_v31 = vpop.f32.mrf.mxu3 }
 0x932   : > { %v5321_v42 = vsel %vm12835_vm7, %v12779_v43, %v5317_v61  ;;  %v5498_v30 = vmul.f32 %v5497_v6, %v12749_v40  ;;  %v5465_v28 = vmul.f32 %v5464_v58, %v12811_v35  ;;  %v12854_v0 = vmin.f32 %v5570_v41, 16.0 }
 0x933   : > { %v12856_v17 = vpop.eup %8448  ;;  %vm5438_vm9 = vweird.f32 %v12767_v56  ;;  %v5442_v60 = vand.u32 2147483647, %v12767_v56  ;;  %v5510_v57 = vadd.f32 0.4994258, %v5509_v50  ;;  %v5453_v43 = vadd.f32 0.00028619796, %v5452_v14 }
 0x934   : > { %v5326_v38 = vsel %vm12839_vm8, %v5325_v7, %v5321_v42  ;;  %v5437_v3 = vadd.f32 %v12796_v18, %v5436_v10  ;;  %vm5439_vm10 = vweird.f32 %v12796_v18  ;;  %v5466_v39 = vadd.f32 0.014752088, %v5465_v28 }
 0x935   : > { %v5444_v63 = vand.u32 2147483648, %v12767_v56  ;;  %v5394_v29 = vmul.f32 %v12856_v17, %v12820_v15  ;;  %v5511_v48 = vmul.f32 %v5510_v57, %v12749_v40  ;;  %v5572_v22 = vmul.f32 2.1237322e-06, %v12854_v0  ;;  %vm12873_vm11 = vmor %vm5438_vm9, %vm5439_vm10 }
 0x936   : > { %v5381_v61 = vadd.f32 1.1283791, %v5380_v55  ;;  %v5499_v13 = vadd.f32 0.18741608, %v5498_v30  ;;  %v5467_v6 = vmul.f32 %v5466_v39, %v12811_v35  ;;  %v5583_v41 = vmul.f32 3.8918573e-05, %v12854_v0 }
 0x937   : > { %v5327_v49 = vmul.f32 %v5326_v38, %v5302_v8  ;;  %v12877_v12 = vadd.f32 1.0, %v5511_v48  ;;  %v5454_v51 = vmul.f32 %v5453_v43, %v12811_v35  ;;  %v4680_v7 = vadd.f32 %v4679_v31, %v11950_v19 }
 0x938   : > { %v5441_v10 = vsel %vm12873_vm11, %v12796_v18, %v5437_v3  ;;  %v5468_v58 = vadd.f32 0.112945676, %v5467_v6  ;;  %v5573_v42 = vadd.f32 0.00028619796, %v5572_v22  ;;  %v5584_v50 = vadd.f32 0.001143296, %v5583_v41  ;;  %v4731_v18 = vpop.f32.mrf.mxu0 }
 0x939   : > { %vm5443_vm12 = vcmp.eq.f32.partialorder %v5442_v60, 8.507059e+37  ;;  %v5445_v8 = vor.u32 1.1754944e-38, %v5444_v63  ;;  %v5395_v56 = vsub.f32 1.0, %v5394_v29  ;;  %8450 = vrcp.f32 %v12877_v12 }
 0x93a   : > { %v12886_v55 = vmul.f32 %v5381_v61, %v12728_v11  ;;  %v12889_v30 = vmul.f32 0.5, %v12772_v2  ;;  %v5469_v28 = vmul.f32 %v5468_v58, %v12811_v35  ;;  %v12893_v57 = vmul.f32 0.5, %v12792_v59 }
 0x93b   : > { %v5446_v43 = vsel %vm5443_vm12, %v5445_v8, %v5441_v10  ;;  %v5455_v38 = vadd.f32 0.0036580483, %v5454_v51  ;;  %v5585_v60 = vmul.f32 %v5584_v50, %v12854_v0  ;;  %v12896_v3 = vmul.f32 0.70710677, %v4680_v7 }
 0x93c   : > { %v7828_v39 = vclamps-f32 %v5327_v49, 1.0  ;;  %v5500_v31 = vmul.f32 %v5499_v13, %v12749_v40  ;;  %v5470_v11 = vadd.f32 0.4994258, %v5469_v28  ;;  %v5574_v63 = vmul.f32 %v5573_v42, %v12854_v0 }
 0x93d   : > { %v5396_v2 = vmul.f32 %v12856_v17, %v5395_v56  ;;  %v5586_v29 = vadd.f32 0.014752088, %v5585_v60  ;;  %v5530_v59 = vmul.f32 %v12896_v3, %v12896_v3  ;;  %v12904_v48 = vadd.f32 %v4731_v18, %v11938_v9 }
 0x93e   : > { %v5447_v22 = vmul.f32 %v5446_v43, %v5422_v23  ;;  %v5402_v61 = vand.u32 2147483647, %v12820_v15  ;;  %v5404_v6 = vand.u32 2147483648, %v12820_v15  ;;  %v5471_v41 = vmul.f32 %v5470_v11, %v12811_v35 }
 0x93f   : > { %v12909_v40 = vpop.eup %8450  ;;  %v5456_v13 = vmul.f32 %v5455_v38, %v12811_v35  ;;  %v5587_v49 = vmul.f32 %v5586_v29, %v12854_v0  ;;  %v12913_v14 = vmin.f32 %v5530_v59, 16.0  ;;  %v12916_v51 = vmul.f32 0.70710677, %v12904_v48 }
 0x940   : > { %v6102_v10 = vadd.f32 1.0, %v7828_v39  ;;  %vm5399_vm13 = vweird.f32 %v12856_v17  ;;  %v5501_v23 = vadd.f32 1.1283791, %v5500_v31  ;;  %v5575_v58 = vadd.f32 0.0036580483, %v5574_v63 }
 0x941   : > { %v5397_v42 = vadd.f32 %v12856_v17, %v5396_v2  ;;  %v5514_v50 = vmul.f32 %v12909_v40, %v12877_v12  ;;  %v12922_v8 = vadd.f32 1.0, %v5471_v41  ;;  %v5588_v56 = vadd.f32 0.112945676, %v5587_v49 }
 0x942   : > { %v7831_v28 = vclamps-f32 %v5447_v22, 1.0  ;;  %vm5398_vm14 = vweird.f32 %v12820_v15  ;;  %v5532_v18 = vmul.f32 2.1237322e-06, %v12913_v14  ;;  %v5650_v43 = vmul.f32 %v12916_v51, %v12916_v51 }
 0x943   : > { %vm12928_vm15 = vcmp.eq.f32.partialorder %v5402_v61, 8.507059e+37  ;;  %v5405_v60 = vor.u32 1.1754944e-38, %v5404_v6  ;;  %v5457_v39 = vadd.f32 0.05243302, %v5456_v13  ;;  %8452 = vrcp.f32 %v12922_v8  ;;  %vm12938_vm0 = vmor %vm5398_vm14, %vm5399_vm13 }
 0x944   : > { %v12934_v31 = vmul.f32 %v6102_v10, %v12783_v26  ;;  %v12943_v11 = vmul.f32 %v5501_v23, %v12734_v1  ;;  %v5576_v63 = vmul.f32 %v5575_v58, %v12854_v0  ;;  %v5589_v2 = vmul.f32 %v5588_v56, %v12854_v0 }
 0x945   : > { %v5401_v29 = vsel %vm12938_vm0, %v12856_v17, %v5397_v42  ;;  %v5515_v59 = vsub.f32 1.0, %v5514_v50  ;;  %v5533_v26 = vadd.f32 0.00028619796, %v5532_v18  ;;  %v5543_v22 = vmul.f32 3.8918573e-05, %v12913_v14 }
 0x946   : > { %v6105_v61 = vadd.f32 1.0, %v7831_v28  ;;  %v5590_v6 = vadd.f32 0.4994258, %v5589_v2  ;;  %v12951_v41 = vmul.f32 0.5, %v4680_v7  ;;  %v12953_v13 = vmin.f32 %v5650_v43, 16.0 }
 0x947   : > { %v5524_v1 = vand.u32 2147483648, %v12877_v12  ;;  %v5458_v49 = vmul.f32 %v5457_v39, %v12811_v35  ;;  %v5534_v10 = vmul.f32 %v5533_v26, %v12913_v14  ;;  %v5544_v23 = vadd.f32 0.001143296, %v5543_v22 }
 0x948   : > { %v5406_v17 = vsel %vm12928_vm15, %v5405_v60, %v5401_v29  ;;  %v5522_v58 = vand.u32 2147483647, %v12877_v12  ;;  %v5577_v42 = vadd.f32 0.05243302, %v5576_v63  ;;  %v5591_v50 = vmul.f32 %v5590_v6, %v12854_v0 }
 0x949   : > { %v12962_v56 = vpop.eup %8452  ;;  %v5516_v7 = vmul.f32 %v12909_v40, %v5515_v59  ;;  %v5535_v28 = vadd.f32 0.0036580483, %v5534_v10  ;;  %v5545_v18 = vmul.f32 %v5544_v23, %v12913_v14  ;;  %v5663_v43 = vmul.f32 3.8918573e-05, %v12953_v13  ;;  %v4682_v59 = vpop.f32.mrf.mxu3 }
 0x94a   : > { %v12968_v39 = vmul.f32 %v6105_v61, %v12800_v24  ;;  %vm5518_vm1 = vweird.f32 %v12877_v12  ;;  %v5474_v38 = vmul.f32 %v12962_v56, %v12922_v8  ;;  %v5652_v60 = vmul.f32 2.1237322e-06, %v12953_v13  ;;  %v4733_v10 = vpop.f32.mrf.mxu0 }
 0x94b   : > { %v5525_v15 = vor.u32 1.1754944e-38, %v5524_v1  ;;  %v5459_v63 = vadd.f32 0.18741608, %v5458_v49  ;;  %v12974_v2 = vadd.f32 1.0, %v5591_v50  ;;  %v5546_v29 = vadd.f32 0.014752088, %v5545_v18 }
 0x94c   : > { %v12977_v26 = vmul.f32 %v5406_v17, %v12886_v55  ;;  %vm12979_vm2 = vcmp.eq.f32.partialorder %v5522_v58, 8.507059e+37  ;;  %v5475_v24 = vsub.f32 1.0, %v5474_v38  ;;  %v5578_v61 = vmul.f32 %v5577_v42, %v12854_v0 }
 0x94d   : > { %v5664_v6 = vadd.f32 0.001143296, %v5663_v43  ;;  %v5517_v23 = vadd.f32 %v12909_v40, %v5516_v7  ;;  %vm5519_vm3 = vweird.f32 %v12909_v40  ;;  %8454 = vrcp.f32 %v12974_v2 }
 0x94e   : > { %v5536_v1 = vmul.f32 %v5535_v28, %v12913_v14  ;;  %v5476_v55 = vmul.f32 %v12962_v56, %v5475_v24  ;;  %v5547_v49 = vmul.f32 %v5546_v29, %v12913_v14  ;;  %v5653_v17 = vadd.f32 0.00028619796, %v5652_v60  ;;  %vm13002_vm4 = vmor %vm5518_vm1, %vm5519_vm3 }
 0x94f   : > { %v12991_v58 = vadd.f32 %v4682_v59, %v11950_v19  ;;  %v5460_v42 = vmul.f32 %v5459_v63, %v12811_v35  ;;  %v5482_v50 = vand.u32 2147483647, %v12922_v8  ;;  %v5665_v7 = vmul.f32 %v5664_v6, %v12953_v13 }
 0x950   : > { %v12997_v18 = vadd.f32 %v4733_v10, %v11938_v9  ;;  %v7830_v43 = vclamps-f32 %v12977_v26, 1.0  ;;  %v5484_v38 = vand.u32 2147483648, %v12922_v8  ;;  %v5579_v60 = vadd.f32 0.18741608, %v5578_v61 }
 0x951   : > { %v5548_v29 = vadd.f32 0.112945676, %v5547_v49  ;;  %v5521_v35 = vsel %vm13002_vm4, %v12909_v40, %v5517_v23  ;;  %vm5479_vm5 = vweird.f32 %v12962_v56  ;;  %v5537_v63 = vadd.f32 0.05243302, %v5536_v1 }
 0x952   : > { %v5666_v59 = vadd.f32 0.014752088, %v5665_v7  ;;  %v5477_v26 = vadd.f32 %v12962_v56, %v5476_v55  ;;  %v5654_v24 = vmul.f32 %v5653_v17, %v12953_v13  ;;  %v13015_v6 = vmul.f32 0.70710677, %v12991_v58 }
 0x953   : > { %v5549_v12 = vmul.f32 %v5548_v29, %v12913_v14  ;;  %v8455_v10 = vpop.eup %8454  ;;  %v5461_v61 = vadd.f32 1.1283791, %v5460_v42  ;;  %vm5478_vm6 = vweird.f32 %v12922_v8  ;;  %v13020_v40 = vmul.f32 0.70710677, %v12997_v18 }
 0x954   : > { %v5667_v49 = vmul.f32 %v5666_v59, %v12953_v13  ;;  %vm13022_vm7 = vcmp.eq.f32.partialorder %v5482_v50, 8.507059e+37  ;;  %v5485_v1 = vor.u32 1.1754944e-38, %v5484_v38  ;;  %v5580_v55 = vmul.f32 %v5579_v60, %v12854_v0  ;;  %vm13032_vm8 = vmor %vm5478_vm6, %vm5479_vm5 }
 0x955   : > { %v5594_v17 = vmul.f32 %v8455_v10, %v12974_v2  ;;  %v5526_v7 = vsel %vm12979_vm2, %v5525_v15, %v5521_v35  ;;  %v5550_v42 = vadd.f32 0.4994258, %v5549_v12  ;;  %v5610_v50 = vmul.f32 %v13015_v6, %v13015_v6 }
 0x956   : > { %v5668_v28 = vadd.f32 0.112945676, %v5667_v49  ;;  %v5481_v0 = vsel %vm13032_vm8, %v12962_v56, %v5477_v26  ;;  %v5538_v60 = vmul.f32 %v5537_v63, %v12913_v14  ;;  %v5655_v22 = vadd.f32 0.0036580483, %v5654_v24 }
 0x957   : > { %v5595_v38 = vsub.f32 1.0, %v5594_v17  ;;  %v5551_v15 = vmul.f32 %v5550_v42, %v12913_v14  ;;  %v13044_v35 = vmin.f32 %v5610_v50, 16.0  ;;  %v5730_v59 = vmul.f32 %v13020_v40, %v13020_v40 }
 0x958   : > { %v5669_v29 = vmul.f32 %v5668_v28, %v12953_v13  ;;  %v5527_v12 = vmul.f32 %v5526_v7, %v12943_v11  ;;  %vm5598_vm9 = vweird.f32 %v12974_v2  ;;  %v5602_v56 = vand.u32 2147483647, %v12974_v2 }
 0x959   : > { %v5596_v49 = vmul.f32 %v8455_v10, %v5595_v38  ;;  %vm5599_vm10 = vweird.f32 %v8455_v10  ;;  %v5604_v63 = vand.u32 2147483648, %v12974_v2  ;;  %v13052_v26 = vadd.f32 1.0, %v5551_v15  ;;  %v4684_v2 = vpop.f32.mrf.mxu3 }
 0x95a   : > { %v5670_v24 = vadd.f32 0.4994258, %v5669_v29  ;;  %v5486_v17 = vsel %vm13022_vm7, %v5485_v1, %v5481_v0  ;;  %v5539_v42 = vadd.f32 0.18741608, %v5538_v60  ;;  %v5623_v28 = vmul.f32 3.8918573e-05, %v13044_v35  ;;  %vm13066_vm11 = vmor %vm5598_vm9, %vm5599_vm10 }
 0x95b   : > { %v5597_v8 = vadd.f32 %v8455_v10, %v5596_v49  ;;  %8456 = vrcp.f32 %v13052_v26  ;;  %v5656_v11 = vmul.f32 %v5655_v22, %v12953_v13  ;;  %v5612_v7 = vmul.f32 2.1237322e-06, %v13044_v35 }
 0x95c   : > { %v13060_v50 = vmin.f32 %v5730_v59, 16.0  ;;  %v6104_v38 = vadd.f32 1.0, %v7830_v43  ;;  %v5462_v15 = vmul.f32 %v5461_v61, %v12786_v34  ;;  %v5581_v37 = vadd.f32 1.1283791, %v5580_v55 }
 0x95d   : > { %v5671_v1 = vmul.f32 %v5670_v24, %v12953_v13  ;;  %v7833_v0 = vclamps-f32 %v5527_v12, 1.0  ;;  %v5601_v60 = vsel %vm13066_vm11, %v8455_v10, %v5597_v8  ;;  %vm5603_vm12 = vcmp.eq.f32.partialorder %v5602_v56, 8.507059e+37 }
 0x95e   : > { %v5624_v22 = vadd.f32 0.001143296, %v5623_v28  ;;  %v13073_v29 = vmul.f32 %v5486_v17, %v5462_v15  ;;  %v5605_v43 = vor.u32 1.1754944e-38, %v5604_v63  ;;  %v5540_v34 = vmul.f32 %v5539_v42, %v12913_v14 }
 0x95f   : > { %v13076_v61 = vadd.f32 1.0, %v5671_v1  ;;  %v5657_v55 = vadd.f32 0.05243302, %v5656_v11  ;;  %v5613_v59 = vadd.f32 0.00028619796, %v5612_v7  ;;  %v6136_v12 = vmul.f32 %v6104_v38, %v12806_v5  ;;  %v6313_v7 = vpop.f32.mrf.mxu1  ;;  %v13093_v38 = vpop.f32.mrf.mxu2 }
 0x960   : > { %v5625_v49 = vmul.f32 %v5624_v22, %v13044_v35  ;;  %v5732_v24 = vmul.f32 2.1237322e-06, %v13060_v50  ;;  %v5606_v23 = vsel %vm5603_vm12, %v5605_v43, %v5601_v60  ;;  %v5743_v10 = vmul.f32 3.8918573e-05, %v13060_v50 }
 0x961   : > { %8458 = vrcp.f32 %v13076_v61  ;;  %v8457_v56 = vpop.eup %8456  ;;  %v13083_v63 = vadd.f32 1.0, %v7833_v0  ;;  %v5582_v14 = vmul.f32 %v5581_v37, %v12816_v47  ;;  %v13087_v17 = vadd.f32 %v4684_v2, %v11950_v19 }
 0x962   : > { %v6194_v8 = vpack.c.bf16 %v12968_v39, %v12844_v25  ;;  %v7832_v42 = vclamps-f32 %v13073_v29, 1.0  ;;  %v5541_v28 = vadd.f32 1.1283791, %v5540_v34  ;;  %v5554_v5 = vmul.f32 %v8457_v56, %v13052_v26 }
 0x963   : > { %v5626_v11 = vadd.f32 0.014752088, %v5625_v49  ;;  %v5607_v15 = vmul.f32 %v5606_v23, %v5582_v14  ;;  %v5658_v1 = vmul.f32 %v5657_v55, %v12953_v13  ;;  %v5614_v37 = vmul.f32 %v5613_v59, %v13044_v35 }
 0x964   : > { %v5733_v47 = vadd.f32 0.00028619796, %v5732_v24  ;;  %6376 = vmatmul.bf16.gmra.mxu2 %v6194_v8  ;;  %v5555_v0 = vsub.f32 1.0, %v5554_v5  ;;  %v5562_v60 = vand.u32 2147483647, %v13052_v26  ;;  %v5564_v22 = vand.u32 2147483648, %v13052_v26 }
 0x965   : > { %v5627_v25 = vmul.f32 %v5626_v11, %v13044_v35  ;;  %v5744_v39 = vadd.f32 0.001143296, %v5743_v10  ;;  %v13102_v43 = vmul.f32 0.70710677, %v13087_v17  ;;  %v6193_v34 = vpack.c.bf16 %v6136_v12, %v12934_v31 }
 0x966   : > { %v5734_v29 = vmul.f32 %v5733_v47, %v13060_v50  ;;  %v5556_v55 = vmul.f32 %v8457_v56, %v5555_v0  ;;  %vm5559_vm13 = vweird.f32 %v8457_v56  ;;  %v7835_v24 = vclamps-f32 %v5607_v15, 1.0 }
 0x967   : > { %v13105_v2 = vpop.eup %8458  ;;  %v5628_v59 = vadd.f32 0.112945676, %v5627_v25  ;;  %v5745_v49 = vmul.f32 %v5744_v39, %v13060_v50  ;;  %v5542_v23 = vmul.f32 %v5541_v28, %v12896_v3  ;;  %vm5558_vm14 = vweird.f32 %v13052_v26  ;;  %6327 = vmatmul.bf16.gmra.mxu1 %v6193_v34  ;;  %v13118_v3 = vld [vmem:[%s14107_s12 + $0x1] ss:$0 sm:$0xff]  ;;  %v6315_v0 = vpop.f32.mrf.mxu1 }
 0x968   : > { %v5615_v10 = vadd.f32 0.0036580483, %v5614_v37  ;;  %v5557_v14 = vadd.f32 %v8457_v56, %v5556_v55  ;;  %v5690_v31 = vmul.f32 %v13102_v43, %v13102_v43  ;;  %vm5560_vm15 = vmor %vm5558_vm14, %vm5559_vm13  ;;  %vm5563_vm0 = vcmp.eq.f32.partialorder %v5562_v60, 8.507059e+37  ;;  %v6364_v25 = vpop.f32.mrf.mxu2 }
 0x969   : > { %v5629_v8 = vmul.f32 %v5628_v59, %v13044_v35  ;;  %v5746_v5 = vadd.f32 0.014752088, %v5745_v49  ;;  %v5565_v12 = vor.u32 1.1754944e-38, %v5564_v22  ;;  %v5674_v11 = vmul.f32 %v13105_v2, %v13076_v61 }
 0x96a   : > { %v5735_v15 = vadd.f32 0.0036580483, %v5734_v29  ;;  %v5561_v26 = vsel %vm5560_vm15, %v8457_v56, %v5557_v14  ;;  %v13121_v47 = vmin.f32 %v5690_v31, 16.0  ;;  %v6106_v39 = vadd.f32 1.0, %v7832_v42 }
 0x96b   : > { %v5630_v28 = vadd.f32 0.4994258, %v5629_v8  ;;  %v5747_v37 = vmul.f32 %v5746_v5, %v13060_v50  ;;  %v6109_v60 = vadd.f32 1.0, %v7835_v24  ;;  %v5566_v22 = vsel %vm5563_vm0, %v5565_v12, %v5561_v26 }
 0x96c   : > { %v5616_v34 = vmul.f32 %v5615_v10, %v13044_v35  ;;  %v5567_v55 = vmul.f32 %v5566_v22, %v5542_v23  ;;  %v5692_v49 = vmul.f32 2.1237322e-06, %v13121_v47  ;;  %v5675_v20 = vsub.f32 1.0, %v5674_v11 }
 0x96d   : > { %v5631_v29 = vmul.f32 %v5630_v28, %v13044_v35  ;;  %v5748_v59 = vadd.f32 0.112945676, %v5747_v37  ;;  %v5736_v56 = vmul.f32 %v5735_v15, %v13060_v50  ;;  %v5703_v14 = vmul.f32 3.8918573e-05, %v13121_v47 }
 0x96e   : > { %v6314_v8 = vadd.f32 %v13118_v3, %v6313_v7  ;;  %v7834_v5 = vclamps-f32 %v5567_v55, 1.0  ;;  %v5693_v24 = vadd.f32 0.00028619796, %v5692_v49  ;;  %v5659_v10 = vadd.f32 0.18741608, %v5658_v1 }
 0x96f   : > { %v13129_v31 = vadd.f32 1.0, %v5631_v29  ;;  %v5749_v42 = vmul.f32 %v5748_v59, %v13060_v50  ;;  %v5617_v23 = vadd.f32 0.05243302, %v5616_v34  ;;  %v5704_v12 = vadd.f32 0.001143296, %v5703_v14 }
 0x970   : > { %v6139_v26 = vmul.f32 %v13083_v63, %v12828_v4  ;;  %v6141_v11 = vmul.f32 %v6109_v60, %v12893_v57  ;;  %v6108_v28 = vadd.f32 1.0, %v7834_v5  ;;  %v6138_v15 = vmul.f32 %v6106_v39, %v12889_v30  ;;  %v6318_v4 = vpop.f32.mrf.mxu1  ;;  %v6367_v63 = vpop.f32.mrf.mxu2 }
 0x971   : > { %8460 = vrcp.f32 %v13129_v31  ;;  %v5676_v7 = vmul.f32 %v13105_v2, %v5675_v20  ;;  %v5737_v37 = vadd.f32 0.05243302, %v5736_v56  ;;  %v6363_v22 = vadd.f32 %v13093_v38, %v6314_v8 }
 0x972   : > { %v6140_v55 = vmul.f32 %v6108_v28, %v12951_v41  ;;  %v5750_v1 = vadd.f32 0.4994258, %v5749_v42  ;;  %v5694_v34 = vmul.f32 %v5693_v24, %v13121_v47  ;;  %v5705_v29 = vmul.f32 %v5704_v12, %v13121_v47 }
 0x973   : > { %v5660_v57 = vmul.f32 %v5659_v10, %v12953_v13  ;;  %vm5678_vm1 = vweird.f32 %v13076_v61  ;;  %v5684_v30 = vand.u32 2147483648, %v13076_v61  ;;  %v5618_v20 = vmul.f32 %v5617_v23, %v13044_v35 }
 0x974   : > { %v5751_v39 = vmul.f32 %v5750_v1, %v13060_v50  ;;  %v5695_v38 = vadd.f32 0.0036580483, %v5694_v34  ;;  %v5706_v60 = vadd.f32 0.014752088, %v5705_v29  ;;  %v6196_v41 = vpack.c.bf16 %v6141_v11, %v6139_v26 }
 0x975   : > { %v5677_v59 = vadd.f32 %v13105_v2, %v5676_v7  ;;  %vm5679_vm2 = vweird.f32 %v13105_v2  ;;  %v13150_v49 = vadd.f32 %v6363_v22, %v11836_v44  ;;  %v6316_v13 = vadd.f32 %v13118_v3, %v6315_v0 }
 0x976   : > { %v5738_v14 = vmul.f32 %v5737_v37, %v13060_v50  ;;  %v13156_v8 = vadd.f32 1.0, %v5751_v39  ;;  %v5707_v5 = vmul.f32 %v5706_v60, %v13121_v47  ;;  %6381 = vmatmul.bf16.gmra.mxu2 %v6196_v41  ;;  %v6195_v42 = vpack.c.bf16 %v6140_v55, %v6138_v15  ;;  %vm13167_vm3 = vmor %vm5678_vm1, %vm5679_vm2 }
 0x977   : > { %v13153_v56 = vpop.eup %8460  ;;  %v5682_v24 = vand.u32 2147483647, %v13076_v61  ;;  %v5619_v10 = vadd.f32 0.18741608, %v5618_v20  ;;  %6422 = vadd.xlane.f32.xlu2 %v13150_v49  ;;  %v6365_v44 = vadd.f32 %v6364_v25, %v6316_v13  ;;  %v5661_v0 = vadd.f32 1.1283791, %v5660_v57 }
 0x978   : > { %v5634_v23 = vmul.f32 %v13153_v56, %v13129_v31  ;;  %8462 = vrcp.f32 %v13156_v8  ;;  %v5696_v26 = vmul.f32 %v5695_v38, %v13121_v47  ;;  %6332 = vmatmul.bf16.gmra.mxu1 %v6195_v42  ;;  %v5681_v11 = vsel %vm13167_vm3, %v13105_v2, %v5677_v59  ;;  %v6320_v22 = vpop.f32.mrf.mxu1  ;;  %v6369_v55 = vpop.f32.mrf.mxu2 }
 0x979   : > { %v5708_v25 = vadd.f32 0.112945676, %v5707_v5  ;;  %v13177_v15 = vadd.f32 %v6365_v44, %v11839_v27  ;;  %v5685_v7 = vor.u32 1.1754944e-38, %v5684_v30  ;;  %v5739_v61 = vadd.f32 0.18741608, %v5738_v14 }
 0x97a   : > { %v5635_v28 = vsub.f32 1.0, %v5634_v23  ;;  %v6319_v37 = vadd.f32 %v13118_v3, %v6318_v4  ;;  %vm5683_vm4 = vcmp.eq.f32.partialorder %v5682_v24, 8.507059e+37  ;;  %v5620_v1 = vmul.f32 %v5619_v10, %v13044_v35 }
 0x97b   : > { %v5709_v34 = vmul.f32 %v5708_v25, %v13121_v47  ;;  %6424 = vadd.xlane.f32.xlu0 %v13177_v15  ;;  %v6321_v2 = vadd.f32 %v13118_v3, %v6320_v22  ;;  %v5686_v29 = vsel %vm5683_vm4, %v5685_v7, %v5681_v11  ;;  %v5697_v57 = vadd.f32 0.05243302, %v5696_v26 }
 0x97c   : > { %v6368_v20 = vadd.f32 %v6367_v63, %v6319_v37  ;;  %v5662_v27 = vmul.f32 %v5661_v0, %v12916_v51  ;;  %v5636_v30 = vmul.f32 %v13153_v56, %v5635_v28  ;;  %v5740_v60 = vmul.f32 %v5739_v61, %v13060_v50 }
 0x97d   : > { %v5710_v39 = vadd.f32 0.4994258, %v5709_v34  ;;  %v6370_v4 = vadd.f32 %v6369_v55, %v6321_v2  ;;  %v5621_v59 = vadd.f32 1.1283791, %v5620_v1  ;;  %v5642_v13 = vand.u32 2147483647, %v13129_v31 }
 0x97e   : > { %v8463_v38 = vpop.eup %8462  ;;  %v13188_v35 = vadd.f32 %v6368_v20, %v11891_v54  ;;  %v5687_v41 = vmul.f32 %v5686_v29, %v5662_v27  ;;  %v5698_v63 = vmul.f32 %v5697_v57, %v13121_v47  ;;  %v5637_v54 = vadd.f32 %v13153_v56, %v5636_v30 }
 0x97f   : > { %v5754_v14 = vmul.f32 %v8463_v38, %v13156_v8  ;;  %v5711_v51 = vmul.f32 %v5710_v39, %v13121_v47  ;;  %v13196_v42 = vadd.f32 %v6370_v4, %v11894_v32  ;;  %vm5639_vm5 = vweird.f32 %v13153_v56 }
 0x980   : > { %6426 = vadd.xlane.f32.xlu1 %v13188_v35  ;;  %v5644_v24 = vand.u32 2147483648, %v13129_v31  ;;  %v5741_v23 = vadd.f32 1.1283791, %v5740_v60  ;;  %v5764_v44 = vand.u32 2147483648, %v13156_v8  ;;  %vm5638_vm6 = vweird.f32 %v13129_v31 }
 0x981   : > { %v5755_v10 = vsub.f32 1.0, %v5754_v14  ;;  %v13205_v0 = vadd.f32 1.0, %v5711_v51  ;;  %6428 = vadd.xlane.f32.xlu2 %v13196_v42  ;;  %vm5759_vm7 = vweird.f32 %v8463_v38  ;;  %v5762_v26 = vand.u32 2147483647, %v13156_v8  ;;  %vm13215_vm8 = vmor %vm5638_vm6, %vm5639_vm5 }
 0x982   : > { %v4736_v5 = vpop.f32.mrf.mxu0  ;;  %v7837_v25 = vclamps-f32 %v5687_v41, 1.0  ;;  %vm5758_vm9 = vweird.f32 %v13156_v8  ;;  %v5699_v61 = vadd.f32 0.18741608, %v5698_v63  ;;  %v5641_v31 = vsel %vm13215_vm8, %v13153_v56, %v5637_v54 }
 0x983   : > { %v13199_v50 = vadd.f32 %v4736_v5, %v11938_v9  ;;  %v5756_v12 = vmul.f32 %v8463_v38, %v5755_v10  ;;  %8464 = vrcp.f32 %v13205_v0  ;;  %vm5643_vm10 = vcmp.eq.f32.partialorder %v5642_v13, 8.507059e+37  ;;  %vm5760_vm11 = vmor %vm5758_vm9, %vm5759_vm7 }
 0x984   : > { %v6372_v28 = vpop.f32.mrf.mxu2  ;;  %v5645_v1 = vor.u32 1.1754944e-38, %v5644_v24  ;;  %v5742_v34 = vmul.f32 %v5741_v23, %v13020_v40  ;;  %v5765_v8 = vor.u32 1.1754944e-38, %v5764_v44  ;;  %vm5763_vm12 = vcmp.eq.f32.partialorder %v5762_v26, 8.507059e+37 }
 0x985   : > { %v13209_v32 = vmul.f32 0.70710677, %v13199_v50  ;;  %v5757_v37 = vadd.f32 %v8463_v38, %v5756_v12  ;;  %v6111_v20 = vadd.f32 1.0, %v7837_v25  ;;  %v5700_v30 = vmul.f32 %v5699_v61, %v13121_v47 }
 0x986   : > { %v5646_v56 = vsel %vm5643_vm10, %v5645_v1, %v5641_v31  ;;  %v5622_v13 = vmul.f32 %v5621_v59, %v13015_v6  ;;  %v4769_v14 = vmul.f32 0.5, %v12997_v18  ;;  %v5722_v18 = vand.u32 2147483647, %v13205_v0 }
 0x987   : > { %v5810_v55 = vmul.f32 %v13209_v32, %v13209_v32  ;;  %v5761_v2 = vsel %vm5760_vm11, %v8463_v38, %v5757_v37  ;;  %v4767_v38 = vmul.f32 0.5, %v12904_v48  ;;  %v5701_v44 = vadd.f32 1.1283791, %v5700_v30 }
 0x988   : > { %v5766_v27 = vsel %vm5763_vm12, %v5765_v8, %v5761_v2  ;;  %v5647_v54 = vmul.f32 %v5646_v56, %v5622_v13  ;;  %v5724_v59 = vand.u32 2147483648, %v13205_v0  ;;  %vm5718_vm14 = vweird.f32 %v13205_v0 }
 0x989   : > { %v13229_v57 = vmin.f32 %v5810_v55, 16.0  ;;  %v5767_v39 = vmul.f32 %v5766_v27, %v5742_v34  ;;  %v8465_v41 = vpop.eup %8464  ;;  %v5702_v2 = vmul.f32 %v5701_v44, %v13102_v43  ;;  %vm5723_vm0 = vcmp.eq.f32.partialorder %v5722_v18, 8.507059e+37  ;;  %v4687_v27 = vpop.f32.mrf.mxu3 }
 0x98a   : > { %v5714_v63 = vmul.f32 %v8465_v41, %v13205_v0  ;;  %vm5719_vm13 = vweird.f32 %v8465_v41  ;;  %v5725_v55 = vor.u32 1.1754944e-38, %v5724_v59  ;;  %v7836_v8 = vclamps-f32 %v5647_v54, 1.0  ;;  %v4738_v54 = vpop.f32.mrf.mxu0 }
 0x98b   : > { %v5812_v60 = vmul.f32 2.1237322e-06, %v13229_v57  ;;  %v5823_v40 = vmul.f32 3.8918573e-05, %v13229_v57  ;;  %v7839_v5 = vclamps-f32 %v5767_v39, 1.0  ;;  %vm5720_vm15 = vmor %vm5718_vm14, %vm5719_vm13  ;;  %v13257_v39 = vadd.f32 %v4687_v27, %v11950_v19 }
 0x98c   : > { %v6323_v11 = vpop.f32.mrf.mxu1  ;;  %v5715_v12 = vsub.f32 1.0, %v5714_v63  ;;  %v6374_v48 = vpop.f32.mrf.mxu2  ;;  %v4766_v43 = vmul.f32 0.5, %v12991_v58 }
 0x98d   : > { %v6324_v22 = vadd.f32 %v13118_v3, %v6323_v11  ;;  %v5813_v51 = vadd.f32 0.00028619796, %v5812_v60  ;;  %v5824_v10 = vadd.f32 0.001143296, %v5823_v40  ;;  %v6113_v23 = vadd.f32 1.0, %v7839_v5 }
 0x98e   : > { %v5716_v25 = vmul.f32 %v8465_v41, %v5715_v12  ;;  %v6110_v60 = vadd.f32 1.0, %v7836_v8  ;;  %v13260_v13 = vmul.f32 0.70710677, %v13257_v39 }
 0x98f   : > { %v6373_v29 = vadd.f32 %v6372_v28, %v6324_v22  ;;  %v5814_v6 = vmul.f32 %v5813_v51, %v13229_v57  ;;  %v5825_v11 = vmul.f32 %v5824_v10, %v13229_v57  ;;  %v6145_v28 = vmul.f32 %v6113_v23, %v4769_v14 }
 0x990   : > { %v5717_v37 = vadd.f32 %v8465_v41, %v5716_v25  ;;  %v6142_v51 = vmul.f32 %v6110_v60, %v4766_v43  ;;  %v13273_v23 = vadd.f32 %v4738_v54, %v11938_v9 }
 0x991   : > { %v13233_v4 = vadd.f32 %v6373_v29, %v11913_v62  ;;  %v6143_v62 = vmul.f32 %v6111_v20, %v4767_v38  ;;  %v5815_v7 = vadd.f32 0.0036580483, %v5814_v6  ;;  %v5826_v31 = vadd.f32 0.014752088, %v5825_v11  ;;  %v4689_v59 = vpop.f32.mrf.mxu3 }
 0x992   : > { %v5721_v29 = vsel %vm5720_vm15, %v8465_v41, %v5717_v37  ;;  %v4768_v41 = vmul.f32 0.5, %v13087_v17 }
 0x993   : > { %6430 = vadd.xlane.f32.xlu0 %v13233_v4  ;;  %v6198_v22 = vpack.c.bf16 %v6145_v28, %v6143_v62  ;;  %v5816_v1 = vmul.f32 %v5815_v7, %v13229_v57  ;;  %v5827_v34 = vmul.f32 %v5826_v31, %v13229_v57  ;;  %v13285_v28 = vadd.f32 %v4689_v59, %v11950_v19  ;;  %v4741_v31 = vpop.f32.mrf.mxu0 }
 0x994   : > { %v6325_v47 = vpop.f32.mrf.mxu1  ;;  %v13296_v8 = vadd.f32 %v4741_v31, %v11938_v9 }
 0x995   : > { %v6326_v24 = vadd.f32 %v13118_v3, %v6325_v47  ;;  %6386 = vmatmul.bf16.gmra.mxu2 %v6198_v22  ;;  %v5828_v20 = vadd.f32 0.112945676, %v5827_v34  ;;  %v5817_v0 = vadd.f32 0.05243302, %v5816_v1  ;;  %v5770_v47 = vmul.f32 %v13260_v13, %v13260_v13 }
 0x997   : > { %v6375_v26 = vadd.f32 %v6374_v48, %v6326_v24  ;;  %v5829_v30 = vmul.f32 %v5828_v20, %v13229_v57  ;;  %v5818_v5 = vmul.f32 %v5817_v0, %v13229_v57  ;;  %v13270_v10 = vmin.f32 %v5770_v47, 16.0 }
 0x998   : > { %v13279_v48 = vmul.f32 0.70710677, %v13273_v23 }
 0x999   : > { %v13248_v61 = vadd.f32 %v6375_v26, %v11916_v45  ;;  %v5726_v45 = vsel %vm5723_vm0, %v5725_v55, %v5721_v29  ;;  %v5830_v38 = vadd.f32 0.4994258, %v5829_v30  ;;  %v5819_v17 = vadd.f32 0.18741608, %v5818_v5 }
 0x99a   : > { %v5727_v56 = vmul.f32 %v5726_v45, %v5702_v2  ;;  %v5772_v44 = vmul.f32 2.1237322e-06, %v13270_v10  ;;  %v5783_v12 = vmul.f32 3.8918573e-05, %v13270_v10  ;;  %v5890_v11 = vmul.f32 %v13279_v48, %v13279_v48 }
 0x99b   : > { %6432 = vadd.xlane.f32.xlu1 %v13248_v61  ;;  %v5831_v63 = vmul.f32 %v5830_v38, %v13229_v57  ;;  %v5820_v26 = vmul.f32 %v5819_v17, %v13229_v57  ;;  %v13292_v55 = vmul.f32 0.70710677, %v13285_v28  ;;  %v13308_v5 = vmul.f32 0.70710677, %v13296_v8 }
 0x99c   : > { %v7838_v40 = vclamps-f32 %v5727_v56, 1.0  ;;  %v5773_v6 = vadd.f32 0.00028619796, %v5772_v44  ;;  %v5784_v18 = vadd.f32 0.001143296, %v5783_v12  ;;  %v13289_v22 = vmin.f32 %v5890_v11, 16.0 }
 0x99d   : > { %v13268_v24 = vadd.f32 1.0, %v5831_v63  ;;  %v5821_v2 = vadd.f32 1.1283791, %v5820_v26  ;;  %v5850_v20 = vmul.f32 %v13292_v55, %v13292_v55 }
 0x99e   : > { %v6112_v14 = vadd.f32 1.0, %v7838_v40  ;;  %v5774_v25 = vmul.f32 %v5773_v6, %v13270_v10  ;;  %v5785_v7 = vmul.f32 %v5784_v18, %v13270_v10  ;;  %v5892_v29 = vmul.f32 2.1237322e-06, %v13289_v22 }
 0x99f   : > { %8466 = vrcp.f32 %v13268_v24  ;;  %v5903_v45 = vmul.f32 3.8918573e-05, %v13289_v22  ;;  %v5842_v27 = vand.u32 2147483647, %v13268_v24  ;;  %v13305_v38 = vmin.f32 %v5850_v20, 16.0 }
 0x9a0   : > { %v6144_v62 = vmul.f32 %v6112_v14, %v4768_v41  ;;  %v5775_v57 = vadd.f32 0.0036580483, %v5774_v25  ;;  %v5786_v34 = vadd.f32 0.014752088, %v5785_v7  ;;  %v5893_v60 = vadd.f32 0.00028619796, %v5892_v29 }
 0x9a1   : > { %v5904_v40 = vadd.f32 0.001143296, %v5903_v45  ;;  %vm5838_vm2 = vweird.f32 %v13268_v24  ;;  %vm13323_vm4 = vcmp.eq.f32.partialorder %v5842_v27, 8.507059e+37  ;;  %v5970_v7 = vmul.f32 %v13308_v5, %v13308_v5 }
 0x9a2   : > { %v6197_v58 = vpack.c.bf16 %v6144_v62, %v6142_v51  ;;  %v5776_v0 = vmul.f32 %v5775_v57, %v13270_v10  ;;  %v5787_v30 = vmul.f32 %v5786_v34, %v13270_v10  ;;  %v5894_v63 = vmul.f32 %v5893_v60, %v13289_v22 }
 0x9a3   : > { %v5905_v47 = vmul.f32 %v5904_v40, %v13289_v22  ;;  %v5852_v51 = vmul.f32 2.1237322e-06, %v13305_v38  ;;  %v5863_v62 = vmul.f32 3.8918573e-05, %v13305_v38 }
 0x9a4   : > { %6337 = vmatmul.bf16.gmra.mxu1 %v6197_v58  ;;  %v5777_v41 = vadd.f32 0.05243302, %v5776_v0  ;;  %v5788_v14 = vadd.f32 0.112945676, %v5787_v30  ;;  %v5844_v58 = vand.u32 2147483648, %v13268_v24  ;;  %v5822_v30 = vmul.f32 %v5821_v2, %v13209_v32 }
 0x9a5   : > { %v8467_v37 = vpop.eup %8466  ;;  %v5895_v12 = vadd.f32 0.0036580483, %v5894_v63  ;;  %v5906_v6 = vadd.f32 0.014752088, %v5905_v47  ;;  %v5853_v18 = vadd.f32 0.00028619796, %v5852_v51  ;;  %v4692_v47 = vpop.f32.mrf.mxu3 }
 0x9a6   : > { %v5834_v1 = vmul.f32 %v8467_v37, %v13268_v24  ;;  %vm5839_vm1 = vweird.f32 %v8467_v37  ;;  %v5778_v17 = vmul.f32 %v5777_v41, %v13270_v10  ;;  %v5789_v44 = vmul.f32 %v5788_v14, %v13270_v10 }
 0x9a7   : > { %vm13319_vm3 = vmor %vm5838_vm2, %vm5839_vm1  ;;  %v5864_v25 = vadd.f32 0.001143296, %v5863_v62  ;;  %v5896_v31 = vmul.f32 %v5895_v12, %v13289_v22  ;;  %v5854_v57 = vmul.f32 %v5853_v18, %v13305_v38  ;;  %v5845_v34 = vor.u32 1.1754944e-38, %v5844_v58 }
 0x9a8   : > { %v5835_v56 = vsub.f32 1.0, %v5834_v1  ;;  %v5790_v11 = vadd.f32 0.4994258, %v5789_v44  ;;  %v5907_v1 = vmul.f32 %v5906_v6, %v13289_v22  ;;  %v5779_v29 = vadd.f32 0.18741608, %v5778_v17 }
 0x9a9   : > { %v5865_v20 = vmul.f32 %v5864_v25, %v13305_v38  ;;  %v5855_v0 = vadd.f32 0.0036580483, %v5854_v57  ;;  %v13342_v63 = vmin.f32 %v5970_v7, 16.0  ;;  %v13347_v58 = vadd.f32 %v4692_v47, %v11950_v19 }
 0x9aa   : > { %v5836_v43 = vmul.f32 %v8467_v37, %v5835_v56  ;;  %v5791_v45 = vmul.f32 %v5790_v11, %v13270_v10  ;;  %v5897_v56 = vadd.f32 0.05243302, %v5896_v31  ;;  %v5908_v27 = vadd.f32 0.112945676, %v5907_v1 }
 0x9ab   : > { %v5866_v40 = vadd.f32 0.014752088, %v5865_v20  ;;  %v5856_v14 = vmul.f32 %v5855_v0, %v13305_v38  ;;  %v5780_v62 = vmul.f32 %v5779_v29, %v13270_v10  ;;  %v5972_v12 = vmul.f32 2.1237322e-06, %v13342_v63  ;;  %v4743_v10 = vpop.f32.mrf.mxu0 }
 0x9ac   : > { %v5837_v54 = vadd.f32 %v8467_v37, %v5836_v43  ;;  %v5792_v60 = vadd.f32 1.0, %v5791_v45  ;;  %v5898_v43 = vmul.f32 %v5897_v56, %v13289_v22  ;;  %v5909_v41 = vmul.f32 %v5908_v27, %v13289_v22 }
 0x9ad   : > { %v5867_v32 = vmul.f32 %v5866_v40, %v13305_v38  ;;  %v5781_v26 = vadd.f32 1.1283791, %v5780_v62  ;;  %v13354_v7 = vmul.f32 0.5, %v13199_v50  ;;  %v5983_v31 = vmul.f32 3.8918573e-05, %v13342_v63 }
 0x9ae   : > { %v5841_v24 = vsel %vm13319_vm3, %v8467_v37, %v5837_v54  ;;  %8468 = vrcp.f32 %v5792_v60  ;;  %v5910_v2 = vadd.f32 0.4994258, %v5909_v41  ;;  %v5857_v54 = vadd.f32 0.05243302, %v5856_v14 }
 0x9af   : > { %v5846_v37 = vsel %vm13323_vm4, %v5845_v34, %v5841_v24  ;;  %v5899_v17 = vadd.f32 0.18741608, %v5898_v43  ;;  %v5868_v44 = vadd.f32 0.112945676, %v5867_v32  ;;  %v13360_v1 = vmul.f32 0.70710677, %v13347_v58 }
 0x9b0   : > { %v5847_v51 = vmul.f32 %v5846_v37, %v5822_v30  ;;  %v5911_v6 = vmul.f32 %v5910_v2, %v13289_v22  ;;  %v5858_v18 = vmul.f32 %v5857_v54, %v13305_v38  ;;  %v5973_v45 = vadd.f32 0.00028619796, %v5972_v12 }
 0x9b1   : > { %v5869_v11 = vmul.f32 %v5868_v44, %v13305_v38  ;;  %v5900_v34 = vmul.f32 %v5899_v17, %v13289_v22  ;;  %v13364_v20 = vmul.f32 0.5, %v13273_v23  ;;  %v13368_v50 = vadd.f32 %v4743_v10, %v11938_v9 }
 0x9b2   : > { %v7841_v59 = vclamps-f32 %v5847_v51, 1.0  ;;  %v13356_v24 = vadd.f32 1.0, %v5911_v6  ;;  %v5859_v56 = vadd.f32 0.18741608, %v5858_v18  ;;  %v5782_v0 = vmul.f32 %v5781_v26, %v13260_v13 }
 0x9b3   : > { %v5870_v29 = vadd.f32 0.4994258, %v5869_v11  ;;  %v5802_v40 = vand.u32 2147483647, %v5792_v60  ;;  %v5804_v22 = vand.u32 2147483648, %v5792_v60  ;;  %v5930_v23 = vmul.f32 %v13360_v1, %v13360_v1  ;;  %v4694_v11 = vpop.f32.mrf.mxu3 }
 0x9b4   : > { %v8469_v25 = vpop.eup %8468  ;;  %8470 = vrcp.f32 %v13356_v24  ;;  %v13370_v27 = vadd.f32 1.0, %v7841_v59  ;;  %v5984_v43 = vadd.f32 0.001143296, %v5983_v31  ;;  %v5901_v14 = vadd.f32 1.1283791, %v5900_v34 }
 0x9b5   : > { %v5794_v57 = vmul.f32 %v8469_v25, %v5792_v60  ;;  %v5871_v37 = vmul.f32 %v5870_v29, %v13305_v38  ;;  %v5974_v9 = vmul.f32 %v5973_v45, %v13342_v63  ;;  %vm5799_vm5 = vweird.f32 %v8469_v25 }
 0x9b6   : > { %v5922_v51 = vand.u32 2147483647, %v13356_v24  ;;  %v5860_v13 = vmul.f32 %v5859_v56, %v13305_v38  ;;  %v5985_v62 = vmul.f32 %v5984_v43, %v13342_v63  ;;  %vm5798_vm6 = vweird.f32 %v5792_v60 }
 0x9b7   : > { %v5795_v30 = vsub.f32 1.0, %v5794_v57  ;;  %v13376_v47 = vadd.f32 1.0, %v5871_v37  ;;  %v5924_v2 = vand.u32 2147483648, %v13356_v24  ;;  %vm13384_vm7 = vcmp.eq.f32.partialorder %v5802_v40, 8.507059e+37  ;;  %vm13393_vm8 = vmor %vm5798_vm6, %vm5799_vm5 }
 0x9b8   : > { %v5986_v44 = vadd.f32 0.014752088, %v5985_v62  ;;  %v13388_v12 = vmin.f32 %v5930_v23, 16.0  ;;  %v13391_v6 = vmul.f32 0.70710677, %v13368_v50  ;;  %v5805_v60 = vor.u32 1.1754944e-38, %v5804_v22 }
 0x9b9   : > { %v5796_v41 = vmul.f32 %v8469_v25, %v5795_v30  ;;  %8472 = vrcp.f32 %v13376_v47  ;;  %v5902_v18 = vmul.f32 %v5901_v14, %v13279_v48  ;;  %v5975_v26 = vadd.f32 0.0036580483, %v5974_v9 }
 0x9ba   : > { %v8471_v54 = vpop.eup %8470  ;;  %vm5918_vm9 = vweird.f32 %v13356_v24  ;;  %vm13402_vm10 = vcmp.eq.f32.partialorder %v5922_v51, 8.507059e+37  ;;  %v5861_v57 = vadd.f32 1.1283791, %v5860_v13  ;;  %v5925_v29 = vor.u32 1.1754944e-38, %v5924_v2 }
 0x9bb   : > { %v5797_v32 = vadd.f32 %v8469_v25, %v5796_v41  ;;  %v5914_v59 = vmul.f32 %v8471_v54, %v13356_v24  ;;  %v5882_v45 = vand.u32 2147483647, %v13376_v47  ;;  %v5987_v48 = vmul.f32 %v5986_v44, %v13342_v63 }
 0x9bc   : > { %vm5919_vm11 = vweird.f32 %v8471_v54  ;;  %v5943_v56 = vmul.f32 3.8918573e-05, %v13388_v12  ;;  %v6050_v30 = vmul.f32 %v13391_v6, %v13391_v6  ;;  %v5932_v23 = vmul.f32 2.1237322e-06, %v13388_v12 }
 0x9bd   : > { %v5801_v10 = vsel %vm13393_vm8, %v8469_v25, %v5797_v32  ;;  %v5915_v34 = vsub.f32 1.0, %v5914_v59  ;;  %v13412_v25 = vadd.f32 %v4694_v11, %v11950_v19  ;;  %v5988_v43 = vadd.f32 0.112945676, %v5987_v48  ;;  %vm5920_vm14 = vmor %vm5918_vm9, %vm5919_vm11 }
 0x9be   : > { %v5806_v40 = vsel %vm13384_vm7, %v5805_v60, %v5801_v10  ;;  %v5862_v41 = vmul.f32 %v5861_v57, %v13292_v55  ;;  %vm5878_vm12 = vweird.f32 %v13376_v47  ;;  %v5944_v9 = vadd.f32 0.001143296, %v5943_v56 }
 0x9bf   : > { %v8473_v37 = vpop.eup %8472  ;;  %v5916_v22 = vmul.f32 %v8471_v54, %v5915_v34  ;;  %vm13420_vm13 = vcmp.eq.f32.partialorder %v5882_v45, 8.507059e+37  ;;  %v5884_v19 = vand.u32 2147483648, %v13376_v47  ;;  %v5989_v62 = vmul.f32 %v5988_v43, %v13342_v63 }
 0x9c0   : > { %v5874_v14 = vmul.f32 %v8473_v37, %v13376_v47  ;;  %v5807_v32 = vmul.f32 %v5806_v40, %v5782_v0  ;;  %v5945_v2 = vmul.f32 %v5944_v9, %v13388_v12  ;;  %v13430_v17 = vmin.f32 %v6050_v30, 16.0 }
 0x9c1   : > { %v5917_v51 = vadd.f32 %v8471_v54, %v5916_v22  ;;  %vm5879_vm15 = vweird.f32 %v8473_v37  ;;  %v5990_v38 = vadd.f32 0.4994258, %v5989_v62  ;;  %v5933_v60 = vadd.f32 0.00028619796, %v5932_v23 }
 0x9c2   : > { %v5875_v55 = vsub.f32 1.0, %v5874_v14  ;;  %v5946_v10 = vadd.f32 0.014752088, %v5945_v2  ;;  %v6052_v0 = vmul.f32 2.1237322e-06, %v13430_v17  ;;  %v5885_v34 = vor.u32 1.1754944e-38, %v5884_v19  ;;  %vm5880_vm0 = vmor %vm5878_vm12, %vm5879_vm15 }
 0x9c3   : > { %v5921_v44 = vsel %vm5920_vm14, %v8471_v54, %v5917_v51  ;;  %v5991_v24 = vmul.f32 %v5990_v38, %v13342_v63  ;;  %v6063_v45 = vmul.f32 3.8918573e-05, %v13430_v17  ;;  %v13439_v30 = vmul.f32 0.70710677, %v13412_v25 }
 0x9c4   : > { %v5926_v59 = vsel %vm13402_vm10, %v5925_v29, %v5921_v44  ;;  %v5876_v11 = vmul.f32 %v8473_v37, %v5875_v55  ;;  %v5947_v56 = vmul.f32 %v5946_v10, %v13388_v12  ;;  %v6053_v54 = vadd.f32 0.00028619796, %v6052_v0 }
 0x9c5   : > { %v5927_v57 = vmul.f32 %v5926_v59, %v5902_v18  ;;  %v7840_v40 = vclamps-f32 %v5807_v32, 1.0  ;;  %v13444_v29 = vadd.f32 1.0, %v5991_v24  ;;  %v6064_v18 = vadd.f32 0.001143296, %v6063_v45 }
 0x9c6   : > { %v5877_v48 = vadd.f32 %v8473_v37, %v5876_v11  ;;  %v5934_v43 = vmul.f32 %v5933_v60, %v13388_v12  ;;  %v5948_v23 = vadd.f32 0.112945676, %v5947_v56  ;;  %v6054_v14 = vmul.f32 %v6053_v54, %v13430_v17 }
 0x9c7   : > { %v7843_v31 = vclamps-f32 %v5927_v57, 1.0  ;;  %8474 = vrcp.f32 %v13444_v29  ;;  %v6010_v19 = vmul.f32 %v13439_v30, %v13439_v30  ;;  %v5976_v62 = vmul.f32 %v5975_v26, %v13342_v63 }
 0x9c8   : > { %v5881_v22 = vsel %vm5880_vm0, %v8473_v37, %v5877_v48  ;;  %v6147_v37 = vmul.f32 %v13370_v27, %v13354_v7  ;;  %v5949_v55 = vmul.f32 %v5948_v23, %v13388_v12  ;;  %v6065_v2 = vmul.f32 %v6064_v18, %v13430_v17 }
 0x9c9   : > { %v6117_v9 = vadd.f32 1.0, %v7843_v31  ;;  %v5886_v51 = vsel %vm13420_vm13, %v5885_v34, %v5881_v22  ;;  %v6114_v44 = vadd.f32 1.0, %v7840_v40  ;;  %v5935_v38 = vadd.f32 0.0036580483, %v5934_v43 }
 0x9ca   : > { %v5887_v47 = vmul.f32 %v5886_v51, %v5862_v41  ;;  %v6055_v60 = vadd.f32 0.0036580483, %v6054_v14  ;;  %v4770_v59 = vmul.f32 0.5, %v13257_v39  ;;  %v5950_v11 = vadd.f32 0.4994258, %v5949_v55 }
 0x9cb   : > { %v6149_v32 = vmul.f32 %v6117_v9, %v13364_v20  ;;  %v6066_v10 = vadd.f32 0.014752088, %v6065_v2  ;;  %v13460_v41 = vmin.f32 %v6010_v19, 16.0  ;;  %v4772_v26 = vmul.f32 0.5, %v13285_v28 }
 0x9cc   : > { %v7842_v13 = vclamps-f32 %v5887_v47, 1.0  ;;  %v5977_v7 = vadd.f32 0.05243302, %v5976_v62  ;;  %v5951_v57 = vmul.f32 %v5950_v11, %v13388_v12  ;;  %v6146_v45 = vmul.f32 %v6114_v44, %v4770_v59 }
 0x9cd   : > { %v6200_v27 = vpack.c.bf16 %v6149_v32, %v6147_v37  ;;  %v13463_v20 = vpop.eup %8474  ;;  %v6067_v34 = vmul.f32 %v6066_v10, %v13430_v17  ;;  %v6012_v24 = vmul.f32 2.1237322e-06, %v13460_v41  ;;  %v5936_v56 = vmul.f32 %v5935_v38, %v13388_v12 }
 0x9ce   : > { %v6116_v0 = vadd.f32 1.0, %v7842_v13  ;;  %v5994_v39 = vmul.f32 %v13463_v20, %v13444_v29  ;;  %v13471_v28 = vadd.f32 1.0, %v5951_v57  ;;  %v6056_v54 = vmul.f32 %v6055_v60, %v13430_v17 }
 0x9cf   : > { %6391 = vmatmul.bf16.gmra.mxu2 %v6200_v27  ;;  %v6068_v40 = vadd.f32 0.112945676, %v6067_v34  ;;  %v5978_v31 = vmul.f32 %v5977_v7, %v13342_v63  ;;  %v6023_v22 = vmul.f32 3.8918573e-05, %v13460_v41  ;;  %v6013_v23 = vadd.f32 0.00028619796, %v6012_v24 }
 0x9d0   : > { %v6148_v48 = vmul.f32 %v6116_v0, %v4772_v26  ;;  %v5995_v18 = vsub.f32 1.0, %v5994_v39  ;;  %8476 = vrcp.f32 %v13471_v28  ;;  %v5937_v14 = vadd.f32 0.05243302, %v5936_v56 }
 0x9d1   : > { %v6069_v9 = vmul.f32 %v6068_v40, %v13430_v17  ;;  %v6057_v51 = vadd.f32 0.05243302, %v6056_v54  ;;  %v6024_v19 = vadd.f32 0.001143296, %v6023_v22  ;;  %v5979_v47 = vadd.f32 0.18741608, %v5978_v31 }
 0x9d2   : > { %v6199_v43 = vpack.c.bf16 %v6148_v48, %v6146_v45  ;;  %v5996_v62 = vmul.f32 %v13463_v20, %v5995_v18  ;;  %v6014_v32 = vmul.f32 %v6013_v23, %v13460_v41  ;;  %v5938_v2 = vmul.f32 %v5937_v14, %v13388_v12 }
 0x9d3   : > { %v6070_v37 = vadd.f32 0.4994258, %v6069_v9  ;;  %v6025_v55 = vmul.f32 %v6024_v19, %v13460_v41  ;;  %v6058_v38 = vmul.f32 %v6057_v51, %v13430_v17  ;;  %v5980_v59 = vmul.f32 %v5979_v47, %v13342_v63 }
 0x9d4   : > { %6342 = vmatmul.bf16.gmra.mxu1 %v6199_v43  ;;  %v5997_v11 = vadd.f32 %v13463_v20, %v5996_v62  ;;  %vm5999_vm1 = vweird.f32 %v13463_v20  ;;  %v6015_v0 = vadd.f32 0.0036580483, %v6014_v32  ;;  %v6004_v27 = vand.u32 2147483648, %v13444_v29 }
 0x9d5   : > { %v6071_v44 = vmul.f32 %v6070_v37, %v13430_v17  ;;  %v6026_v60 = vadd.f32 0.014752088, %v6025_v55  ;;  %v5939_v57 = vadd.f32 0.18741608, %v5938_v2  ;;  %vm5998_vm2 = vweird.f32 %v13444_v29 }
 0x9d6   : > { %v13483_v13 = vpop.eup %8476  ;;  %v6002_v34 = vand.u32 2147483647, %v13444_v29  ;;  %v6059_v63 = vadd.f32 0.18741608, %v6058_v38  ;;  %v5981_v45 = vadd.f32 1.1283791, %v5980_v59  ;;  %vm6000_vm3 = vmor %vm5998_vm2, %vm5999_vm1  ;;  %v6016_v54 = vmul.f32 %v6015_v0, %v13460_v41 }
 0x9d7   : > { %v5954_v10 = vmul.f32 %v13483_v13, %v13471_v28  ;;  %v13491_v26 = vadd.f32 1.0, %v6071_v44  ;;  %v6027_v7 = vmul.f32 %v6026_v60, %v13460_v41  ;;  %v6001_v39 = vsel %vm6000_vm3, %v13463_v20, %v5997_v11 }
 0x9d8   : > { %v6005_v18 = vor.u32 1.1754944e-38, %v6004_v27  ;;  %v5940_v22 = vmul.f32 %v5939_v57, %v13388_v12  ;;  %vm6003_vm4 = vcmp.eq.f32.partialorder %v6002_v34, 8.507059e+37  ;;  %v6060_v43 = vmul.f32 %v6059_v63, %v13430_v17 }
 0x9d9   : > { %8478 = vrcp.f32 %v13491_v26  ;;  %v6028_v48 = vadd.f32 0.112945676, %v6027_v7  ;;  %v5955_v56 = vsub.f32 1.0, %v5954_v10  ;;  %v5982_v20 = vmul.f32 %v5981_v45, %v13308_v5 }
 0x9da   : > { %v6006_v14 = vsel %vm6003_vm4, %v6005_v18, %v6001_v39  ;;  %v6017_v47 = vadd.f32 0.05243302, %v6016_v54  ;;  %v5941_v32 = vadd.f32 1.1283791, %v5940_v22  ;;  %vm5958_vm5 = vweird.f32 %v13471_v28 }
 0x9db   : > { %v6029_v29 = vmul.f32 %v6028_v48, %v13460_v41  ;;  %v5956_v19 = vmul.f32 %v13483_v13, %v5955_v56  ;;  %v6007_v55 = vmul.f32 %v6006_v14, %v5982_v20  ;;  %v6061_v17 = vadd.f32 1.1283791, %v6060_v43 }
 0x9dc   : > { %vm5959_vm6 = vweird.f32 %v13483_v13  ;;  %v6084_v60 = vand.u32 2147483648, %v13491_v26  ;;  %v6018_v11 = vmul.f32 %v6017_v47, %v13460_v41  ;;  %v5962_v45 = vand.u32 2147483647, %v13471_v28 }
 0x9dd   : > { %v6030_v9 = vadd.f32 0.4994258, %v6029_v29  ;;  %v5957_v59 = vadd.f32 %v13483_v13, %v5956_v19  ;;  %v5964_v48 = vand.u32 2147483648, %v13471_v28  ;;  %vm13533_vm8 = vmor %vm5958_vm5, %vm5959_vm6  ;;  %vm6078_vm9 = vweird.f32 %v13491_v26 }
 0x9de   : > { %v6062_v54 = vmul.f32 %v6061_v17, %v13391_v6  ;;  %v4775_v14 = vmul.f32 0.5, %v13296_v8  ;;  %vm5963_vm12 = vcmp.eq.f32.partialorder %v5962_v45, 8.507059e+37 }
 0x9df   : > { %v8479_v51 = vpop.eup %8478  ;;  %v6031_v2 = vmul.f32 %v6030_v9, %v13460_v41  ;;  %v5961_v28 = vsel %vm13533_vm8, %v13483_v13, %v5957_v59  ;;  %v5942_v9 = vmul.f32 %v5941_v32, %v13360_v1  ;;  %v13564_v1 = vld [vmem:[%s14107_s12 + $0x1] ss:$0 sm:$0xff] }
 0x9e0   : > { %v6074_v12 = vmul.f32 %v8479_v51, %v13491_v26  ;;  %vm6079_vm7 = vweird.f32 %v8479_v51 }
 0x9e1   : > { %v13519_v10 = vadd.f32 1.0, %v6031_v2  ;;  %vm6080_vm10 = vmor %vm6078_vm9, %vm6079_vm7 }
 0x9e2   : > { %v6075_v38 = vsub.f32 1.0, %v6074_v12 }
 0x9e3   : > { %8480 = vrcp.f32 %v13519_v10  ;;  %vm6038_vm14 = vweird.f32 %v13519_v10 }
 0x9e4   : > { %v6328_v24 = vpop.f32.mrf.mxu1  ;;  %v6076_v27 = vmul.f32 %v8479_v51, %v6075_v38 }
 0x9e5   : > { %v6329_v40 = vadd.f32 %v13118_v3, %v6328_v24  ;;  %v7845_v24 = vclamps-f32 %v6007_v55, 1.0 }
 0x9e6   : > { %v6077_v39 = vadd.f32 %v8479_v51, %v6076_v27 }
 0x9e7   : > { %v6377_v31 = vpop.f32.mrf.mxu2  ;;  %v6119_v43 = vadd.f32 1.0, %v7845_v24 }
 0x9e8   : > { %v6378_v23 = vadd.f32 %v6377_v31, %v6329_v40  ;;  %v6085_v40 = vor.u32 1.1754944e-38, %v6084_v60  ;;  %v6019_v31 = vadd.f32 0.18741608, %v6018_v11  ;;  %v6081_v18 = vsel %vm6080_vm10, %v8479_v51, %v6077_v39 }
 0x9e9   : > { %v8481_v19 = vpop.eup %8480  ;;  %v6042_v11 = vand.u32 2147483647, %v13519_v10 }
 0x9ea   : > { %v6423_v62 = vpop.xlane.xlu2 %6422  ;;  %v13507_v37 = vadd.f32 %v6378_v23, %v11983_v46  ;;  %v6082_v46 = vand.u32 2147483647, %v13491_v26  ;;  %v6034_v2 = vmul.f32 %v8481_v19, %v13519_v10  ;;  %vm6039_vm13 = vweird.f32 %v8481_v19 }
 0x9eb   : > { %v6454_v44 = vmul.f32 %v6423_v62, %v14275_v21  ;;  %v6020_v62 = vmul.f32 %v6019_v31, %v13460_v41  ;;  %v4777_v41 = vmul.f32 0.5, %v13368_v50  ;;  %vm6040_vm15 = vmor %vm6038_vm14, %vm6039_vm13  ;;  %vm6043_vm0 = vcmp.eq.f32.partialorder %v6042_v11, 8.507059e+37  ;;  %v8048_v11 = vld [vmem:[#allocation19 + $0x38] sm:$0xff] }
 0x9ec   : > { %6434 = vadd.xlane.f32.xlu1 %v13507_v37  ;;  %v6330_v5 = vpop.f32.mrf.mxu1  ;;  %vm6083_vm11 = vcmp.eq.f32.partialorder %v6082_v46, 8.507059e+37  ;;  %v6035_v46 = vsub.f32 1.0, %v6034_v2  ;;  %6856 = vmatpush.bf16.msra.mxu3 %v8048_v11 }
 0x9ed   : > { %v13522_v0 = vsub.f32 %v13150_v49, %v6454_v44  ;;  %v6331_v57 = vadd.f32 %v13118_v3, %v6330_v5  ;;  %v6086_v23 = vsel %vm6083_vm11, %v6085_v40, %v6081_v18  ;;  %v6151_v44 = vmul.f32 %v6119_v43, %v4775_v14  ;;  %v14369_v40 = vld [vmem:[#allocation30_spill] sm:$0xff] }
 0x9ee   : > { %v6425_v7 = vpop.xlane.xlu0 %6424  ;;  %v6087_v20 = vmul.f32 %v6086_v23, %v6062_v54  ;;  %v6021_v59 = vadd.f32 1.1283791, %v6020_v62  ;;  %v6036_v50 = vmul.f32 %v8481_v19, %v6035_v46  ;;  %v14370_v23 = vld [vmem:[#allocation29_spill] sm:$0xff]  ;;  %v4774_v14 = vmul.f32 0.5, %v13347_v58 }
 0x9ef   : > { %v6379_v34 = vpop.f32.mrf.mxu2  ;;  %v6455_v63 = vmul.f32 %v6425_v7, %v14275_v21  ;;  %v6486_v3 = vmul.f32 %v13522_v0, %v13522_v0  ;;  %v6044_v7 = vand.u32 2147483648, %v13519_v10 }
 0x9f0   : > { %v6380_v22 = vadd.f32 %v6379_v34, %v6331_v57  ;;  %v7847_v17 = vclamps-f32 %v6087_v20, 1.0  ;;  %v6037_v34 = vadd.f32 %v8481_v19, %v6036_v50 }
 0x9f1   : > { %v13541_v56 = vsub.f32 %v13177_v15, %v6455_v63  ;;  %6502 = vadd.xlane.f32.xlu2 %v6486_v3  ;;  %v5965_v15 = vor.u32 1.1754944e-38, %v5964_v48  ;;  %v6022_v48 = vmul.f32 %v6021_v59, %v13439_v30  ;;  %v6045_v49 = vor.u32 1.1754944e-38, %v6044_v7 }
 0x9f2   : > { %v13559_v8 = vadd.f32 %v6380_v22, %v12004_v53  ;;  %v6121_v38 = vadd.f32 1.0, %v7847_v17  ;;  %v6041_v54 = vsel %vm6040_vm15, %v8481_v19, %v6037_v34 }
 0x9f3   : > { %v6487_v26 = vmul.f32 %v13541_v56, %v13541_v56  ;;  %v6427_v29 = vpop.xlane.xlu1 %6426  ;;  %v5966_v47 = vsel %vm5963_vm12, %v5965_v15, %v5961_v28  ;;  %v6046_v10 = vsel %vm6043_vm0, %v6045_v49, %v6041_v54  ;;  %v8045_v54 = vld [vmem:[#allocation19 + $0x20] sm:$0xff] }
 0x9f4   : > { %v6456_v6 = vmul.f32 %v6427_v29, %v14275_v21  ;;  %v6429_v51 = vpop.xlane.xlu2 %6428  ;;  %v5967_v5 = vmul.f32 %v5966_v47, %v5942_v9  ;;  %v6153_v57 = vmul.f32 %v6121_v38, %v4777_v41  ;;  %v6047_v18 = vmul.f32 %v6046_v10, %v6022_v48  ;;  %v8044_v10 = vld [vmem:[#allocation19 + $0x18] sm:$0xff] }
 0x9f5   : > { %6504 = vadd.xlane.f32.xlu0 %v6487_v26  ;;  %v6333_v13 = vpop.f32.mrf.mxu1  ;;  %v6457_v55 = vmul.f32 %v6429_v51, %v14275_v21  ;;  %v4776_v9 = vmul.f32 0.5, %v13412_v25 }
 0x9f6   : > { %v13554_v12 = vsub.f32 %v13188_v35, %v6456_v6  ;;  %v6334_v32 = vadd.f32 %v13564_v1, %v6333_v13  ;;  %v6202_v63 = vpack.c.bf16 %v6153_v57, %v6151_v44  ;;  %v7844_v45 = vclamps-f32 %v5967_v5, 1.0 }
 0x9f7   : > { %v13569_v35 = vsub.f32 %v13196_v42, %v6457_v55  ;;  %v7846_v43 = vclamps-f32 %v6047_v18, 1.0 }
 0x9f8   : > { %v6488_v53 = vmul.f32 %v13554_v12, %v13554_v12  ;;  %6396 = vmatmul.bf16.gmra.mxu2 %v6202_v63  ;;  %v6118_v29 = vadd.f32 1.0, %v7844_v45 }
 0x9f9   : > { %v6382_v60 = vpop.f32.mrf.mxu2  ;;  %v6489_v27 = vmul.f32 %v13569_v35, %v13569_v35  ;;  %6436 = vadd.xlane.f32.xlu2 %v13559_v8  ;;  %v6120_v20 = vadd.f32 1.0, %v7846_v43 }
 0x9fa   : > { %v6383_v42 = vadd.f32 %v6382_v60, %v6334_v32  ;;  %v6150_v51 = vmul.f32 %v6118_v29, %v4774_v14 }
 0x9fb   : > { %6508 = vadd.xlane.f32.xlu1 %v6489_v27  ;;  %v6152_v19 = vmul.f32 %v6120_v20, %v4776_v9  ;;  %v8043_v9 = vld [vmem:[#allocation19 + $0x10] sm:$0xff] }
 0x9fc   : > { %v13582_v31 = vadd.f32 %v6383_v42, %v14369_v40  ;;  %v8047_v42 = vld [vmem:[#allocation19 + $0x30] sm:$0xff] }
 0x9fd   : > { %6506 = vadd.xlane.f32.xlu0 %v6488_v53  ;;  %v6335_v24 = vpop.f32.mrf.mxu1  ;;  %v6201_v62 = vpack.c.bf16 %v6152_v19, %v6150_v51  ;;  %6857 = vmatpush.bf16.msra.mxu3 %v8047_v42 }
 0x9fe   : > { %v6336_v39 = vadd.f32 %v13564_v1, %v6335_v24 }
 0x9ff   : > { %6347 = vmatmul.bf16.gmra.mxu1 %v6201_v62 }
 0xa01   : > { %v6384_v22 = vpop.f32.mrf.mxu2  ;;  %6438 = vadd.xlane.f32.xlu2 %v13582_v31 }
 0xa02   : > { %v6385_v30 = vadd.f32 %v6384_v22, %v6336_v39 }
 0xa04   : > { %v13592_v6 = vadd.f32 %v6385_v30, %v14370_v23 }
 0xa06   : > { %v6431_v3 = vpop.xlane.xlu0 %6430  ;;  %6440 = vadd.xlane.f32.xlu0 %v13592_v6 }
 0xa07   : > { %v6458_v28 = vmul.f32 %v6431_v3, %v14275_v21 }
 0xa09   : > { %v13586_v26 = vsub.f32 %v13233_v4, %v6458_v28 }
 0xa0b   : > { %v6490_v15 = vmul.f32 %v13586_v26, %v13586_v26 }
 0xa0d   : > { %6510 = vadd.xlane.f32.xlu1 %v6490_v15 }
 0xa0e   : > { %v6433_v13 = vpop.xlane.xlu1 %6432 }
 0xa0f   : > { %v6459_v4 = vmul.f32 %v6433_v13, %v14275_v21 }
 0xa11   : > { %v13599_v47 = vsub.f32 %v13248_v61, %v6459_v4 }
 0xa13   : > { %v6491_v55 = vmul.f32 %v13599_v47, %v13599_v47 }
 0xa15   : > { %6512 = vadd.xlane.f32.xlu2 %v6491_v55 }
 0xa18   : > { %v6387_v25 = vpop.f32.mrf.mxu2 }
 0xa20   : > { %v6389_v41 = vpop.f32.mrf.mxu2 }
 0xa21   : > { %v6338_v58 = vpop.f32.mrf.mxu1 }
 0xa22   : > { %v6339_v17 = vadd.f32 %v13564_v1, %v6338_v58  ;;  %v8042_v58 = vld [vmem:[#allocation19 + $0x8] sm:$0xff] }
 0xa24   : > { %v6388_v2 = vadd.f32 %v6387_v25, %v6339_v17 }
 0xa26   : > { %v13605_v32 = vadd.f32 %v6388_v2, %v12294_v36 }
 0xa28   : > { %6442 = vadd.xlane.f32.xlu0 %v13605_v32 }
 0xa29   : > { %v6340_v44 = vpop.f32.mrf.mxu1 }
 0xa2a   : > { %v6341_v61 = vadd.f32 %v13564_v1, %v6340_v44 }
 0xa2c   : > { %v6390_v5 = vadd.f32 %v6389_v41, %v6341_v61 }
 0xa2e   : > { %v13610_v38 = vadd.f32 %v6390_v5, %v12298_v16 }
 0xa30   : > { %6444 = vadd.xlane.f32.xlu1 %v13610_v38 }
 0xa51   : > { %v6343_v46 = vpop.f32.mrf.mxu1 }
 0xa52   : > { %v6344_v60 = vadd.f32 %v13564_v1, %v6343_v46  ;;  %v6392_v53 = vpop.f32.mrf.mxu2  ;;  %v8041_v46 = vld [vmem:[#allocation19] sm:$0xff] }
 0xa54   : > { %v6393_v59 = vadd.f32 %v6392_v53, %v6344_v60 }
 0xa56   : > { %v13615_v36 = vadd.f32 %v6393_v59, %v12653_v33  ;;  %v8046_v33 = vld [vmem:[#allocation19 + $0x28] sm:$0xff] }
 0xa57   : > { %6858 = vmatpush.bf16.msra.mxu3 %v8046_v33 }
 0xa58   : > { %6446 = vadd.xlane.f32.xlu1 %v13615_v36 }
 0xa59   : > { %v6345_v57 = vpop.f32.mrf.mxu1 }
 0xa5a   : > { %v6346_v50 = vadd.f32 %v13564_v1, %v6345_v57  ;;  %v6394_v63 = vpop.f32.mrf.mxu2 }
 0xa5b   : > { %6859 = vmatpush.bf16.msra.mxu3 %v8045_v54 }
 0xa5c   : > { %v6395_v45 = vadd.f32 %v6394_v63, %v6346_v50 }
 0xa5e   : > { %v13628_v3 = vadd.f32 %v6395_v45, %v12655_v52 }
 0xa5f   : > { %v6435_v7 = vpop.xlane.xlu1 %6434  ;;  %6860 = vmatpush.bf16.msra.mxu3 %v8044_v10 }
 0xa60   : > { %v6460_v27 = vmul.f32 %v6435_v7, %v14275_v21 }
 0xa62   : > { %v13620_v16 = vsub.f32 %v13507_v37, %v6460_v27  ;;  %v13654_v27 = vld [vmem:[%s14287_s27 + $0x1] ss:$0 sm:$0xff] }
 0xa63   : > { %6861 = vmatpush.bf16.msra.mxu3 %v8043_v9 }
 0xa64   : > { %v6492_v34 = vmul.f32 %v13620_v16, %v13620_v16  ;;  %v6503_v24 = vpop.xlane.xlu2 %6502 }
 0xa65   : > { %v6534_v48 = vmul.f32 %v6503_v24, %v14275_v21 }
 0xa66   : > { %6514 = vadd.xlane.f32.xlu2 %v6492_v34 }
 0xa67   : > { %v6550_v39 = vadd.f32 1e-05, %v6534_v48  ;;  %6862 = vmatpush.bf16.msra.mxu3 %v8042_v58 }
 0xa68   : > { %v6505_v49 = vpop.xlane.xlu0 %6504 }
 0xa69   : > { %v6535_v37 = vmul.f32 %v6505_v49, %v14275_v21  ;;  %8482 = vrsqrt.f32 %v6550_v39  ;;  %vm6572_vm2 = vweird.f32 %v6550_v39 }
 0xa6b   : > { %v6551_v40 = vadd.f32 1e-05, %v6535_v37  ;;  %6863 = vmatpush.bf16.msra.mxu3 %v8041_v46 }
 0xa6c   : > { %v6437_v28 = vpop.xlane.xlu2 %6436 }
 0xa6d   : > { %8484 = vrsqrt.f32 %v6551_v40  ;;  %v6461_v18 = vmul.f32 %v6437_v28, %v14275_v21  ;;  %vm6582_vm5 = vweird.f32 %v6551_v40 }
 0xa6e   : > { %6448 = vadd.xlane.f32.xlu2 %v13628_v3  ;;  %v6509_v22 = vpop.xlane.xlu1 %6508 }
 0xa6f   : > { %v6537_v29 = vmul.f32 %v6509_v22, %v14275_v21  ;;  %v8483_v43 = vpop.eup %8482  ;;  %v13634_v52 = vsub.f32 %v13559_v8, %v6461_v18 }
 0xa70   : > { %v6507_v30 = vpop.xlane.xlu0 %6506  ;;  %v6567_v23 = vmul.f32 %v8483_v43, %v6550_v39  ;;  %vm6573_vm1 = vweird.f32 %v8483_v43  ;;  %v13671_v39 = vld [vmem:[%s14288_s23 + $0x1] ss:$0 sm:$0xff] }
 0xa71   : > { %v6536_v15 = vmul.f32 %v6507_v30, %v14275_v21  ;;  %v13637_v14 = vadd.f32 1e-05, %v6537_v29  ;;  %v6493_v13 = vmul.f32 %v13634_v52, %v13634_v52  ;;  %vm6574_vm4 = vmor %vm6572_vm2, %vm6573_vm1 }
 0xa72   : > { %v6568_v51 = vmul.f32 %v8483_v43, %v6567_v23 }
 0xa73   : > { %v8485_v20 = vpop.eup %8484  ;;  %v13641_v4 = vadd.f32 1e-05, %v6536_v15  ;;  %8486 = vrsqrt.f32 %v13637_v14  ;;  %6516 = vadd.xlane.f32.xlu0 %v6493_v13  ;;  %vm6602_vm9 = vweird.f32 %v13637_v14 }
 0xa74   : > { %v6577_v19 = vmul.f32 %v8485_v20, %v6551_v40  ;;  %v6569_v8 = vmul.f32 0.5, %v6568_v51  ;;  %v6439_v55 = vpop.xlane.xlu2 %6438  ;;  %vm6583_vm3 = vweird.f32 %v8485_v20 }
 0xa75   : > { %8488 = vrsqrt.f32 %v13641_v4  ;;  %v6462_v25 = vmul.f32 %v6439_v55, %v14275_v21  ;;  %vm6584_vm6 = vmor %vm6582_vm5, %vm6583_vm3  ;;  %vm6592_vm10 = vweird.f32 %v13641_v4 }
 0xa76   : > { %v6578_v62 = vmul.f32 %v8485_v20, %v6577_v19  ;;  %v6570_v17 = vsub.f32 1.5, %v6569_v8 }
 0xa77   : > { %v13647_v61 = vsub.f32 %v13582_v31, %v6462_v25 }
 0xa78   : > { %v6579_v2 = vmul.f32 0.5, %v6578_v62  ;;  %v6571_v53 = vmul.f32 %v8483_v43, %v6570_v17 }
 0xa79   : > { %v6441_v41 = vpop.xlane.xlu0 %6440  ;;  %v8487_v60 = vpop.eup %8486  ;;  %v6494_v31 = vmul.f32 %v13647_v61, %v13647_v61 }
 0xa7a   : > { %v6580_v59 = vsub.f32 1.5, %v6579_v2  ;;  %v6463_v11 = vmul.f32 %v6441_v41, %v14275_v21  ;;  %v6597_v57 = vmul.f32 %v8487_v60, %v13637_v14  ;;  %v6575_v42 = vsel %vm6574_vm4, %v8483_v43, %v6571_v53 }
 0xa7b   : > { %v8489_v7 = vpop.eup %8488  ;;  %v6726_v63 = vmul.f32 %v6575_v42, %v13522_v0  ;;  %6518 = vadd.xlane.f32.xlu0 %v6494_v31  ;;  %vm6603_vm7 = vweird.f32 %v8487_v60  ;;  %v6397_v58 = vpop.f32.mrf.mxu2 }
 0xa7c   : > { %v6581_v34 = vmul.f32 %v8485_v20, %v6580_v59  ;;  %v6587_v33 = vmul.f32 %v8489_v7, %v13641_v4  ;;  %v6598_v24 = vmul.f32 %v8487_v60, %v6597_v57  ;;  %v13665_v45 = vsub.f32 %v13592_v6, %v6463_v11  ;;  %vm6604_vm11 = vmor %vm6602_vm9, %vm6603_vm7  ;;  %v6348_v55 = vpop.f32.mrf.mxu1 }
 0xa7d   : > { %v6745_v37 = vmul.f32 %v13654_v27, %v6726_v63  ;;  %vm6593_vm8 = vweird.f32 %v8489_v7  ;;  %v6349_v25 = vadd.f32 %v13564_v1, %v6348_v55 }
 0xa7e   : > { %v6585_v48 = vsel %vm6584_vm6, %v8485_v20, %v6581_v34  ;;  %v6588_v49 = vmul.f32 %v8489_v7, %v6587_v33  ;;  %v6599_v0 = vmul.f32 0.5, %v6598_v24  ;;  %v6495_v40 = vmul.f32 %v13665_v45, %v13665_v45  ;;  %vm6594_vm12 = vmor %vm6592_vm10, %vm6593_vm8 }
 0xa7f   : > { %v6727_v54 = vmul.f32 %v6585_v48, %v13541_v56  ;;  %v6764_v15 = vadd.f32 %v13671_v39, %v6745_v37  ;;  %v6398_v2 = vadd.f32 %v6397_v58, %v6349_v25  ;;  %v14372_v48 = vld [vmem:[#allocation32_spill] sm:$0xff] }
 0xa80   : > { %v6511_v44 = vpop.xlane.xlu1 %6510  ;;  %v6589_v6 = vmul.f32 0.5, %v6588_v49  ;;  %v6600_v22 = vsub.f32 1.5, %v6599_v0  ;;  %6520 = vadd.xlane.f32.xlu1 %v6495_v40 }
 0xa81   : > { %v6538_v5 = vmul.f32 %v6511_v44, %v14275_v21  ;;  %v6746_v18 = vmul.f32 %v13654_v27, %v6727_v54 }
 0xa82   : > { %v6590_v30 = vsub.f32 1.5, %v6589_v6  ;;  %v6601_v23 = vmul.f32 %v8487_v60, %v6600_v22 }
 0xa83   : > { %v13660_v50 = vadd.f32 1e-05, %v6538_v5  ;;  %v6765_v56 = vadd.f32 %v13671_v39, %v6746_v18  ;;  %v14371_v5 = vld [vmem:[#allocation31_spill] sm:$0xff]  ;;  %v6399_v42 = vpop.f32.mrf.mxu2 }
 0xa84   : > { %v6591_v9 = vmul.f32 %v8489_v7, %v6590_v30  ;;  %v6605_v13 = vsel %vm6604_vm11, %v8487_v60, %v6601_v23  ;;  %v13689_v46 = vadd.f32 %v6398_v2, %v14371_v5 }
 0xa85   : > { %8490 = vrsqrt.f32 %v13660_v50  ;;  %v6796_v51 = vpack.c.bf16 %v6765_v56, %v6764_v15  ;;  %v6729_v62 = vmul.f32 %v6605_v13, %v13569_v35  ;;  %vm6612_vm0 = vweird.f32 %v13660_v50 }
 0xa86   : > { %v6595_v19 = vsel %vm6594_vm12, %v8489_v7, %v6591_v9  ;;  %6450 = vadd.xlane.f32.xlu2 %v13689_v46  ;;  %v6350_v7 = vpop.f32.mrf.mxu1 }
 0xa87   : > { %6864 = vmatmul.bf16.vlgmr.msra.gmra.mxu3 %v6796_v51  ;;  %v6728_v14 = vmul.f32 %v6595_v19, %v13554_v12  ;;  %v6748_v41 = vmul.f32 %v13654_v27, %v6729_v62  ;;  %v6351_v12 = vadd.f32 %v13564_v1, %v6350_v7 }
 0xa88   : > { %v6513_v28 = vpop.xlane.xlu2 %6512 }
 0xa89   : > { %v6539_v10 = vmul.f32 %v6513_v28, %v14275_v21  ;;  %v6747_v53 = vmul.f32 %v13654_v27, %v6728_v14  ;;  %v6767_v11 = vadd.f32 %v13671_v39, %v6748_v41  ;;  %v6400_v33 = vadd.f32 %v6399_v42, %v6351_v12 }
 0xa8b   : > { %v6555_v29 = vadd.f32 1e-05, %v6539_v10  ;;  %v8491_v43 = vpop.eup %8490  ;;  %v6766_v57 = vadd.f32 %v13671_v39, %v6747_v53  ;;  %v13698_v49 = vadd.f32 %v6400_v33, %v14372_v48 }
 0xa8c   : > { %v6607_v20 = vmul.f32 %v8491_v43, %v13660_v50  ;;  %vm6613_vm14 = vweird.f32 %v8491_v43 }
 0xa8d   : > { %8492 = vrsqrt.f32 %v6555_v29  ;;  %vm6622_vm15 = vweird.f32 %v6555_v29  ;;  %v6797_v24 = vpack.c.bf16 %v6767_v11, %v6766_v57  ;;  %vm6614_vm2 = vmor %vm6612_vm0, %vm6613_vm14  ;;  %6452 = vadd.xlane.f32.xlu0 %v13698_v49 }
 0xa8e   : > { %v6608_v8 = vmul.f32 %v8491_v43, %v6607_v20 }
 0xa90   : > { %v6609_v4 = vmul.f32 0.5, %v6608_v8 }
 0xa92   : > { %v6610_v35 = vsub.f32 1.5, %v6609_v4 }
 0xa93   : > { %v8493_v17 = vpop.eup %8492 }
 0xa94   : > { %v6617_v44 = vmul.f32 %v8493_v17, %v6555_v29  ;;  %vm6623_vm13 = vweird.f32 %v8493_v17  ;;  %v6611_v34 = vmul.f32 %v8491_v43, %v6610_v35 }
 0xa95   : > { %vm6624_vm1 = vmor %vm6622_vm15, %vm6623_vm13 }
 0xa96   : > { %v6618_v60 = vmul.f32 %v8493_v17, %v6617_v44  ;;  %v6615_v1 = vsel %vm6614_vm2, %v8491_v43, %v6611_v34 }
 0xa97   : > { %6869 = vmatmul.bf16.gmra.mxu3 %v6797_v24  ;;  %v6730_v28 = vmul.f32 %v6615_v1, %v13586_v26 }
 0xa98   : > { %v6619_v59 = vmul.f32 0.5, %v6618_v60 }
 0xa99   : > { %v6749_v18 = vmul.f32 %v13654_v27, %v6730_v28 }
 0xa9a   : > { %v6620_v31 = vsub.f32 1.5, %v6619_v59 }
 0xa9b   : > { %v6443_v54 = vpop.xlane.xlu0 %6442  ;;  %v6768_v26 = vadd.f32 %v13671_v39, %v6749_v18 }
 0xa9c   : > { %v6621_v63 = vmul.f32 %v8493_v17, %v6620_v31  ;;  %v6464_v0 = vmul.f32 %v6443_v54, %v14275_v21 }
 0xa9e   : > { %v6625_v37 = vsel %vm6624_vm1, %v8493_v17, %v6621_v63  ;;  %v13705_v6 = vsub.f32 %v13605_v32, %v6464_v0 }
 0xa9f   : > { %v6731_v40 = vmul.f32 %v6625_v37, %v13599_v47 }
 0xaa0   : > { %v6496_v50 = vmul.f32 %v13705_v6, %v13705_v6 }
 0xaa1   : > { %v6750_v10 = vmul.f32 %v13654_v27, %v6731_v40 }
 0xaa2   : > { %6522 = vadd.xlane.f32.xlu1 %v6496_v50 }
 0xaa3   : > { %v6445_v22 = vpop.xlane.xlu1 %6444  ;;  %v6769_v29 = vadd.f32 %v13671_v39, %v6750_v10 }
 0xaa4   : > { %v6465_v30 = vmul.f32 %v6445_v22, %v14275_v21 }
 0xaa5   : > { %v6798_v43 = vpack.c.bf16 %v6769_v29, %v6768_v26 }
 0xaa6   : > { %v13714_v47 = vsub.f32 %v13610_v38, %v6465_v30 }
 0xaa7   : > { %6874 = vmatmul.bf16.gmra.mxu3 %v6798_v43 }
 0xaa8   : > { %v6497_v32 = vmul.f32 %v13714_v47, %v13714_v47 }
 0xaaa   : > { %6524 = vadd.xlane.f32.xlu2 %v6497_v32 }
 0xacb   : > { %v6447_v15 = vpop.xlane.xlu1 %6446 }
 0xacc   : > { %v6466_v56 = vmul.f32 %v6447_v15, %v14275_v21 }
 0xace   : > { %v13721_v23 = vsub.f32 %v13615_v36, %v6466_v56 }
 0xad0   : > { %v6498_v9 = vmul.f32 %v13721_v23, %v13721_v23 }
 0xad2   : > { %6526 = vadd.xlane.f32.xlu0 %v6498_v9  ;;  %v13750_v9 = vld [vmem:[%s14373_s26] ss:$0 sm:$0xff]  ;;  %s7294_s26 = sshll.u32 %s13951_s22, 4  ;;  %s7295_s26 = int_to_ptr.vmem [resolvable:$true] %s7294_s26 }
 0xad9   : > { %v6515_v20 = vpop.xlane.xlu2 %6514 }
 0xada   : > { %v6540_v38 = vmul.f32 %v6515_v20, %v14275_v21 }
 0xadc   : > { %v6556_v13 = vadd.f32 1e-05, %v6540_v38 }
 0xade   : > { %8494 = vrsqrt.f32 %v6556_v13  ;;  %vm6632_vm4 = vweird.f32 %v6556_v13 }
 0xae1   : > { %v6449_v51 = vpop.xlane.xlu2 %6448 }
 0xae2   : > { %v6467_v19 = vmul.f32 %v6449_v51, %v14275_v21 }
 0xae4   : > { %v8495_v8 = vpop.eup %8494  ;;  %v13728_v62 = vsub.f32 %v13628_v3, %v6467_v19 }
 0xae5   : > { %v6627_v55 = vmul.f32 %v8495_v8, %v6556_v13  ;;  %vm6633_vm3 = vweird.f32 %v8495_v8 }
 0xae6   : > { %v6499_v36 = vmul.f32 %v13728_v62, %v13728_v62  ;;  %v6517_v25 = vpop.xlane.xlu0 %6516  ;;  %vm6634_vm5 = vmor %vm6632_vm4, %vm6633_vm3 }
 0xae7   : > { %v6628_v58 = vmul.f32 %v8495_v8, %v6627_v55  ;;  %v6541_v14 = vmul.f32 %v6517_v25, %v14275_v21 }
 0xae8   : > { %6528 = vadd.xlane.f32.xlu1 %v6499_v36 }
 0xae9   : > { %v6557_v17 = vadd.f32 1e-05, %v6541_v14  ;;  %v6629_v4 = vmul.f32 0.5, %v6628_v58 }
 0xaeb   : > { %8496 = vrsqrt.f32 %v6557_v17  ;;  %v6630_v2 = vsub.f32 1.5, %v6629_v4  ;;  %vm6642_vm7 = vweird.f32 %v6557_v17 }
 0xaed   : > { %v6631_v3 = vmul.f32 %v8495_v8, %v6630_v2 }
 0xaee   : > { %v6519_v44 = vpop.xlane.xlu0 %6518 }
 0xaef   : > { %v6542_v41 = vmul.f32 %v6519_v44, %v14275_v21  ;;  %v6635_v12 = vsel %vm6634_vm5, %v8495_v8, %v6631_v3 }
 0xaf0   : > { %v6732_v34 = vmul.f32 %v6635_v12, %v13620_v16 }
 0xaf1   : > { %v8497_v5 = vpop.eup %8496  ;;  %v6558_v60 = vadd.f32 1e-05, %v6542_v41 }
 0xaf2   : > { %v6637_v53 = vmul.f32 %v8497_v5, %v6557_v17  ;;  %vm6643_vm6 = vweird.f32 %v8497_v5  ;;  %v6751_v54 = vmul.f32 %v13654_v27, %v6732_v34 }
 0xaf3   : > { %v6521_v35 = vpop.xlane.xlu1 %6520  ;;  %8498 = vrsqrt.f32 %v6558_v60  ;;  %vm6644_vm8 = vmor %vm6642_vm7, %vm6643_vm6  ;;  %vm6652_vm10 = vweird.f32 %v6558_v60 }
 0xaf4   : > { %v6543_v59 = vmul.f32 %v6521_v35, %v14275_v21  ;;  %v6638_v11 = vmul.f32 %v8497_v5, %v6637_v53  ;;  %v6770_v22 = vadd.f32 %v13671_v39, %v6751_v54 }
 0xaf6   : > { %v6559_v7 = vadd.f32 1e-05, %v6543_v59  ;;  %v6639_v31 = vmul.f32 0.5, %v6638_v11 }
 0xaf8   : > { %8500 = vrsqrt.f32 %v6559_v7  ;;  %v6640_v57 = vsub.f32 1.5, %v6639_v31  ;;  %vm6662_vm13 = vweird.f32 %v6559_v7 }
 0xaf9   : > { %v8499_v42 = vpop.eup %8498  ;;  %v6451_v50 = vpop.xlane.xlu2 %6450 }
 0xafa   : > { %v6641_v33 = vmul.f32 %v8497_v5, %v6640_v57  ;;  %v6647_v63 = vmul.f32 %v8499_v42, %v6558_v60  ;;  %vm6653_vm9 = vweird.f32 %v8499_v42  ;;  %v6468_v16 = vmul.f32 %v6451_v50, %v14275_v21 }
 0xafb   : > { %vm6654_vm11 = vmor %vm6652_vm10, %vm6653_vm9 }
 0xafc   : > { %v6645_v24 = vsel %vm6644_vm8, %v8497_v5, %v6641_v33  ;;  %v6648_v48 = vmul.f32 %v8499_v42, %v6647_v63 }
 0xafd   : > { %v6733_v1 = vmul.f32 %v6645_v24, %v13634_v52  ;;  %v13743_v52 = vsub.f32 %v13689_v46, %v6468_v16 }
 0xafe   : > { %v8501_v37 = vpop.eup %8500  ;;  %v6649_v0 = vmul.f32 0.5, %v6648_v48 }
 0xaff   : > { %v6657_v40 = vmul.f32 %v8501_v37, %v6559_v7  ;;  %v6752_v28 = vmul.f32 %v13654_v27, %v6733_v1  ;;  %vm6663_vm12 = vweird.f32 %v8501_v37  ;;  %v6500_v56 = vmul.f32 %v13743_v52, %v13743_v52 }
 0xb00   : > { %v6650_v10 = vsub.f32 1.5, %v6649_v0  ;;  %vm6664_vm14 = vmor %vm6662_vm13, %vm6663_vm12  ;;  %v6453_v13 = vpop.xlane.xlu0 %6452 }
 0xb01   : > { %v6658_v18 = vmul.f32 %v8501_v37, %v6657_v40  ;;  %v6771_v30 = vadd.f32 %v13671_v39, %v6752_v28  ;;  %6530 = vadd.xlane.f32.xlu2 %v6500_v56  ;;  %v6469_v8 = vmul.f32 %v6453_v13, %v14275_v21 }
 0xb02   : > { %v6651_v29 = vmul.f32 %v8499_v42, %v6650_v10 }
 0xb03   : > { %v6659_v26 = vmul.f32 0.5, %v6658_v18  ;;  %v6799_v32 = vpack.c.bf16 %v6771_v30, %v6770_v22  ;;  %v13759_v36 = vsub.f32 %v13698_v49, %v6469_v8 }
 0xb04   : > { %v6655_v43 = vsel %vm6654_vm11, %v8499_v42, %v6651_v29 }
 0xb05   : > { %v6660_v15 = vsub.f32 1.5, %v6659_v26  ;;  %6879 = vmatmul.bf16.gmra.mxu3 %v6799_v32  ;;  %v6734_v38 = vmul.f32 %v6655_v43, %v13647_v61  ;;  %v6501_v25 = vmul.f32 %v13759_v36, %v13759_v36 }
 0xb07   : > { %v6661_v20 = vmul.f32 %v8501_v37, %v6660_v15  ;;  %v6753_v58 = vmul.f32 %v13654_v27, %v6734_v38  ;;  %6532 = vadd.xlane.f32.xlu0 %v6501_v25 }
 0xb09   : > { %v6665_v46 = vsel %vm6664_vm14, %v8501_v37, %v6661_v20  ;;  %v6772_v4 = vadd.f32 %v13671_v39, %v6753_v58 }
 0xb0a   : > { %v6865_v51 = vpop.f32.mrf.mxu3  ;;  %v6735_v19 = vmul.f32 %v6665_v46, %v13665_v45 }
 0xb0b   : > { %v13756_v55 = vadd.f32 %v13750_v9, %v6865_v51 }
 0xb0c   : > { %v6754_v61 = vmul.f32 %v13654_v27, %v6735_v19 }
 0xb0d   : > { %6907 = vadd.xlane.f32.xlu1 %v13756_v55 }
 0xb0e   : > { %v6773_v14 = vadd.f32 %v13671_v39, %v6754_v61 }
 0xb10   : > { %v6800_v44 = vpack.c.bf16 %v6773_v14, %v6772_v4 }
 0xb12   : > { %v6867_v2 = vpop.f32.mrf.mxu3 }
 0xb13   : > { %v13770_v41 = vadd.f32 %v13750_v9, %v6867_v2 }
 0xb15   : > { %v6523_v45 = vpop.xlane.xlu1 %6522  ;;  %6909 = vadd.xlane.f32.xlu2 %v13770_v41  ;;  %6884 = vmatmul.bf16.gmra.mxu3 %v6800_v44 }
 0xb16   : > { %v6544_v17 = vmul.f32 %v6523_v45, %v14275_v21 }
 0xb18   : > { %v6560_v49 = vadd.f32 1e-05, %v6544_v17 }
 0xb1a   : > { %8502 = vrsqrt.f32 %v6560_v49  ;;  %v6870_v3 = vpop.f32.mrf.mxu3  ;;  %vm6672_vm0 = vweird.f32 %v6560_v49 }
 0xb1b   : > { %v13775_v59 = vadd.f32 %v13750_v9, %v6870_v3 }
 0xb1d   : > { %v6525_v5 = vpop.xlane.xlu2 %6524  ;;  %6911 = vadd.xlane.f32.xlu0 %v13775_v59 }
 0xb1e   : > { %v6545_v60 = vmul.f32 %v6525_v5, %v14275_v21 }
 0xb20   : > { %v8503_v53 = vpop.eup %8502  ;;  %v6561_v35 = vadd.f32 1e-05, %v6545_v60 }
 0xb21   : > { %v6667_v11 = vmul.f32 %v8503_v53, %v6560_v49  ;;  %vm6673_vm15 = vweird.f32 %v8503_v53 }
 0xb22   : > { %8504 = vrsqrt.f32 %v6561_v35  ;;  %v6872_v57 = vpop.f32.mrf.mxu3  ;;  %vm6674_vm1 = vmor %vm6672_vm0, %vm6673_vm15  ;;  %vm6682_vm3 = vweird.f32 %v6561_v35 }
 0xb23   : > { %v6668_v7 = vmul.f32 %v8503_v53, %v6667_v11  ;;  %v13779_v34 = vadd.f32 %v13750_v9, %v6872_v57 }
 0xb25   : > { %v6669_v12 = vmul.f32 0.5, %v6668_v7  ;;  %6913 = vadd.xlane.f32.xlu1 %v13779_v34 }
 0xb27   : > { %v6670_v31 = vsub.f32 1.5, %v6669_v12 }
 0xb28   : > { %v8505_v42 = vpop.eup %8504 }
 0xb29   : > { %v6671_v33 = vmul.f32 %v8503_v53, %v6670_v31  ;;  %v6677_v63 = vmul.f32 %v8505_v42, %v6561_v35  ;;  %vm6683_vm2 = vweird.f32 %v8505_v42 }
 0xb2a   : > { %v6875_v54 = vpop.f32.mrf.mxu3  ;;  %vm6684_vm4 = vmor %vm6682_vm3, %vm6683_vm2 }
 0xb2b   : > { %v6678_v24 = vmul.f32 %v8505_v42, %v6677_v63  ;;  %v6675_v48 = vsel %vm6674_vm1, %v8503_v53, %v6671_v33  ;;  %v13784_v40 = vadd.f32 %v13750_v9, %v6875_v54 }
 0xb2c   : > { %v6736_v0 = vmul.f32 %v6675_v48, %v13705_v6 }
 0xb2d   : > { %v6679_v37 = vmul.f32 0.5, %v6678_v24  ;;  %6915 = vadd.xlane.f32.xlu2 %v13784_v40 }
 0xb2e   : > { %v6755_v18 = vmul.f32 %v13654_v27, %v6736_v0 }
 0xb2f   : > { %v6680_v1 = vsub.f32 1.5, %v6679_v37 }
 0xb30   : > { %v6774_v30 = vadd.f32 %v13671_v39, %v6755_v18 }
 0xb31   : > { %v6681_v28 = vmul.f32 %v8505_v42, %v6680_v1 }
 0xb32   : > { %v6877_v22 = vpop.f32.mrf.mxu3 }
 0xb33   : > { %v6685_v50 = vsel %vm6684_vm4, %v8505_v42, %v6681_v28  ;;  %v13793_v29 = vadd.f32 %v13750_v9, %v6877_v22 }
 0xb34   : > { %v6737_v10 = vmul.f32 %v6685_v50, %v13714_v47 }
 0xb35   : > { %6917 = vadd.xlane.f32.xlu0 %v13793_v29 }
 0xb36   : > { %v6756_v16 = vmul.f32 %v13654_v27, %v6737_v10 }
 0xb38   : > { %v6775_v6 = vadd.f32 %v13671_v39, %v6756_v16 }
 0xb3a   : > { %v6801_v26 = vpack.c.bf16 %v6775_v6, %v6774_v30 }
 0xb3c   : > { %6889 = vmatmul.bf16.gmra.mxu3 %v6801_v26 }
 0xb45   : > { %v6527_v32 = vpop.xlane.xlu0 %6526 }
 0xb46   : > { %v6546_v43 = vmul.f32 %v6527_v32, %v14275_v21 }
 0xb48   : > { %v6562_v47 = vadd.f32 1e-05, %v6546_v43 }
 0xb4a   : > { %8506 = vrsqrt.f32 %v6562_v47  ;;  %vm6692_vm6 = vweird.f32 %v6562_v47 }
 0xb50   : > { %v8507_v15 = vpop.eup %8506 }
 0xb51   : > { %v6687_v56 = vmul.f32 %v8507_v15, %v6562_v47  ;;  %vm6693_vm5 = vweird.f32 %v8507_v15 }
 0xb52   : > { %vm6694_vm7 = vmor %vm6692_vm6, %vm6693_vm5 }
 0xb53   : > { %v6688_v20 = vmul.f32 %v8507_v15, %v6687_v56 }
 0xb55   : > { %v6689_v51 = vmul.f32 0.5, %v6688_v20 }
 0xb57   : > { %v6690_v19 = vsub.f32 1.5, %v6689_v51 }
 0xb59   : > { %v6691_v58 = vmul.f32 %v8507_v15, %v6690_v19 }
 0xb5b   : > { %v6529_v38 = vpop.xlane.xlu1 %6528  ;;  %v6695_v14 = vsel %vm6694_vm7, %v8507_v15, %v6691_v58 }
 0xb5c   : > { %v6547_v46 = vmul.f32 %v6529_v38, %v14275_v21  ;;  %v6738_v4 = vmul.f32 %v6695_v14, %v13721_v23 }
 0xb5e   : > { %v6563_v13 = vadd.f32 1e-05, %v6547_v46  ;;  %v6757_v5 = vmul.f32 %v13654_v27, %v6738_v4 }
 0xb60   : > { %8508 = vrsqrt.f32 %v6563_v13  ;;  %vm6702_vm9 = vweird.f32 %v6563_v13  ;;  %v6776_v3 = vadd.f32 %v13671_v39, %v6757_v5 }
 0xb66   : > { %v8509_v8 = vpop.eup %8508 }
 0xb67   : > { %v6697_v61 = vmul.f32 %v8509_v8, %v6563_v13  ;;  %vm6703_vm8 = vweird.f32 %v8509_v8 }
 0xb68   : > { %vm6704_vm10 = vmor %vm6702_vm9, %vm6703_vm8 }
 0xb69   : > { %v6698_v25 = vmul.f32 %v8509_v8, %v6697_v61 }
 0xb6b   : > { %v6699_v45 = vmul.f32 0.5, %v6698_v25 }
 0xb6d   : > { %v6700_v17 = vsub.f32 1.5, %v6699_v45 }
 0xb6f   : > { %v6701_v2 = vmul.f32 %v8509_v8, %v6700_v17 }
 0xb71   : > { %v6705_v49 = vsel %vm6704_vm10, %v8509_v8, %v6701_v2 }
 0xb72   : > { %v6739_v44 = vmul.f32 %v6705_v49, %v13728_v62 }
 0xb74   : > { %v6758_v60 = vmul.f32 %v13654_v27, %v6739_v44  ;;  %v6531_v11 = vpop.xlane.xlu2 %6530 }
 0xb75   : > { %v6548_v7 = vmul.f32 %v6531_v11, %v14275_v21 }
 0xb76   : > { %v6777_v53 = vadd.f32 %v13671_v39, %v6758_v60 }
 0xb77   : > { %v6564_v23 = vadd.f32 1e-05, %v6548_v7 }
 0xb78   : > { %v6802_v35 = vpack.c.bf16 %v6777_v53, %v6776_v3 }
 0xb79   : > { %8510 = vrsqrt.f32 %v6564_v23  ;;  %vm6712_vm12 = vweird.f32 %v6564_v23 }
 0xb7a   : > { %6894 = vmatmul.bf16.gmra.mxu3 %v6802_v35  ;;  %v6533_v12 = vpop.xlane.xlu0 %6532 }
 0xb7b   : > { %v6549_v31 = vmul.f32 %v6533_v12, %v14275_v21 }
 0xb7d   : > { %v6565_v62 = vadd.f32 1e-05, %v6549_v31 }
 0xb7f   : > { %v8511_v57 = vpop.eup %8510  ;;  %8512 = vrsqrt.f32 %v6565_v62  ;;  %vm6722_vm15 = vweird.f32 %v6565_v62 }
 0xb80   : > { %v6707_v42 = vmul.f32 %v8511_v57, %v6564_v23  ;;  %vm6713_vm11 = vweird.f32 %v8511_v57  ;;  %v6908_v58 = vpop.xlane.xlu1 %6907 }
 0xb81   : > { %vm6714_vm13 = vmor %vm6712_vm12, %vm6713_vm11  ;;  %v6939_v25 = vmul.f32 %v6908_v58, %v14275_v21 }
 0xb82   : > { %v6708_v33 = vmul.f32 %v8511_v57, %v6707_v42 }
 0xb83   : > { %v13840_v45 = vsub.f32 %v13756_v55, %v6939_v25 }
 0xb84   : > { %v6709_v48 = vmul.f32 0.5, %v6708_v33 }
 0xb85   : > { %v8513_v1 = vpop.eup %8512  ;;  %v6971_v2 = vmul.f32 %v13840_v45, %v13840_v45 }
 0xb86   : > { %v6710_v37 = vsub.f32 1.5, %v6709_v48  ;;  %v6717_v0 = vmul.f32 %v8513_v1, %v6565_v62  ;;  %vm6723_vm14 = vweird.f32 %v8513_v1 }
 0xb87   : > { %vm6724_vm0 = vmor %vm6722_vm15, %vm6723_vm14 }
 0xb88   : > { %v6880_v63 = vpop.f32.mrf.mxu3  ;;  %v6711_v54 = vmul.f32 %v8511_v57, %v6710_v37  ;;  %v6718_v28 = vmul.f32 %v8513_v1, %v6717_v0 }
 0xb89   : > { %v6881_v24 = vadd.f32 %v13750_v9, %v6880_v63 }
 0xb8a   : > { %v6715_v18 = vsel %vm6714_vm13, %v8511_v57, %v6711_v54  ;;  %v6719_v16 = vmul.f32 0.5, %v6718_v28 }
 0xb8b   : > { %6919 = vadd.xlane.f32.xlu1 %v6881_v24  ;;  %v6740_v30 = vmul.f32 %v6715_v18, %v13743_v52 }
 0xb8c   : > { %v6720_v22 = vsub.f32 1.5, %v6719_v16 }
 0xb8d   : > { %v6759_v47 = vmul.f32 %v13654_v27, %v6740_v30 }
 0xb8e   : > { %v6721_v6 = vmul.f32 %v8513_v1, %v6720_v22 }
 0xb8f   : > { %v6778_v20 = vadd.f32 %v13671_v39, %v6759_v47 }
 0xb90   : > { %v6882_v50 = vpop.f32.mrf.mxu3  ;;  %v6725_v26 = vsel %vm6724_vm0, %v8513_v1, %v6721_v6  ;;  %v6912_v62 = vpop.xlane.xlu0 %6911 }
 0xb91   : > { %v13808_v10 = vadd.f32 %v13750_v9, %v6882_v50  ;;  %v6741_v43 = vmul.f32 %v6725_v26, %v13759_v36  ;;  %v6941_v63 = vmul.f32 %v6912_v62, %v14275_v21 }
 0xb93   : > { %6921 = vadd.xlane.f32.xlu2 %v13808_v10  ;;  %v6760_v56 = vmul.f32 %v13654_v27, %v6741_v43  ;;  %v13877_v1 = vsub.f32 %v13775_v59, %v6941_v63 }
 0xb95   : > { %v6779_v52 = vadd.f32 %v13671_v39, %v6760_v56  ;;  %v6973_v18 = vmul.f32 %v13877_v1, %v13877_v1 }
 0xb97   : > { %v6803_v38 = vpack.c.bf16 %v6779_v52, %v6778_v20 }
 0xb98   : > { %v6885_v32 = vpop.f32.mrf.mxu3  ;;  %v6914_v17 = vpop.xlane.xlu1 %6913 }
 0xb99   : > { %v13815_v15 = vadd.f32 %v13750_v9, %v6885_v32  ;;  %6899 = vmatmul.bf16.gmra.mxu3 %v6803_v38  ;;  %v6942_v4 = vmul.f32 %v6914_v17, %v14275_v21 }
 0xb9b   : > { %6923 = vadd.xlane.f32.xlu0 %v13815_v15  ;;  %v13846_v49 = vsub.f32 %v13779_v34, %v6942_v4  ;;  %v6910_v34 = vpop.xlane.xlu2 %6909 }
 0xb9c   : > { %v6940_v12 = vmul.f32 %v6910_v34, %v14275_v21 }
 0xb9d   : > { %v6974_v60 = vmul.f32 %v13846_v49, %v13846_v49 }
 0xb9e   : > { %v13866_v57 = vsub.f32 %v13770_v41, %v6940_v12  ;;  %v13934_v12 = vld [vmem:[%s14374_s16] ss:$0 sm:$0xff]  ;;  %s8898_s16 = scalar_lea.hbm %s8897_s11, 128 }
 0xb9f   : > { %p8899_p1 = scmp.ne.s32.totalorder %s8897_s11, %s8898_s16 }
 0xba0   : > { %v6887_v46 = vpop.f32.mrf.mxu3  ;;  %v6972_v37 = vmul.f32 %v13866_v57, %v13866_v57 }
 0xba1   : > { %v6888_v13 = vadd.f32 %v13750_v9, %v6887_v46  ;;  %p8900_p3 = pnand %p8899_p1, %p9221_p5 }
 0xba3   : > { %6925 = vadd.xlane.f32.xlu1 %v6888_v13  ;;  %v6916_v42 = vpop.xlane.xlu2 %6915  ;;  %p8901_p4 = pneg %p8900_p3 }
 0xba8   : > { %v6918_v54 = vpop.xlane.xlu0 %6917 }
 0xba9   : > { %v6944_v28 = vmul.f32 %v6918_v54, %v14275_v21 }
 0xbab   : > { %v13889_v59 = vsub.f32 %v13793_v29, %v6944_v28 }
 0xbad   : > { %v6976_v32 = vmul.f32 %v13889_v59, %v13889_v59 }
 0xbbf   : > { %v6890_v36 = vpop.f32.mrf.mxu3 }
 0xbc0   : > { %v13823_v51 = vadd.f32 %v13750_v9, %v6890_v36 }
 0xbc2   : > { %6927 = vadd.xlane.f32.xlu2 %v13823_v51 }
 0xbc7   : > { %v6892_v19 = vpop.f32.mrf.mxu3 }
 0xbc8   : > { %v13827_v27 = vadd.f32 %v13750_v9, %v6892_v19 }
 0xbca   : > { %6929 = vadd.xlane.f32.xlu0 %v13827_v27 }
 0xbfd   : > { %v6895_v8 = vpop.f32.mrf.mxu3 }
 0xbfe   : > { %v13831_v39 = vadd.f32 %v13750_v9, %v6895_v8  ;;  %v6920_v44 = vpop.xlane.xlu1 %6919 }
 0xbff   : > { %v6945_v5 = vmul.f32 %v6920_v44, %v14275_v21 }
 0xc00   : > { %6931 = vadd.xlane.f32.xlu1 %v13831_v39 }
 0xc01   : > { %v13851_v3 = vsub.f32 %v6881_v24, %v6945_v5  ;;  %v6943_v24 = vmul.f32 %v6916_v42, %v14275_v21 }
 0xc03   : > { %v6977_v35 = vmul.f32 %v13851_v3, %v13851_v3  ;;  %v13880_v41 = vsub.f32 %v13784_v40, %v6943_v24 }
 0xc05   : > { %v6897_v61 = vpop.f32.mrf.mxu3 }
 0xc06   : > { %v13836_v14 = vadd.f32 %v13750_v9, %v6897_v61  ;;  %v6922_v0 = vpop.xlane.xlu2 %6921 }
 0xc07   : > { %v6946_v50 = vmul.f32 %v6922_v0, %v14275_v21 }
 0xc08   : > { %6933 = vadd.xlane.f32.xlu2 %v13836_v14 }
 0xc09   : > { %v13892_v40 = vsub.f32 %v13808_v10, %v6946_v50 }
 0xc0b   : > { %v6978_v26 = vmul.f32 %v13892_v40, %v13892_v40 }
 0xc0e   : > { %v6924_v16 = vpop.xlane.xlu0 %6923 }
 0xc0f   : > { %v6947_v30 = vmul.f32 %v6924_v16, %v14275_v21 }
 0xc10   : > { %6987 = vadd.xlane.f32.xlu2 %v6971_v2 }
 0xc11   : > { %v13901_v29 = vsub.f32 %v13815_v15, %v6947_v30 }
 0xc13   : > { %v6979_v20 = vmul.f32 %v13901_v29, %v13901_v29 }
 0xc16   : > { %v6926_v55 = vpop.xlane.xlu1 %6925 }
 0xc17   : > { %v6948_v53 = vmul.f32 %v6926_v55, %v14275_v21 }
 0xc18   : > { %6993 = vadd.xlane.f32.xlu2 %v6974_v60 }
 0xc19   : > { %v13856_v11 = vsub.f32 %v6888_v13, %v6948_v53 }
 0xc1b   : > { %v6980_v23 = vmul.f32 %v13856_v11, %v13856_v11 }
 0xc1c   : > { %v6900_v7 = vpop.f32.mrf.mxu3 }
 0xc1d   : > { %v13862_v31 = vadd.f32 %v13750_v9, %v6900_v7 }
 0xc1f   : > { %6935 = vadd.xlane.f32.xlu0 %v13862_v31 }
 0xc20   : > { %6999 = vadd.xlane.f32.xlu2 %v6977_v35 }
 0xc24   : > { %v6902_v33 = vpop.f32.mrf.mxu3 }
 0xc25   : > { %v13871_v48 = vadd.f32 %v13750_v9, %v6902_v33  ;;  %v6975_v9 = vmul.f32 %v13880_v41, %v13880_v41  ;;  %v13939_v33 = vld [vmem:[%s14375_s1] ss:$0 sm:$0xff]  ;;  %s8902_s1 = scalar_lea.hbm %s14376_s25, 256 }
 0xc26   : > { %p8904_p7 = scmp.lt.s32.totalorder %s8902_s1, %s8898_s16 }
 0xc27   : > { %6937 = vadd.xlane.f32.xlu1 %v13871_v48  ;;  %6989 = vadd.xlane.f32.xlu0 %v6972_v37 }
 0xc28   : > { %7005 = vadd.xlane.f32.xlu2 %v6980_v23  ;;  %p8905_p8 = por %p8904_p7, %p8903_p12 }
 0xc2a   : > { %p8906_p9 = pnand %p8905_p8, %p8901_p4 }
 0xc2f   : > { %6995 = vadd.xlane.f32.xlu0 %v6975_v9  ;;  %6991 = vadd.xlane.f32.xlu1 %v6973_v18 }
 0xc35   : > { %v6928_v22 = vpop.xlane.xlu2 %6927 }
 0xc36   : > { %v6949_v6 = vmul.f32 %v6928_v22, %v14275_v21 }
 0xc37   : > { %7001 = vadd.xlane.f32.xlu0 %v6978_v26  ;;  %6997 = vadd.xlane.f32.xlu1 %v6976_v32 }
 0xc38   : > { %v13904_v10 = vsub.f32 %v13823_v51, %v6949_v6 }
 0xc3a   : > { %v6981_v56 = vmul.f32 %v13904_v10, %v13904_v10 }
 0xc3d   : > { %v6930_v43 = vpop.xlane.xlu0 %6929 }
 0xc3e   : > { %v6950_v47 = vmul.f32 %v6930_v43, %v14275_v21 }
 0xc3f   : > { %7007 = vadd.xlane.f32.xlu0 %v6981_v56  ;;  %7003 = vadd.xlane.f32.xlu1 %v6979_v20 }
 0xc40   : > { %v13912_v52 = vsub.f32 %v13827_v27, %v6950_v47 }
 0xc42   : > { %v6982_v15 = vmul.f32 %v13912_v52, %v13912_v52 }
 0xc47   : > { %7009 = vadd.xlane.f32.xlu1 %v6982_v15 }
 0xc73   : > { %v6932_v38 = vpop.xlane.xlu1 %6931 }
 0xc74   : > { %v6951_v46 = vmul.f32 %v6932_v38, %v14275_v21 }
 0xc76   : > { %v13918_v13 = vsub.f32 %v13831_v39, %v6951_v46 }
 0xc78   : > { %v6983_v36 = vmul.f32 %v13918_v13, %v13918_v13 }
 0xc7a   : > { %7011 = vadd.xlane.f32.xlu2 %v6983_v36 }
 0xc7b   : > { %v6934_v51 = vpop.xlane.xlu2 %6933 }
 0xc7c   : > { %v6952_v19 = vmul.f32 %v6934_v51, %v14275_v21 }
 0xc7e   : > { %v13924_v27 = vsub.f32 %v13836_v14, %v6952_v19 }
 0xc80   : > { %v6984_v8 = vmul.f32 %v13924_v27, %v13924_v27 }
 0xc82   : > { %7013 = vadd.xlane.f32.xlu0 %v6984_v8 }
 0xc83   : > { %v6988_v58 = vpop.xlane.xlu2 %6987 }
 0xc84   : > { %v7019_v61 = vmul.f32 %v6988_v58, %v14275_v21 }
 0xc86   : > { %v7035_v25 = vadd.f32 1e-05, %v7019_v61 }
 0xc88   : > { %8514 = vrsqrt.f32 %v7035_v25  ;;  %vm7057_vm2 = vweird.f32 %v7035_v25 }
 0xc8b   : > { %v6994_v39 = vpop.xlane.xlu2 %6993 }
 0xc8c   : > { %v7022_v17 = vmul.f32 %v6994_v39, %v14275_v21 }
 0xc8e   : > { %v8515_v4 = vpop.eup %8514  ;;  %v7038_v2 = vadd.f32 1e-05, %v7022_v17 }
 0xc8f   : > { %v7052_v44 = vmul.f32 %v8515_v4, %v7035_v25  ;;  %vm7058_vm1 = vweird.f32 %v8515_v4 }
 0xc90   : > { %8516 = vrsqrt.f32 %v7038_v2  ;;  %vm7059_vm3 = vmor %vm7057_vm2, %vm7058_vm1  ;;  %vm7087_vm5 = vweird.f32 %v7038_v2 }
 0xc91   : > { %v7053_v5 = vmul.f32 %v8515_v4, %v7052_v44 }
 0xc92   : > { %v6936_v0 = vpop.xlane.xlu0 %6935 }
 0xc93   : > { %v7054_v60 = vmul.f32 0.5, %v7053_v5  ;;  %v7000_v14 = vpop.xlane.xlu2 %6999  ;;  %v6953_v50 = vmul.f32 %v6936_v0, %v14275_v21 }
 0xc94   : > { %v7025_v55 = vmul.f32 %v7000_v14, %v14275_v21 }
 0xc95   : > { %v7055_v53 = vsub.f32 1.5, %v7054_v60  ;;  %v13947_v30 = vsub.f32 %v13862_v31, %v6953_v50 }
 0xc96   : > { %v8517_v35 = vpop.eup %8516  ;;  %v7041_v34 = vadd.f32 1e-05, %v7025_v55 }
 0xc97   : > { %v7056_v7 = vmul.f32 %v8515_v4, %v7055_v53  ;;  %v7082_v23 = vmul.f32 %v8517_v35, %v7038_v2  ;;  %vm7088_vm4 = vweird.f32 %v8517_v35  ;;  %v6985_v26 = vmul.f32 %v13947_v30, %v13947_v30 }
 0xc98   : > { %8518 = vrsqrt.f32 %v7041_v34  ;;  %vm7089_vm6 = vmor %vm7087_vm5, %vm7088_vm4  ;;  %vm7117_vm8 = vweird.f32 %v7041_v34 }
 0xc99   : > { %v7060_v62 = vsel %vm7059_vm3, %v8515_v4, %v7056_v7  ;;  %v7083_v42 = vmul.f32 %v8517_v35, %v7082_v23  ;;  %7015 = vadd.xlane.f32.xlu1 %v6985_v26 }
 0xc9a   : > { %v7211_v63 = vmul.f32 %v7060_v62, %v13840_v45  ;;  %v6938_v20 = vpop.xlane.xlu1 %6937  ;;  %v6990_v15 = vpop.xlane.xlu0 %6989 }
 0xc9b   : > { %v7084_v24 = vmul.f32 0.5, %v7083_v42  ;;  %v7006_v37 = vpop.xlane.xlu2 %7005  ;;  %v6954_v38 = vmul.f32 %v6938_v20, %v14275_v21  ;;  %v7020_v46 = vmul.f32 %v6990_v15, %v14275_v21 }
 0xc9c   : > { %v7230_v54 = vmul.f32 %v13934_v12, %v7211_v63  ;;  %v7028_v28 = vmul.f32 %v7006_v37, %v14275_v21 }
 0xc9d   : > { %v7085_v9 = vsub.f32 1.5, %v7084_v24  ;;  %v13962_v8 = vsub.f32 %v13871_v48, %v6954_v38 }
 0xc9e   : > { %v8519_v18 = vpop.eup %8518  ;;  %v7249_v16 = vadd.f32 %v13939_v33, %v7230_v54  ;;  %v7044_v22 = vadd.f32 1e-05, %v7028_v28 }
 0xc9f   : > { %v7086_v45 = vmul.f32 %v8517_v35, %v7085_v9  ;;  %v7112_v6 = vmul.f32 %v8519_v18, %v7041_v34  ;;  %vm7118_vm7 = vweird.f32 %v8519_v18  ;;  %v6986_v25 = vmul.f32 %v13962_v8, %v13962_v8 }
 0xca0   : > { %7265 = vst [vmem:[%s13951_s22] sm:$0xff] %v7249_v16  ;;  %8520 = vrsqrt.f32 %v7044_v22  ;;  %vm7119_vm9 = vmor %vm7117_vm8, %vm7118_vm7  ;;  %vm7147_vm11 = vweird.f32 %v7044_v22 }
 0xca1   : > { %v7090_v32 = vsel %vm7089_vm6, %v8517_v35, %v7086_v45  ;;  %v7113_v43 = vmul.f32 %v8519_v18, %v7112_v6  ;;  %7017 = vadd.xlane.f32.xlu2 %v6986_v25 }
 0xca2   : > { %v7214_v47 = vmul.f32 %v7090_v32, %v13846_v49  ;;  %v7036_v49 = vadd.f32 1e-05, %v7020_v46  ;;  %v6992_v44 = vpop.xlane.xlu1 %6991  ;;  %v6996_v48 = vpop.xlane.xlu0 %6995 }
 0xca3   : > { %v7114_v31 = vmul.f32 0.5, %v7113_v43  ;;  %v7021_v60 = vmul.f32 %v6992_v44, %v14275_v21  ;;  %v7023_v14 = vmul.f32 %v6996_v48, %v14275_v21 }
 0xca4   : > { %v7233_v56 = vmul.f32 %v13934_v12, %v7214_v47  ;;  %8522 = vrsqrt.f32 %v7036_v49  ;;  %vm7067_vm14 = vweird.f32 %v7036_v49 }
 0xca5   : > { %v7115_v36 = vsub.f32 1.5, %v7114_v31  ;;  %v7037_v34 = vadd.f32 1e-05, %v7021_v60  ;;  %v13972_v7 = vadd.f32 1e-05, %v7023_v14 }
 0xca6   : > { %v8521_v51 = vpop.eup %8520  ;;  %v7252_v19 = vadd.f32 %v13939_v33, %v7233_v56 }
 0xca7   : > { %v7116_v58 = vmul.f32 %v8519_v18, %v7115_v36  ;;  %v7142_v61 = vmul.f32 %v8521_v51, %v7044_v22  ;;  %vm7148_vm10 = vweird.f32 %v8521_v51  ;;  %8524 = vrsqrt.f32 %v7037_v34 }
 0xca8   : > { %7268 = vst [vmem:[%s13951_s22 + $0x18] sm:$0xff] %v7252_v19  ;;  %vm7149_vm12 = vmor %vm7147_vm11, %vm7148_vm10  ;;  %8526 = vrsqrt.f32 %v13972_v7  ;;  %vm7077_vm2 = vweird.f32 %v7037_v34  ;;  %vm7097_vm4 = vweird.f32 %v13972_v7 }
 0xca9   : > { %v7120_v39 = vsel %vm7119_vm9, %v8519_v18, %v7116_v58  ;;  %v7143_v4 = vmul.f32 %v8521_v51, %v7142_v61 }
 0xcaa   : > { %v7217_v17 = vmul.f32 %v7120_v39, %v13851_v3  ;;  %v8523_v35 = vpop.eup %8522  ;;  %v6998_v37 = vpop.xlane.xlu1 %6997 }
 0xcab   : > { %v7144_v5 = vmul.f32 0.5, %v7143_v4  ;;  %v7062_v3 = vmul.f32 %v8523_v35, %v7036_v49  ;;  %v7002_v54 = vpop.xlane.xlu0 %7001  ;;  %v7024_v28 = vmul.f32 %v6998_v37, %v14275_v21  ;;  %vm7068_vm13 = vweird.f32 %v8523_v35 }
 0xcac   : > { %v7236_v2 = vmul.f32 %v13934_v12, %v7217_v17  ;;  %v7026_v50 = vmul.f32 %v7002_v54, %v14275_v21  ;;  %vm7069_vm15 = vmor %vm7067_vm14, %vm7068_vm13 }
 0xcad   : > { %v7145_v53 = vsub.f32 1.5, %v7144_v5  ;;  %v7063_v62 = vmul.f32 %v8523_v35, %v7062_v3  ;;  %v8525_v18 = vpop.eup %8524  ;;  %v13981_v22 = vadd.f32 1e-05, %v7024_v28 }
 0xcae   : > { %v7255_v55 = vadd.f32 %v13939_v33, %v7236_v2  ;;  %v13983_v45 = vadd.f32 1e-05, %v7026_v50  ;;  %v7072_v26 = vmul.f32 %v8525_v18, %v7037_v34  ;;  %vm7078_vm0 = vweird.f32 %v8525_v18 }
 0xcaf   : > { %v7146_v23 = vmul.f32 %v8521_v51, %v7145_v53  ;;  %v7064_v24 = vmul.f32 0.5, %v7063_v62  ;;  %8528 = vrsqrt.f32 %v13981_v22  ;;  %vm7079_vm3 = vmor %vm7077_vm2, %vm7078_vm0  ;;  %vm7107_vm8 = vweird.f32 %v13981_v22 }
 0xcb0   : > { %7271 = vst [vmem:[%s13951_s22 + $0x30] sm:$0xff] %v7255_v55  ;;  %v7073_v47 = vmul.f32 %v8525_v18, %v7072_v26  ;;  %8530 = vrsqrt.f32 %v13983_v45  ;;  %vm7127_vm10 = vweird.f32 %v13983_v45 }
 0xcb1   : > { %v7150_v42 = vsel %vm7149_vm12, %v8521_v51, %v7146_v23  ;;  %v7065_v9 = vsub.f32 1.5, %v7064_v24 }
 0xcb2   : > { %v7220_v63 = vmul.f32 %v7150_v42, %v13856_v11  ;;  %v8527_v11 = vpop.eup %8526  ;;  %v7074_v20 = vmul.f32 0.5, %v7073_v47  ;;  %v7004_v15 = vpop.xlane.xlu1 %7003 }
 0xcb3   : > { %v7066_v6 = vmul.f32 %v8523_v35, %v7065_v9  ;;  %v7092_v32 = vmul.f32 %v8527_v11, %v13972_v7  ;;  %v7008_v38 = vpop.xlane.xlu0 %7007  ;;  %v7027_v51 = vmul.f32 %v7004_v15, %v14275_v21  ;;  %vm7098_vm1 = vweird.f32 %v8527_v11 }
 0xcb4   : > { %v7239_v0 = vmul.f32 %v13934_v12, %v7220_v63  ;;  %v7029_v19 = vmul.f32 %v7008_v38, %v14275_v21  ;;  %v7075_v49 = vsub.f32 1.5, %v7074_v20  ;;  %vm7099_vm5 = vmor %vm7097_vm4, %vm7098_vm1 }
 0xcb5   : > { %v7070_v43 = vsel %vm7069_vm15, %v8523_v35, %v7066_v6  ;;  %v7093_v56 = vmul.f32 %v8527_v11, %v7092_v32  ;;  %v8529_v58 = vpop.eup %8528 }
 0xcb6   : > { %v7258_v16 = vadd.f32 %v13939_v33, %v7239_v0  ;;  %v7212_v31 = vmul.f32 %v7070_v43, %v13866_v57  ;;  %v13994_v57 = vadd.f32 1e-05, %v7027_v51  ;;  %v13996_v39 = vadd.f32 1e-05, %v7029_v19  ;;  %v8531_v17 = vpop.eup %8530 }
 0xcb7   : > { %v7094_v36 = vmul.f32 0.5, %v7093_v56  ;;  %v7076_v4 = vmul.f32 %v8525_v18, %v7075_v49  ;;  %v7102_v2 = vmul.f32 %v8529_v58, %v13981_v22  ;;  %v7122_v48 = vmul.f32 %v8531_v17, %v13983_v45 }
 0xcb8   : > { %7274 = vst [vmem:[%s13951_s22 + $0x48] sm:$0xff] %v7258_v16  ;;  %v7231_v46 = vmul.f32 %v13934_v12, %v7212_v31  ;;  %8532 = vrsqrt.f32 %v13994_v57  ;;  %vm7108_vm6 = vweird.f32 %v8529_v58  ;;  %vm7128_vm7 = vweird.f32 %v8531_v17 }
 0xcb9   : > { %v7095_v25 = vsub.f32 1.5, %v7094_v36  ;;  %v7080_v5 = vsel %vm7079_vm3, %v8525_v18, %v7076_v4  ;;  %v7103_v60 = vmul.f32 %v8529_v58, %v7102_v2  ;;  %8534 = vrsqrt.f32 %v13996_v39  ;;  %vm7109_vm9 = vmor %vm7107_vm8, %vm7108_vm6 }
 0xcba   : > { %v7250_v61 = vadd.f32 %v13939_v33, %v7231_v46  ;;  %v7213_v14 = vmul.f32 %v7080_v5, %v13877_v1  ;;  %v7123_v53 = vmul.f32 %v8531_v17, %v7122_v48  ;;  %v7010_v3 = vpop.xlane.xlu1 %7009  ;;  %vm7129_vm11 = vmor %vm7127_vm10, %vm7128_vm7  ;;  %vm7137_vm14 = vweird.f32 %v13994_v57 }
 0xcbb   : > { %v7096_v44 = vmul.f32 %v8527_v11, %v7095_v25  ;;  %v7104_v34 = vmul.f32 0.5, %v7103_v60  ;;  %v7030_v62 = vmul.f32 %v7010_v3, %v14275_v21  ;;  %vm7157_vm0 = vweird.f32 %v13996_v39 }
 0xcbc   : > { %7266 = vst [vmem:[%s13951_s22 + $0x8] sm:$0xff] %v7250_v61  ;;  %v7232_v7 = vmul.f32 %v13934_v12, %v7213_v14  ;;  %v7124_v23 = vmul.f32 0.5, %v7123_v53 }
 0xcbd   : > { %v7100_v55 = vsel %vm7099_vm5, %v8527_v11, %v7096_v44  ;;  %v7105_v63 = vsub.f32 1.5, %v7104_v34  ;;  %v7046_v54 = vadd.f32 1e-05, %v7030_v62 }
 0xcbe   : > { %v7215_v35 = vmul.f32 %v7100_v55, %v13880_v41  ;;  %v8533_v24 = vpop.eup %8532  ;;  %v7251_v1 = vadd.f32 %v13939_v33, %v7232_v7  ;;  %v7125_v37 = vsub.f32 1.5, %v7124_v23 }
 0xcbf   : > { %v8535_v41 = vpop.eup %8534  ;;  %v7106_v28 = vmul.f32 %v8529_v58, %v7105_v63  ;;  %v7132_v50 = vmul.f32 %v8533_v24, %v13994_v57  ;;  %8536 = vrsqrt.f32 %v7046_v54  ;;  %vm7138_vm12 = vweird.f32 %v8533_v24 }
 0xcc0   : > { %v7234_v42 = vmul.f32 %v13934_v12, %v7215_v35  ;;  %7267 = vst [vmem:[%s13951_s22 + $0x10] sm:$0xff] %v7251_v1  ;;  %v7126_v9 = vmul.f32 %v8531_v17, %v7125_v37  ;;  %v7152_v18 = vmul.f32 %v8535_v41, %v13996_v39  ;;  %vm7158_vm13 = vweird.f32 %v8535_v41  ;;  %vm7139_vm15 = vmor %vm7137_vm14, %vm7138_vm12 }
 0xcc1   : > { %v7110_v16 = vsel %vm7109_vm9, %v8529_v58, %v7106_v28  ;;  %v7133_v11 = vmul.f32 %v8533_v24, %v7132_v50  ;;  %vm7159_vm1 = vmor %vm7157_vm0, %vm7158_vm13  ;;  %vm7167_vm3 = vweird.f32 %v7046_v54 }
 0xcc2   : > { %v7253_v0 = vadd.f32 %v13939_v33, %v7234_v42  ;;  %v7216_v6 = vmul.f32 %v7110_v16, %v13889_v59  ;;  %v7130_v26 = vsel %vm7129_vm11, %v8531_v17, %v7126_v9  ;;  %v7153_v32 = vmul.f32 %v8535_v41, %v7152_v18 }
 0xcc3   : > { %v7218_v22 = vmul.f32 %v7130_v26, %v13892_v40  ;;  %v7134_v43 = vmul.f32 0.5, %v7133_v11 }
 0xcc4   : > { %7269 = vst [vmem:[%s13951_s22 + $0x20] sm:$0xff] %v7253_v0  ;;  %v7235_v47 = vmul.f32 %v13934_v12, %v7216_v6  ;;  %v7154_v31 = vmul.f32 0.5, %v7153_v32 }
 0xcc5   : > { %v7237_v45 = vmul.f32 %v13934_v12, %v7218_v22  ;;  %v7135_v56 = vsub.f32 1.5, %v7134_v43  ;;  %v8537_v20 = vpop.eup %8536 }
 0xcc6   : > { %v7254_v15 = vadd.f32 %v13939_v33, %v7235_v47  ;;  %v7155_v38 = vsub.f32 1.5, %v7154_v31  ;;  %v7162_v40 = vmul.f32 %v8537_v20, %v7046_v54  ;;  %vm7168_vm2 = vweird.f32 %v8537_v20 }
 0xcc7   : > { %v7256_v59 = vadd.f32 %v13939_v33, %v7237_v45  ;;  %v7136_v46 = vmul.f32 %v8533_v24, %v7135_v56  ;;  %vm7169_vm4 = vmor %vm7167_vm3, %vm7168_vm2 }
 0xcc8   : > { %7270 = vst [vmem:[%s13951_s22 + $0x28] sm:$0xff] %v7254_v15  ;;  %v7156_v36 = vmul.f32 %v8535_v41, %v7155_v38  ;;  %v7163_v19 = vmul.f32 %v8537_v20, %v7162_v40 }
 0xcc9   : > { %7272 = vst [vmem:[%s13951_s22 + $0x38] sm:$0xff] %v7256_v59  ;;  %v7140_v51 = vsel %vm7139_vm15, %v8533_v24, %v7136_v46 }
 0xcca   : > { %v7219_v49 = vmul.f32 %v7140_v51, %v13901_v29  ;;  %v7160_v58 = vsel %vm7159_vm1, %v8535_v41, %v7156_v36  ;;  %v7164_v25 = vmul.f32 0.5, %v7163_v19 }
 0xccb   : > { %v7221_v61 = vmul.f32 %v7160_v58, %v13904_v10 }
 0xccc   : > { %v7238_v57 = vmul.f32 %v13934_v12, %v7219_v49  ;;  %v7165_v4 = vsub.f32 1.5, %v7164_v25 }
 0xccd   : > { %v7240_v17 = vmul.f32 %v13934_v12, %v7221_v61 }
 0xcce   : > { %v7257_v39 = vadd.f32 %v13939_v33, %v7238_v57  ;;  %v7166_v44 = vmul.f32 %v8537_v20, %v7165_v4 }
 0xccf   : > { %v7259_v2 = vadd.f32 %v13939_v33, %v7240_v17 }
 0xcd0   : > { %7273 = vst [vmem:[%s13951_s22 + $0x40] sm:$0xff] %v7257_v39  ;;  %v7170_v29 = vsel %vm7169_vm4, %v8537_v20, %v7166_v44 }
 0xcd1   : > { %7275 = vst [vmem:[%s13951_s22 + $0x50] sm:$0xff] %v7259_v2  ;;  %v7222_v10 = vmul.f32 %v7170_v29, %v13912_v52 }
 0xcd3   : > { %v7241_v48 = vmul.f32 %v13934_v12, %v7222_v10 }
 0xcd5   : > { %v7260_v5 = vadd.f32 %v13939_v33, %v7241_v48 }
 0xcd7   : > { %7276 = vst [vmem:[%s13951_s22 + $0x58] sm:$0xff] %v7260_v5 }
 0xced   : > { %v7012_v60 = vpop.xlane.xlu2 %7011 }
 0xcee   : > { %v7031_v14 = vmul.f32 %v7012_v60, %v14275_v21 }
 0xcf0   : > { %v7047_v55 = vadd.f32 1e-05, %v7031_v14 }
 0xcf2   : > { %8538 = vrsqrt.f32 %v7047_v55  ;;  %vm7177_vm6 = vweird.f32 %v7047_v55 }
 0xcf5   : > { %v7014_v53 = vpop.xlane.xlu0 %7013 }
 0xcf6   : > { %v7032_v35 = vmul.f32 %v7014_v53, %v14275_v21 }
 0xcf8   : > { %v8539_v34 = vpop.eup %8538  ;;  %v7048_v3 = vadd.f32 1e-05, %v7032_v35 }
 0xcf9   : > { %v7172_v7 = vmul.f32 %v8539_v34, %v7047_v55  ;;  %vm7178_vm5 = vweird.f32 %v8539_v34 }
 0xcfa   : > { %8540 = vrsqrt.f32 %v7048_v3  ;;  %vm7179_vm7 = vmor %vm7177_vm6, %vm7178_vm5  ;;  %vm7187_vm9 = vweird.f32 %v7048_v3 }
 0xcfb   : > { %v7173_v23 = vmul.f32 %v8539_v34, %v7172_v7 }
 0xcfd   : > { %v7174_v62 = vmul.f32 0.5, %v7173_v23 }
 0xcff   : > { %v7175_v52 = vsub.f32 1.5, %v7174_v62 }
 0xd00   : > { %v8541_v42 = vpop.eup %8540 }
 0xd01   : > { %v7176_v63 = vmul.f32 %v8539_v34, %v7175_v52  ;;  %v7182_v24 = vmul.f32 %v8541_v42, %v7048_v3  ;;  %vm7188_vm8 = vweird.f32 %v8541_v42 }
 0xd02   : > { %vm7189_vm10 = vmor %vm7187_vm9, %vm7188_vm8 }
 0xd03   : > { %v7180_v1 = vsel %vm7179_vm7, %v8539_v34, %v7176_v63  ;;  %v7183_v37 = vmul.f32 %v8541_v42, %v7182_v24 }
 0xd04   : > { %v7223_v54 = vmul.f32 %v7180_v1, %v13918_v13 }
 0xd05   : > { %v7184_v41 = vmul.f32 0.5, %v7183_v37 }
 0xd06   : > { %v7242_v0 = vmul.f32 %v13934_v12, %v7223_v54 }
 0xd07   : > { %v7185_v28 = vsub.f32 1.5, %v7184_v41 }
 0xd08   : > { %v7261_v50 = vadd.f32 %v13939_v33, %v7242_v0 }
 0xd09   : > { %v7186_v9 = vmul.f32 %v8541_v42, %v7185_v28 }
 0xd0a   : > { %7277 = vst [vmem:[%s13951_s22 + $0x60] sm:$0xff] %v7261_v50 }
 0xd0b   : > { %v7190_v18 = vsel %vm7189_vm10, %v8541_v42, %v7186_v9 }
 0xd0c   : > { %v7224_v16 = vmul.f32 %v7190_v18, %v13924_v27  ;;  %v7016_v13 = vpop.xlane.xlu1 %7015 }
 0xd0d   : > { %v7033_v26 = vmul.f32 %v7016_v13, %v14275_v21 }
 0xd0e   : > { %v7243_v11 = vmul.f32 %v13934_v12, %v7224_v16 }
 0xd0f   : > { %v7049_v32 = vadd.f32 1e-05, %v7033_v26 }
 0xd10   : > { %v7262_v6 = vadd.f32 %v13939_v33, %v7243_v11 }
 0xd11   : > { %8542 = vrsqrt.f32 %v7049_v32  ;;  %vm7197_vm12 = vweird.f32 %v7049_v32 }
 0xd12   : > { %7278 = vst [vmem:[%s13951_s22 + $0x68] sm:$0xff] %v7262_v6 }
 0xd14   : > { %v7018_v22 = vpop.xlane.xlu2 %7017 }
 0xd15   : > { %v7034_v43 = vmul.f32 %v7018_v22, %v14275_v21 }
 0xd17   : > { %v8543_v47 = vpop.eup %8542  ;;  %v7050_v31 = vadd.f32 1e-05, %v7034_v43 }
 0xd18   : > { %v7192_v45 = vmul.f32 %v8543_v47, %v7049_v32  ;;  %vm7198_vm11 = vweird.f32 %v8543_v47 }
 0xd19   : > { %8544 = vrsqrt.f32 %v7050_v31  ;;  %vm7199_vm13 = vmor %vm7197_vm12, %vm7198_vm11  ;;  %vm7207_vm15 = vweird.f32 %v7050_v31 }
 0xd1a   : > { %v7193_v56 = vmul.f32 %v8543_v47, %v7192_v45 }
 0xd1c   : > { %v7194_v27 = vmul.f32 0.5, %v7193_v56 }
 0xd1e   : > { %v7195_v20 = vsub.f32 1.5, %v7194_v27 }
 0xd1f   : > { %v8545_v15 = vpop.eup %8544 }
 0xd20   : > { %v7196_v38 = vmul.f32 %v8543_v47, %v7195_v20  ;;  %v7202_v59 = vmul.f32 %v8545_v15, %v7050_v31  ;;  %vm7208_vm14 = vweird.f32 %v8545_v15 }
 0xd21   : > { %vm7209_vm0 = vmor %vm7207_vm15, %vm7208_vm14 }
 0xd22   : > { %v7200_v46 = vsel %vm7199_vm13, %v8543_v47, %v7196_v38  ;;  %v7203_v40 = vmul.f32 %v8545_v15, %v7202_v59 }
 0xd23   : > { %v7225_v21 = vmul.f32 %v7200_v46, %v13947_v30 }
 0xd24   : > { %v7204_v36 = vmul.f32 0.5, %v7203_v40 }
 0xd25   : > { %v7244_v51 = vmul.f32 %v13934_v12, %v7225_v21 }
 0xd26   : > { %v7205_v19 = vsub.f32 1.5, %v7204_v36 }
 0xd27   : > { %v7263_v49 = vadd.f32 %v13939_v33, %v7244_v51 }
 0xd28   : > { %v7206_v58 = vmul.f32 %v8545_v15, %v7205_v19 }
 0xd29   : > { %7279 = vst [vmem:[%s13951_s22 + $0x70] sm:$0xff] %v7263_v49 }
 0xd2a   : > { %v7210_v30 = vsel %vm7209_vm0, %v8545_v15, %v7206_v58 }
 0xd2b   : > { %v7226_v61 = vmul.f32 %v7210_v30, %v13962_v8 }
 0xd2d   : > { %v7245_v25 = vmul.f32 %v13934_v12, %v7226_v61 }
 0xd2f   : > { %v7264_v57 = vadd.f32 %v13939_v33, %v7245_v25 }
 0xd31   : > { %7280 = vst [vmem:[%s13951_s22 + $0x78] sm:$0xff] %v7264_v57 }
 0xd32   : > { %8909 = shalt.err (!%p8906_p9)
}
 0xd33   : > { %s8987_s18 = smov 128   ;;  %s8988_s22 = smov 8  }
 0xd34   : > { %8092 = dma.vmem_to_hbm [thread:$0]  (%p9221_p5), %s7295_s26, 2048, %s7297_s24, %s7282_s19, %s8987_s18, %s8987_s18, %s8988_s22  }
 0xd35 PF: > { %s7311_s7 = sand.u32 1, %s8956_s0   ;;  %p14377_p10 = scmp.ge.s32.totalorder %s8968_s21, 2 }
 0xd36   : > { %s7312_s29 = scalar_lea.sflag [#allocation4], %s7311_s7 }
 0xd37   : > { %p8130_p13 = pnand %p14377_p10, %p9225_p6 }
 0xd39   : > { %p8131_p11 = pneg %p8130_p13 }
 0xd3b   : > { %8951 = dma.done.wait (%p8131_p11), %s7312_s29, 2048  }
 0xd3c   : > { %8953 = vsyncadd (%p8131_p11), %s7312_s29, 4294965248  ;;  %p37_p0 = scmp.ge.s32.totalorder %s9195_s5, 4   ;;  %s14378_s0 = smov %s8960_s30 }
 0xd3d   : > { %s14379_s30 = smov %s8964_s20  ;;  %s14380_s20 = smov %s9206_s13 }
 0xd3e   : > { %s14381_s21 = smov %s9195_s5  ;;  %39 = sbr.rel (!%p37_p0) target bundleno = 26 (0x1a), region = 191 }
 0xd43   :  { %7318 = vsyncpa [#allocation3], 1 }
 0xd44   :  { %7320 = vsyncpa [#allocation3 + $0x1], 1 }
 0xd45   :  { %7321 = vsyncpa [#allocation6], 1 }
 0xd46   :  { %7322 = vsyncpa [#allocation9], 1 }
 0xd47   :  { %7323 = vsyncpa [#allocation12], 1 }
 0xd48   :  { %7324 = vsyncpa [#allocation15], 1 }
 0xd49   :  { %7325 = vsyncpa [#allocation18], 1 }
 0xd4a   :  { %7326 = vsyncpa [#allocation4], 1 }
 0xd4b   :  { %7328 = vsyncpa [#allocation4 + $0x1], 1 }

</bundles_post_ra>
